<compile_context>
chip_gen: v7x
topology: tpu7x:2x2x1
jax: 0.10.0
libtpu: 0.0.40
codegen_flags: <defaults>
</compile_context>

<pallas_src>
import functools

import jax
import jax.numpy as jnp
from jax.experimental import pallas as pl
from jax.experimental.pallas import tpu as pltpu

_BN_EPS = 1e-5
_OUT_PAD = 128   # lane-dense padded width for the final logits (29 -> 128)


# ------------------------------ fused kernel ------------------------------- #

def _scnnb_fused_kernel(x_ref, w1_ref, b1_ref, w2_ref, b2_ref,
                        wf1_ref, bf1_ref, wf2_ref, bf2_ref, o_ref):
    """Whole SCNNB forward, VMEM-resident.

    conv1(+folded BN)+ReLU+pool -> conv2(+folded BN)+ReLU+pool ->
    flatten (folded into w_fc1 layout) -> FC1 -> Dropout(eval) -> FC2 (padded).
    """

    def conv3x3_relu(x, w_mat, b):
        # x: (N, H, W, Cin) NHWC; w_mat: (9*Cin, Cout), rows ordered (kh,kw,cin);
        # b: (1, Cout) with BatchNorm already folded in.
        N, H, W, Cin = x.shape
        Ho, Wo = H - 2, W - 2
        cols = []
        for kh in range(3):
            for kw in range(3):
                cols.append(
                    x[:, kh:kh + Ho, kw:kw + Wo, :].reshape(N * Ho * Wo, Cin))
        patches = jnp.concatenate(cols, axis=-1)          # (N*Ho*Wo, 9*Cin)
        y = jnp.dot(patches, w_mat,
                    preferred_element_type=jnp.float32) + b
        y = jnp.maximum(y, 0.0)                           # ReLU
        return y.reshape(N, Ho, Wo, w_mat.shape[1])

    def maxpool2x2(y):
        # MaxPool2d(2,2), floor mode: crop odd remainder, split H/W into pairs
        # via reshape (no stride-2 slicing along the sublane/W axis).
        N, H, W, C = y.shape
        Hp, Wp = H // 2, W // 2
        a = y[:, :2 * Hp, :2 * Wp, :].reshape(N, Hp, 2, Wp, 2, C)
        a = jnp.maximum(a[:, :, 0], a[:, :, 1])           # max over H pair
        return jnp.maximum(a[:, :, :, 0], a[:, :, :, 1])  # max over W pair

    x = x_ref[...]                                                 # (N,16,16,2)
    y = maxpool2x2(conv3x3_relu(x, w1_ref[...], b1_ref[...]))      # (N,7,7,32)
    y = maxpool2x2(conv3x3_relu(y, w2_ref[...], b2_ref[...]))      # (N,2,2,64)

    # FC1: the NCHW flatten permutation is folded into wf1's (Hp,Wp,C,F) layout,
    # so the flatten is a sum of per-pixel (N,C)x(C,F) matmuls -- no activation
    # transpose or lane-merging reshape.
    N = y.shape[0]
    Hp, Wp, C, F1 = wf1_ref.shape
    h = jnp.zeros((N, F1), jnp.float32)
    for hh in range(Hp):
        for ww in range(Wp):
            h += jnp.dot(y[:, hh, ww, :], wf1_ref[hh, ww],
                         preferred_element_type=jnp.float32)
    h += bf1_ref[...]
    # TODO(synk): Dropout(0.5) is identity in eval mode; training-mode RNG
    # dropout is intentionally not reproduced.

    o = jnp.dot(h, wf2_ref[...],
                preferred_element_type=jnp.float32) + bf2_ref[...]
    o_ref[...] = o.astype(o_ref.dtype)


# ----------------------- one-time parameter preparation -------------------- #

def _fold_bn(w_hwio, b, gamma, beta, mean, var):
    """Fold eval-mode BatchNorm into conv weights/bias; reshape HWIO -> im2col."""
    scale = gamma * jax.lax.rsqrt(var + _BN_EPS)                   # (Cout,)
    w_f = (w_hwio * scale).reshape(-1, w_hwio.shape[-1])           # (9*Cin, Cout)
    b_f = ((b - mean) * scale + beta).reshape(1, -1)
    return w_f.astype(jnp.float32), b_f.astype(jnp.float32)


def prepare_params(params, input_hw):
    """Host-side, one-time prep: BN folding, flatten-order folding, lane padding."""
    h, w = input_hw
    h1, w1 = (h - 2) // 2, (w - 2) // 2          # after layer1 (conv3x3 + pool)
    h2, w2 = (h1 - 2) // 2, (w1 - 2) // 2        # after layer2

    w1m, b1v = _fold_bn(params["w_conv1"], params["b_conv1"],
                        params["bn1_gamma"], params["bn1_beta"],
                        params["bn1_mean"], params["bn1_var"])
    w2m, b2v = _fold_bn(params["w_conv2"], params["b_conv2"],
                        params["bn2_gamma"], params["bn2_beta"],
                        params["bn2_mean"], params["bn2_var"])

    c2 = params["w_conv2"].shape[-1]
    f1 = params["w_fc1"].shape[1]
    assert params["w_fc1"].shape[0] == c2 * h2 * w2
    # w_fc1 rows follow PyTorch's NCHW flatten (c*Hp*Wp + h*Wp + w); regroup to
    # (Hp, Wp, C, F1) so the kernel consumes the NHWC pooled activation directly.
    wf1 = (params["w_fc1"].reshape(c2, h2, w2, f1)
           .transpose(1, 2, 0, 3).astype(jnp.float32))
    bf1 = params["b_fc1"].reshape(1, -1).astype(jnp.float32)

    out_dim = params["w_fc2"].shape[1]
    pad = _OUT_PAD - out_dim
    wf2 = jnp.pad(params["w_fc2"], ((0, 0), (0, pad))).astype(jnp.float32)
    bf2 = jnp.pad(params["b_fc2"], (0, pad)).reshape(1, -1).astype(jnp.float32)

    return {"w1": w1m, "b1": b1v, "w2": w2m, "b2": b2v,
            "wf1": wf1, "bf1": bf1, "wf2": wf2, "bf2": bf2,
            "out_dim": out_dim}


# ---------------------------------- forward -------------------------------- #

def scnnb_forward(prepped, x_nchw):
    n, _, h, w = x_nchw.shape
    x = jnp.transpose(x_nchw, (0, 2, 3, 1)).astype(jnp.float32)    # NCHW->NHWC

    args = (x, prepped["w1"], prepped["b1"], prepped["w2"], prepped["b2"],
            prepped["wf1"], prepped["bf1"], prepped["wf2"], prepped["bf2"])
    vmem_spec = pl.BlockSpec(memory_space=pltpu.MemorySpace.VMEM)

    # Advisory cost estimate for XLA scheduling around the fused custom call.
    ho1, wo1 = h - 2, w - 2
    hp1, wp1 = ho1 // 2, wo1 // 2
    ho2, wo2 = hp1 - 2, wp1 - 2
    c1 = prepped["w1"].shape[1]
    c2 = prepped["w2"].shape[1]
    f1 = prepped["wf1"].shape[-1]
    flops = 2 * n * (ho1 * wo1 * prepped["w1"].shape[0] * c1
                     + ho2 * wo2 * prepped["w2"].shape[0] * c2
                     + prepped["wf1"].shape[0] * prepped["wf1"].shape[1] * c2 * f1
                     + f1 * _OUT_PAD)
    bytes_accessed = (sum(int(a.size) * a.dtype.itemsize for a in args)
                      + n * _OUT_PAD * 4)

    out_padded = pl.pallas_call(
        _scnnb_fused_kernel,
        out_shape=jax.ShapeDtypeStruct((n, _OUT_PAD), jnp.float32),
        in_specs=[vmem_spec] * len(args),
        out_specs=vmem_spec,
        compiler_params=pltpu.CompilerParams(
            vmem_limit_bytes=32 * 1024 * 1024),
        cost_estimate=pl.CostEstimate(flops=flops, transcendentals=0,
                                      bytes_accessed=bytes_accessed),
    )(*args)
    return out_padded[:, :prepped["out_dim"]]


# ------------------------------- parameter init ----------------------------- #

def init_params(key, flat_features):
    ks = jax.random.split(key, 6)
    f32 = jnp.float32
    return {
        # layer1: Conv2d(2 -> 32, 3x3), BN(32)
        "w_conv1": 0.1 * jax.random.normal(ks[0], (3, 3, 2, 32), f32),
        "b_conv1": 0.01 * jax.random.normal(ks[1], (32,), f32),
        "bn1_gamma": jnp.ones((32,), f32),
        "bn1_beta": jnp.zeros((32,), f32),
        "bn1_mean": jnp.zeros((32,), f32),
        "bn1_var": jnp.ones((32,), f32),
        # layer2: Conv2d(32 -> 64, 3x3), BN(64)
        "w_conv2": 0.05 * jax.random.normal(ks[2], (3, 3, 32, 64), f32),
        "b_conv2": 0.01 * jax.random.normal(ks[3], (64,), f32),
        "bn2_gamma": jnp.ones((64,), f32),
        "bn2_beta": jnp.zeros((64,), f32),
        "bn2_mean": jnp.zeros((64,), f32),
        "bn2_var": jnp.ones((64,), f32),
        # layer3: Linear(flat -> 1280), Dropout, Linear(1280 -> 29)
        "w_fc1": 0.02 * jax.random.normal(ks[4], (flat_features, 1280), f32),
        "b_fc1": jnp.zeros((1280,), f32),
        "w_fc2": 0.02 * jax.random.normal(ks[5], (1280, 29), f32),
        "b_fc2": jnp.zeros((29,), f32),
    }


# ------------------------------------ main ---------------------------------- #

if __name__ == "__main__":
    key = jax.random.PRNGKey(0)
    pkey, xkey = jax.random.split(key)

    # Input: NCHW (batch=2, channels=2, 16x16 spatial).
    # 16 -> conv(3x3) 14 -> pool 7 -> conv(3x3) 5 -> pool 2 ; flat = 64*2*2 = 256
    x = jax.random.normal(xkey, (2, 2, 16, 16), jnp.float32)
    params = init_params(pkey, flat_features=64 * 2 * 2)
    prepped = prepare_params(params, input_hw=(16, 16))

    fwd = jax.jit(functools.partial(scnnb_forward, prepped))
    out = fwd(x)
    jax.block_until_ready(out)

    assert out.shape == (2, 29), out.shape
    assert out.dtype == jnp.float32
    print("KERNEL_OK")
</pallas_src>

<mosaic_0001>
module attributes {stable_mosaic.version = 11 : i64} {
  func.func @_scnnb_fused_kernel(%arg0: memref<2x16x16x2xf32, #tpu.memory_space<vmem>>, %arg1: memref<18x32xf32, #tpu.memory_space<vmem>>, %arg2: memref<1x32xf32, #tpu.memory_space<vmem>>, %arg3: memref<288x64xf32, #tpu.memory_space<vmem>>, %arg4: memref<1x64xf32, #tpu.memory_space<vmem>>, %arg5: memref<2x2x64x1280xf32, #tpu.memory_space<vmem>>, %arg6: memref<1x1280xf32, #tpu.memory_space<vmem>>, %arg7: memref<1280x128xf32, #tpu.memory_space<vmem>>, %arg8: memref<1x128xf32, #tpu.memory_space<vmem>>, %arg9: memref<2x128xf32, #tpu.memory_space<vmem>>) attributes {dimension_semantics = [], scalar_prefetch = 0 : i64, scratch_operands = 0 : i64, tpu.core_type = #tpu.core_type<tc>} {
    %c0 = arith.constant 0 : index
    %c0_0 = arith.constant 0 : index
    %c0_1 = arith.constant 0 : index
    %c0_2 = arith.constant 0 : index
    %0 = vector.load %arg0[%c0, %c0_0, %c0_1, %c0_2] : memref<2x16x16x2xf32, #tpu.memory_space<vmem>>, vector<2x16x16x2xf32>
    %c0_3 = arith.constant 0 : index
    %c0_4 = arith.constant 0 : index
    %1 = vector.load %arg1[%c0_3, %c0_4] : memref<18x32xf32, #tpu.memory_space<vmem>>, vector<18x32xf32>
    %c0_5 = arith.constant 0 : index
    %c0_6 = arith.constant 0 : index
    %2 = vector.load %arg2[%c0_5, %c0_6] : memref<1x32xf32, #tpu.memory_space<vmem>>, vector<1x32xf32>
    %3 = vector.extract_strided_slice %0 {offsets = [0, 0, 0, 0], sizes = [2, 14, 14, 2], strides = [1, 1, 1, 1]} : vector<2x16x16x2xf32> to vector<2x14x14x2xf32>
    %4 = vector.shape_cast %3 : vector<2x14x14x2xf32> to vector<392x2xf32>
    %5 = vector.extract_strided_slice %0 {offsets = [0, 0, 1, 0], sizes = [2, 14, 14, 2], strides = [1, 1, 1, 1]} : vector<2x16x16x2xf32> to vector<2x14x14x2xf32>
    %6 = vector.shape_cast %5 : vector<2x14x14x2xf32> to vector<392x2xf32>
    %7 = vector.extract_strided_slice %0 {offsets = [0, 0, 2, 0], sizes = [2, 14, 14, 2], strides = [1, 1, 1, 1]} : vector<2x16x16x2xf32> to vector<2x14x14x2xf32>
    %8 = vector.shape_cast %7 : vector<2x14x14x2xf32> to vector<392x2xf32>
    %9 = vector.extract_strided_slice %0 {offsets = [0, 1, 0, 0], sizes = [2, 14, 14, 2], strides = [1, 1, 1, 1]} : vector<2x16x16x2xf32> to vector<2x14x14x2xf32>
    %10 = vector.shape_cast %9 : vector<2x14x14x2xf32> to vector<392x2xf32>
    %11 = vector.extract_strided_slice %0 {offsets = [0, 1, 1, 0], sizes = [2, 14, 14, 2], strides = [1, 1, 1, 1]} : vector<2x16x16x2xf32> to vector<2x14x14x2xf32>
    %12 = vector.shape_cast %11 : vector<2x14x14x2xf32> to vector<392x2xf32>
    %13 = vector.extract_strided_slice %0 {offsets = [0, 1, 2, 0], sizes = [2, 14, 14, 2], strides = [1, 1, 1, 1]} : vector<2x16x16x2xf32> to vector<2x14x14x2xf32>
    %14 = vector.shape_cast %13 : vector<2x14x14x2xf32> to vector<392x2xf32>
    %15 = vector.extract_strided_slice %0 {offsets = [0, 2, 0, 0], sizes = [2, 14, 14, 2], strides = [1, 1, 1, 1]} : vector<2x16x16x2xf32> to vector<2x14x14x2xf32>
    %16 = vector.shape_cast %15 : vector<2x14x14x2xf32> to vector<392x2xf32>
    %17 = vector.extract_strided_slice %0 {offsets = [0, 2, 1, 0], sizes = [2, 14, 14, 2], strides = [1, 1, 1, 1]} : vector<2x16x16x2xf32> to vector<2x14x14x2xf32>
    %18 = vector.shape_cast %17 : vector<2x14x14x2xf32> to vector<392x2xf32>
    %19 = vector.extract_strided_slice %0 {offsets = [0, 2, 2, 0], sizes = [2, 14, 14, 2], strides = [1, 1, 1, 1]} : vector<2x16x16x2xf32> to vector<2x14x14x2xf32>
    %20 = vector.shape_cast %19 : vector<2x14x14x2xf32> to vector<392x2xf32>
    %21 = tpu.concatenate %4, %6, %8, %10, %12, %14, %16, %18, %20 in 1 : vector<392x2xf32>, vector<392x2xf32>, vector<392x2xf32>, vector<392x2xf32>, vector<392x2xf32>, vector<392x2xf32>, vector<392x2xf32>, vector<392x2xf32>, vector<392x2xf32> -> vector<392x18xf32>
    %cst = arith.constant dense<0.000000e+00> : vector<392x32xf32>
    %22 = tpu.matmul %21, %1, %cst {dimension_numbers = #tpu.dot_dimension_numbers<[1], [0], [0], [1], [0, 0, 1, 1], [], []>} : vector<392x18xf32>, vector<18x32xf32>, vector<392x32xf32> -> vector<392x32xf32>
    %23 = vector.broadcast %2 : vector<1x32xf32> to vector<392x32xf32>
    %24 = arith.addf %22, %23 : vector<392x32xf32>
    %cst_7 = arith.constant 0.000000e+00 : f32
    %25 = vector.broadcast %cst_7 : f32 to vector<392x32xf32>
    %26 = arith.maximumf %24, %25 : vector<392x32xf32>
    %27 = vector.shape_cast %26 : vector<392x32xf32> to vector<2x14x14x32xf32>
    %28 = vector.shape_cast %27 : vector<2x14x14x32xf32> to vector<2x7x2x7x2x32xf32>
    %29 = vector.extract_strided_slice %28 {offsets = [0, 0, 0, 0, 0, 0], sizes = [2, 7, 1, 7, 2, 32], strides = [1, 1, 1, 1, 1, 1]} : vector<2x7x2x7x2x32xf32> to vector<2x7x1x7x2x32xf32>
    %30 = vector.shape_cast %29 : vector<2x7x1x7x2x32xf32> to vector<2x7x7x2x32xf32>
    %31 = vector.extract_strided_slice %28 {offsets = [0, 0, 1, 0, 0, 0], sizes = [2, 7, 1, 7, 2, 32], strides = [1, 1, 1, 1, 1, 1]} : vector<2x7x2x7x2x32xf32> to vector<2x7x1x7x2x32xf32>
    %32 = vector.shape_cast %31 : vector<2x7x1x7x2x32xf32> to vector<2x7x7x2x32xf32>
    %33 = arith.maximumf %30, %32 : vector<2x7x7x2x32xf32>
    %34 = vector.extract_strided_slice %33 {offsets = [0, 0, 0, 0, 0], sizes = [2, 7, 7, 1, 32], strides = [1, 1, 1, 1, 1]} : vector<2x7x7x2x32xf32> to vector<2x7x7x1x32xf32>
    %35 = vector.shape_cast %34 : vector<2x7x7x1x32xf32> to vector<2x7x7x32xf32>
    %36 = vector.extract_strided_slice %33 {offsets = [0, 0, 0, 1, 0], sizes = [2, 7, 7, 1, 32], strides = [1, 1, 1, 1, 1]} : vector<2x7x7x2x32xf32> to vector<2x7x7x1x32xf32>
    %37 = vector.shape_cast %36 : vector<2x7x7x1x32xf32> to vector<2x7x7x32xf32>
    %38 = arith.maximumf %35, %37 : vector<2x7x7x32xf32>
    %c0_8 = arith.constant 0 : index
    %c0_9 = arith.constant 0 : index
    %39 = vector.load %arg3[%c0_8, %c0_9] : memref<288x64xf32, #tpu.memory_space<vmem>>, vector<288x64xf32>
    %c0_10 = arith.constant 0 : index
    %c0_11 = arith.constant 0 : index
    %40 = vector.load %arg4[%c0_10, %c0_11] : memref<1x64xf32, #tpu.memory_space<vmem>>, vector<1x64xf32>
    %41 = vector.extract_strided_slice %38 {offsets = [0, 0, 0, 0], sizes = [2, 5, 5, 32], strides = [1, 1, 1, 1]} : vector<2x7x7x32xf32> to vector<2x5x5x32xf32>
    %42 = vector.shape_cast %41 : vector<2x5x5x32xf32> to vector<50x32xf32>
    %43 = vector.extract_strided_slice %38 {offsets = [0, 0, 1, 0], sizes = [2, 5, 5, 32], strides = [1, 1, 1, 1]} : vector<2x7x7x32xf32> to vector<2x5x5x32xf32>
    %44 = vector.shape_cast %43 : vector<2x5x5x32xf32> to vector<50x32xf32>
    %45 = vector.extract_strided_slice %38 {offsets = [0, 0, 2, 0], sizes = [2, 5, 5, 32], strides = [1, 1, 1, 1]} : vector<2x7x7x32xf32> to vector<2x5x5x32xf32>
    %46 = vector.shape_cast %45 : vector<2x5x5x32xf32> to vector<50x32xf32>
    %47 = vector.extract_strided_slice %38 {offsets = [0, 1, 0, 0], sizes = [2, 5, 5, 32], strides = [1, 1, 1, 1]} : vector<2x7x7x32xf32> to vector<2x5x5x32xf32>
    %48 = vector.shape_cast %47 : vector<2x5x5x32xf32> to vector<50x32xf32>
    %49 = vector.extract_strided_slice %38 {offsets = [0, 1, 1, 0], sizes = [2, 5, 5, 32], strides = [1, 1, 1, 1]} : vector<2x7x7x32xf32> to vector<2x5x5x32xf32>
    %50 = vector.shape_cast %49 : vector<2x5x5x32xf32> to vector<50x32xf32>
    %51 = vector.extract_strided_slice %38 {offsets = [0, 1, 2, 0], sizes = [2, 5, 5, 32], strides = [1, 1, 1, 1]} : vector<2x7x7x32xf32> to vector<2x5x5x32xf32>
    %52 = vector.shape_cast %51 : vector<2x5x5x32xf32> to vector<50x32xf32>
    %53 = vector.extract_strided_slice %38 {offsets = [0, 2, 0, 0], sizes = [2, 5, 5, 32], strides = [1, 1, 1, 1]} : vector<2x7x7x32xf32> to vector<2x5x5x32xf32>
    %54 = vector.shape_cast %53 : vector<2x5x5x32xf32> to vector<50x32xf32>
    %55 = vector.extract_strided_slice %38 {offsets = [0, 2, 1, 0], sizes = [2, 5, 5, 32], strides = [1, 1, 1, 1]} : vector<2x7x7x32xf32> to vector<2x5x5x32xf32>
    %56 = vector.shape_cast %55 : vector<2x5x5x32xf32> to vector<50x32xf32>
    %57 = vector.extract_strided_slice %38 {offsets = [0, 2, 2, 0], sizes = [2, 5, 5, 32], strides = [1, 1, 1, 1]} : vector<2x7x7x32xf32> to vector<2x5x5x32xf32>
    %58 = vector.shape_cast %57 : vector<2x5x5x32xf32> to vector<50x32xf32>
    %59 = tpu.concatenate %42, %44, %46, %48, %50, %52, %54, %56, %58 in 1 : vector<50x32xf32>, vector<50x32xf32>, vector<50x32xf32>, vector<50x32xf32>, vector<50x32xf32>, vector<50x32xf32>, vector<50x32xf32>, vector<50x32xf32>, vector<50x32xf32> -> vector<50x288xf32>
    %cst_12 = arith.constant dense<0.000000e+00> : vector<50x64xf32>
    %60 = tpu.matmul %59, %39, %cst_12 {dimension_numbers = #tpu.dot_dimension_numbers<[1], [0], [0], [1], [0, 0, 1, 1], [], []>} : vector<50x288xf32>, vector<288x64xf32>, vector<50x64xf32> -> vector<50x64xf32>
    %61 = vector.broadcast %40 : vector<1x64xf32> to vector<50x64xf32>
    %62 = arith.addf %60, %61 : vector<50x64xf32>
    %cst_13 = arith.constant 0.000000e+00 : f32
    %63 = vector.broadcast %cst_13 : f32 to vector<50x64xf32>
    %64 = arith.maximumf %62, %63 : vector<50x64xf32>
    %65 = vector.shape_cast %64 : vector<50x64xf32> to vector<2x5x5x64xf32>
    %66 = vector.extract_strided_slice %65 {offsets = [0, 0, 0, 0], sizes = [2, 4, 4, 64], strides = [1, 1, 1, 1]} : vector<2x5x5x64xf32> to vector<2x4x4x64xf32>
    %67 = vector.shape_cast %66 : vector<2x4x4x64xf32> to vector<2x2x2x2x2x64xf32>
    %68 = vector.extract_strided_slice %67 {offsets = [0, 0, 0, 0, 0, 0], sizes = [2, 2, 1, 2, 2, 64], strides = [1, 1, 1, 1, 1, 1]} : vector<2x2x2x2x2x64xf32> to vector<2x2x1x2x2x64xf32>
    %69 = vector.shape_cast %68 : vector<2x2x1x2x2x64xf32> to vector<2x2x2x2x64xf32>
    %70 = vector.extract_strided_slice %67 {offsets = [0, 0, 1, 0, 0, 0], sizes = [2, 2, 1, 2, 2, 64], strides = [1, 1, 1, 1, 1, 1]} : vector<2x2x2x2x2x64xf32> to vector<2x2x1x2x2x64xf32>
    %71 = vector.shape_cast %70 : vector<2x2x1x2x2x64xf32> to vector<2x2x2x2x64xf32>
    %72 = arith.maximumf %69, %71 : vector<2x2x2x2x64xf32>
    %73 = vector.extract_strided_slice %72 {offsets = [0, 0, 0, 0, 0], sizes = [2, 2, 2, 1, 64], strides = [1, 1, 1, 1, 1]} : vector<2x2x2x2x64xf32> to vector<2x2x2x1x64xf32>
    %74 = vector.shape_cast %73 : vector<2x2x2x1x64xf32> to vector<2x2x2x64xf32>
    %75 = vector.extract_strided_slice %72 {offsets = [0, 0, 0, 1, 0], sizes = [2, 2, 2, 1, 64], strides = [1, 1, 1, 1, 1]} : vector<2x2x2x2x64xf32> to vector<2x2x2x1x64xf32>
    %76 = vector.shape_cast %75 : vector<2x2x2x1x64xf32> to vector<2x2x2x64xf32>
    %77 = arith.maximumf %74, %76 : vector<2x2x2x64xf32>
    %cst_14 = arith.constant 0.000000e+00 : f32
    %78 = vector.broadcast %cst_14 : f32 to vector<2x1280xf32>
    %79 = vector.extract_strided_slice %77 {offsets = [0, 0, 0, 0], sizes = [2, 1, 1, 64], strides = [1, 1, 1, 1]} : vector<2x2x2x64xf32> to vector<2x1x1x64xf32>
    %80 = vector.shape_cast %79 : vector<2x1x1x64xf32> to vector<2x64xf32>
    %c0_15 = arith.constant 0 : index
    %c0_16 = arith.constant 0 : index
    %c0_17 = arith.constant 0 : index
    %c0_18 = arith.constant 0 : index
    %81 = vector.load %arg5[%c0_15, %c0_16, %c0_17, %c0_18] : memref<2x2x64x1280xf32, #tpu.memory_space<vmem>>, vector<1x1x64x1280xf32>
    %82 = vector.shape_cast %81 : vector<1x1x64x1280xf32> to vector<64x1280xf32>
    %cst_19 = arith.constant dense<0.000000e+00> : vector<2x1280xf32>
    %83 = tpu.matmul %80, %82, %cst_19 {dimension_numbers = #tpu.dot_dimension_numbers<[1], [0], [0], [1], [0, 0, 1, 1], [], []>} : vector<2x64xf32>, vector<64x1280xf32>, vector<2x1280xf32> -> vector<2x1280xf32>
    %84 = arith.addf %78, %83 : vector<2x1280xf32>
    %85 = vector.extract_strided_slice %77 {offsets = [0, 0, 1, 0], sizes = [2, 1, 1, 64], strides = [1, 1, 1, 1]} : vector<2x2x2x64xf32> to vector<2x1x1x64xf32>
    %86 = vector.shape_cast %85 : vector<2x1x1x64xf32> to vector<2x64xf32>
    %c0_20 = arith.constant 0 : index
    %c1 = arith.constant 1 : index
    %c0_21 = arith.constant 0 : index
    %c0_22 = arith.constant 0 : index
    %87 = vector.load %arg5[%c0_20, %c1, %c0_21, %c0_22] : memref<2x2x64x1280xf32, #tpu.memory_space<vmem>>, vector<1x1x64x1280xf32>
    %88 = vector.shape_cast %87 : vector<1x1x64x1280xf32> to vector<64x1280xf32>
    %cst_23 = arith.constant dense<0.000000e+00> : vector<2x1280xf32>
    %89 = tpu.matmul %86, %88, %cst_23 {dimension_numbers = #tpu.dot_dimension_numbers<[1], [0], [0], [1], [0, 0, 1, 1], [], []>} : vector<2x64xf32>, vector<64x1280xf32>, vector<2x1280xf32> -> vector<2x1280xf32>
    %90 = arith.addf %84, %89 : vector<2x1280xf32>
    %91 = vector.extract_strided_slice %77 {offsets = [0, 1, 0, 0], sizes = [2, 1, 1, 64], strides = [1, 1, 1, 1]} : vector<2x2x2x64xf32> to vector<2x1x1x64xf32>
    %92 = vector.shape_cast %91 : vector<2x1x1x64xf32> to vector<2x64xf32>
    %c1_24 = arith.constant 1 : index
    %c0_25 = arith.constant 0 : index
    %c0_26 = arith.constant 0 : index
    %c0_27 = arith.constant 0 : index
    %93 = vector.load %arg5[%c1_24, %c0_25, %c0_26, %c0_27] : memref<2x2x64x1280xf32, #tpu.memory_space<vmem>>, vector<1x1x64x1280xf32>
    %94 = vector.shape_cast %93 : vector<1x1x64x1280xf32> to vector<64x1280xf32>
    %cst_28 = arith.constant dense<0.000000e+00> : vector<2x1280xf32>
    %95 = tpu.matmul %92, %94, %cst_28 {dimension_numbers = #tpu.dot_dimension_numbers<[1], [0], [0], [1], [0, 0, 1, 1], [], []>} : vector<2x64xf32>, vector<64x1280xf32>, vector<2x1280xf32> -> vector<2x1280xf32>
    %96 = arith.addf %90, %95 : vector<2x1280xf32>
    %97 = vector.extract_strided_slice %77 {offsets = [0, 1, 1, 0], sizes = [2, 1, 1, 64], strides = [1, 1, 1, 1]} : vector<2x2x2x64xf32> to vector<2x1x1x64xf32>
    %98 = vector.shape_cast %97 : vector<2x1x1x64xf32> to vector<2x64xf32>
    %c1_29 = arith.constant 1 : index
    %c1_30 = arith.constant 1 : index
    %c0_31 = arith.constant 0 : index
    %c0_32 = arith.constant 0 : index
    %99 = vector.load %arg5[%c1_29, %c1_30, %c0_31, %c0_32] : memref<2x2x64x1280xf32, #tpu.memory_space<vmem>>, vector<1x1x64x1280xf32>
    %100 = vector.shape_cast %99 : vector<1x1x64x1280xf32> to vector<64x1280xf32>
    %cst_33 = arith.constant dense<0.000000e+00> : vector<2x1280xf32>
    %101 = tpu.matmul %98, %100, %cst_33 {dimension_numbers = #tpu.dot_dimension_numbers<[1], [0], [0], [1], [0, 0, 1, 1], [], []>} : vector<2x64xf32>, vector<64x1280xf32>, vector<2x1280xf32> -> vector<2x1280xf32>
    %102 = arith.addf %96, %101 : vector<2x1280xf32>
    %c0_34 = arith.constant 0 : index
    %c0_35 = arith.constant 0 : index
    %103 = vector.load %arg6[%c0_34, %c0_35] : memref<1x1280xf32, #tpu.memory_space<vmem>>, vector<1x1280xf32>
    %104 = vector.broadcast %103 : vector<1x1280xf32> to vector<2x1280xf32>
    %105 = arith.addf %102, %104 : vector<2x1280xf32>
    %c0_36 = arith.constant 0 : index
    %c0_37 = arith.constant 0 : index
    %106 = vector.load %arg7[%c0_36, %c0_37] : memref<1280x128xf32, #tpu.memory_space<vmem>>, vector<1280x128xf32>
    %cst_38 = arith.constant dense<0.000000e+00> : vector<2x128xf32>
    %107 = tpu.matmul %105, %106, %cst_38 {dimension_numbers = #tpu.dot_dimension_numbers<[1], [0], [0], [1], [0, 0, 1, 1], [], []>} : vector<2x1280xf32>, vector<1280x128xf32>, vector<2x128xf32> -> vector<2x128xf32>
    %c0_39 = arith.constant 0 : index
    %c0_40 = arith.constant 0 : index
    %108 = vector.load %arg8[%c0_39, %c0_40] : memref<1x128xf32, #tpu.memory_space<vmem>>, vector<1x128xf32>
    %109 = vector.broadcast %108 : vector<1x128xf32> to vector<2x128xf32>
    %110 = arith.addf %107, %109 : vector<2x128xf32>
    %c0_41 = arith.constant 0 : index
    %c0_42 = arith.constant 0 : index
    %111 = vector.load %arg9[%c0_41, %c0_42] : memref<2x128xf32, #tpu.memory_space<vmem>>, vector<2x128xf32>
    tpu.vector_store %arg9[%c0_41, %c0_42], %110 {strides = array<i32>} : memref<2x128xf32, #tpu.memory_space<vmem>>, vector<2x128xf32>,
    return
  }
}

</mosaic_0001>

<bundles_post_ra>
// kernel: scnnb_forward.1
= control target key start
LH: loop header
LB: loop body
LE: loop exit
PB: predicated region body
PF: predicated region fallthrough
CT: control target
= control target key end

     0   :  { %14 = vsyncpa [#allocation3], 0  ;;  %s25399_s0 = inlined_call_operand.vmem [shape: f32[2,16,16,2], index: 0, kind: input, shape index: {}]   ;;  %s25400_s1 = inlined_call_operand.hbm [shape: f32[18,32], index: 1, kind: input, shape index: {}]   ;;  %s25401_s2 = inlined_call_operand.hbm [shape: f32[1,32], index: 2, kind: input, shape index: {}]   ;;  %s25402_s3 = inlined_call_operand.hbm [shape: f32[288,64], index: 3, kind: input, shape index: {}]   ;;  %s25403_s4 = inlined_call_operand.hbm [shape: f32[1,64], index: 4, kind: input, shape index: {}]   ;;  %s25404_s5 = inlined_call_operand.hbm [shape: f32[2,2,64,1280], index: 5, kind: input, shape index: {}]   ;;  %s25405_s6 = inlined_call_operand.vmem [shape: f32[1,1280], index: 6, kind: input, shape index: {}]   ;;  %s25406_s7 = inlined_call_operand.hbm [shape: f32[1280,128], index: 7, kind: input, shape index: {}]   ;;  %s25407_s8 = inlined_call_operand.vmem [shape: f32[1,128], index: 8, kind: input, shape index: {}]   ;;  %s25408_s9 = inlined_call_operand.hbm [shape: f32[2,128], index: 9, kind: output, shape index: {}]  }
   0x1   :  { %15 = vsyncpa [#allocation6], 0 }
   0x2   :  { %16 = vsyncpa [#allocation9], 0 }
   0x3   :  { %17 = vsyncpa [#allocation12], 0 }
   0x4   :  { %18 = vsyncpa [#allocation4], 0  ;;  %s15868_s30 = smov [#allocation5]   ;;  %s15869_s11 = smov [#allocation8]  }
   0x5   :  { %s39_s10 = sshll.u32 %s15868_s30, 4  ;;  %s61_s12 = sshll.u32 %s15869_s11, 4  ;;  %s40_s10 = int_to_ptr.vmem [resolvable:$true] %s39_s10  ;;  %s62_s12 = int_to_ptr.vmem [resolvable:$true] %s61_s12 }
   0x6   :  { %s15704_s15 = scalar_lea.hbm %s25401_s2, 16 }
   0x7   :  { %p15705_p0 = scmp.ne.s32.totalorder %s25401_s2, %s15704_s15  ;;  %p15708_p1 = scmp.lt.u32.totalorder %s15704_s15, %s25401_s2 }
   0x9   :  { %p15710_p2 = pnand %p15708_p1, %p15705_p0 }
   0xb   :  { %15713 = shalt.err (!%p15710_p2)
}
   0xc   :  { %s15714_s20 = scalar_lea.vmem %s40_s10, 16  ;;  %s15718_s21 = scalar_lea.vmem %s40_s10, 32 }
   0xd   :  { %p15715_p3 = scmp.ne.s32.totalorder %s40_s10, %s15714_s20  ;;  %p15719_p4 = scmp.lt.s32.totalorder %s40_s10, %s40_s10 }
   0xe   :  { %p15720_p5 = scmp.lt.s32.totalorder %s15718_s21, %s15714_s20 }
  0x10   :  { %p15721_p6 = por %p15720_p5, %p15719_p4 }
  0x12   :  { %p15722_p7 = pnand %p15721_p6, %p15715_p3 }
  0x14   :  { %15725 = shalt.err (!%p15722_p7)
}
  0x15   :  { %42 = dma.hbm_to_vmem [thread:$0]  %s25401_s2, 16, %s40_s10, [#allocation6]  }
  0x16   :  { %s15726_s26 = scalar_lea.hbm %s25403_s4, 16 }
  0x17   :  { %p15727_p8 = scmp.ne.s32.totalorder %s25403_s4, %s15726_s26  ;;  %p15730_p9 = scmp.lt.u32.totalorder %s15726_s26, %s25403_s4 }
  0x19   :  { %p15732_p10 = pnand %p15730_p9, %p15727_p8 }
  0x1b   :  { %15735 = shalt.err (!%p15732_p10)
}
  0x1c   :  { %s15736_s11 = scalar_lea.vmem %s62_s12, 16  ;;  %s15740_s13 = scalar_lea.vmem %s62_s12, 32 }
  0x1d   :  { %p15737_p11 = scmp.ne.s32.totalorder %s62_s12, %s15736_s11  ;;  %p15741_p12 = scmp.lt.s32.totalorder %s62_s12, %s62_s12 }
  0x1e   :  { %p15742_p13 = scmp.lt.s32.totalorder %s15740_s13, %s15736_s11 }
  0x20   :  { %p15743_p0 = por %p15742_p13, %p15741_p12 }
  0x22   :  { %p15744_p1 = pnand %p15743_p0, %p15737_p11 }
  0x24   :  { %15747 = shalt.err (!%p15744_p1)
}
  0x25   :  { %64 = dma.hbm_to_vmem [thread:$0]  %s25403_s4, 16, %s62_s12, [#allocation9]  }
  0x26   :  { %s15870_s14 = smov [#allocation2]   ;;  %s15748_s18 = scalar_lea.hbm %s25400_s1, 384 }
  0x27   :  { %s26_s15 = sshll.u32 %s15870_s14, 4  ;;  %p15749_p2 = scmp.ne.s32.totalorder %s25400_s1, %s15748_s18  ;;  %s27_s15 = int_to_ptr.vmem [resolvable:$true] %s26_s15 }
  0x28   :  { %p15752_p3 = scmp.lt.u32.totalorder %s15748_s18, %s25400_s1 }
  0x2a   :  { %p15754_p4 = pnand %p15752_p3, %p15749_p2 }
  0x2c   :  { %15757 = shalt.err (!%p15754_p4)
}
  0x2d   :  { %s15758_s23 = scalar_lea.vmem %s27_s15, 384  ;;  %p15763_p6 = scmp.lt.s32.totalorder %s27_s15, %s27_s15 }
  0x2e   :  { %p15759_p5 = scmp.ne.s32.totalorder %s27_s15, %s15758_s23  ;;  %p15764_p7 = scmp.lt.s32.totalorder %s15758_s23, %s15758_s23 }
  0x30   :  { %p15765_p8 = por %p15764_p7, %p15763_p6 }
  0x32   :  { %p15766_p9 = pnand %p15765_p8, %p15759_p5 }
  0x34   :  { %15769 = shalt.err (!%p15766_p9)
}
  0x35   :  { %s15871_s4 = smov 128   ;;  %s15872_s12 = smov 8  }
  0x36   :  { %32 = dma.hbm_to_vmem [thread:$0]  %s25400_s1, 384, %s27_s15, [#allocation3], %s15871_s4, %s15871_s4, %s15872_s12  }
  0x37   :  { %s15873_s26 = smov [#allocation7]   ;;  %s15874_s28 = smov [#allocation10]  }
  0x38   :  { %s48_s27 = sshll.u32 %s15873_s26, 4  ;;  %s70_s29 = sshll.u32 %s15874_s28, 4  ;;  %s49_s27 = int_to_ptr.vmem [resolvable:$true] %s48_s27  ;;  %s71_s29 = int_to_ptr.vmem [resolvable:$true] %s70_s29 }
  0x39   :  { %s15770_s13 = scalar_lea.hbm %s25402_s3, 4608 }
  0x3a   :  { %p15771_p10 = scmp.ne.s32.totalorder %s25402_s3, %s15770_s13  ;;  %p15774_p11 = scmp.lt.u32.totalorder %s15770_s13, %s25402_s3 }
  0x3c   :  { %p15776_p12 = pnand %p15774_p11, %p15771_p10 }
  0x3e   :  { %15779 = shalt.err (!%p15776_p12)
}
  0x3f   :  { %s15780_s1 = scalar_lea.vmem %s49_s27, 4608  ;;  %p15785_p0 = scmp.lt.s32.totalorder %s49_s27, %s49_s27 }
  0x40   :  { %p15781_p13 = scmp.ne.s32.totalorder %s49_s27, %s15780_s1  ;;  %p15786_p1 = scmp.lt.s32.totalorder %s15780_s1, %s15780_s1 }
  0x42   :  { %p15787_p2 = por %p15786_p1, %p15785_p0 }
  0x44   :  { %p15788_p3 = pnand %p15787_p2, %p15781_p13 }
  0x46   :  { %15791 = shalt.err (!%p15788_p3)
}
  0x47   :  { %54 = dma.hbm_to_vmem [thread:$0]  %s25402_s3, 4608, %s49_s27, [#allocation6], %s15871_s4, %s15871_s4, %s15872_s12  }
  0x48   :  { %s15792_s20 = scalar_lea.hbm %s25404_s5, 40960 }
  0x49   :  { %p15793_p4 = scmp.ne.s32.totalorder %s25404_s5, %s15792_s20  ;;  %p15796_p5 = scmp.lt.u32.totalorder %s15792_s20, %s25404_s5 }
  0x4b   :  { %p15798_p6 = pnand %p15796_p5, %p15793_p4 }
  0x4d   :  { %15801 = shalt.err (!%p15798_p6)
}
  0x4e   :  { %s15802_s25 = scalar_lea.vmem %s71_s29, 40960  ;;  %p15807_p8 = scmp.lt.s32.totalorder %s71_s29, %s71_s29 }
  0x4f   :  { %p15803_p7 = scmp.ne.s32.totalorder %s71_s29, %s15802_s25  ;;  %p15808_p9 = scmp.lt.s32.totalorder %s15802_s25, %s15802_s25 }
  0x51   :  { %p15809_p10 = por %p15808_p9, %p15807_p8 }
  0x53   :  { %p15810_p11 = pnand %p15809_p10, %p15803_p7 }
  0x55   :  { %15813 = shalt.err (!%p15810_p11)
}
  0x56   :  { %s15875_s3 = smov 1280   ;;  %s15876_s26 = smov 80  }
  0x57   :  { %76 = dma.hbm_to_vmem [thread:$0]  %s25404_s5, 40960, %s71_s29, [#allocation9], %s15875_s3, %s15875_s3, %s15876_s26  }
  0x58   :  { %s15877_s30 = smov [#allocation11]   ;;  %s15814_s10 = scalar_lea.hbm %s25406_s7, 20480 }
  0x59   :  { %s84_s11 = sshll.u32 %s15877_s30, 4  ;;  %p15815_p12 = scmp.ne.s32.totalorder %s25406_s7, %s15814_s10  ;;  %s85_s11 = int_to_ptr.vmem [resolvable:$true] %s84_s11 }
  0x5a   :  { %p15818_p13 = scmp.lt.u32.totalorder %s15814_s10, %s25406_s7 }
  0x5c   :  { %p15820_p0 = pnand %p15818_p13, %p15815_p12 }
  0x5e   :  { %15823 = shalt.err (!%p15820_p0)
}
  0x5f   :  { %s15824_s17 = scalar_lea.vmem %s85_s11, 20480  ;;  %p15829_p2 = scmp.lt.s32.totalorder %s85_s11, %s85_s11 }
  0x60   :  { %p15825_p1 = scmp.ne.s32.totalorder %s85_s11, %s15824_s17  ;;  %p15830_p3 = scmp.lt.s32.totalorder %s15824_s17, %s15824_s17 }
  0x62   :  { %p15831_p4 = por %p15830_p3, %p15829_p2 }
  0x64   :  { %p15832_p5 = pnand %p15831_p4, %p15825_p1 }
  0x66   :  { %15835 = shalt.err (!%p15832_p5)
}
  0x67   :  { %90 = dma.hbm_to_vmem [thread:$0]  %s25406_s7, 20480, %s85_s11, [#allocation12], %s15871_s4, %s15871_s4, %s15872_s12  }
  0x68   :  { %15858 = dma.done.wait [#allocation3], 384  }
  0x69   :  { %15859 = vsyncadd [#allocation3], 4294966912 }
  0x6a   :  { %15860 = dma.done.wait [#allocation6], 4624  }
  0x6b   :  { %15861 = vsyncadd [#allocation6], 4294962672 }
  0x6c   :  { %15862 = dma.done.wait [#allocation9], 40976  }
  0x6d   :  { %15863 = vsyncadd [#allocation9], 4294926320 }
  0x6e   :  { %15864 = dma.done.wait [#allocation12], 20480  }
  0x6f   :  { %15865 = vsyncadd [#allocation12], 4294946816  ;;  %v239_v0 = vlaneseq  ;;  %v15878_v1 = vmov 1983009808   ;;  %v114_v6 = vld [vmem:[%s25399_s0 + $0x18] sm:$0xff]  ;;  %v16036_v7 = vld [vmem:[%s25399_s0 + $0x20] sm:$0xff] }
  0x70   :  { %v237_v2 = vunpack.c.l.s4 %v15878_v1  ;;  %v112_v8 = vld [vmem:[%s25399_s0 + $0x8] sm:$0xff]  ;;  %vm1187_vm0 = vcmask 1040384   ;;  %vm1188_vm1 = vcmask 1042434   ;;  %vm1190_vm2 = vcmask 1044484   ;;  %v113_v12 = vld [vmem:[%s25399_s0 + $0x10] sm:$0xff]  ;;  %v111_v14 = vld [vmem:[%s25399_s0] sm:$0xff] }
  0x71   :  { %v16025_v3 = vshrl.u32 %v239_v0, 7  ;;  %v285_v9 = vcombine.high %v114_v6, %v114_v6  ;;  %v252_v13 = vcombine.high %v112_v8, %v112_v8  ;;  %v268_v17 = vcombine.high %v113_v12, %v113_v12  ;;  %vm16123_vm4 = vmor %vm1187_vm0, %vm1188_vm1  ;;  %s15879_s3 = smov 10   ;;  %s15880_s26 = smov 4  }
  0x72   :  { %v238_v4 = vunpack.c.0.s8 %v237_v2  ;;  %v235_v18 = vcombine.high %v111_v14, %v111_v14  ;;  %vm25845_vm3 = vcmask 1046534   ;;  %v301_v55 = vcombine.high %v16036_v7, %v16036_v7  ;;  %vm1191_vm5 = vmor %vm16123_vm4, %vm1190_vm2  ;;  %s15881_s27 = smov 6   ;;  %s15882_s11 = smov 12  }
  0x73   :  { %25850 = vst [vmem:[#allocation19_spill] sm:$0xff] %v16025_v3  ;;  %vm16175_vm6 = vmor %vm1191_vm5, %vm25845_vm3  ;;  %s15883_s13 = smov 2   ;;  %s15884_s2 = smov 16   ;;  %vm8142_vm7 = vcmask 1041408   ;;  %vm15888_vm8 = vmmov 0   ;;  %vm7588_vm9 = vcmask 15360  }
  0x74   :  { %v16028_v5 = vsub.s32 %v238_v4, %v16025_v3  ;;  %s15885_s16 = smov 14   ;;  %vm25834_vm10 = vcmask 31744   ;;  %vm25826_vm11 = vcmask 48128   ;;  %vm7738_vm12 = vcmask 64512  }
  0x75   :  { %vm7788_vm13 = vcmask 80896   ;;  %vm7838_vm14 = vcmask 97280   ;;  %vm7888_vm15 = vcmask 113664   ;;  %vm7938_vm0 = vcmask 130048  }
  0x76   :  { %v16042_v10 = vrot.slane %v114_v6, %v16028_v5  ;;  %v16046_v11 = vrot.slane %v16036_v7, %v16028_v5  ;;  %v16055_v15 = vrot.slane %v112_v8, %v16028_v5  ;;  %v16058_v16 = vrot.slane %v113_v12, %v16028_v5 }
  0x77   :  { %v16061_v19 = vrot.slane %v285_v9, %v16028_v5  ;;  %v16072_v22 = vrot.slane %v252_v13, %v16028_v5  ;;  %v16079_v24 = vrot.slane %v268_v17, %v16028_v5  ;;  %v16086_v26 = vrot.slane %v111_v14, %v16028_v5  ;;  %v116_v13 = vld [vmem:[%s25399_s0 + $0x28] sm:$0xff] }
  0x78   :  { %v16065_v20 = vcombine.high %v16042_v10, %v16042_v10  ;;  %v16069_v21 = vcombine.high %v16046_v11, %v16046_v11  ;;  %v16076_v23 = vcombine.high %v16055_v15, %v16055_v15  ;;  %v16083_v25 = vcombine.high %v16058_v16, %v16058_v16 }
  0x79   :  { %v14282_v29 = vcombine.high %v16061_v19, %v16046_v11  ;;  %v14268_v30 = vcombine.high %v16072_v22, %v16058_v16  ;;  %v16100_v32 = vcombine.high %v16079_v24, %v16079_v24  ;;  %v4893_v46 = vcombine.low %v16061_v19, %v16046_v11 }
  0x7a   :  { %v2093_v27 = vcombine.low %v16065_v20, %v16061_v19  ;;  %v2094_v28 = vcombine.low %v16046_v11, %v16069_v21  ;;  %v3921_v31 = vcombine.low %v16076_v23, %v16072_v22  ;;  %v4884_v33 = vcombine.low %v16058_v16, %v16083_v25 }
  0x7b   :  { %v3939_v34 = vcombine.low %v16042_v10, %v16065_v20  ;;  %v6339_v37 = vrot.slane %v14282_v29, %v16028_v5  ;;  %v3936_v38 = vrot.slane %v14268_v30, %v16028_v5  ;;  %v3938_v40 = vcombine.low %v16079_v24, %v16100_v32 }
  0x7c   :  { %v16107_v35 = vrot.slane %v2093_v27, %v16028_v5  ;;  %v16110_v36 = vrot.slane %v2094_v28, %v16028_v5  ;;  %v3929_v39 = vrot.slane %v3921_v31, %v16028_v5  ;;  %v4891_v41 = vrot.slane %v4884_v33, %v16028_v5 }
  0x7d   :  { %v16119_v42 = vrot.slane %v3939_v34, %v16028_v5  ;;  %v2076_v47 = vcombine.low %v16083_v25, %v16079_v24  ;;  %v16135_v49 = vrot.slane %v3938_v40, %v16028_v5  ;;  %v2077_v50 = vcombine.low %v16100_v32, %v16042_v10 }
  0x7e   :  { %25851 = vst [vmem:[#allocation20_spill] sm:$0xff] %v16107_v35  ;;  %25852 = vst [vmem:[#allocation21_spill] sm:$0xff] %v16110_v36  ;;  %v6340_v44 = vcombine.low %v16107_v35, %v6339_v37  ;;  %v3937_v48 = vcombine.low %v3929_v39, %v3936_v38  ;;  %v16140_v51 = vrot.slane %v235_v18, %v16028_v5  ;;  %v1205_v63 = vrot.slane %v16055_v15, 7 }
  0x7f   :  { %v4900_v52 = vrot.slane %v4893_v46, %v16028_v5  ;;  %v2084_v53 = vrot.slane %v2076_v47, %v16028_v5  ;;  %v16147_v54 = vcombine.high %v16086_v26, %v16086_v26  ;;  %v4892_v56 = vcombine.low %v4891_v41, %v16135_v49 }
  0x80   :  { %6619 = vrot.lane.b32.xlu1 %v6340_v44, %s15879_s3  ;;  %4739 = vrot.lane.b32.xlu0 %v3937_v48, %s15880_s26  ;;  %v2091_v57 = vrot.slane %v2077_v50, %v16028_v5  ;;  %v16159_v58 = vcombine.high %v16140_v51, %v16140_v51  ;;  %v1159_v59 = vcombine.high %v16072_v22, %v16072_v22  ;;  %v1208_v4 = vrot.slane %v16076_v23, 7 }
  0x81   :  { %v4901_v60 = vcombine.low %v16119_v42, %v4900_v52  ;;  %v3904_v61 = vcombine.low %v16147_v54, %v16140_v51  ;;  %v16167_v62 = vrot.slane %v301_v55, %v16028_v5  ;;  %v1211_v6 = vrot.slane %v16072_v22, 7 }
  0x82   :  { %v16170_v0 = vcombine.low %v2084_v53, %v2091_v57  ;;  %v3905_v1 = vcombine.low %v16159_v58, %v16055_v15  ;;  %v1207_v9 = vrot.slane %v1205_v63, 2  ;;  %v1214_v12 = vrot.slane %v1159_v59, 7 }
  0x83   :  { %v3912_v7 = vrot.slane %v3904_v61, %v16028_v5  ;;  %v16185_v8 = vcombine.high %v16167_v62, %v16167_v62  ;;  %v1210_v17 = vrot.slane %v1208_v4, 2  ;;  %v1213_v18 = vrot.slane %v1211_v6, 2 }
  0x84   :  { %25855 = vst [vmem:[#allocation22_spill] sm:$0xff] %v16170_v0  ;;  %5205 = vrot.lane.b32.xlu1 %v4892_v56, %s15881_s27  ;;  %5207 = vrot.lane.b32.xlu0 %v4901_v60, %s15881_s27  ;;  %v3919_v14 = vrot.slane %v3905_v1, %v16028_v5  ;;  %v14237_v27 = vrot.slane %v16058_v16, 9  ;;  %v1209_v29 = vsel %vm16175_vm6, %v1207_v9, %v1208_v4  ;;  %v1218_v30 = vrot.slane %v16083_v25, 7 }
  0x85   :  { %v2110_v28 = vcombine.low %v16167_v62, %v16185_v8  ;;  %v1212_v33 = vsel %vm16175_vm6, %v1210_v17, %v1211_v6  ;;  %v1215_v34 = vsel %vm16175_vm6, %v1213_v18, %v1214_v12  ;;  %v16205_v37 = vrot.slane %v116_v13, %v16028_v5 }
  0x86   :  { %v3920_v31 = vcombine.low %v3912_v7, %v3919_v14  ;;  %v1219_v39 = vsel %vm16175_vm6, %v14237_v27, %v1218_v30  ;;  %v2941_v25 = vcombine.low %v1209_v29, %v1212_v33  ;;  %v318_v40 = vcombine.high %v116_v13, %v116_v13 }
  0x87   :  { %v16210_v38 = vrot.slane %v2110_v28, %v16028_v5  ;;  %v2942_v41 = vcombine.low %v1215_v34, %v1219_v39  ;;  %v3956_v43 = vcombine.low %v16069_v21, %v16167_v62  ;;  %v3972_v44 = vcombine.low %v16185_v8, %v16205_v37 }
  0x88   :  { %6617 = vrot.lane.b32.xlu1 %v16170_v0, %s15879_s3  ;;  %4737 = vrot.lane.b32.xlu0 %v3920_v31, %s15880_s26  ;;  %v16221_v46 = vcombine.high %v16061_v19, %v16061_v19  ;;  %v2949_v48 = vrot.slane %v2941_v25, %v16028_v5  ;;  %v1227_v50 = vrot.slane %v16042_v10, 7  ;;  %v1230_v52 = vrot.slane %v16065_v20, 7 }
  0x89   :  { %v6764_v47 = vcombine.low %v16110_v36, %v16210_v38  ;;  %v2956_v53 = vrot.slane %v2942_v41, %v16028_v5  ;;  %v16230_v55 = vrot.slane %v3956_v43, %v16028_v5  ;;  %v16233_v56 = vrot.slane %v3972_v44, %v16028_v5 }
  0x8a   :  { %v1233_v57 = vrot.slane %v16061_v19, 7  ;;  %v1229_v59 = vrot.slane %v1227_v50, 2  ;;  %v1232_v60 = vrot.slane %v1230_v52, 2  ;;  %v1236_v61 = vrot.slane %v16221_v46, 7 }
  0x8b   :  { %v14238_v10 = vrot.slane %v16046_v11, 9  ;;  %v2957_v20 = vcombine.low %v2949_v48, %v2956_v53  ;;  %v16241_v1 = vcombine.low %v16230_v55, %v16233_v56  ;;  %v1240_v6 = vrot.slane %v16069_v21, 7 }
  0x8c   :  { %6893 = vrot.lane.b32.xlu1 %v6764_v47, %s15882_s11  ;;  %v1235_v4 = vrot.slane %v1233_v57, 2  ;;  %v1231_v7 = vsel %vm16175_vm6, %v1229_v59, %v1230_v52  ;;  %v16248_v9 = vsel %vm16175_vm6, %v1232_v60, %v1233_v57  ;;  %v1243_v12 = vrot.slane %v16167_v62, 7 }
  0x8d   :  { %v1220_v13 = vrot.slane %v1218_v30, 2  ;;  %3759 = vrot.lane.b32.xlu0 %v2957_v20, %s15883_s13  ;;  %v1241_v21 = vsel %vm16175_vm6, %v14238_v10, %v1240_v6  ;;  %v1242_v14 = vrot.slane %v1240_v6, 2  ;;  %v5369_v17 = vcombine.low %v1231_v7, %v16248_v9 }
  0x8e   :  { %v16254_v11 = vsel %vm16175_vm6, %v1235_v4, %v1236_v61  ;;  %v16260_v18 = vrot.slane %v318_v40, %v16028_v5  ;;  %v1221_v27 = vrot.slane %v16079_v24, 7  ;;  %v1224_v28 = vrot.slane %v16100_v32, 7 }
  0x8f   :  { %v5370_v62 = vcombine.low %v16254_v11, %v1241_v21  ;;  %v16269_v29 = vsel %vm16175_vm6, %v1242_v14, %v1243_v12  ;;  %v5377_v30 = vrot.slane %v5369_v17, %v16028_v5  ;;  %v14236_v31 = vrot.slane %v16086_v26, 9 }
  0x90   :  { %7441 = vrot.lane.b32.xlu1 %v16241_v1, %s15884_s2  ;;  %v1196_v33 = vrot.slane %v16147_v54, 7  ;;  %v2976_v34 = vcombine.low %v1241_v21, %v16269_v29  ;;  %v1222_v40 = vsel %vm16175_vm6, %v1220_v13, %v1221_v27  ;;  %v1223_v24 = vrot.slane %v1221_v27, 2 }
  0x91   :  { %v5384_v25 = vrot.slane %v5370_v62, %v16028_v5  ;;  %v1226_v41 = vrot.slane %v1224_v28, 2  ;;  %v5352_v32 = vcombine.low %v1219_v39, %v1222_v40  ;;  %v1199_v52 = vrot.slane %v16140_v51, 7 }
  0x92   :  { %v1197_v43 = vsel %vm16175_vm6, %v14236_v31, %v1196_v33  ;;  %v1198_v44 = vrot.slane %v1196_v33, 2  ;;  %v1225_v48 = vsel %vm16175_vm6, %v1223_v24, %v1224_v28  ;;  %v1202_v53 = vrot.slane %v16159_v58, 7 }
  0x93   :  { %v5385_v47 = vcombine.low %v5377_v30, %v5384_v25  ;;  %v1228_v57 = vsel %vm16175_vm6, %v1226_v41, %v1227_v50  ;;  %v5360_v59 = vrot.slane %v5352_v32, %v16028_v5  ;;  %v2958_v60 = vcombine.low %v1222_v40, %v1225_v48 }
  0x94   :  { %v1245_v61 = vrot.slane %v1243_v12, 2  ;;  %v2959_v39 = vcombine.low %v1228_v57, %v1231_v7  ;;  %v5353_v10 = vcombine.low %v1225_v48, %v1228_v57  ;;  %v1200_v20 = vsel %vm16175_vm6, %v1198_v44, %v1199_v52  ;;  %v117_v7 = vld [vmem:[%s25399_s0 + $0x30] sm:$0xff] }
  0x95   :  { %6187 = vrot.lane.b32.xlu0 %v5385_v47, %s15872_s12  ;;  %v1201_v4 = vrot.slane %v1199_v52, 2  ;;  %v1204_v6 = vrot.slane %v1202_v53, 2  ;;  %v2924_v13 = vcombine.low %v1197_v43, %v1200_v20  ;;  %v1246_v21 = vrot.slane %v16185_v8, 7 }
  0x96   :  { %v1249_v14 = vrot.slane %v16205_v37, 7  ;;  %v5367_v50 = vrot.slane %v5353_v10, %v16028_v5  ;;  %v2966_v12 = vrot.slane %v2958_v60, %v16028_v5  ;;  %v2973_v33 = vrot.slane %v2959_v39, %v16028_v5 }
  0x97   :  { %v1203_v17 = vsel %vm16175_vm6, %v1201_v4, %v1202_v53  ;;  %v1206_v62 = vsel %vm16175_vm6, %v1204_v6, %v1205_v63  ;;  %v2932_v8 = vrot.slane %v2924_v13, %v16028_v5  ;;  %v1247_v27 = vsel %vm16175_vm6, %v1245_v61, %v1246_v21 }
  0x98   :  { %v1248_v28 = vrot.slane %v1246_v21, 2  ;;  %v5368_v30 = vcombine.low %v5360_v59, %v5367_v50  ;;  %v2925_v31 = vcombine.low %v1203_v17, %v1206_v62  ;;  %v333_v25 = vcombine.high %v16205_v37, %v16205_v37 }
  0x99   :  { %v16312_v24 = vrot.slane %v2976_v34, %v16028_v5  ;;  %v16315_v63 = vrot.slane %v117_v7, %v16028_v5  ;;  %v16319_v41 = vcombine.high %v16260_v18, %v16260_v18  ;;  %v2974_v44 = vcombine.low %v2966_v12, %v2973_v33  ;;  %v118_v33 = vld [vmem:[%s25399_s0 + $0x38] sm:$0xff] }
  0x9a   :  { %v1250_v40 = vsel %vm16175_vm6, %v1248_v28, %v1249_v14  ;;  %6185 = vrot.lane.b32.xlu1 %v5368_v30, %s15872_s12  ;;  %v2939_v32 = vrot.slane %v2925_v31, %v16028_v5  ;;  %v2111_v47 = vcombine.low %v16205_v37, %v333_v25  ;;  %v1251_v52 = vrot.slane %v1249_v14, 2 }
  0x9b   :  { %v2992_v43 = vcombine.low %v1247_v27, %v1250_v40  ;;  %v2127_v48 = vcombine.low %v16260_v18, %v16315_v63  ;;  %v16328_v34 = vcombine.high %v16315_v63, %v16315_v63  ;;  %v1252_v53 = vrot.slane %v333_v25, 7 }
  0x9c   :  { %v2940_v57 = vcombine.low %v2932_v8, %v2939_v32  ;;  %v2125_v60 = vrot.slane %v2111_v47, %v16028_v5  ;;  %v1255_v61 = vrot.slane %v16260_v18, 7  ;;  %v1258_v20 = vrot.slane %v16319_v41, 7 }
  0x9d   :  { %v16331_v59 = vrot.slane %v2992_v43, %v16028_v5  ;;  %v16336_v39 = vrot.slane %v2127_v48, %v16028_v5  ;;  %v1253_v37 = vsel %vm16175_vm6, %v1251_v52, %v1252_v53  ;;  %v1254_v10 = vrot.slane %v1252_v53, 2 }
  0x9e   :  { %3757 = vrot.lane.b32.xlu0 %v2940_v57, %s15883_s13  ;;  %v1257_v6 = vrot.slane %v1255_v61, 2  ;;  %v14239_v13 = vrot.slane %v16315_v63, 9  ;;  %v1262_v21 = vrot.slane %v16328_v34, 7  ;;  %v3973_v17 = vcombine.low %v333_v25, %v16260_v18 }
  0x9f   :  { %25858 = vst [vmem:[#allocation23_spill] sm:$0xff] %v16336_v39  ;;  %v7040_v4 = vcombine.low %v16312_v24, %v16331_v59  ;;  %v6765_v14 = vcombine.low %v2125_v60, %v16336_v39  ;;  %v16349_v50 = vsel %vm16175_vm6, %v1254_v10, %v1255_v61  ;;  %v14269_v28 = vcombine.high %v16260_v18, %v16315_v63 }
  0xa0   :  { %v16355_v12 = vsel %vm16175_vm6, %v1257_v6, %v1258_v20  ;;  %v16359_v62 = vsel %vm16175_vm6, %v14239_v13, %v1262_v21  ;;  %v2993_v8 = vcombine.low %v1253_v37, %v16349_v50  ;;  %v5386_v31 = vcombine.low %v16269_v29, %v1247_v27 }
  0xa1   :  { %7201 = vrot.lane.b32.xlu1 %v7040_v4, %s15885_s16  ;;  %v3009_v30 = vcombine.low %v16355_v12, %v16359_v62  ;;  %v3954_v25 = vcombine.low %v16135_v49, %v16119_v42  ;;  %v5387_v43 = vcombine.low %v1250_v40, %v1253_v37  ;;  %v334_v48 = vcombine.high %v117_v7, %v117_v7 }
  0xa2   :  { %3761 = vrot.lane.b32.xlu0 %v2974_v44, %s15883_s13  ;;  %v16374_v32 = vrot.slane %v2993_v8, %v16028_v5  ;;  %v16381_v29 = vrot.slane %v3973_v17, %v16028_v5  ;;  %v16384_v27 = vrot.slane %v14269_v28, %v16028_v5  ;;  %v358_v44 = vrot.slane %v118_v33, %v16028_v5 }
  0xa3   :  { %v16377_v47 = vrot.slane %v3009_v30, %v16028_v5  ;;  %v2975_v42 = vcombine.low %v16248_v9, %v16254_v11  ;;  %v5394_v40 = vrot.slane %v5386_v31, %v16028_v5  ;;  %v348_v7 = vrot.slane %v334_v48, %v16028_v5 }
  0xa4   :  { %v5401_v52 = vrot.slane %v5387_v43, %v16028_v5  ;;  %v16395_v53 = vcombine.high %v358_v44, %v358_v44  ;;  %v1264_v57 = vrot.slane %v1262_v21, 2  ;;  %v1271_v61 = vrot.slane %v358_v44, 7 }
  0xa5   :  { %6895 = vrot.lane.b32.xlu1 %v6765_v14, %s15882_s11  ;;  %v7041_v49 = vcombine.low %v16374_v32, %v16377_v47  ;;  %v350_v37 = vcombine.high %v348_v7, %v348_v7  ;;  %v2128_v10 = vcombine.low %v16328_v34, %v348_v7  ;;  %v3955_v9 = vcombine.low %v16061_v19, %v16221_v46 }
  0xa6   :  { %4741 = vrot.lane.b32.xlu0 %v3954_v25, %s15880_s26  ;;  %v1265_v11 = vrot.slane %v348_v7, 7  ;;  %v7348_v20 = vcombine.low %v16381_v29, %v16384_v27  ;;  %v1273_v4 = vrot.slane %v1271_v61, 2  ;;  %v1274_v6 = vrot.slane %v16395_v53, 7 }
  0xa7   :  { %v351_v13 = vcombine.high %v118_v33, %v118_v33  ;;  %v2144_v14 = vcombine.low %v350_v37, %v358_v44  ;;  %v5402_v21 = vcombine.low %v5394_v40, %v5401_v52  ;;  %v2983_v8 = vrot.slane %v2975_v42, %v16028_v5 }
  0xa8   :  { %v1267_v17 = vrot.slane %v1265_v11, 2  ;;  %v1266_v19 = vsel %vm16175_vm6, %v1264_v57, %v1265_v11  ;;  %v1268_v46 = vrot.slane %v350_v37, 7  ;;  %v16410_v28 = vcombine.low %v16210_v38, %v2125_v60 }
  0xa9   :  { %7203 = vrot.lane.b32.xlu1 %v7041_v49, %s15885_s16  ;;  %v16413_v30 = vrot.slane %v2128_v10, %v16028_v5  ;;  %v3963_v31 = vrot.slane %v3955_v9, %v16028_v5  ;;  %v4903_v33 = vcombine.low %v16315_v63, %v16328_v34  ;;  %v16428_v38 = vsel %vm16175_vm6, %v1273_v4, %v1274_v6  ;;  %v119_v63 = vld [vmem:[%s25399_s0 + $0x40] sm:$0xff] }
  0xaa   :  { %5209 = vrot.lane.b32.xlu0 %v16241_v1, %s15881_s27  ;;  %25859 = vst [vmem:[#allocation24_spill] sm:$0xff] %v16410_v28  ;;  %v16420_v1 = vrot.slane %v2144_v14, %v16028_v5  ;;  %v16424_v25 = vsel %vm16175_vm6, %v1267_v17, %v1268_v46  ;;  %v1270_v43 = vrot.slane %v1268_v46, 2  ;;  %v16431_v60 = vrot.slane %v351_v13, %v16028_v5 }
  0xab   :  { %25860 = vst [vmem:[#allocation25_spill] sm:$0xff] %v16413_v30  ;;  %v3010_v48 = vcombine.low %v1266_v19, %v16424_v25  ;;  %v2991_v34 = vcombine.low %v2983_v8, %v16312_v24  ;;  %v3990_v49 = vcombine.low %v348_v7, %v350_v37  ;;  %v4006_v40 = vcombine.low %v358_v44, %v16395_v53 }
  0xac   :  { %v16441_v42 = vsel %vm16175_vm6, %v1270_v43, %v1271_v61  ;;  %v3971_v52 = vcombine.low %v3963_v31, %v16230_v55  ;;  %v4910_v10 = vrot.slane %v4903_v33, %v16028_v5  ;;  %v367_v9 = vcombine.high %v119_v63, %v119_v63 }
  0xad   :  { %7443 = vrot.lane.b32.xlu1 %v7348_v20, %s15884_s2  ;;  %v3026_v57 = vcombine.low %v16441_v42, %v16428_v38  ;;  %v6766_v24 = vcombine.low %v16413_v30, %v16420_v1  ;;  %v16453_v61 = vrot.slane %v3010_v48, %v16028_v5  ;;  %v5403_v44 = vcombine.low %v16349_v50, %v16355_v12 }
  0xae   :  { %6189 = vrot.lane.b32.xlu0 %v5402_v21, %s15872_s12  ;;  %v16458_v55 = vrot.slane %v119_v63, %v16028_v5  ;;  %v5404_v37 = vcombine.low %v16359_v62, %v1266_v19  ;;  %v16465_v11 = vrot.slane %v367_v9, %v16028_v5  ;;  %v1162_v20 = vcombine.high %v16431_v60, %v16431_v60 }
  0xaf   :  { %v16461_v7 = vrot.slane %v3026_v57, %v16028_v5  ;;  %v16471_v4 = vrot.slane %v3990_v49, %v16028_v5  ;;  %v16474_v50 = vrot.slane %v4006_v40, %v16028_v5  ;;  %v1277_v13 = vrot.slane %v16431_v60, 7  ;;  %v120_v49 = vld [vmem:[%s25399_s0 + $0x48] sm:$0xff] }
  0xb0   :  { %v382_v12 = vcombine.high %v16458_v55, %v16458_v55  ;;  %v6341_v62 = vcombine.low %v16260_v18, %v16319_v41  ;;  %v1276_v14 = vrot.slane %v1274_v6, 2  ;;  %v1280_v17 = vrot.slane %v1162_v20, 7 }
  0xb1   :  { %6621 = vrot.lane.b32.xlu1 %v16410_v28, %s15879_s3  ;;  %v14240_v21 = vrot.slane %v16458_v55, 9  ;;  %v7042_v8 = vcombine.low %v16453_v61, %v16461_v7  ;;  %v1279_v19 = vrot.slane %v1277_v13, 2  ;;  %v1287_v31 = vrot.slane %v16465_v11, 7 }
  0xb2   :  { %3763 = vrot.lane.b32.xlu0 %v2991_v34, %s15883_s13  ;;  %v1284_v46 = vrot.slane %v382_v12, 7  ;;  %v5411_v33 = vrot.slane %v5403_v44, %v16028_v5  ;;  %v5418_v43 = vrot.slane %v5404_v37, %v16028_v5  ;;  %v4911_v18 = vcombine.low %v16381_v29, %v4910_v10 }
  0xb3   :  { %v6348_v6 = vrot.slane %v6341_v62, %v16028_v5  ;;  %v1278_v48 = vsel %vm16175_vm6, %v1276_v14, %v1277_v13  ;;  %v16495_v63 = vsel %vm16175_vm6, %v1279_v19, %v1280_v17  ;;  %v16507_v40 = vcombine.low %v16471_v4, %v16474_v50 }
  0xb4   :  { %v1286_v41 = vrot.slane %v1284_v46, 2  ;;  %v16499_v34 = vsel %vm16175_vm6, %v14240_v21, %v1284_v46  ;;  %v2161_v57 = vcombine.low %v16458_v55, %v382_v12  ;;  %v5419_v9 = vcombine.low %v5411_v33, %v5418_v43 }
  0xb5   :  { %6897 = vrot.lane.b32.xlu1 %v6766_v24, %s15882_s11  ;;  %v4007_v24 = vcombine.low %v16431_v60, %v1162_v20  ;;  %v4023_v44 = vcombine.low %v382_v12, %v16465_v11  ;;  %v3027_v37 = vcombine.low %v1278_v48, %v16495_v63  ;;  %v391_v62 = vrot.slane %v120_v49, %v16028_v5 }
  0xb6   :  { %4743 = vrot.lane.b32.xlu0 %v3971_v52, %s15880_s26  ;;  %v2145_v52 = vcombine.low %v16395_v53, %v16431_v60  ;;  %v16514_v10 = vsel %vm16175_vm6, %v1286_v41, %v1287_v31  ;;  %v383_v53 = vcombine.high %v16465_v11, %v16465_v11  ;;  %v6349_v14 = vcombine.low %v6348_v6, %v16413_v30 }
  0xb7   :  { %v3043_v13 = vcombine.low %v16499_v34, %v16514_v10  ;;  %v384_v17 = vcombine.high %v120_v49, %v120_v49  ;;  %v16530_v12 = vrot.slane %v2161_v57, %v16028_v5  ;;  %v399_v21 = vcombine.high %v391_v62, %v391_v62 }
  0xb8   :  { %v2159_v20 = vrot.slane %v2145_v52, %v16028_v5  ;;  %v3008_v19 = vcombine.low %v16331_v59, %v16374_v32  ;;  %v16535_v46 = vrot.slane %v4007_v24, %v16028_v5  ;;  %v5420_v33 = vcombine.low %v16424_v25, %v16441_v42 }
  0xb9   :  { %7205 = vrot.lane.b32.xlu1 %v7042_v8, %s15885_s16  ;;  %25861 = vst [vmem:[#allocation26_spill] sm:$0xff] %v16530_v12  ;;  %v1290_v8 = vrot.slane %v383_v53, 7  ;;  %v5421_v43 = vcombine.low %v16428_v38, %v1278_v48  ;;  %v16545_v41 = vrot.slane %v3043_v13, %v16028_v5  ;;  %v16548_v6 = vrot.slane %v4023_v44, %v16028_v5 }
  0xba   :  { %5211 = vrot.lane.b32.xlu0 %v4911_v18, %s15881_s27  ;;  %v16542_v18 = vrot.slane %v3027_v37, %v16028_v5  ;;  %v1293_v59 = vrot.slane %v391_v62, 7  ;;  %v16551_v32 = vrot.slane %v384_v17, %v16028_v5  ;;  %v1289_v49 = vrot.slane %v1287_v31, 2 }
  0xbb   :  { %v1292_v52 = vrot.slane %v1290_v8, 2  ;;  %v1296_v25 = vrot.slane %v399_v21, 7  ;;  %v6767_v38 = vcombine.low %v2159_v20, %v16530_v12  ;;  %v2162_v42 = vcombine.low %v16465_v11, %v383_v53 }
  0xbc   :  { %v2178_v48 = vcombine.low %v391_v62, %v399_v21  ;;  %v4913_v57 = vcombine.low %v16431_v60, %v16458_v55  ;;  %v5428_v24 = vrot.slane %v5420_v33, %v16028_v5  ;;  %v5435_v44 = vrot.slane %v5421_v43, %v16028_v5 }
  0xbd   :  { %7445 = vrot.lane.b32.xlu1 %v16507_v40, %s15884_s2  ;;  %v16563_v31 = vcombine.low %v16420_v1, %v2159_v20  ;;  %v7043_v37 = vcombine.low %v16542_v18, %v16545_v41  ;;  %v7349_v11 = vcombine.low %v16535_v46, %v16548_v6  ;;  %v16579_v1 = vsel %vm16175_vm6, %v1292_v52, %v1293_v59 }
  0xbe   :  { %6191 = vrot.lane.b32.xlu0 %v5419_v9, %s15872_s12  ;;  %v3988_v9 = vcombine.low %v16233_v56, %v16381_v29  ;;  %v121_v56 = vld [vmem:[%s25399_s0 + $0x50] sm:$0xff]  ;;  %v1291_v29 = vsel %vm16175_vm6, %v1289_v49, %v1290_v8  ;;  %v1298_v17 = vrot.slane %v1296_v25, 2  ;;  %v1299_v20 = vrot.slane %v16551_v32, 7 }
  0xbf   :  { %25862 = vst [vmem:[#allocation27_spill] sm:$0xff] %v16563_v31  ;;  %v16587_v33 = vrot.slane %v2178_v48, %v16028_v5  ;;  %v16590_v43 = vrot.slane %v4913_v57, %v16028_v5  ;;  %v4024_v45 = vcombine.low %v383_v53, %v391_v62  ;;  %v4040_v8 = vcombine.low %v399_v21, %v16551_v32 }
  0xc0   :  { %v400_v49 = vcombine.high %v121_v56, %v121_v56  ;;  %v16598_v52 = vcombine.high %v16551_v32, %v16551_v32  ;;  %v3044_v53 = vcombine.low %v1291_v29, %v16579_v1  ;;  %v1300_v62 = vsel %vm16175_vm6, %v1298_v17, %v1299_v20 }
  0xc1   :  { %6623 = vrot.lane.b32.xlu1 %v6349_v14, %s15879_s3  ;;  %v1295_v14 = vrot.slane %v1293_v59, 2  ;;  %25864 = vst [vmem:[#allocation29_spill] sm:$0xff] %v16587_v33  ;;  %v16594_v59 = vrot.slane %v121_v56, %v16028_v5  ;;  %v5437_v21 = vcombine.low %v16495_v63, %v16499_v34  ;;  %v16625_v34 = vrot.slane %v4040_v8, %v16028_v5 }
  0xc2   :  { %3765 = vrot.lane.b32.xlu0 %v3008_v19, %s15883_s13  ;;  %v16584_v19 = vrot.slane %v2162_v42, %v16028_v5  ;;  %v414_v57 = vrot.slane %v400_v49, %v16028_v5  ;;  %v5438_v56 = vcombine.low %v16514_v10, %v1291_v29  ;;  %vm25827_vm4 = vcmask 146432  }
  0xc3   :  { %v1297_v48 = vsel %vm16175_vm6, %v1295_v14, %v1296_v25  ;;  %v16619_v25 = vrot.slane %v4024_v45, %v16028_v5  ;;  %v1302_v14 = vrot.slane %v16598_v52, 7  ;;  %v14283_v45 = vcombine.high %v16431_v60, %v16458_v55 }
  0xc4   :  { %25863 = vst [vmem:[#allocation28_spill] sm:$0xff] %v16584_v19  ;;  %v6768_v63 = vcombine.low %v16584_v19, %v16587_v33  ;;  %v16628_v17 = vcombine.high %v414_v57, %v414_v57  ;;  %v1309_v49 = vrot.slane %v414_v57, 7  ;;  %v16639_v8 = vrot.slane %v5437_v21, %v16028_v5 }
  0xc5   :  { %6899 = vrot.lane.b32.xlu1 %v6767_v38, %s15882_s11  ;;  %v5436_v38 = vcombine.low %v5428_v24, %v5435_v44  ;;  %v1301_v44 = vrot.slane %v1299_v20, 2  ;;  %v16636_v24 = vrot.slane %v3044_v53, %v16028_v5  ;;  %v14241_v10 = vrot.slane %v16594_v59, 9 }
  0xc6   :  { %4745 = vrot.lane.b32.xlu0 %v3988_v9, %s15880_s26  ;;  %v16613_v9 = vcombine.high %v16594_v59, %v16594_v59  ;;  %v1312_v29 = vrot.slane %v16628_v17, 7  ;;  %v1311_v42 = vrot.slane %v1309_v49, 2  ;;  %v5454_v13 = vcombine.low %v16579_v1, %v1297_v48 }
  0xc7   :  { %v1303_v60 = vsel %vm16175_vm6, %v1301_v44, %v1302_v14  ;;  %v16661_v44 = vcombine.low %v16619_v25, %v16625_v34  ;;  %v16664_v14 = vrot.slane %v5438_v56, %v16028_v5  ;;  %v16667_v53 = vrot.slane %v14283_v45, %v16028_v5 }
  0xc8   :  { %v1306_v20 = vrot.slane %v16613_v9, 7  ;;  %v2195_v21 = vcombine.low %v16613_v9, %v414_v57  ;;  %v5455_v3 = vcombine.low %v1300_v62, %v1303_v60  ;;  %v1314_v12 = vrot.slane %v1312_v29, 2 }
  0xc9   :  { %7207 = vrot.lane.b32.xlu1 %v7043_v37, %s15885_s16  ;;  %v3060_v37 = vcombine.low %v1297_v48, %v1300_v62  ;;  %v14270_v62 = vcombine.high %v16551_v32, %v16594_v59  ;;  %vm10458_vm5 = vcmask 1041409  }
  0xca   :  { %5213 = vrot.lane.b32.xlu0 %v16507_v40, %s15881_s27  ;;  %v2179_v40 = vcombine.low %v16551_v32, %v16594_v59  ;;  %v1308_v55 = vrot.slane %v1306_v20, 2  ;;  %v1307_v1 = vsel %vm16175_vm6, %v14241_v10, %v1306_v20  ;;  %v16695_v10 = vrot.slane %v5455_v3, %v16028_v5 }
  0xcb   :  { %v16657_v28 = vrot.slane %v3060_v37, %v16028_v5  ;;  %v4057_v37 = vcombine.low %v414_v57, %v16628_v17  ;;  %v25866_v57 = vcombine.low %v16377_v47, %v16453_v61  ;;  %v5453_v3 = vcombine.low %v16639_v8, %v16664_v14 }
  0xcc   :  { %v1310_v48 = vsel %vm16175_vm6, %v1308_v55, %v1309_v49  ;;  %v16682_v56 = vrot.slane %v2179_v40, %v16028_v5  ;;  %v16689_v49 = vrot.slane %v2195_v21, %v16028_v5  ;;  %v6359_v55 = vcombine.low %v16551_v32, %v16598_v52 }
  0xcd   :  { %7447 = vrot.lane.b32.xlu1 %v7349_v11, %s15884_s2  ;;  %v122_v11 = vld [vmem:[%s25399_s0 + $0x58] sm:$0xff]  ;;  %v3061_v40 = vcombine.low %v1303_v60, %v1307_v1  ;;  %v6358_v32 = vcombine.low %v16667_v53, %v16584_v19  ;;  %v7044_v61 = vcombine.low %v16636_v24, %v16657_v28  ;;  %v16720_v60 = vrot.slane %v14270_v62, %v16028_v5 }
  0xce   :  { %6193 = vrot.lane.b32.xlu0 %v5436_v38, %s15872_s12  ;;  %v16675_v38 = vsel %vm16175_vm6, %v1311_v42, %v1312_v29  ;;  %25865 = vst [vmem:[#allocation30_spill] sm:$0xff] %v16682_v56  ;;  %v417_v45 = vcombine.high %v122_v11, %v122_v11  ;;  %v16686_v20 = vrot.slane %v122_v11, %v16028_v5 }
  0xcf   :  { %v16692_v42 = vrot.slane %v5454_v13, %v16028_v5  ;;  %v3077_v11 = vcombine.low %v1310_v48, %v16675_v38  ;;  %v16730_v14 = vrot.slane %v6359_v55, %v16028_v5  ;;  %v25868_v62 = vcombine.low %v16384_v27, %v16471_v4  ;;  %v123_v27 = vld [vmem:[%s25399_s0 + $0x60] sm:$0xff] }
  0xd0   :  { %v16705_v21 = vrot.slane %v417_v45, %v16028_v5  ;;  %v432_v13 = vcombine.high %v16686_v20, %v16686_v20  ;;  %v1315_v47 = vrot.slane %v16686_v20, 7  ;;  %v16723_v45 = vrot.slane %v4057_v37, %v16028_v5 }
  0xd1   :  { %6625 = vrot.lane.b32.xlu1 %v16563_v31, %s15879_s3  ;;  %v16738_v37 = vrot.slane %v3061_v40, %v16028_v5  ;;  %v16741_v52 = vrot.slane %v3077_v11, %v16028_v5  ;;  %v4923_v55 = vcombine.low %v16594_v59, %v16613_v9  ;;  %v5471_v36 = vcombine.low %v1307_v1, %v1310_v48 }
  0xd2   :  { %3767 = vrot.lane.b32.xlu0 %v25866_v57, %s15883_s13  ;;  %25867 = vst [vmem:[#allocation31_spill] sm:$0xff] %v16723_v45  ;;  %v1164_v8 = vcombine.high %v16705_v21, %v16705_v21  ;;  %v1318_v57 = vrot.slane %v432_v13, 7  ;;  %v1317_v19 = vrot.slane %v1315_v47, 2  ;;  %v2196_v9 = vcombine.low %v16628_v17, %v16686_v20 }
  0xd3   :  { %v2212_v29 = vcombine.low %v432_v13, %v16705_v21  ;;  %v25869_v48 = vcombine.low %v16590_v43, %v16548_v6  ;;  %v16769_v31 = vrot.slane %v4923_v55, %v16028_v5  ;;  %v4058_v59 = vcombine.low %v16686_v20, %v432_v13  ;;  %v124_v55 = vld [vmem:[%s25399_s0 + $0x68] sm:$0xff] }
  0xd4   :  { %v1320_v40 = vrot.slane %v1318_v57, 2  ;;  %v433_v53 = vcombine.high %v123_v27, %v123_v27  ;;  %v1316_v17 = vsel %vm16175_vm6, %v1314_v12, %v1315_v47  ;;  %v16776_v1 = vsel %vm16175_vm6, %v1317_v19, %v1318_v57 }
  0xd5   :  { %6901 = vrot.lane.b32.xlu1 %v6768_v63, %s15882_s11  ;;  %v1321_v63 = vrot.slane %v16705_v21, 7  ;;  %v16779_v4 = vrot.slane %v5471_v36, %v16028_v5  ;;  %v16782_v43 = vrot.slane %v123_v27, %v16028_v5  ;;  %v4074_v36 = vcombine.low %v16705_v21, %v1164_v8 }
  0xd6   :  { %4747 = vrot.lane.b32.xlu0 %v25868_v62, %s15880_s26  ;;  %v1324_v62 = vrot.slane %v1164_v8, 7  ;;  %v447_v20 = vrot.slane %v433_v53, %v16028_v5  ;;  %v16800_v13 = vrot.slane %v2196_v9, %v16028_v5  ;;  %v16803_v47 = vrot.slane %v2212_v29, %v16028_v5 }
  0xd7   :  { %v1323_v11 = vrot.slane %v1321_v63, 2  ;;  %v16791_v12 = vsel %vm16175_vm6, %v1320_v40, %v1321_v63  ;;  %v5472_v57 = vcombine.low %v16675_v38, %v1316_v17  ;;  %v448_v63 = vcombine.high %v16782_v43, %v16782_v43 }
  0xd8   :  { %25870 = vst [vmem:[#allocation32_spill] sm:$0xff] %v16803_v47  ;;  %v3078_v27 = vcombine.low %v1316_v17, %v16776_v1  ;;  %v16811_v40 = vrot.slane %v4058_v59, %v16028_v5  ;;  %v16813_v8 = vcombine.high %v447_v20, %v447_v20  ;;  %v16816_v53 = vrot.slane %v124_v55, %v16028_v5 }
  0xd9   :  { %7209 = vrot.lane.b32.xlu1 %v7044_v61, %s15885_s16  ;;  %v16795_v19 = vsel %vm16175_vm6, %v1323_v11, %v1324_v62  ;;  %v2059_v38 = vcombine.low %v16055_v15, %v16076_v23  ;;  %v14242_v62 = vrot.slane %v16782_v43, 9  ;;  %v1328_v9 = vrot.slane %v448_v63, 7 }
  0xda   :  { %5215 = vrot.lane.b32.xlu0 %v25869_v48, %s15881_s27  ;;  %v3094_v11 = vcombine.low %v16791_v12, %v16795_v19  ;;  %v2060_v59 = vcombine.low %v16072_v22, %v16058_v16  ;;  %v1331_v29 = vrot.slane %v447_v20, 7  ;;  %v1334_v48 = vrot.slane %v16813_v8, 7 }
  0xdb   :  { %v2213_v17 = vcombine.low %v16782_v43, %v448_v63  ;;  %v2229_v61 = vcombine.low %v447_v20, %v16813_v8  ;;  %v1330_v35 = vrot.slane %v1328_v9, 2  ;;  %v25871_v23 = vcombine.low %v16461_v7, %v16542_v18 }
  0xdc   :  { %v16841_v16 = vrot.slane %v5472_v57, %v16028_v5  ;;  %v1333_v22 = vrot.slane %v1331_v29, 2  ;;  %v16844_v0 = vrot.slane %v3094_v11, %v16028_v5  ;;  %v16847_v39 = vrot.slane %v2059_v38, %v16028_v5 }
  0xdd   :  { %7449 = vrot.lane.b32.xlu1 %v16661_v44, %s15884_s2  ;;  %v16851_v15 = vsel %vm16175_vm6, %v14242_v62, %v1328_v9  ;;  %v16855_v7 = vsel %vm16175_vm6, %v1330_v35, %v1331_v29  ;;  %v25873_v18 = vcombine.low %v16682_v56, %v16689_v49  ;;  %v450_v57 = vcombine.high %v124_v55, %v124_v55 }
  0xde   :  { %6195 = vrot.lane.b32.xlu0 %v5453_v3, %s15872_s12  ;;  %v16825_v3 = vrot.slane %v4074_v36, %v16028_v5  ;;  %v1336_v36 = vrot.slane %v1334_v48, 2  ;;  %25872 = vst [vmem:[#allocation33_spill] sm:$0xff] %v16844_v0  ;;  %v25874_v11 = vrot.slane %v16816_v53, 7  ;;  %v4932_v35 = vcombine.low %v16705_v21, %v16782_v43 }
  0xdf   :  { %v16874_v62 = vrot.slane %v2213_v17, %v16028_v5  ;;  %v16877_v9 = vrot.slane %v2229_v61, %v16028_v5  ;;  %v16880_v55 = vrot.slane %v2060_v59, %v16028_v5  ;;  %v4075_v29 = vcombine.low %v448_v63, %v447_v20  ;;  %v175_v59 = vld [vmem:[#allocation2] sm:$0xff] }
  0xe0   :  { %v16869_v38 = vsel %vm16175_vm6, %v1336_v36, %v25874_v11  ;;  %v3095_v61 = vcombine.low %v16851_v15, %v16855_v7  ;;  %v176_v36 = vld [vmem:[#allocation2 + $0x8] sm:$0xff]  ;;  %v16913_v17 = vrot.slane %v450_v57, %v16028_v5  ;;  %v16930_v57 = vld [vmem:[%s25399_s0 + $0x70] sm:$0xff]  ;;  %v2042_v20 = vcombine.low %v16086_v26, %v16147_v54 }
  0xe1   :  { %6627 = vrot.lane.b32.xlu1 %v6358_v32, %s15879_s3  ;;  %v16838_v32 = vrot.slane %v3078_v27, %v16028_v5  ;;  %v16863_v27 = vsel %vm16175_vm6, %v1333_v22, %v1334_v48  ;;  %25875 = vst [vmem:[#allocation34_spill] sm:$0xff] %v16874_v62  ;;  %v25876_v48 = vcombine.low %v16474_v50, %v16535_v46  ;;  %v25424_v11 = vmov 0.0|0.0  }
  0xe2   :  { %3769 = vrot.lane.b32.xlu0 %v25871_v23, %s15883_s13  ;;  %v16900_v50 = vcombine.low %v16689_v49, %v16800_v13  ;;  %v3111_v46 = vcombine.low %v16863_v27, %v16869_v38  ;;  %v16916_v49 = vrot.slane %v4932_v35, %v16028_v5  ;;  %v4091_v22 = vcombine.low %v16813_v8, %v16816_v53 }
  0xe3   :  { %v16935_v35 = vrot.slane %v3095_v61, %v16028_v5  ;;  %v14950_v63 = vpack.c.bf16 %v176_v36, %v175_v59  ;;  %v5489_v8 = vcombine.low %v16795_v19, %v16851_v15  ;;  %14949 = vmatprep.subr.bf16.mxu0 %v25424_v11  ;;  %15470 = vmatprep.subr.bf16.mxu1 %v25424_v11  ;;  %v25422_v15 = vmov 0.0   ;;  %v177_v61 = vld [vmem:[#allocation2 + $0x10] sm:$0x3] }
  0xe4   :  { %25877 = vst [vmem:[#allocation35_spill] sm:$0xff] %v16900_v50  ;;  %v16960_v26 = vrot.slane %v16930_v57, %v16028_v5  ;;  %v16963_v54 = vrot.slane %v4091_v22, %v16028_v5  ;;  %v2043_v19 = vcombine.low %v16140_v51, %v16159_v58  ;;  %v14284_v22 = vcombine.high %v16705_v21, %v16782_v43 }
  0xe5   :  { %6903 = vrot.lane.b32.xlu1 %v25873_v18, %s15882_s11  ;;  %v25878_v18 = vcombine.low %v16738_v37, %v16741_v52  ;;  %14951 = vmatpush3.bf16.msra.mxu0 %v14950_v63  ;;  %v16985_v58 = vcombine.high %v16913_v17, %v16913_v17  ;;  %v1343_v36 = vrot.slane %v16913_v17, 7  ;;  %v25883_v21 = vcombine.low %v16587_v33, %v16730_v14 }
  0xe6   :  { %4749 = vrot.lane.b32.xlu0 %v25876_v48, %s15880_s26  ;;  %v5488_v48 = vcombine.low %v16776_v1, %v16791_v12  ;;  %v16956_v12 = vcombine.high %v16816_v53, %v16816_v53  ;;  %25880 = vst [vmem:[#allocation36_spill] sm:$0xff] %v16963_v54  ;;  %14771 = vmatprep.subr.mxu0 %v25422_v15 }
  0xe7   :  { %15472 = vmatpush3.bf16.msra.mxu1 %v14950_v63  ;;  %14773 = vmatprep.mubr.msk.f32.mxu0 %vm15888_vm8, %v25422_v15  ;;  %v16981_v51 = vcombine.high %v16960_v26, %v16960_v26  ;;  %v2246_v14 = vcombine.low %v16913_v17, %v16960_v26  ;;  %v1345_v1 = vrot.slane %v1343_v36, 2  ;;  %v1346_v23 = vrot.slane %v16985_v58, 7 }
  0xe8   :  { %v16973_v59 = vrot.slane %v5488_v48, %v16028_v5  ;;  %v1340_v63 = vrot.slane %v16956_v12, 7  ;;  %15471 = vmatprep.subr.mxu1 %v25422_v15  ;;  %14911 = vmatprep.mubr.msk.f32.mxu1 %vm15888_vm8, %v25422_v15  ;;  %v17001_v48 = vrot.slane %v5489_v8, %v16028_v5  ;;  %v17021_v11 = vrot.slane %v2042_v20, %v16028_v5 }
  0xe9   :  { %7211 = vrot.lane.b32.xlu1 %v25878_v18, %s15885_s16  ;;  %v16923_v18 = vrot.slane %v4075_v29, %v16028_v5  ;;  %v16940_v29 = vrot.slane %v3111_v46, %v16028_v5  ;;  %v25881_v46 = vcombine.low %v16692_v42, %v16695_v10  ;;  %v25882_v42 = vrot.slane %v16816_v53, 7  ;;  %14772 = vmatpush3.msk.msra.mxu0 %vm8142_vm7, %v177_v61 }
  0xea   :  { %5217 = vrot.lane.b32.xlu0 %v16661_v44, %s15881_s27  ;;  %v25879_v44 = vcombine.low %v16720_v60, %v16723_v45  ;;  %v17027_v33 = vrot.slane %v14284_v22, %v16028_v5  ;;  %v25885_v56 = vrot.slane %v16981_v51, 7  ;;  %v14271_v20 = vcombine.high %v16913_v17, %v16960_v26 }
  0xeb   :  { %v1339_v10 = vrot.slane %v25882_v42, 2  ;;  %15473 = vmatpush3.msk.msra.mxu1 %vm8142_vm7, %v177_v61  ;;  %v17024_v42 = vrot.slane %v2043_v19, %v16028_v5  ;;  %v25886_v19 = vmov 0.0|0.0   ;;  %v25887_v22 = vcombine.low %v16800_v13, %v16803_v47  ;;  %v126_v13 = vld [vmem:[%s25399_s0 + $0x78] sm:$0xff] }
  0xec   :  { %14984 = vmatprep.subr.bf16.mxu1 %v25886_v19  ;;  %vm10461_vm7 = vcmask 1043459  }
  0xed   :  { %7451 = vrot.lane.b32.xlu1 %v25879_v44, %s15884_s2  ;;  %v2230_v44 = vcombine.low %v16816_v53, %v16956_v12  ;;  %v25884_v53 = vcombine.low %v16545_v41, %v16636_v24  ;;  %v1341_v61 = vsel %vm16175_vm6, %v1339_v10, %v1340_v63  ;;  %v4092_v24 = vcombine.low %v16956_v12, %v16913_v17 }
  0xee   :  { %6197 = vrot.lane.b32.xlu0 %v25881_v46, %s15872_s12  ;;  %v14243_v46 = vrot.slane %v16960_v26, 9  ;;  %v5505_v12 = vcombine.low %v16855_v7, %v16863_v27  ;;  %v17074_v7 = vrot.slane %v2246_v14, %v16028_v5  ;;  %v25890_v27 = vcombine.low %v16548_v6, %v16619_v25 }
  0xef   :  { %v17092_v6 = vrot.slane %v4092_v24, %v16028_v5  ;;  %v490_v25 = vrot.slane %v126_v13, %v16028_v5 }
  0xf0   :  { %v17035_v41 = vsel %vm16175_vm6, %v14243_v46, %v25885_v56  ;;  %v17054_v56 = vsel %vm16175_vm6, %v1345_v1, %v1346_v23  ;;  %v5506_v46 = vcombine.low %v16869_v38, %v1341_v61  ;;  %v17071_v1 = vrot.slane %v2230_v44, %v16028_v5  ;;  %25889 = vst [vmem:[#allocation38_spill] sm:$0xff] %v17074_v7 }
  0xf1   :  { %6629 = vrot.lane.b32.xlu1 %v25883_v21, %s15879_s3  ;;  %v1342_v21 = vrot.slane %v1340_v63, 2  ;;  %v466_v44 = vcombine.high %v16930_v57, %v16930_v57  ;;  %v3128_v23 = vcombine.low %v17054_v56, %v17035_v41  ;;  %v17103_v57 = vrot.slane %v5505_v12, %v16028_v5 }
  0xf2   :  { %v16998_v43 = vpop.permute.xlu1 %6619  ;;  %v17008_v15 = vpop.permute.xlu0 %4739  ;;  %3771 = vrot.lane.b32.xlu0 %v25884_v53, %s15883_s13  ;;  %25888 = vst [vmem:[#allocation37_spill] sm:$0xff] %v17071_v1  ;;  %v17115_v8 = vcombine.high %v490_v25, %v490_v25  ;;  %v25894_v12 = vcombine.low %v16769_v31, %v16723_v45  ;;  %v4942_v38 = vcombine.low %v16960_v26, %v16981_v51 }
  0xf3   :  { %v17050_v63 = vsel %vm16175_vm6, %v1342_v21, %v1343_v36  ;;  %v17066_v36 = vcombine.low %v16923_v18, %v16963_v54  ;;  %v17100_v21 = vrot.slane %v14271_v20, %v16028_v5  ;;  %v480_v24 = vrot.slane %v466_v44, %v16028_v5 }
  0xf4   :  { %v3112_v14 = vcombine.low %v1341_v61, %v17050_v63  ;;  %v17106_v61 = vrot.slane %v5506_v46, %v16028_v5  ;;  %v1359_v20 = vrot.slane %v490_v25, 7  ;;  %v17125_v44 = vcombine.low %v16877_v9, %v17071_v1 }
  0xf5   :  { %6905 = vrot.lane.b32.xlu1 %v25887_v22, %s15882_s11  ;;  %25892 = vst [vmem:[#allocation39_spill] sm:$0xff] %v17100_v21  ;;  %v482_v19 = vcombine.high %v480_v24, %v480_v24  ;;  %v1353_v30 = vrot.slane %v480_v24, 7  ;;  %v17133_v7 = vrot.slane %v3128_v23, %v16028_v5  ;;  %v5522_v23 = vcombine.low %v17050_v63, %v17054_v56 }
  0xf6   :  { %v17046_v10 = vpop.permute.xlu1 %5205  ;;  %v17062_v53 = vpop.permute.xlu0 %5207  ;;  %4751 = vrot.lane.b32.xlu0 %v25890_v27, %s15880_s26  ;;  %v25891_v27 = vcombine.low %v16838_v32, %v16844_v0  ;;  %25893 = vst [vmem:[#allocation40_spill] sm:$0xff] %v17106_v61  ;;  %25896 = vst [vmem:[#allocation42_spill] sm:$0xff] %v17125_v44  ;;  %v25898_v44 = vcombine.low %v16811_v40, %v16825_v3  ;;  %v1362_v0 = vrot.slane %v17115_v8, 7 }
  0xf7   :  { %25897 = vst [vmem:[#allocation43_spill] sm:$0xff] %v17133_v7  ;;  %v1355_v1 = vrot.slane %v1353_v30, 2  ;;  %v1356_v31 = vrot.slane %v482_v19, 7  ;;  %v2247_v45 = vcombine.low %v16981_v51, %v480_v24  ;;  %v2263_v21 = vcombine.low %v482_v19, %v490_v25 }
  0xf8   :  { %v17156_v26 = vrot.slane %v4942_v38, %v16028_v5  ;;  %v25901_v38 = vcombine.low %v16847_v39, %v16880_v55  ;;  %v4109_v63 = vcombine.low %v480_v24, %v482_v19  ;;  %v25902_v19 = vcombine.low %v16657_v28, %v16738_v37 }
  0xf9   :  { %7213 = vrot.lane.b32.xlu1 %v25891_v27, %s15885_s16  ;;  %v17130_v27 = vrot.slane %v3112_v14, %v16028_v5  ;;  %v25899_v14 = vrot.slane %v16981_v51, 7  ;;  %v6377_v28 = vcombine.low %v16913_v17, %v16985_v58 }
  0xfa   :  { %v17109_v22 = vpop.permute.xlu0 %4737  ;;  %5219 = vrot.lane.b32.xlu0 %v25894_v12, %s15881_s27  ;;  %v17121_v46 = vpop.permute.xlu1 %6617  ;;  %v483_v12 = vcombine.high %v126_v13, %v126_v13  ;;  %v1361_v13 = vrot.slane %v1359_v20, 2 }
  0xfb   :  { %25895 = vst [vmem:[#allocation41_spill] sm:$0xff] %v17121_v46  ;;  %v1352_v46 = vrot.slane %v25899_v14, 2  ;;  %v4125_v14 = vcombine.low %v490_v25, %v17115_v8 }
  0xfc   :  { %v17162_v56 = vrot.slane %v483_v12, %v16028_v5  ;;  %v17177_v12 = vrot.slane %v5522_v23, %v16028_v5  ;;  %v17192_v55 = vsel %vm16175_vm6, %v1361_v13, %v1362_v0  ;;  %v17225_v23 = vrot.slane %v4109_v63, %v16028_v5 }
  0xfd   :  { %7453 = vrot.lane.b32.xlu1 %v25898_v44, %s15884_s2  ;;  %v25900_v44 = vcombine.low %v16779_v4, %v16841_v16  ;;  %v1358_v16 = vrot.slane %v1356_v31, 2  ;;  %v127_v4 = vld [vmem:[%s25399_s0 + $0x80] sm:$0xff] }
  0xfe   :  { %v17168_v51 = vpop.permute.xlu1 %6893  ;;  %v499_v37 = vcombine.high %v127_v4, %v127_v4  ;;  %25906 = vst [vmem:[#allocation46_spill] sm:$0xff] %v17225_v23  ;;  %v1166_v17 = vcombine.high %v17162_v56, %v17162_v56  ;;  %v1365_v13 = vrot.slane %v17162_v56, 7 }
  0xff   :  { %6199 = vrot.lane.b32.xlu0 %v25900_v44, %s15872_s12  ;;  %v3760_v61 = vpop.permute.xlu0 %3759  ;;  %v1354_v44 = vsel %vm16175_vm6, %v1352_v46, %v1353_v30  ;;  %v17188_v39 = vsel %vm16175_vm6, %v1358_v16, %v1359_v20  ;;  %v17208_v20 = vrot.slane %v4125_v14, %v16028_v5  ;;  %v17215_v46 = vrot.slane %v127_v4, %v16028_v5 }
 0x100   :  { %v7590_v25 = vsel %vm7588_vm9, %v25901_v38, %v3760_v61  ;;  %v5523_v30 = vcombine.low %v17035_v41, %v1354_v44  ;;  %v17200_v61 = vrot.slane %v2247_v45, %v16028_v5  ;;  %v25905_v45 = vcombine.low %v16874_v62, %v16877_v9 }
 0x101   :  { %6631 = vrot.lane.b32.xlu1 %v16900_v50, %s15879_s3  ;;  %v17184_v50 = vsel %vm16175_vm6, %v1355_v1, %v1356_v31  ;;  %v17203_v1 = vrot.slane %v2263_v21, %v16028_v5  ;;  %25904 = vst [vmem:[#allocation45_spill] sm:$0xff] %v17208_v20  ;;  %v7640_v41 = vsel %vm25834_vm10, %v7590_v25, %v17008_v15  ;;  %v14244_v58 = vrot.slane %v17215_v46, 9 }
 0x102   :  { %25903 = vst [vmem:[#allocation44_spill] sm:$0xff] %v17200_v61  ;;  %v3129_v21 = vcombine.low %v1354_v44, %v17184_v50  ;;  %v3145_v31 = vcombine.low %v17188_v39, %v17192_v55  ;;  %v17230_v15 = vrot.slane %v5523_v30, %v16028_v5  ;;  %v514_v9 = vcombine.high %v17215_v46, %v17215_v46  ;;  %v17241_v63 = vpop.permute.xlu1 %7441  ;;  %v25920_v54 = vld [vmem:[#allocation41_spill] sm:$0xff] }
 0x103   :  { %3773 = vrot.lane.b32.xlu0 %v25902_v19, %s15883_s13  ;;  %v25907_v14 = vcombine.low %v16625_v34, %v16720_v60  ;;  %v7690_v4 = vsel %vm25826_vm11, %v7640_v41, %v17062_v53  ;;  %v2264_v38 = vcombine.low %v17115_v8, %v17162_v56  ;;  %v17250_v25 = vrot.slane %v499_v37, %v16028_v5 }
 0x104   :  { %v2280_v30 = vcombine.low %v17215_v46, %v514_v9  ;;  %v1364_v19 = vrot.slane %v1362_v0, 2  ;;  %v1367_v34 = vrot.slane %v1365_v13, 2  ;;  %v1368_v60 = vrot.slane %v1166_v17, 7 }
 0x105   :  { %6907 = vrot.lane.b32.xlu1 %v25905_v45, %s15882_s11  ;;  %v25908_v45 = vcombine.low %v16935_v35, %v16940_v29  ;;  %v17258_v53 = vrot.slane %v3129_v21, %v16028_v5  ;;  %v17261_v41 = vrot.slane %v3145_v31, %v16028_v5  ;;  %v17264_v8 = vrot.slane %v6377_v28, %v16028_v5 }
 0x106   :  { %v1372_v37 = vrot.slane %v514_v9, 7  ;;  %v17268_v0 = vcombine.low %v17225_v23, %v17208_v20  ;;  %v25910_v21 = vcombine.low %v16811_v40, %v16916_v49  ;;  %v17280_v31 = vrot.slane %v2264_v38, %v16028_v5 }
 0x107   :  { %4753 = vrot.lane.b32.xlu0 %v25907_v14, %s15880_s26  ;;  %v6188_v44 = vpop.permute.xlu0 %6187  ;;  %25909 = vst [vmem:[#allocation47_spill] sm:$0xff] %v17261_v41  ;;  %v1375_v16 = vrot.slane %v17250_v25, 7  ;;  %v17284_v14 = vrot.slane %v2280_v30, %v16028_v5  ;;  %v17290_v62 = vsel %vm16175_vm6, %v1367_v34, %v1368_v60  ;;  %v4142_v49 = vcombine.low %v514_v9, %v17250_v25 }
 0x108   :  { %v7740_v28 = vsel %vm7738_vm12, %v7690_v4, %v6188_v44  ;;  %v1374_v24 = vrot.slane %v1372_v37, 2  ;;  %v128_v4 = vld [vmem:[%s25399_s0 + $0x88] sm:$0xff]  ;;  %v5539_v9 = vcombine.low %v17184_v50, %v17188_v39  ;;  %v17312_v34 = vsel %vm16175_vm6, %v14244_v58, %v1372_v37 }
 0x109   :  { %7215 = vrot.lane.b32.xlu1 %v25908_v45, %s15885_s16  ;;  %v4126_v45 = vcombine.low %v17162_v56, %v1166_v17  ;;  %25911 = vst [vmem:[#allocation48_spill] sm:$0xff] %v17284_v14  ;;  %v1366_v17 = vsel %vm16175_vm6, %v1364_v19, %v1365_v13  ;;  %v17308_v19 = vsel %vm7788_vm13, %v7740_v28, %v16998_v43 }
 0x10a   :  { %v25912_v50 = vcombine.low %v16973_v59, %v17001_v48  ;;  %v17327_v43 = vsel %vm16175_vm6, %v1374_v24, %v1375_v16  ;;  %v3146_v39 = vcombine.low %v1366_v17, %v17290_v62  ;;  %v516_v58 = vcombine.high %v128_v4, %v128_v4 }
 0x10b   :  { %5221 = vrot.lane.b32.xlu0 %v25910_v21, %s15881_s27  ;;  %v17315_v60 = vrot.slane %v4126_v45, %v16028_v5  ;;  %v17319_v21 = vcombine.high %v17250_v25, %v17250_v25  ;;  %v17331_v37 = vrot.slane %v128_v4, %v16028_v5  ;;  %v17336_v28 = vrot.slane %v4142_v49, %v16028_v5 }
 0x10c   :  { %v6186_v38 = vpop.permute.xlu1 %6185  ;;  %v5540_v59 = vcombine.low %v17192_v55, %v1366_v17  ;;  %v25913_v24 = vcombine.low %v16803_v47, %v17027_v33  ;;  %v17345_v30 = vrot.slane %v5539_v9, %v16028_v5  ;;  %v17348_v4 = vrot.slane %v516_v58, %v16028_v5 }
 0x10d   :  { %7455 = vrot.lane.b32.xlu1 %v17066_v36, %s15884_s2  ;;  %v1378_v48 = vrot.slane %v17319_v21, 7  ;;  %v17352_v49 = vcombine.high %v17331_v37, %v17331_v37  ;;  %v1381_v55 = vrot.slane %v17331_v37, 7  ;;  %v25914_v17 = vcombine.low %v17021_v11, %v17024_v42 }
 0x10e   :  { %v3162_v33 = vcombine.low %v17312_v34, %v17327_v43  ;;  %v17363_v9 = vcombine.low %v17203_v1, %v17280_v31  ;;  %v2281_v58 = vcombine.low %v17250_v25, %v17319_v21  ;;  %v25916_v13 = vcombine.low %v16741_v52, %v16838_v32  ;;  %v25917_v52 = vld [vmem:[#allocation37_spill] sm:$0xff]  ;;  %v25918_v32 = vld [vmem:[#allocation38_spill] sm:$0xff] }
 0x10f   :  { %6201 = vrot.lane.b32.xlu0 %v25912_v50, %s15872_s12  ;;  %v1377_v42 = vrot.slane %v1375_v16, 2  ;;  %v2297_v47 = vcombine.low %v17331_v37, %v17352_v49  ;;  %v1384_v25 = vrot.slane %v17352_v49, 7  ;;  %v17385_v16 = vrot.slane %v3146_v39, %v16028_v5 }
 0x110   :  { %v3758_v50 = vpop.permute.xlu0 %3757  ;;  %25915 = vst [vmem:[#allocation49_spill] sm:$0xff] %v17363_v9  ;;  %v1387_v9 = vrot.slane %v17348_v4, 7 }
 0x111   :  { %6633 = vrot.lane.b32.xlu1 %v25913_v24, %s15879_s3  ;;  %v7589_v45 = vsel %vm7588_vm9, %v25914_v17, %v3758_v50  ;;  %v1380_v50 = vrot.slane %v1378_v48, 2  ;;  %v1383_v17 = vrot.slane %v1381_v55, 2 }
 0x112   :  { %v7639_v24 = vsel %vm25834_vm10, %v7589_v45, %v17109_v22 }
 0x113   :  { %3775 = vrot.lane.b32.xlu0 %v25916_v13, %s15883_s13  ;;  %v7202_v11 = vpop.permute.xlu1 %7201  ;;  %v7689_v44 = vsel %vm25826_vm11, %v7639_v24, %v17046_v10  ;;  %v25919_v13 = vcombine.low %v25917_v52, %v25918_v32  ;;  %v17388_v10 = vrot.slane %v5540_v59, %v16028_v5  ;;  %v4952_v52 = vcombine.low %v17162_v56, %v17215_v46 }
 0x114   :  { %v7739_v22 = vsel %vm7738_vm12, %v7689_v44, %v6186_v38  ;;  %v3762_v45 = vpop.permute.xlu0 %3761  ;;  %v17395_v38 = vrot.slane %v3162_v33, %v16028_v5  ;;  %v1386_v44 = vrot.slane %v1384_v25, 2  ;;  %v1379_v24 = vsel %vm16175_vm6, %v1377_v42, %v1378_v48 }
 0x115   :  { %6909 = vrot.lane.b32.xlu1 %v25919_v13, %s15882_s11  ;;  %v7789_v14 = vsel %vm7788_vm13, %v7739_v22, %v25920_v54  ;;  %v25922_v13 = vld [vmem:[#allocation31_spill] sm:$0xff]  ;;  %v17409_v54 = vsel %vm16175_vm6, %v1380_v50, %v1381_v55  ;;  %v17413_v33 = vsel %vm16175_vm6, %v1383_v17, %v1384_v25  ;;  %v25926_v42 = vcombine.low %v17130_v27, %v17133_v7 }
 0x116   :  { %25921 = vst [vmem:[#allocation37_spill] sm:$0xff] %v17395_v38  ;;  %v7839_v39 = vsel %vm7838_vm14, %v7789_v14, %v17168_v51  ;;  %v25923_v59 = vcombine.low %v25922_v13, %v16811_v40  ;;  %v17417_v51 = vrot.slane %v2281_v58, %v16028_v5  ;;  %v17420_v40 = vrot.slane %v2297_v47, %v16028_v5  ;;  %v129_v13 = vld [vmem:[%s25399_s0 + $0x90] sm:$0xff]  ;;  %v25932_v17 = vld [vmem:[#allocation39_spill] sm:$0xff] }
 0x117   :  { %v6896_v32 = vpop.permute.xlu1 %6895  ;;  %v7889_v22 = vsel %vm7888_vm15, %v7839_v39, %v7202_v11  ;;  %v17424_v14 = vsel %vm16175_vm6, %v1386_v44, %v1387_v9  ;;  %v3163_v25 = vcombine.low %v1379_v24, %v17409_v54  ;;  %v17443_v44 = vrot.slane %v4952_v52, %v16028_v5 }
 0x118   :  { %4755 = vrot.lane.b32.xlu0 %v25923_v59, %s15880_s26  ;;  %25924 = vst [vmem:[#allocation41_spill] sm:$0xff] %v17417_v51  ;;  %25925 = vst [vmem:[#allocation31_spill] sm:$0xff] %v17420_v40  ;;  %v4742_v48 = vpop.permute.xlu0 %4741  ;;  %v7939_v55 = vsel %vm7938_vm0, %v7889_v22, %v17241_v63  ;;  %v3179_v63 = vcombine.low %v17413_v33, %v17424_v14  ;;  %v4143_v39 = vcombine.low %v17319_v21, %v17331_v37  ;;  %v25930_v59 = vld [vmem:[#allocation22_spill] sm:$0xff] }
 0x119   :  { %7217 = vrot.lane.b32.xlu1 %v25926_v42, %s15885_s16  ;;  %14774 = vmatmul.mubr.msk.f32.vlgmr.msra.gmra.mrb[0].mxu0 %vm25827_vm4, %v7939_v55  ;;  %25929 = vst [vmem:[#allocation50_spill] sm:$0xff] %v17443_v44  ;;  %v7591_v22 = vsel %vm7588_vm9, %v25930_v59, %v3762_v45  ;;  %v25931_v42 = vmov 0.0   ;;  %v7840_v37 = vsel %vm7838_vm14, %v17308_v19, %v6896_v32  ;;  %v1389_v45 = vrot.slane %v1387_v9, 2 }
 0x11a   :  { %14776 = vmatprep.mubr.msk.f32.mxu0 %vm15888_vm8, %v25931_v42  ;;  %v25933_v58 = vcombine.low %v17092_v6, %v25932_v17  ;;  %v5556_v52 = vcombine.low %v17290_v62, %v17312_v34  ;;  %v5557_v21 = vcombine.low %v17327_v43, %v1379_v24  ;;  %v532_v11 = vcombine.high %v129_v13, %v129_v13  ;;  %v25936_v34 = vld [vmem:[#allocation40_spill] sm:$0xff] }
 0x11b   :  { %v7204_v55 = vpop.permute.xlu1 %7203  ;;  %v17474_v19 = vrot.slane %v129_v13, %v16028_v5  ;;  %v17477_v9 = vrot.slane %v3163_v25, %v16028_v5  ;;  %v25937_v43 = vcombine.low %v17103_v57, %v25936_v34  ;;  %v14285_v25 = vcombine.high %v17162_v56, %v17215_v46  ;;  %v25939_v56 = vld [vmem:[#allocation42_spill] sm:$0xff] }
 0x11c   :  { %5223 = vrot.lane.b32.xlu0 %v17066_v36, %s15881_s27  ;;  %v4159_v36 = vcombine.low %v17352_v49, %v17348_v4  ;;  %v5210_v59 = vpop.permute.xlu0 %5209  ;;  %v17480_v49 = vrot.slane %v3179_v63, %v16028_v5  ;;  %v7890_v62 = vsel %vm7888_vm15, %v7840_v37, %v7204_v55  ;;  %v546_v63 = vrot.slane %v532_v11, %v16028_v5 }
 0x11d   :  { %7457 = vrot.lane.b32.xlu1 %v25933_v58, %s15884_s2  ;;  %v17485_v58 = vrot.slane %v4143_v39, %v16028_v5  ;;  %v17497_v13 = vcombine.high %v17474_v19, %v17474_v19  ;;  %v17505_v55 = vcombine.high %v17348_v4, %v17348_v4  ;;  %v14245_v57 = vrot.slane %v17474_v19, 9 }
 0x11e   :  { %25934 = vst [vmem:[#allocation22_spill] sm:$0xff] %v17480_v49  ;;  %v17501_v32 = vrot.slane %v4159_v36, %v16028_v5  ;;  %v17512_v46 = vrot.slane %v5556_v52, %v16028_v5  ;;  %v17515_v11 = vrot.slane %v5557_v21, %v16028_v5  ;;  %v17517_v36 = vcombine.high %v546_v63, %v546_v63  ;;  %v25940_v21 = vld [vmem:[#allocation33_spill] sm:$0xff] }
 0x11f   :  { %25935 = vst [vmem:[#allocation51_spill] sm:$0xff] %v17485_v58  ;;  %v7444_v24 = vpop.permute.xlu1 %7443  ;;  %v2298_v34 = vcombine.low %v17348_v4, %v17474_v19  ;;  %v7641_v52 = vsel %vm25834_vm10, %v7591_v22, %v4742_v48  ;;  %v25941_v47 = vcombine.low %v25940_v21, %v16935_v35  ;;  %v17532_v50 = vrot.slane %v14285_v25, %v16028_v5 }
 0x120   :  { %6203 = vrot.lane.b32.xlu0 %v25937_v43, %s15872_s12  ;;  %v7940_v39 = vsel %vm7938_vm0, %v7890_v62, %v7444_v24  ;;  %25938 = vst [vmem:[#allocation40_spill] sm:$0xff] %v17501_v32  ;;  %v6190_v37 = vpop.permute.xlu0 %6189  ;;  %v1394_v62 = vrot.slane %v17497_v13, 7  ;;  %v2314_v43 = vcombine.low %v17497_v13, %v546_v63  ;;  %v1390_v24 = vrot.slane %v17505_v55, 7 }
 0x121   :  { %6635 = vrot.lane.b32.xlu1 %v25939_v56, %s15879_s3  ;;  %14777 = vmatmul.mubr.msk.f32.gmra.mrb[2].mxu0 %vm25827_vm4, %v7940_v39  ;;  %v1397_v39 = vrot.slane %v546_v63, 7  ;;  %25942 = vst [vmem:[#allocation33_spill] sm:$0xff] %v17532_v50  ;;  %v1400_v23 = vrot.slane %v17517_v36, 7  ;;  %v14272_v22 = vcombine.high %v17348_v4, %v17474_v19  ;;  %v7691_v35 = vsel %vm25826_vm11, %v7641_v52, %v5210_v59  ;;  %v130_v52 = vld [vmem:[%s25399_s0 + $0x98] sm:$0xff] }
 0x122   :  { %14779 = vmatprep.mubr.msk.f32.mxu0 %vm15888_vm8, %v25931_v42  ;;  %v1396_v44 = vrot.slane %v1394_v62, 2  ;;  %v1391_v17 = vsel %vm16175_vm6, %v1389_v45, %v1390_v24  ;;  %v17539_v7 = vsel %vm16175_vm6, %v14245_v57, %v1394_v62  ;;  %v25943_v25 = vcombine.low %v17200_v61, %v17203_v1 }
 0x123   :  { %v6622_v56 = vpop.permute.xlu1 %6621  ;;  %v1399_v48 = vrot.slane %v1397_v39, 2  ;;  %v4176_v57 = vcombine.low %v546_v63, %v17517_v36  ;;  %v17555_v62 = vcombine.low %v17485_v58, %v17501_v32  ;;  %v17560_v24 = vrot.slane %v2298_v34, %v16028_v5  ;;  %v25992_v32 = vld [vmem:[#allocation23_spill] sm:$0xff] }
 0x124   :  { %3777 = vrot.lane.b32.xlu0 %v25941_v47, %s15883_s13  ;;  %v3764_v47 = vpop.permute.xlu0 %3763  ;;  %v17563_v1 = vrot.slane %v2314_v43, %v16028_v5  ;;  %v25945_v63 = vcombine.low %v16825_v3, %v16923_v18  ;;  %v17574_v45 = vsel %vm16175_vm6, %v1396_v44, %v1397_v39  ;;  %v3180_v43 = vcombine.low %v1391_v17, %v17539_v7  ;;  %v25948_v3 = vld [vmem:[#allocation21_spill] sm:$0xff] }
 0x125   :  { %6911 = vrot.lane.b32.xlu1 %v25943_v25, %s15882_s11  ;;  %25944 = vst [vmem:[#allocation52_spill] sm:$0xff] %v17560_v24  ;;  %v17578_v34 = vsel %vm16175_vm6, %v1399_v48, %v1400_v23  ;;  %v5573_v59 = vcombine.low %v17409_v54, %v17413_v33  ;;  %v7741_v21 = vsel %vm7738_vm12, %v7691_v35, %v6190_v37  ;;  %v25947_v35 = vld [vmem:[#allocation20_spill] sm:$0xff] }
 0x126   :  { %v17589_v44 = vrot.slane %v14272_v22, %v16028_v5  ;;  %v7791_v39 = vsel %vm7788_vm13, %v7741_v21, %v6622_v56  ;;  %v17597_v54 = vrot.slane %v4176_v57, %v16028_v5  ;;  %v5574_v33 = vcombine.low %v17424_v14, %v1391_v17 }
 0x127   :  { %v6898_v25 = vpop.permute.xlu1 %6897  ;;  %v549_v37 = vcombine.high %v130_v52, %v130_v52  ;;  %v25949_v18 = vcombine.low %v25947_v35, %v25948_v3  ;;  %v3196_v21 = vcombine.low %v17574_v45, %v17578_v34  ;;  %v556_v20 = vrot.slane %v130_v52, %v16028_v5 }
 0x128   :  { %4757 = vrot.lane.b32.xlu0 %v25945_v63, %s15880_s26  ;;  %v4744_v48 = vpop.permute.xlu0 %4743  ;;  %v25946_v63 = vcombine.low %v17258_v53, %v17261_v41  ;;  %v25950_v57 = vcombine.low %v17092_v6, %v17156_v26  ;;  %v17614_v17 = vrot.slane %v3180_v43, %v16028_v5  ;;  %v17617_v3 = vrot.slane %v5573_v59, %v16028_v5 }
 0x129   :  { %v7592_v22 = vsel %vm7588_vm9, %v25949_v18, %v3764_v47  ;;  %v6395_v47 = vcombine.low %v17348_v4, %v17505_v55  ;;  %v17622_v18 = vrot.slane %v549_v37, %v16028_v5  ;;  %v7841_v52 = vsel %vm7838_vm14, %v7791_v39, %v6898_v25 }
 0x12a   :  { %7219 = vrot.lane.b32.xlu1 %v25946_v63, %s15885_s16  ;;  %25951 = vst [vmem:[#allocation20_spill] sm:$0xff] %v17614_v17  ;;  %25952 = vst [vmem:[#allocation21_spill] sm:$0xff] %v17617_v3  ;;  %v564_v63 = vcombine.high %v556_v20, %v556_v20  ;;  %v1402_v35 = vrot.slane %v1400_v23, 2  ;;  %v1403_v56 = vrot.slane %v556_v20, 7  ;;  %v17630_v59 = vrot.slane %v5574_v33, %v16028_v5 }
 0x12b   :  { %v7206_v14 = vpop.permute.xlu1 %7205  ;;  %v1168_v4 = vcombine.high %v17622_v18, %v17622_v18  ;;  %v1409_v55 = vrot.slane %v17622_v18, 7  ;;  %v17637_v23 = vrot.slane %v3196_v21, %v16028_v5  ;;  %v2315_v37 = vcombine.low %v17517_v36, %v556_v20 }
 0x12c   :  { %5225 = vrot.lane.b32.xlu0 %v25950_v57, %s15881_s27  ;;  %v5212_v26 = vpop.permute.xlu0 %5211  ;;  %25953 = vst [vmem:[#allocation53_spill] sm:$0xff] %v17630_v59  ;;  %v7891_v25 = vsel %vm7888_vm15, %v7841_v52, %v7206_v14  ;;  %v25955_v33 = vcombine.low %v17177_v12, %v17230_v15  ;;  %v2331_v43 = vcombine.low %v564_v63, %v17622_v18  ;;  %v1405_v24 = vrot.slane %v1403_v56, 2 }
 0x12d   :  { %25954 = vst [vmem:[#allocation54_spill] sm:$0xff] %v17637_v23  ;;  %v1406_v41 = vrot.slane %v564_v63, 7  ;;  %v4962_v14 = vcombine.low %v17474_v19, %v17497_v13  ;;  %v1404_v52 = vsel %vm16175_vm6, %v1402_v35, %v1403_v56  ;;  %v1411_v39 = vrot.slane %v1409_v55, 2 }
 0x12e   :  { %7459 = vrot.lane.b32.xlu1 %v17268_v0, %s15884_s2  ;;  %v1412_v36 = vrot.slane %v1168_v4, 7  ;;  %v25956_v12 = vcombine.low %v17264_v8, %v17200_v61  ;;  %v4177_v13 = vcombine.low %v556_v20, %v564_v63  ;;  %v7642_v56 = vsel %vm25834_vm10, %v7592_v22, %v4744_v48  ;;  %v131_v63 = vld [vmem:[%s25399_s0 + $0xa0] sm:$0xff] }
 0x12f   :  { %v7446_v57 = vpop.permute.xlu1 %7445  ;;  %v17659_v15 = vsel %vm16175_vm6, %v1405_v24, %v1406_v41  ;;  %v1408_v19 = vrot.slane %v1406_v41, 2  ;;  %v17668_v8 = vrot.slane %v6395_v47, %v16028_v5  ;;  %v25960_v20 = vcombine.low %v16940_v29, %v17130_v27 }
 0x130   :  { %6205 = vrot.lane.b32.xlu0 %v25955_v33, %s15872_s12  ;;  %v7941_v21 = vsel %vm7938_vm0, %v7891_v25, %v7446_v57  ;;  %v6192_v50 = vpop.permute.xlu0 %6191  ;;  %v4193_v25 = vcombine.low %v17622_v18, %v1168_v4  ;;  %v17677_v24 = vrot.slane %v2315_v37, %v16028_v5  ;;  %v17680_v48 = vrot.slane %v2331_v43, %v16028_v5 }
 0x131   :  { %14780 = vmatmul.mubr.msk.f32.gmra.mrb[4].mxu0 %vm25827_vm4, %v7941_v21  ;;  %25957 = vst [vmem:[#allocation55_spill] sm:$0xff] %v17668_v8  ;;  %v17685_v47 = vrot.slane %v4962_v14, %v16028_v5  ;;  %v7692_v29 = vsel %vm25826_vm11, %v7642_v56, %v5212_v26  ;;  %v17693_v27 = vsel %vm16175_vm6, %v1411_v39, %v1412_v36  ;;  %v25964_v14 = vld [vmem:[#allocation48_spill] sm:$0xff] }
 0x132   :  { %6637 = vrot.lane.b32.xlu1 %v25956_v12, %s15879_s3  ;;  %14782 = vmatprep.mubr.msk.f32.mxu0 %vm15888_vm8, %v25931_v42  ;;  %25961 = vst [vmem:[#allocation56_spill] sm:$0xff] %v17677_v24  ;;  %25962 = vst [vmem:[#allocation57_spill] sm:$0xff] %v17680_v48  ;;  %v3197_v4 = vcombine.low %v1404_v52, %v17659_v15  ;;  %v5590_v43 = vcombine.low %v17539_v7, %v17574_v45  ;;  %v132_v7 = vld [vmem:[%s25399_s0 + $0xa8] sm:$0xff] }
 0x133   :  { %v6624_v41 = vpop.permute.xlu1 %6623  ;;  %25963 = vst [vmem:[#allocation58_spill] sm:$0xff] %v17685_v47  ;;  %v25965_v12 = vcombine.low %v17280_v31, %v25964_v14  ;;  %v17707_v26 = vrot.slane %v4177_v13, %v16028_v5  ;;  %v17710_v39 = vrot.slane %v4193_v25, %v16028_v5  ;;  %v5591_v36 = vcombine.low %v17578_v34, %v1404_v52  ;;  %v25967_v25 = vld [vmem:[#allocation36_spill] sm:$0xff] }
 0x134   :  { %3779 = vrot.lane.b32.xlu0 %v25960_v20, %s15883_s13  ;;  %v3766_v37 = vpop.permute.xlu0 %3765  ;;  %v17704_v20 = vsel %vm16175_vm6, %v1408_v19, %v1409_v55  ;;  %v7742_v45 = vsel %vm7738_vm12, %v7692_v29, %v6192_v50  ;;  %v565_v19 = vcombine.high %v131_v63, %v131_v63  ;;  %v25968_v56 = vcombine.low %v25967_v25, %v17092_v6 }
 0x135   :  { %25966 = vst [vmem:[#allocation59_spill] sm:$0xff] %v17710_v39  ;;  %v7792_v13 = vsel %vm7788_vm13, %v7742_v45, %v6624_v41  ;;  %v17731_v29 = vrot.slane %v131_v63, %v16028_v5  ;;  %v3213_v41 = vcombine.low %v17704_v20, %v17693_v27  ;;  %v17742_v6 = vrot.slane %v132_v7, %v16028_v5  ;;  %v25971_v63 = vld [vmem:[#allocation24_spill] sm:$0xff] }
 0x136   :  { %6913 = vrot.lane.b32.xlu1 %v25965_v12, %s15882_s11  ;;  %v17734_v12 = vrot.slane %v3197_v4, %v16028_v5  ;;  %v17739_v45 = vrot.slane %v565_v19, %v16028_v5  ;;  %v17751_v4 = vrot.slane %v5590_v43, %v16028_v5  ;;  %v17754_v50 = vrot.slane %v5591_v36, %v16028_v5 }
 0x137   :  { %v6900_v34 = vpop.permute.xlu1 %6899  ;;  %v580_v19 = vcombine.high %v17731_v29, %v17731_v29  ;;  %v17760_v21 = vcombine.low %v17563_v1, %v17677_v24  ;;  %v7593_v36 = vsel %vm7588_vm9, %v25971_v63, %v3766_v37  ;;  %v582_v55 = vcombine.high %v132_v7, %v132_v7 }
 0x138   :  { %4759 = vrot.lane.b32.xlu0 %v25968_v56, %s15880_s26  ;;  %v4746_v25 = vpop.permute.xlu0 %4745  ;;  %v25969_v56 = vcombine.low %v17385_v16, %v17395_v38  ;;  %v1419_v43 = vrot.slane %v17739_v45, 7  ;;  %v14246_v35 = vrot.slane %v17731_v29, 9  ;;  %v1425_v61 = vrot.slane %v17742_v6, 7  ;;  %v25990_v38 = vld [vmem:[#allocation50_spill] sm:$0xff] }
 0x139   :  { %25970 = vst [vmem:[#allocation36_spill] sm:$0xff] %v17760_v21  ;;  %v1416_v31 = vrot.slane %v580_v19, 7  ;;  %v4971_v21 = vcombine.low %v17622_v18, %v17731_v29  ;;  %v25972_v37 = vcombine.low %v17315_v60, %v17336_v28  ;;  %v2332_v7 = vcombine.low %v17731_v29, %v580_v19 }
 0x13a   :  { %7221 = vrot.lane.b32.xlu1 %v25969_v56, %s15885_s16  ;;  %v17766_v56 = vcombine.high %v17739_v45, %v17739_v45  ;;  %v1421_v14 = vrot.slane %v1419_v43, 2  ;;  %v7842_v57 = vsel %vm7838_vm14, %v7792_v13, %v6900_v34  ;;  %v1427_v58 = vrot.slane %v1425_v61, 2 }
 0x13b   :  { %v7208_v52 = vpop.permute.xlu1 %7207  ;;  %v1418_v33 = vrot.slane %v1416_v31, 2  ;;  %v1417_v17 = vsel %vm16175_vm6, %v14246_v35, %v1416_v31 }
 0x13c   :  { %5227 = vrot.lane.b32.xlu0 %v17268_v0, %s15881_s27  ;;  %v1422_v22 = vrot.slane %v17766_v56, 7  ;;  %v5214_v47 = vpop.permute.xlu0 %5213  ;;  %v17783_v0 = vrot.slane %v3213_v41, %v16028_v5  ;;  %v2348_v63 = vcombine.low %v17739_v45, %v17766_v56  ;;  %v25975_v41 = vcombine.low %v17345_v30, %v17388_v10 }
 0x13d   :  { %v17802_v13 = vsel %vm16175_vm6, %v1418_v33, %v1419_v43  ;;  %v17817_v10 = vrot.slane %v4971_v21, %v16028_v5  ;;  %v25977_v33 = vld [vmem:[#allocation49_spill] sm:$0xff]  ;;  %v4210_v31 = vcombine.low %v17766_v56, %v17742_v6 }
 0x13e   :  { %7461 = vrot.lane.b32.xlu1 %v25972_v37, %s15884_s2  ;;  %v1424_v59 = vrot.slane %v1422_v22, 2  ;;  %v7892_v37 = vsel %vm7888_vm15, %v7842_v57, %v7208_v52  ;;  %v17806_v34 = vsel %vm16175_vm6, %v1421_v14, %v1422_v22  ;;  %v17810_v57 = vrot.slane %v582_v55, %v16028_v5 }
 0x13f   :  { %v7448_v3 = vpop.permute.xlu1 %7447  ;;  %25976 = vst [vmem:[#allocation24_spill] sm:$0xff] %v17817_v10  ;;  %v17823_v22 = vrot.slane %v2332_v7, %v16028_v5  ;;  %v4194_v14 = vcombine.low %v580_v19, %v17739_v45  ;;  %v3214_v21 = vcombine.low %v1417_v17, %v17802_v13  ;;  %v5607_v55 = vcombine.low %v17659_v15, %v17704_v20  ;;  %v25979_v45 = vld [vmem:[#allocation43_spill] sm:$0xff] }
 0x140   :  { %6207 = vrot.lane.b32.xlu0 %v25975_v41, %s15872_s12  ;;  %v7942_v8 = vsel %vm7938_vm0, %v7892_v37, %v7448_v3  ;;  %v17814_v30 = vsel %vm16175_vm6, %v1424_v59, %v1425_v61  ;;  %v6194_v35 = vpop.permute.xlu0 %6193  ;;  %v17826_v3 = vrot.slane %v2348_v63, %v16028_v5  ;;  %v17832_v59 = vld [vmem:[%s25399_s0 + $0xb0] sm:$0xff]  ;;  %v7643_v52 = vsel %vm25834_vm10, %v7593_v36, %v4746_v25 }
 0x141   :  { %14783 = vmatmul.mubr.msk.f32.gmra.mrb[6].mxu0 %vm25827_vm4, %v7942_v8  ;;  %25978 = vst [vmem:[#allocation60_spill] sm:$0xff] %v17823_v22  ;;  %v3230_v8 = vcombine.low %v17806_v34, %v17814_v30  ;;  %v25980_v19 = vcombine.low %v25979_v45, %v17258_v53  ;;  %v5608_v37 = vcombine.low %v17693_v27, %v1417_v17  ;;  %v25993_v22 = vld [vmem:[#allocation25_spill] sm:$0xff] }
 0x142   :  { %6639 = vrot.lane.b32.xlu1 %v25977_v33, %s15879_s3  ;;  %14785 = vmatprep.mubr.msk.f32.mxu0 %vm15888_vm8, %v25931_v42  ;;  %v14286_v15 = vcombine.high %v17622_v18, %v17731_v29  ;;  %v17859_v20 = vcombine.high %v17742_v6, %v17742_v6  ;;  %v17863_v53 = vrot.slane %v17832_v59, %v16028_v5 }
 0x143   :  { %v6626_v43 = vpop.permute.xlu1 %6625  ;;  %v7693_v25 = vsel %vm25826_vm11, %v7643_v52, %v5214_v47  ;;  %v25981_v17 = vcombine.low %v17417_v51, %v17420_v40  ;;  %v17873_v18 = vrot.slane %v4194_v14, %v16028_v5  ;;  %v17877_v29 = vcombine.high %v17810_v57, %v17810_v57  ;;  %v25985_v14 = vld [vmem:[#allocation46_spill] sm:$0xff] }
 0x144   :  { %3781 = vrot.lane.b32.xlu0 %v25980_v19, %s15883_s13  ;;  %v3768_v36 = vpop.permute.xlu0 %3767  ;;  %v17880_v41 = vrot.slane %v3214_v21, %v16028_v5  ;;  %v17883_v47 = vrot.slane %v3230_v8, %v16028_v5  ;;  %v17886_v52 = vrot.slane %v4210_v31, %v16028_v5  ;;  %v17889_v45 = vrot.slane %v5607_v55, %v16028_v5  ;;  %v25984_v19 = vld [vmem:[#allocation39_spill] sm:$0xff] }
 0x145   :  { %25982 = vst [vmem:[#allocation43_spill] sm:$0xff] %v17873_v18  ;;  %v17896_v63 = vrot.slane %v5608_v37, %v16028_v5  ;;  %v17900_v21 = vcombine.high %v17863_v53, %v17863_v53  ;;  %v1428_v8 = vrot.slane %v17859_v20, 7  ;;  %v1431_v31 = vrot.slane %v17810_v57, 7 }
 0x146   :  { %6915 = vrot.lane.b32.xlu1 %v25981_v17, %s15882_s11  ;;  %25983 = vst [vmem:[#allocation61_spill] sm:$0xff] %v17886_v52  ;;  %v25986_v17 = vcombine.low %v25984_v19, %v25985_v14  ;;  %v7743_v55 = vsel %vm7738_vm12, %v7693_v25, %v6194_v35  ;;  %v17906_v27 = vrot.slane %v14286_v15, %v16028_v5  ;;  %v1434_v19 = vrot.slane %v17877_v29, 7 }
 0x147   :  { %v6902_v56 = vpop.permute.xlu1 %6901  ;;  %v25988_v37 = vcombine.low %v17477_v9, %v17480_v49  ;;  %v1433_v7 = vrot.slane %v1431_v31, 2  ;;  %v14247_v33 = vrot.slane %v17863_v53, 9  ;;  %v17917_v35 = vcombine.low %v17873_v18, %v17886_v52 }
 0x148   :  { %4761 = vrot.lane.b32.xlu0 %v25986_v17, %s15880_s26  ;;  %25987 = vst [vmem:[#allocation39_spill] sm:$0xff] %v17906_v27  ;;  %v4748_v14 = vpop.permute.xlu0 %4747  ;;  %v1430_v17 = vrot.slane %v1428_v8, 2  ;;  %v2349_v15 = vcombine.low %v17742_v6, %v17859_v20  ;;  %v2365_v25 = vcombine.low %v17810_v57, %v17863_v53  ;;  %v25991_v10 = vcombine.low %v25990_v38, %v17336_v28 }
 0x149   :  { %25989 = vst [vmem:[#allocation46_spill] sm:$0xff] %v17917_v35  ;;  %v25994_v49 = vcombine.low %v25992_v32, %v25993_v22  ;;  %v1429_v38 = vsel %vm16175_vm6, %v1427_v58, %v1428_v8  ;;  %v17952_v6 = vsel %vm16175_vm6, %v1433_v7, %v1434_v19  ;;  %v4211_v58 = vcombine.low %v17859_v20, %v17810_v57 }
 0x14a   :  { %7223 = vrot.lane.b32.xlu1 %v25988_v37, %s15885_s16  ;;  %v7793_v37 = vsel %vm7788_vm13, %v7743_v55, %v6626_v43  ;;  %v14273_v22 = vcombine.high %v17810_v57, %v17863_v53  ;;  %v17971_v8 = vrot.slane %v2349_v15, %v16028_v5  ;;  %v598_v15 = vcombine.high %v17832_v59, %v17832_v59  ;;  %v26015_v55 = vld [vmem:[#allocation20_spill] sm:$0xff] }
 0x14b   :  { %v7210_v24 = vpop.permute.xlu1 %7209  ;;  %v7594_v43 = vsel %vm7588_vm9, %v25994_v49, %v3768_v36  ;;  %v25995_v49 = vrot.slane %v17900_v21, 7  ;;  %v17967_v36 = vld [vmem:[%s25399_s0 + $0xb8] sm:$0xff]  ;;  %v7843_v7 = vsel %vm7838_vm14, %v7793_v37, %v6902_v56  ;;  %v18001_v59 = vrot.slane %v4211_v58, %v16028_v5 }
 0x14c   :  { %5229 = vrot.lane.b32.xlu0 %v25991_v10, %s15881_s27  ;;  %v17946_v10 = vsel %vm16175_vm6, %v1430_v17, %v1431_v31  ;;  %v5216_v35 = vpop.permute.xlu0 %5215  ;;  %25996 = vst [vmem:[#allocation50_spill] sm:$0xff] %v17971_v8  ;;  %v17974_v31 = vrot.slane %v2365_v25, %v16028_v5  ;;  %v7644_v20 = vsel %vm25834_vm10, %v7594_v43, %v4748_v14 }
 0x14d   :  { %v17958_v32 = vsel %vm16175_vm6, %v14247_v33, %v25995_v49  ;;  %v5624_v33 = vcombine.low %v17802_v13, %v17806_v34  ;;  %v7893_v19 = vsel %vm7888_vm15, %v7843_v7, %v7210_v24  ;;  %v25998_v17 = vcombine.low %v17512_v46, %v17515_v11  ;;  %v25999_v46 = vld [vmem:[#allocation33_spill] sm:$0xff] }
 0x14e   :  { %7463 = vrot.lane.b32.xlu1 %v17555_v62, %s15884_s2  ;;  %25997 = vst [vmem:[#allocation23_spill] sm:$0xff] %v17974_v31  ;;  %v3231_v56 = vcombine.low %v1429_v38, %v17946_v10  ;;  %v3247_v13 = vcombine.low %v17952_v6, %v17958_v32  ;;  %v5625_v34 = vcombine.low %v17814_v30, %v1429_v38  ;;  %v26012_v38 = vld [vmem:[#allocation45_spill] sm:$0xff] }
 0x14f   :  { %v7450_v49 = vpop.permute.xlu1 %7449  ;;  %v17993_v24 = vrot.slane %v17967_v36, %v16028_v5  ;;  %v26000_v11 = vcombine.low %v25999_v46, %v17417_v51  ;;  %v18004_v37 = vrot.slane %v14273_v22, %v16028_v5  ;;  %v18007_v30 = vrot.slane %v598_v15, %v16028_v5  ;;  %v26004_v22 = vld [vmem:[#allocation47_spill] sm:$0xff] }
 0x150   :  { %6209 = vrot.lane.b32.xlu0 %v25998_v17, %s15872_s12  ;;  %v7943_v25 = vsel %vm7938_vm0, %v7893_v19, %v7450_v49  ;;  %v6196_v14 = vpop.permute.xlu0 %6195  ;;  %v7694_v43 = vsel %vm25826_vm11, %v7644_v20, %v5216_v35  ;;  %v18015_v7 = vrot.slane %v5624_v33, %v16028_v5  ;;  %v18019_v58 = vcombine.low %v17826_v3, %v17971_v8 }
 0x151   :  { %14786 = vmatmul.mubr.msk.f32.gmra.mrb[8].mxu0 %vm25827_vm4, %v7943_v25  ;;  %26001 = vst [vmem:[#allocation25_spill] sm:$0xff] %v18004_v37  ;;  %v26005_v19 = vcombine.low %v26004_v22, %v17385_v16  ;;  %v614_v35 = vcombine.high %v18007_v30, %v18007_v30  ;;  %v18029_v20 = vcombine.high %v17993_v24, %v17993_v24  ;;  %v1441_v33 = vrot.slane %v18007_v30, 7  ;;  %v26007_v22 = vld [vmem:[#allocation52_spill] sm:$0xff] }
 0x152   :  { %6641 = vrot.lane.b32.xlu1 %v26000_v11, %s15879_s3  ;;  %14788 = vmatprep.mubr.msk.f32.mxu0 %vm15888_vm8, %v25931_v42  ;;  %26002 = vst [vmem:[#allocation33_spill] sm:$0xff] %v18015_v7  ;;  %26003 = vst [vmem:[#allocation62_spill] sm:$0xff] %v18019_v58  ;;  %v1447_v49 = vrot.slane %v17993_v24, 7  ;;  %v18034_v15 = vrot.slane %v3231_v56, %v16028_v5  ;;  %v18037_v25 = vrot.slane %v3247_v13, %v16028_v5 }
 0x153   :  { %v6628_v17 = vpop.permute.xlu1 %6627  ;;  %v18040_v16 = vrot.slane %v5625_v34, %v16028_v5  ;;  %v4981_v46 = vcombine.low %v17863_v53, %v17900_v21  ;;  %v2366_v13 = vcombine.low %v17900_v21, %v18007_v30  ;;  %v2382_v34 = vcombine.low %v614_v35, %v17993_v24 }
 0x154   :  { %3783 = vrot.lane.b32.xlu0 %v26005_v19, %s15883_s13  ;;  %v3770_v11 = vpop.permute.xlu0 %3769  ;;  %v26008_v19 = vcombine.low %v26007_v22, %v17563_v1  ;;  %v615_v58 = vcombine.high %v17967_v36, %v17967_v36  ;;  %v26011_v1 = vrot.slane %v17900_v21, 7  ;;  %v1444_v22 = vrot.slane %v614_v35, 7 }
 0x155   :  { %26006 = vst [vmem:[#allocation47_spill] sm:$0xff] %v18040_v16  ;;  %v26013_v51 = vcombine.low %v26012_v38, %v17315_v60  ;;  %v1443_v31 = vrot.slane %v1441_v33, 2  ;;  %v1449_v8 = vrot.slane %v1447_v49, 2  ;;  %v1450_v27 = vrot.slane %v18029_v20, 7 }
 0x156   :  { %6917 = vrot.lane.b32.xlu1 %v26008_v19, %s15882_s11  ;;  %v1440_v19 = vrot.slane %v26011_v1, 2  ;;  %v4244_v53 = vcombine.low %v17993_v24, %v18029_v20  ;;  %v18075_v60 = vrot.slane %v4981_v46, %v16028_v5  ;;  %v26016_v61 = vcombine.low %v26015_v55, %v17637_v23 }
 0x157   :  { %v6904_v56 = vpop.permute.xlu1 %6903  ;;  %v18083_v24 = vrot.slane %v2366_v13, %v16028_v5  ;;  %v18086_v36 = vrot.slane %v2382_v34, %v16028_v5  ;;  %v1446_v21 = vrot.slane %v1444_v22, 2  ;;  %v18090_v46 = vrot.slane %v615_v58, %v16028_v5  ;;  %v26018_v13 = vld [vmem:[#allocation27_spill] sm:$0xff] }
 0x158   :  { %4763 = vrot.lane.b32.xlu0 %v26013_v51, %s15880_s26  ;;  %26014 = vst [vmem:[#allocation45_spill] sm:$0xff] %v18075_v60  ;;  %v7744_v51 = vsel %vm7738_vm12, %v7694_v43, %v6196_v14  ;;  %v4750_v38 = vpop.permute.xlu0 %4749  ;;  %v1442_v14 = vsel %vm16175_vm6, %v1440_v19, %v1441_v33  ;;  %v4228_v43 = vcombine.low %v18007_v30, %v614_v35 }
 0x159   :  { %26017 = vst [vmem:[#allocation20_spill] sm:$0xff] %v18083_v24  ;;  %v7794_v1 = vsel %vm7788_vm13, %v7744_v51, %v6628_v17  ;;  %v7595_v18 = vsel %vm7588_vm9, %v26018_v13, %v3770_v11  ;;  %v18104_v58 = vsel %vm16175_vm6, %v1443_v31, %v1444_v22  ;;  %v18108_v17 = vsel %vm16175_vm6, %v1449_v8, %v1450_v27 }
 0x15a   :  { %7225 = vrot.lane.b32.xlu1 %v26016_v61, %s15885_s16  ;;  %v135_v61 = vld [vmem:[%s25399_s0 + $0xc0] sm:$0xff]  ;;  %v18111_v30 = vrot.slane %v4244_v53, %v16028_v5  ;;  %v7844_v35 = vsel %vm7838_vm14, %v7794_v1, %v6904_v56  ;;  %v26020_v31 = vcombine.low %v17589_v44, %v17597_v54  ;;  %v18126_v22 = vsel %vm16175_vm6, %v1446_v21, %v1447_v49  ;;  %v26022_v49 = vld [vmem:[#allocation21_spill] sm:$0xff] }
 0x15b   :  { %v7212_v34 = vpop.permute.xlu1 %7211  ;;  %v631_v11 = vcombine.high %v135_v61, %v135_v61  ;;  %v5642_v56 = vcombine.low %v17958_v32, %v1442_v14  ;;  %v18130_v53 = vrot.slane %v135_v61, %v16028_v5  ;;  %v18135_v1 = vrot.slane %v4228_v43, %v16028_v5  ;;  %v26023_v21 = vld [vmem:[#allocation53_spill] sm:$0xff] }
 0x15c   :  { %5231 = vrot.lane.b32.xlu0 %v17555_v62, %s15881_s27  ;;  %26019 = vst [vmem:[#allocation27_spill] sm:$0xff] %v18111_v30  ;;  %v5641_v62 = vcombine.low %v17946_v10, %v17952_v6  ;;  %v5218_v19 = vpop.permute.xlu0 %5217  ;;  %v7645_v6 = vsel %vm25834_vm10, %v7595_v18, %v4750_v38  ;;  %v3248_v10 = vcombine.low %v1442_v14, %v18104_v58  ;;  %v1453_v43 = vrot.slane %v18090_v46, 7 }
 0x15d   :  { %26021 = vst [vmem:[#allocation63_spill] sm:$0xff] %v18135_v1  ;;  %v6413_v51 = vcombine.low %v17810_v57, %v17877_v29  ;;  %v7894_v13 = vsel %vm7888_vm15, %v7844_v35, %v7212_v34  ;;  %v646_v61 = vcombine.high %v18130_v53, %v18130_v53  ;;  %v18147_v18 = vrot.slane %v631_v11, %v16028_v5  ;;  %v26026_v35 = vld [vmem:[#allocation55_spill] sm:$0xff] }
 0x15e   :  { %7465 = vrot.lane.b32.xlu1 %v26020_v31, %s15884_s2  ;;  %v26024_v31 = vcombine.low %v26022_v49, %v26023_v21  ;;  %v1170_v38 = vcombine.high %v18090_v46, %v18090_v46  ;;  %v3264_v57 = vcombine.low %v18126_v22, %v18108_v17  ;;  %v18155_v29 = vrot.slane %v5641_v62, %v16028_v5 }
 0x15f   :  { %v7452_v32 = vpop.permute.xlu1 %7451  ;;  %v26027_v49 = vcombine.low %v17420_v40, %v26026_v35  ;;  %v18164_v11 = vrot.slane %v5642_v56, %v16028_v5  ;;  %v18169_v62 = vrot.slane %v6413_v51, %v16028_v5  ;;  %v2399_v35 = vcombine.low %v18130_v53, %v646_v61 }
 0x160   :  { %6211 = vrot.lane.b32.xlu0 %v26024_v31, %s15872_s12  ;;  %v7944_v14 = vsel %vm7938_vm0, %v7894_v13, %v7452_v32  ;;  %26025 = vst [vmem:[#allocation21_spill] sm:$0xff] %v18155_v29  ;;  %v6198_v34 = vpop.permute.xlu0 %6197  ;;  %v1452_v13 = vrot.slane %v1450_v27, 2  ;;  %v1456_v21 = vrot.slane %v1170_v38, 7  ;;  %v1460_v31 = vrot.slane %v646_v61, 7 }
 0x161   :  { %14789 = vmatmul.mubr.msk.f32.gmra.mrb[10].mxu0 %vm25827_vm4, %v7944_v14  ;;  %26028 = vst [vmem:[#allocation53_spill] sm:$0xff] %v18164_v11  ;;  %26029 = vst [vmem:[#allocation55_spill] sm:$0xff] %v18169_v62  ;;  %v2383_v32 = vcombine.low %v18029_v20, %v18090_v46  ;;  %v26030_v14 = vld [vmem:[#allocation37_spill] sm:$0xff]  ;;  %v18179_v33 = vrot.slane %v3248_v10, %v16028_v5  ;;  %v14248_v8 = vrot.slane %v18130_v53, 9  ;;  %v1463_v51 = vrot.slane %v18147_v18, 7  ;;  %v26034_v10 = vld [vmem:[#allocation56_spill] sm:$0xff] }
 0x162   :  { %6643 = vrot.lane.b32.xlu1 %v26027_v49, %s15879_s3  ;;  %14791 = vmatprep.mubr.msk.f32.mxu0 %vm15888_vm8, %v25931_v42  ;;  %v1455_v49 = vrot.slane %v1453_v43, 2  ;;  %v26031_v56 = vcombine.low %v26030_v14, %v17477_v9  ;;  %v1462_v60 = vrot.slane %v1460_v31, 2  ;;  %v18184_v40 = vrot.slane %v3264_v57, %v16028_v5  ;;  %v136_v57 = vld [vmem:[%s25399_s0 + $0xc8] sm:$0xff] }
 0x163   :  { %v6630_v27 = vpop.permute.xlu1 %6629  ;;  %26032 = vst [vmem:[#allocation37_spill] sm:$0xff] %v18179_v33  ;;  %v18188_v20 = vcombine.low %v18135_v1, %v18111_v30  ;;  %v4245_v16 = vcombine.low %v18090_v46, %v1170_v38  ;;  %v4261_v9 = vcombine.low %v646_v61, %v18147_v18  ;;  %v1454_v23 = vsel %vm16175_vm6, %v1452_v13, %v1453_v43  ;;  %v26038_v43 = vld [vmem:[#allocation51_spill] sm:$0xff]  ;;  %v26074_v1 = vld [vmem:[#allocation29_spill] sm:$0xff] }
 0x164   :  { %3785 = vrot.lane.b32.xlu0 %v26031_v56, %s15883_s13  ;;  %v3772_v14 = vpop.permute.xlu0 %3771  ;;  %v26035_v56 = vcombine.low %v26034_v10, %v17680_v48  ;;  %v18204_v38 = vsel %vm16175_vm6, %v1455_v49, %v1456_v21  ;;  %v7695_v61 = vsel %vm25826_vm11, %v7645_v6, %v5218_v19  ;;  %v18210_v10 = vrot.slane %v2383_v32, %v16028_v5  ;;  %v26044_v49 = vld [vmem:[#allocation58_spill] sm:$0xff] }
 0x165   :  { %26033 = vst [vmem:[#allocation64_spill] sm:$0xff] %v18188_v20  ;;  %v26039_v13 = vcombine.low %v17336_v28, %v26038_v43  ;;  %v18226_v6 = vsel %vm16175_vm6, %v14248_v8, %v1460_v31  ;;  %v18230_v32 = vsel %vm16175_vm6, %v1462_v60, %v1463_v51  ;;  %v3265_v28 = vcombine.low %v1454_v23, %v18204_v38  ;;  %v26042_v20 = vld [vmem:[#allocation28_spill] sm:$0xff] }
 0x166   :  { %6919 = vrot.lane.b32.xlu1 %v26035_v56, %s15882_s11  ;;  %26036 = vst [vmem:[#allocation56_spill] sm:$0xff] %v18210_v10  ;;  %v18213_v56 = vrot.slane %v2399_v35, %v16028_v5  ;;  %v5658_v35 = vcombine.low %v18104_v58, %v18126_v22  ;;  %v18238_v43 = vrot.slane %v4245_v16, %v16028_v5 }
 0x167   :  { %v6906_v21 = vpop.permute.xlu1 %6905  ;;  %v7745_v8 = vsel %vm7738_vm12, %v7695_v61, %v6198_v34  ;;  %v26040_v60 = vcombine.low %v17734_v12, %v17783_v0  ;;  %v18250_v58 = vcombine.high %v18147_v18, %v18147_v18  ;;  %v648_v22 = vcombine.high %v136_v57, %v136_v57 }
 0x168   :  { %26037 = vst [vmem:[#allocation65_spill] sm:$0xff] %v18213_v56  ;;  %4765 = vrot.lane.b32.xlu0 %v26039_v13, %s15880_s26  ;;  %v18241_v13 = vrot.slane %v4261_v9, %v16028_v5  ;;  %v4752_v31 = vpop.permute.xlu0 %4751  ;;  %v18253_v19 = vrot.slane %v136_v57, %v16028_v5  ;;  %v7795_v16 = vsel %vm7788_vm13, %v7745_v8, %v6630_v27  ;;  %v26041_v9 = vld [vmem:[#allocation26_spill] sm:$0xff]  ;;  %v1465_v8 = vrot.slane %v1463_v51, 2 }
 0x169   :  { %v26043_v7 = vcombine.low %v26041_v9, %v26042_v20  ;;  %v26045_v52 = vcombine.low %v26044_v49, %v17597_v54  ;;  %v5659_v62 = vcombine.low %v18108_v17, %v1454_v23  ;;  %v18270_v27 = vrot.slane %v5658_v35, %v16028_v5 }
 0x16a   :  { %7227 = vrot.lane.b32.xlu1 %v26040_v60, %s15885_s16  ;;  %v3281_v60 = vcombine.low %v18226_v6, %v18230_v32  ;;  %v1466_v20 = vrot.slane %v18250_v58, 7  ;;  %v18281_v49 = vrot.slane %v648_v22, %v16028_v5  ;;  %v7845_v23 = vsel %vm7838_vm14, %v7795_v16, %v6906_v21 }
 0x16b   :  { %v7596_v34 = vsel %vm7588_vm9, %v26043_v7, %v3772_v14  ;;  %v7214_v57 = vpop.permute.xlu1 %7213  ;;  %26046 = vst [vmem:[#allocation51_spill] sm:$0xff] %v18270_v27  ;;  %v663_v7 = vcombine.high %v18253_v19, %v18253_v19  ;;  %v18276_v14 = vrot.slane %v3265_v28, %v16028_v5  ;;  %v26047_v35 = vcombine.low %v17707_v26, %v17710_v39 }
 0x16c   :  { %5233 = vrot.lane.b32.xlu0 %v26045_v52, %s15881_s27  ;;  %v1469_v52 = vrot.slane %v18253_v19, 7  ;;  %v5220_v17 = vpop.permute.xlu0 %5219  ;;  %v18291_v28 = vcombine.low %v18086_v36, %v18210_v10  ;;  %v2400_v9 = vcombine.low %v18147_v18, %v18250_v58  ;;  %v1468_v61 = vrot.slane %v1466_v20, 2 }
 0x16d   :  { %v2416_v22 = vcombine.low %v18253_v19, %v663_v7  ;;  %v1472_v56 = vrot.slane %v663_v7, 7  ;;  %v4991_v21 = vcombine.low %v18090_v46, %v18130_v53  ;;  %v7895_v16 = vsel %vm7888_vm15, %v7845_v23, %v7214_v57 }
 0x16e   :  { %7467 = vrot.lane.b32.xlu1 %v26047_v35, %s15884_s2  ;;  %26048 = vst [vmem:[#allocation26_spill] sm:$0xff] %v18291_v28  ;;  %v26049_v35 = vcombine.low %v17751_v4, %v17754_v50  ;;  %v18304_v28 = vrot.slane %v3281_v60, %v16028_v5  ;;  %v18307_v18 = vrot.slane %v5659_v62, %v16028_v5  ;;  %v1471_v29 = vrot.slane %v1469_v52, 2  ;;  %v26051_v50 = vld [vmem:[#allocation36_spill] sm:$0xff] }
 0x16f   :  { %v7454_v10 = vpop.permute.xlu1 %7453  ;;  %v1474_v39 = vrot.slane %v1472_v56, 2  ;;  %v1475_v57 = vrot.slane %v18281_v49, 7  ;;  %v18317_v4 = vrot.slane %v2400_v9, %v16028_v5  ;;  %v18320_v62 = vrot.slane %v2416_v22, %v16028_v5 }
 0x170   :  { %6213 = vrot.lane.b32.xlu0 %v26049_v35, %s15872_s12  ;;  %26050 = vst [vmem:[#allocation28_spill] sm:$0xff] %v18307_v18  ;;  %v7945_v11 = vsel %vm7938_vm0, %v7895_v16, %v7454_v10  ;;  %v4262_v60 = vcombine.low %v18250_v58, %v18253_v19  ;;  %v137_v10 = vld [vmem:[%s25399_s0 + $0xd0] sm:$0xff]  ;;  %v18335_v9 = vsel %vm16175_vm6, %v1468_v61, %v1469_v52 }
 0x171   :  { %v6200_v23 = vpop.permute.xlu0 %6199  ;;  %14792 = vmatmul.mubr.msk.f32.gmra.mrb[12].mxu0 %vm25827_vm4, %v7945_v11  ;;  %26052 = vst [vmem:[#allocation58_spill] sm:$0xff] %v18317_v4  ;;  %26053 = vst [vmem:[#allocation66_spill] sm:$0xff] %v18320_v62  ;;  %v1467_v11 = vsel %vm16175_vm6, %v1465_v8, %v1466_v20  ;;  %v18338_v22 = vrot.slane %v4991_v21, %v16028_v5  ;;  %v7646_v19 = vsel %vm25834_vm10, %v7596_v34, %v4752_v31  ;;  %v26057_v58 = vld [vmem:[#allocation22_spill] sm:$0xff] }
 0x172   :  { %6645 = vrot.lane.b32.xlu1 %v26051_v50, %s15879_s3  ;;  %14794 = vmatprep.mubr.msk.f32.mxu0 %vm15888_vm8, %v25931_v42  ;;  %v26058_v50 = vcombine.low %v26057_v58, %v26015_v55  ;;  %v4278_v61 = vcombine.low %v663_v7, %v18281_v49  ;;  %v18354_v31 = vsel %vm16175_vm6, %v1471_v29, %v1472_v56 }
 0x173   :  { %26056 = vst [vmem:[#allocation67_spill] sm:$0xff] %v18338_v22  ;;  %v6632_v33 = vpop.permute.xlu1 %6631  ;;  %v18358_v55 = vsel %vm16175_vm6, %v1474_v39, %v1475_v57  ;;  %v664_v34 = vcombine.high %v137_v10, %v137_v10  ;;  %v7696_v52 = vsel %vm25826_vm11, %v7646_v19, %v5220_v17  ;;  %v3282_v20 = vcombine.low %v1467_v11, %v18335_v9  ;;  %v26062_v19 = vld [vmem:[#allocation40_spill] sm:$0xff] }
 0x174   :  { %3787 = vrot.lane.b32.xlu0 %v26058_v50, %s15883_s13  ;;  %v26059_v50 = vld [vmem:[#allocation60_spill] sm:$0xff]  ;;  %v18369_v29 = vrot.slane %v4262_v60, %v16028_v5  ;;  %v5675_v56 = vcombine.low %v18204_v38, %v18226_v6  ;;  %v18376_v17 = vrot.slane %v137_v10, %v16028_v5  ;;  %v3298_v60 = vcombine.low %v18354_v31, %v18358_v55 }
 0x175   :  { %v3774_v21 = vpop.permute.xlu0 %3773  ;;  %v26060_v58 = vcombine.low %v26059_v50, %v17826_v3  ;;  %v18379_v3 = vrot.slane %v664_v34, %v16028_v5  ;;  %v18388_v39 = vrot.slane %v4278_v61, %v16028_v5  ;;  %v18392_v38 = vcombine.high %v18281_v49, %v18281_v49 }
 0x176   :  { %26061 = vst [vmem:[#allocation22_spill] sm:$0xff] %v18369_v29  ;;  %v1477_v6 = vrot.slane %v1475_v57, 2  ;;  %v5676_v10 = vcombine.low %v18230_v32, %v1467_v11  ;;  %v14287_v34 = vcombine.high %v18090_v46, %v18130_v53  ;;  %v7746_v61 = vsel %vm7738_vm12, %v7696_v52, %v6200_v23  ;;  %v26068_v52 = vld [vmem:[#allocation24_spill] sm:$0xff] }
 0x177   :  { %6921 = vrot.lane.b32.xlu1 %v26060_v58, %s15882_s11  ;;  %v26063_v58 = vcombine.low %v26062_v19, %v17589_v44  ;;  %v6908_v7 = vpop.permute.xlu1 %6907  ;;  %26064 = vst [vmem:[#allocation40_spill] sm:$0xff] %v18388_v39  ;;  %v18399_v44 = vcombine.high %v18376_v17, %v18376_v17  ;;  %v18403_v19 = vcombine.high %v18379_v3, %v18379_v3  ;;  %v1478_v32 = vrot.slane %v18392_v38, 7 }
 0x178   :  { %v26065_v57 = vcombine.low %v17880_v41, %v17883_v47  ;;  %v14249_v46 = vrot.slane %v18376_v17, 9  ;;  %v1485_v53 = vrot.slane %v18379_v3, 7  ;;  %v7796_v11 = vsel %vm7788_vm13, %v7746_v61, %v6632_v33 }
 0x179   :  { %4767 = vrot.lane.b32.xlu0 %v26063_v58, %s15880_s26  ;;  %v4754_v58 = vpop.permute.xlu0 %4753  ;;  %v18415_v8 = vrot.slane %v3282_v20, %v16028_v5  ;;  %v18418_v51 = vrot.slane %v5675_v56, %v16028_v5  ;;  %v1482_v23 = vrot.slane %v18399_v44, 7  ;;  %v18426_v16 = vrot.slane %v3298_v60, %v16028_v5  ;;  %v26075_v60 = vld [vmem:[#allocation30_spill] sm:$0xff] }
 0x17a   :  { %v1487_v61 = vrot.slane %v1485_v53, 2  ;;  %v18433_v56 = vcombine.low %v18369_v29, %v18388_v39  ;;  %v18436_v35 = vrot.slane %v5676_v10, %v16028_v5  ;;  %v26076_v50 = vcombine.low %v26074_v1, %v26075_v60  ;;  %v26077_v20 = vld [vmem:[#allocation46_spill] sm:$0xff]  ;;  %v26080_v60 = vld [vmem:[#allocation39_spill] sm:$0xff] }
 0x17b   :  { %7229 = vrot.lane.b32.xlu1 %v26065_v57, %s15885_s16  ;;  %26066 = vst [vmem:[#allocation68_spill] sm:$0xff] %v18415_v8  ;;  %26067 = vst [vmem:[#allocation69_spill] sm:$0xff] %v18418_v51  ;;  %v26069_v57 = vcombine.low %v17707_v26, %v26068_v52  ;;  %v7216_v22 = vpop.permute.xlu1 %7215  ;;  %v18439_v52 = vrot.slane %v14287_v34, %v16028_v5  ;;  %v7846_v33 = vsel %vm7838_vm14, %v7796_v11, %v6908_v7 }
 0x17c   :  { %26070 = vst [vmem:[#allocation24_spill] sm:$0xff] %v18426_v16  ;;  %26071 = vst [vmem:[#allocation70_spill] sm:$0xff] %v18433_v56  ;;  %v7597_v18 = vsel %vm7588_vm9, %v26076_v50, %v3774_v21  ;;  %v1479_v56 = vsel %vm16175_vm6, %v1477_v6, %v1478_v32  ;;  %v18452_v10 = vsel %vm16175_vm6, %v14249_v46, %v1482_v23  ;;  %v26078_v50 = vrot.slane %v18403_v19, 7 }
 0x17d   :  { %5235 = vrot.lane.b32.xlu0 %v26069_v57, %s15881_s27  ;;  %26072 = vst [vmem:[#allocation71_spill] sm:$0xff] %v18436_v35  ;;  %26073 = vst [vmem:[#allocation72_spill] sm:$0xff] %v18439_v52  ;;  %v1484_v57 = vrot.slane %v1482_v23, 2  ;;  %v5222_v27 = vpop.permute.xlu0 %5221  ;;  %v2417_v34 = vcombine.low %v18281_v49, %v18376_v17  ;;  %v2433_v1 = vcombine.low %v18399_v44, %v18379_v3 }
 0x17e   :  { %v18466_v7 = vsel %vm16175_vm6, %v1487_v61, %v26078_v50  ;;  %v7896_v6 = vsel %vm7888_vm15, %v7846_v33, %v7216_v22  ;;  %v26079_v32 = vcombine.low %v17889_v45, %v17896_v63  ;;  %v4295_v23 = vcombine.low %v18379_v3, %v18403_v19  ;;  %v138_v61 = vld [vmem:[%s25399_s0 + $0xd8] sm:$0xff] }
 0x17f   :  { %7469 = vrot.lane.b32.xlu1 %v26077_v20, %s15884_s2  ;;  %v18460_v21 = vsel %vm16175_vm6, %v1484_v57, %v1485_v53  ;;  %v7456_v46 = vpop.permute.xlu1 %7455  ;;  %v14274_v53 = vcombine.high %v18281_v49, %v18376_v17  ;;  %v3299_v45 = vcombine.low %v1479_v56, %v18452_v10  ;;  %v5692_v33 = vcombine.low %v18335_v9, %v18354_v31 }
 0x180   :  { %v7946_v22 = vsel %vm7938_vm0, %v7896_v6, %v7456_v46  ;;  %v26081_v50 = vcombine.low %v17680_v48, %v26080_v60  ;;  %v3315_v6 = vcombine.low %v18460_v21, %v18466_v7  ;;  %v18503_v31 = vrot.slane %v2417_v34, %v16028_v5  ;;  %v26084_v60 = vld [vmem:[#allocation54_spill] sm:$0xff] }
 0x181   :  { %6215 = vrot.lane.b32.xlu0 %v26079_v32, %s15872_s12  ;;  %v6202_v57 = vpop.permute.xlu0 %6201  ;;  %14795 = vmatmul.mubr.msk.f32.gmra.mrb[14].mxu0 %vm25827_vm4, %v7946_v22  ;;  %v5693_v32 = vcombine.low %v18358_v55, %v1479_v56  ;;  %v18506_v46 = vrot.slane %v2433_v1, %v16028_v5  ;;  %v681_v22 = vcombine.high %v138_v61, %v138_v61 }
 0x182   :  { %14797 = vmatprep.mubr.msk.f32.mxu0 %vm15888_vm8, %v25931_v42  ;;  %26082 = vst [vmem:[#allocation29_spill] sm:$0xff] %v18503_v31  ;;  %v18513_v55 = vrot.slane %v14274_v53, %v16028_v5  ;;  %v18516_v56 = vrot.slane %v4295_v23, %v16028_v5  ;;  %v6431_v34 = vcombine.low %v18281_v49, %v18392_v38  ;;  %v26088_v23 = vld [vmem:[#allocation50_spill] sm:$0xff]  ;;  %v26096_v31 = vrot.slane %v18403_v19, 7 }
 0x183   :  { %6647 = vrot.lane.b32.xlu1 %v26081_v50, %s15879_s3  ;;  %26083 = vst [vmem:[#allocation30_spill] sm:$0xff] %v18506_v46  ;;  %v26085_v50 = vcombine.low %v26084_v60, %v17734_v12  ;;  %v6634_v11 = vpop.permute.xlu1 %6633  ;;  %v18521_v9 = vrot.slane %v138_v61, %v16028_v5  ;;  %v7647_v1 = vsel %vm25834_vm10, %v7597_v18, %v4754_v58 }
 0x184   :  { %v18525_v3 = vrot.slane %v3299_v45, %v16028_v5  ;;  %v18528_v12 = vrot.slane %v5692_v33, %v16028_v5  ;;  %v18531_v53 = vrot.slane %v681_v22, %v16028_v5  ;;  %v18538_v49 = vrot.slane %v3315_v6, %v16028_v5 }
 0x185   :  { %3789 = vrot.lane.b32.xlu0 %v26085_v50, %s15883_s13  ;;  %v3776_v60 = vpop.permute.xlu0 %3775  ;;  %v26089_v50 = vld [vmem:[#allocation23_spill] sm:$0xff]  ;;  %v18541_v18 = vrot.slane %v5693_v32, %v16028_v5  ;;  %v696_v38 = vcombine.high %v18521_v9, %v18521_v9  ;;  %v1491_v58 = vrot.slane %v18521_v9, 7  ;;  %v7697_v61 = vsel %vm25826_vm11, %v7647_v1, %v5222_v27 }
 0x186   :  { %26086 = vst [vmem:[#allocation46_spill] sm:$0xff] %v18525_v3  ;;  %26087 = vst [vmem:[#allocation39_spill] sm:$0xff] %v18528_v12  ;;  %v26090_v63 = vcombine.low %v26088_v23, %v26089_v50  ;;  %v1172_v33 = vcombine.high %v18531_v53, %v18531_v53  ;;  %v26092_v6 = vcombine.low %v17597_v54, %v17707_v26  ;;  %v1490_v52 = vrot.slane %v26096_v31, 2 }
 0x187   :  { %26091 = vst [vmem:[#allocation54_spill] sm:$0xff] %v18541_v18  ;;  %v6910_v32 = vpop.permute.xlu1 %6909  ;;  %v18559_v23 = vrot.slane %v6431_v34, %v16028_v5  ;;  %v7747_v30 = vsel %vm7738_vm12, %v7697_v61, %v6202_v57  ;;  %v1493_v54 = vrot.slane %v1491_v58, 2  ;;  %v1494_v26 = vrot.slane %v696_v38, 7  ;;  %v26098_v34 = vld [vmem:[#allocation35_spill] sm:$0xff] }
 0x188   :  { %6923 = vrot.lane.b32.xlu1 %v26090_v63, %s15882_s11  ;;  %v1497_v63 = vrot.slane %v18531_v53, 7  ;;  %v26097_v22 = vcombine.low %v18034_v15, %v18037_v25  ;;  %v2434_v57 = vcombine.low %v18403_v19, %v18521_v9  ;;  %v5001_v31 = vcombine.low %v18376_v17, %v18399_v44  ;;  %v139_v44 = vld [vmem:[%s25399_s0 + $0xe0] sm:$0xff] }
 0x189   :  { %4769 = vrot.lane.b32.xlu0 %v26092_v6, %s15880_s26  ;;  %26093 = vst [vmem:[#allocation50_spill] sm:$0xff] %v18559_v23  ;;  %v2450_v61 = vcombine.low %v696_v38, %v18531_v53  ;;  %v1496_v50 = vrot.slane %v1494_v26, 2  ;;  %v1500_v45 = vrot.slane %v1172_v33, 7  ;;  %v7797_v35 = vsel %vm7788_vm13, %v7747_v30, %v6634_v11 }
 0x18a   :  { %v4756_v6 = vpop.permute.xlu0 %4755  ;;  %v1499_v1 = vrot.slane %v1497_v63, 2  ;;  %v5709_v17 = vcombine.low %v18452_v10, %v18460_v21  ;;  %v1492_v30 = vsel %vm16175_vm6, %v1490_v52, %v1491_v58  ;;  %v4296_v11 = vcombine.low %v18521_v9, %v696_v38 }
 0x18b   :  { %v4312_v27 = vcombine.low %v18531_v53, %v1172_v33  ;;  %v7598_v19 = vsel %vm7588_vm9, %v26098_v34, %v3776_v60  ;;  %v7847_v10 = vsel %vm7838_vm14, %v7797_v35, %v6910_v32  ;;  %v26099_v29 = vcombine.low %v18001_v59, %v18004_v37  ;;  %v26103_v33 = vld [vmem:[#allocation33_spill] sm:$0xff]  ;;  %v26104_v32 = vld [vmem:[#allocation47_spill] sm:$0xff] }
 0x18c   :  { %7231 = vrot.lane.b32.xlu1 %v26097_v22, %s15885_s16  ;;  %v7218_v22 = vpop.permute.xlu1 %7217  ;;  %v18609_v52 = vrot.slane %v2434_v57, %v16028_v5  ;;  %v18612_v58 = vrot.slane %v5001_v31, %v16028_v5  ;;  %v18615_v9 = vrot.slane %v2450_v61, %v16028_v5  ;;  %v18619_v60 = vsel %vm16175_vm6, %v1496_v50, %v1497_v63  ;;  %v140_v61 = vld [vmem:[%s25399_s0 + $0xe8] sm:$0xff] }
 0x18d   :  { %5237 = vrot.lane.b32.xlu0 %v26077_v20, %s15881_s27  ;;  %v18597_v20 = vsel %vm16175_vm6, %v1493_v54, %v1494_v26  ;;  %v18623_v35 = vsel %vm16175_vm6, %v1499_v1, %v1500_v45  ;;  %v1814_v38 = vcombine.high %v139_v44, %v139_v44  ;;  %v26105_v54 = vcombine.low %v26103_v33, %v26104_v32 }
 0x18e   :  { %v5224_v21 = vpop.permute.xlu0 %5223  ;;  %26100 = vst [vmem:[#allocation35_spill] sm:$0xff] %v18609_v52  ;;  %26101 = vst [vmem:[#allocation73_spill] sm:$0xff] %v18612_v58  ;;  %v3316_v34 = vcombine.low %v1492_v30, %v18597_v20  ;;  %v18632_v57 = vrot.slane %v5709_v17, %v16028_v5  ;;  %v18635_v50 = vrot.slane %v139_v44, %v16028_v5  ;;  %v26106_v17 = vld [vmem:[#allocation62_spill] sm:$0xff] }
 0x18f   :  { %26102 = vst [vmem:[#allocation74_spill] sm:$0xff] %v18615_v9  ;;  %v18639_v63 = vrot.slane %v4296_v11, %v16028_v5  ;;  %v18642_v1 = vrot.slane %v4312_v27, %v16028_v5  ;;  %v18645_v31 = vrot.slane %v1814_v38, %v16028_v5  ;;  %v3332_v44 = vcombine.low %v18619_v60, %v18623_v35 }
 0x190   :  { %7471 = vrot.lane.b32.xlu1 %v26099_v29, %s15884_s2  ;;  %v7897_v29 = vsel %vm7888_vm15, %v7847_v10, %v7218_v22  ;;  %v7458_v26 = vpop.permute.xlu1 %7457  ;;  %v5710_v11 = vcombine.low %v18466_v7, %v1492_v30  ;;  %v1829_v27 = vcombine.high %v18635_v50, %v18635_v50  ;;  %v7648_v10 = vsel %vm25834_vm10, %v7598_v19, %v4756_v6 }
 0x191   :  { %6217 = vrot.lane.b32.xlu0 %v26105_v54, %s15872_s12  ;;  %v7947_v45 = vsel %vm7938_vm0, %v7897_v29, %v7458_v26  ;;  %v1830_v33 = vcombine.high %v18645_v31, %v18645_v31  ;;  %v26107_v7 = vcombine.low %v17783_v0, %v17880_v41  ;;  %v18673_v6 = vcombine.low %v18506_v46, %v18609_v52 }
 0x192   :  { %v6204_v22 = vpop.permute.xlu0 %6203  ;;  %14798 = vmatmul.mubr.msk.f32.gmra.mrb[16].mxu0 %vm25827_vm4, %v7947_v45  ;;  %v18676_v19 = vrot.slane %v140_v61, %v16028_v5  ;;  %v1884_v32 = vrot.slane %v1829_v27, 7  ;;  %v1887_v54 = vrot.slane %v18645_v31, 7  ;;  %v18680_v26 = vrot.slane %v3316_v34, %v16028_v5 }
 0x193   :  { %14800 = vmatprep.mubr.msk.f32.mxu0 %vm15888_vm8, %v25931_v42  ;;  %26108 = vst [vmem:[#allocation33_spill] sm:$0xff] %v18673_v6  ;;  %v1890_v29 = vrot.slane %v1830_v33, 7  ;;  %v5010_v0 = vcombine.low %v18531_v53, %v18635_v50  ;;  %v18691_v38 = vrot.slane %v3332_v44, %v16028_v5  ;;  %v6449_v34 = vcombine.low %v18645_v31, %v1830_v33 }
 0x194   :  { %6649 = vrot.lane.b32.xlu1 %v26106_v17, %s15879_s3  ;;  %v6636_v30 = vpop.permute.xlu1 %6635  ;;  %v18694_v17 = vrot.slane %v5710_v11, %v16028_v5  ;;  %v6785_v45 = vcombine.low %v18635_v50, %v1829_v27  ;;  %v7698_v6 = vsel %vm25826_vm11, %v7648_v10, %v5224_v21  ;;  %v14264_v52 = vrot.slane %v18635_v50, 9 }
 0x195   :  { %3791 = vrot.lane.b32.xlu0 %v26107_v7, %s15883_s13  ;;  %v26109_v7 = vcombine.low %v18083_v24, %v18086_v36  ;;  %v1886_v23 = vrot.slane %v1884_v32, 2  ;;  %v26111_v36 = vld [vmem:[#allocation59_spill] sm:$0xff]  ;;  %v1831_v11 = vcombine.high %v140_v61, %v140_v61  ;;  %v1889_v12 = vrot.slane %v1887_v54, 2 }
 0x196   :  { %v3778_v41 = vpop.permute.xlu0 %3777  ;;  %26110 = vst [vmem:[#allocation47_spill] sm:$0xff] %v18694_v17  ;;  %v1892_v46 = vrot.slane %v1890_v29, 2  ;;  %v1893_v51 = vrot.slane %v18676_v19, 7  ;;  %v18712_v58 = vrot.slane %v5010_v0, %v16028_v5  ;;  %v5019_v3 = vcombine.low %v1829_v27, %v18645_v31 }
 0x197   :  { %v18724_v21 = vrot.slane %v6449_v34, %v16028_v5  ;;  %v18727_v0 = vrot.slane %v6785_v45, %v16028_v5  ;;  %v7748_v31 = vsel %vm7738_vm12, %v7698_v6, %v6204_v22  ;;  %v1885_v27 = vsel %vm16175_vm6, %v14264_v52, %v1884_v32  ;;  %v26120_v45 = vld [vmem:[#allocation45_spill] sm:$0xff]  ;;  %v26122_v32 = vld [vmem:[#allocation32_spill] sm:$0xff] }
 0x198   :  { %6925 = vrot.lane.b32.xlu1 %v26109_v7, %s15882_s11  ;;  %v26112_v7 = vld [vmem:[#allocation43_spill] sm:$0xff]  ;;  %v6912_v18 = vpop.permute.xlu1 %6911  ;;  %26116 = vst [vmem:[#allocation59_spill] sm:$0xff] %v18712_v58  ;;  %v5020_v10 = vcombine.low %v1830_v33, %v18676_v19  ;;  %v7798_v34 = vsel %vm7788_vm13, %v7748_v31, %v6636_v30  ;;  %v26121_v22 = vcombine.low %v18001_v59, %v26120_v45 }
 0x199   :  { %v26113_v44 = vcombine.low %v26111_v36, %v26112_v7  ;;  %v26117_v36 = vld [vmem:[#allocation37_spill] sm:$0xff]  ;;  %26119 = vst [vmem:[#allocation43_spill] sm:$0xff] %v18727_v0  ;;  %v18748_v52 = vrot.slane %v1831_v11, %v16028_v5  ;;  %v18756_v33 = vsel %vm16175_vm6, %v1892_v46, %v1893_v51  ;;  %v18767_v11 = vcombine.high %v18676_v19, %v18676_v19  ;;  %v26125_v46 = vld [vmem:[#allocation64_spill] sm:$0xff] }
 0x19a   :  { %v4758_v16 = vpop.permute.xlu0 %4757  ;;  %v26118_v61 = vcombine.low %v26117_v36, %v18184_v40  ;;  %v26127_v7 = vld [vmem:[#allocation53_spill] sm:$0xff] }
 0x19b   :  { %4771 = vrot.lane.b32.xlu0 %v26113_v44, %s15880_s26  ;;  %v18740_v44 = vld [vmem:[%s25399_s0 + $0xf0] sm:$0xff]  ;;  %v18792_v37 = vcombine.high %v18748_v52, %v18748_v52  ;;  %v1896_v39 = vrot.slane %v18767_v11, 7 }
 0x19c   :  { %7233 = vrot.lane.b32.xlu1 %v26118_v61, %s15885_s16  ;;  %v18734_v61 = vsel %vm16175_vm6, %v1886_v23, %v1887_v54  ;;  %v7220_v6 = vpop.permute.xlu1 %7219  ;;  %v18752_v23 = vsel %vm16175_vm6, %v1889_v12, %v1890_v29  ;;  %v26123_v54 = vld [vmem:[#allocation34_spill] sm:$0xff]  ;;  %v7848_v12 = vsel %vm7838_vm14, %v7798_v34, %v6912_v18  ;;  %v5726_v18 = vcombine.low %v18597_v20, %v18619_v60 }
 0x19d   :  { %v26124_v30 = vcombine.low %v26122_v32, %v26123_v54  ;;  %v18777_v54 = vrot.slane %v18740_v44, %v16028_v5  ;;  %v5727_v34 = vcombine.low %v18623_v35, %v1885_v27  ;;  %v7898_v45 = vsel %vm7888_vm15, %v7848_v12, %v7220_v6  ;;  %v26126_v32 = vld [vmem:[#allocation21_spill] sm:$0xff]  ;;  %v26129_v6 = vld [vmem:[#allocation55_spill] sm:$0xff] }
 0x19e   :  { %v5226_v29 = vpop.permute.xlu0 %5225  ;;  %v26128_v58 = vcombine.low %v26126_v32, %v26127_v7  ;;  %v14288_v60 = vcombine.high %v18531_v53, %v18635_v50  ;;  %v6450_v35 = vcombine.low %v18676_v19, %v18767_v11  ;;  %v26130_v12 = vcombine.low %v26129_v6, %v18083_v24 }
 0x19f   :  { %5239 = vrot.lane.b32.xlu0 %v26121_v22, %s15881_s27  ;;  %v7599_v31 = vsel %vm7588_vm9, %v26124_v30, %v3778_v41  ;;  %v5027_v22 = vrot.slane %v5019_v3, %v16028_v5  ;;  %v7061_v41 = vcombine.low %v1885_v27, %v18734_v61  ;;  %v7062_v3 = vcombine.low %v18752_v23, %v18756_v33 }
 0x1a0   :  { %7473 = vrot.lane.b32.xlu1 %v26125_v46, %s15884_s2  ;;  %v5034_v30 = vrot.slane %v5020_v10, %v16028_v5  ;;  %v7460_v8 = vpop.permute.xlu1 %7459  ;;  %v1899_v10 = vrot.slane %v18748_v52, 7  ;;  %v7649_v7 = vsel %vm25834_vm10, %v7599_v31, %v4758_v16  ;;  %v1895_v53 = vrot.slane %v1893_v51, 2 }
 0x1a1   :  { %v7948_v20 = vsel %vm7938_vm0, %v7898_v45, %v7460_v8  ;;  %v6794_v8 = vcombine.low %v18748_v52, %v18777_v54  ;;  %v1898_v50 = vrot.slane %v1896_v39, 2  ;;  %v18816_v19 = vrot.slane %v7061_v41, %v16028_v5 }
 0x1a2   :  { %v6206_v27 = vpop.permute.xlu0 %6205  ;;  %14801 = vmatmul.mubr.msk.f32.gmra.mrb[18].mxu0 %vm25827_vm4, %v7948_v20  ;;  %v18819_v16 = vrot.slane %v7062_v3, %v16028_v5  ;;  %v18822_v31 = vrot.slane %v5726_v18, %v16028_v5  ;;  %v18825_v45 = vrot.slane %v5727_v34, %v16028_v5  ;;  %v26133_v51 = vcombine.low %v17883_v47, %v18034_v15  ;;  %v26137_v15 = vld [vmem:[#allocation56_spill] sm:$0xff] }
 0x1a3   :  { %6219 = vrot.lane.b32.xlu0 %v26128_v58, %s15872_s12  ;;  %v18803_v58 = vcombine.high %v18777_v54, %v18777_v54  ;;  %14803 = vmatprep.mubr.msk.f32.mxu0 %vm15888_vm8, %v25931_v42  ;;  %v1901_v20 = vrot.slane %v1899_v10, 2  ;;  %v1902_v6 = vrot.slane %v18792_v37, 7  ;;  %v14266_v41 = vrot.slane %v18777_v54, 9 }
 0x1a4   :  { %6651 = vrot.lane.b32.xlu1 %v26130_v12, %s15879_s3  ;;  %26131 = vst [vmem:[#allocation37_spill] sm:$0xff] %v18822_v31  ;;  %26132 = vst [vmem:[#allocation45_spill] sm:$0xff] %v18825_v45  ;;  %v6638_v32 = vpop.permute.xlu1 %6637  ;;  %v18834_v12 = vcombine.low %v5027_v22, %v5034_v30  ;;  %v18837_v18 = vrot.slane %v14288_v60, %v16028_v5  ;;  %v18842_v0 = vrot.slane %v6450_v35, %v16028_v5  ;;  %v143_v35 = vld [vmem:[%s25399_s0 + $0x100] sm:$0xff] }
 0x1a5   :  { %v25535_v3 = vrot.slane %v18803_v58, 7  ;;  %v18849_v17 = vrot.slane %v6794_v8, %v16028_v5  ;;  %v18853_v22 = vsel %vm16175_vm6, %v1895_v53, %v1896_v39  ;;  %v18857_v30 = vsel %vm16175_vm6, %v1898_v50, %v1899_v10  ;;  %v26141_v50 = vld [vmem:[#allocation61_spill] sm:$0xff] }
 0x1a6   :  { %26134 = vst [vmem:[#allocation32_spill] sm:$0xff] %v18834_v12  ;;  %26135 = vst [vmem:[#allocation34_spill] sm:$0xff] %v18837_v18  ;;  %v3780_v47 = vpop.permute.xlu0 %3779  ;;  %v5036_v60 = vcombine.low %v18767_v11, %v18748_v52  ;;  %v14296_v39 = vcombine.high %v18748_v52, %v18777_v54  ;;  %v697_v53 = vcombine.high %v143_v35, %v143_v35 }
 0x1a7   :  { %3793 = vrot.lane.b32.xlu0 %v26133_v51, %s15883_s13  ;;  %26136 = vst [vmem:[#allocation64_spill] sm:$0xff] %v18842_v0  ;;  %v26138_v51 = vld [vmem:[#allocation65_spill] sm:$0xff]  ;;  %26140 = vst [vmem:[#allocation21_spill] sm:$0xff] %v18849_v17  ;;  %v7699_v10 = vsel %vm25826_vm11, %v7649_v7, %v5226_v29  ;;  %v26142_v11 = vcombine.low %v26141_v50, %v18001_v59  ;;  %v2001_v54 = vsel %vm16175_vm6, %v14266_v41, %v25535_v3  ;;  %v26158_v0 = vld [vmem:[#allocation26_spill] sm:$0xff] }
 0x1a8   :  { %v26139_v24 = vcombine.low %v26137_v15, %v26138_v51  ;;  %v6914_v15 = vpop.permute.xlu1 %6913  ;;  %v7749_v29 = vsel %vm7738_vm12, %v7699_v10, %v6206_v27  ;;  %v7078_v7 = vcombine.low %v18853_v22, %v18857_v30  ;;  %v18889_v59 = vrot.slane %v143_v35, %v16028_v5  ;;  %v26155_v51 = vld [vmem:[#allocation28_spill] sm:$0xff] }
 0x1a9   :  { %v18892_v50 = vrot.slane %v697_v53, %v16028_v5  ;;  %v26145_v27 = vcombine.low %v18276_v14, %v18304_v28  ;;  %v18909_v53 = vrot.slane %v5036_v60, %v16028_v5  ;;  %v18913_v34 = vrot.slane %v14296_v39, %v16028_v5 }
 0x1aa   :  { %6927 = vrot.lane.b32.xlu1 %v26139_v24, %s15882_s11  ;;  %v18879_v24 = vsel %vm16175_vm6, %v1901_v20, %v1902_v6  ;;  %26143 = vst [vmem:[#allocation53_spill] sm:$0xff] %v18889_v59  ;;  %v18897_v20 = vld [vmem:[%s25399_s0 + $0xf8] sm:$0xff]  ;;  %v7799_v6 = vsel %vm7788_vm13, %v7749_v29, %v6638_v32  ;;  %v5743_v32 = vcombine.low %v18734_v61, %v18752_v23  ;;  %v14250_v35 = vrot.slane %v18889_v59, 9  ;;  %v18935_v61 = vld [vmem:[%s25399_s0 + $0x110] sm:$0xff] }
 0x1ab   :  { %4773 = vrot.lane.b32.xlu0 %v26142_v11, %s15880_s26  ;;  %26144 = vst [vmem:[#allocation55_spill] sm:$0xff] %v18892_v50  ;;  %v4760_v11 = vpop.permute.xlu0 %4759  ;;  %26146 = vst [vmem:[#allocation56_spill] sm:$0xff] %v18909_v53  ;;  %v7079_v10 = vcombine.low %v18879_v24, %v2001_v54  ;;  %v18919_v29 = vcombine.high %v18889_v59, %v18889_v59  ;;  %v5744_v60 = vcombine.low %v18756_v33, %v18853_v22  ;;  %v26149_v23 = vld [vmem:[#allocation42_spill] sm:$0xff] }
 0x1ac   :  { %26147 = vst [vmem:[#allocation61_spill] sm:$0xff] %v18913_v34  ;;  %v1930_v39 = vcombine.high %v18740_v44, %v18740_v44  ;;  %v18930_v54 = vrot.slane %v18897_v20, %v16028_v5  ;;  %v18940_v41 = vrot.slane %v7078_v7, %v16028_v5  ;;  %v7849_v44 = vsel %vm7838_vm14, %v7799_v6, %v6914_v15 }
 0x1ad   :  { %26148 = vst [vmem:[#allocation75_spill] sm:$0xff] %v18919_v29  ;;  %v1504_v33 = vrot.slane %v18919_v29, 7  ;;  %v26151_v3 = vcombine.low %v18238_v43, %v18241_v13  ;;  %v4313_v7 = vcombine.low %v18919_v29, %v18892_v50  ;;  %v18958_v22 = vrot.slane %v7079_v10, %v16028_v5 }
 0x1ae   :  { %7235 = vrot.lane.b32.xlu1 %v26145_v27, %s15885_s16  ;;  %v7222_v27 = vpop.permute.xlu1 %7221  ;;  %26150 = vst [vmem:[#allocation42_spill] sm:$0xff] %v18940_v41  ;;  %v18962_v6 = vrot.slane %v18935_v61, %v16028_v5  ;;  %v18976_v10 = vcombine.high %v18930_v54, %v18930_v54  ;;  %v18991_v18 = vrot.slane %v5743_v32, %v16028_v5 }
 0x1af   :  { %5241 = vrot.lane.b32.xlu0 %v26125_v46, %s15881_s27  ;;  %v7600_v46 = vsel %vm7588_vm9, %v26149_v23, %v3780_v47  ;;  %v5228_v8 = vpop.permute.xlu0 %5227  ;;  %v18952_v47 = vrot.slane %v1930_v39, %v16028_v5  ;;  %v7899_v23 = vsel %vm7888_vm15, %v7849_v44, %v7222_v27  ;;  %26152 = vst [vmem:[#allocation76_spill] sm:$0xff] %v18958_v22  ;;  %v1506_v15 = vrot.slane %v1504_v33, 2  ;;  %v26170_v22 = vld [vmem:[#allocation63_spill] sm:$0xff] }
 0x1b0   :  { %26153 = vst [vmem:[#allocation77_spill] sm:$0xff] %v18962_v6  ;;  %v1505_v17 = vsel %vm16175_vm6, %v14250_v35, %v1504_v33  ;;  %v2009_v44 = vrot.slane %v18930_v54, 7  ;;  %v26162_v32 = vcombine.low %v18037_v25, %v26117_v36  ;;  %v7650_v45 = vsel %vm25834_vm10, %v7600_v46, %v4760_v11 }
 0x1b1   :  { %v18972_v27 = vcombine.high %v18952_v47, %v18952_v47  ;;  %v2003_v33 = vrot.slane %v18952_v47, 7 }
 0x1b2   :  { %7475 = vrot.lane.b32.xlu1 %v26151_v3, %s15884_s2  ;;  %v26154_v3 = vld [vmem:[#allocation51_spill] sm:$0xff]  ;;  %v7462_v39 = vpop.permute.xlu1 %7461  ;;  %v2011_v34 = vrot.slane %v2009_v44, 2 }
 0x1b3   :  { %v26156_v59 = vcombine.low %v26154_v3, %v26155_v51  ;;  %v7949_v29 = vsel %vm7938_vm0, %v7899_v23, %v7462_v39  ;;  %v6208_v3 = vpop.permute.xlu0 %6207  ;;  %26159 = vst [vmem:[#allocation51_spill] sm:$0xff] %v18991_v18  ;;  %v18994_v23 = vrot.slane %v5744_v60, %v16028_v5  ;;  %v18997_v39 = vrot.slane %v4313_v7, %v16028_v5 }
 0x1b4   :  { %14804 = vmatmul.mubr.msk.f32.gmra.mrb[20].mxu0 %vm25827_vm4, %v7949_v29  ;;  %v6804_v51 = vcombine.low %v18972_v27, %v18930_v54  ;;  %v2006_v29 = vrot.slane %v18972_v27, 7  ;;  %v26163_v7 = vrot.slane %v18803_v58, 7  ;;  %v2005_v36 = vrot.slane %v2003_v33, 2 }
 0x1b5   :  { %6221 = vrot.lane.b32.xlu0 %v26156_v59, %s15872_s12  ;;  %v26157_v59 = vrot.slane %v18892_v50, 7  ;;  %26160 = vst [vmem:[#allocation28_spill] sm:$0xff] %v18994_v23  ;;  %26161 = vst [vmem:[#allocation78_spill] sm:$0xff] %v18997_v39  ;;  %14806 = vmatprep.mubr.msk.f32.mxu0 %vm15888_vm8, %v25931_v42 }
 0x1b6   :  { %6653 = vrot.lane.b32.xlu1 %v26158_v0, %s15879_s3  ;;  %v6640_v60 = vpop.permute.xlu1 %6639  ;;  %v2002_v0 = vrot.slane %v26163_v7, 2  ;;  %v2008_v46 = vrot.slane %v2006_v29, 2  ;;  %v19039_v48 = vrot.slane %v6804_v51, %v16028_v5 }
 0x1b7   :  { %v1508_v35 = vsel %vm16175_vm6, %v1506_v15, %v26157_v59  ;;  %v6803_v59 = vcombine.low %v18803_v58, %v18952_v47  ;;  %v144_v58 = vld [vmem:[%s25399_s0 + $0x108] sm:$0xff]  ;;  %v3782_v7 = vpop.permute.xlu0 %3781 }
 0x1b8   :  { %v3333_v15 = vcombine.low %v1505_v17, %v1508_v35  ;;  %v19015_v35 = vcombine.high %v18962_v6, %v18962_v6  ;;  %v26165_v17 = vcombine.low %v18317_v4, %v18320_v62  ;;  %v714_v31 = vcombine.high %v144_v58, %v144_v58  ;;  %26168 = vst [vmem:[#allocation81_spill] sm:$0xff] %v19039_v48 }
 0x1b9   :  { %3795 = vrot.lane.b32.xlu0 %v26162_v32, %s15883_s13  ;;  %v7700_v32 = vsel %vm25826_vm11, %v7650_v45, %v5228_v8  ;;  %v19036_v12 = vrot.slane %v6803_v59, %v16028_v5  ;;  %v26172_v59 = vrot.slane %v18976_v10, 7 }
 0x1ba   :  { %6929 = vrot.lane.b32.xlu1 %v26165_v17, %s15882_s11  ;;  %v19033_v25 = vrot.slane %v3333_v15, %v16028_v5  ;;  %v7750_v8 = vsel %vm7738_vm12, %v7700_v32, %v6208_v3  ;;  %v26169_v17 = vld [vmem:[#allocation25_spill] sm:$0xff]  ;;  %v6916_v23 = vpop.permute.xlu1 %6915  ;;  %v2004_v15 = vsel %vm16175_vm6, %v2002_v0, %v2003_v33  ;;  %v5037_v18 = vcombine.low %v18962_v6, %v19015_v35  ;;  %v26173_v33 = vld [vmem:[#allocation68_spill] sm:$0xff] }
 0x1bb   :  { %26167 = vst [vmem:[#allocation80_spill] sm:$0xff] %v19036_v12  ;;  %v26171_v11 = vcombine.low %v26169_v17, %v26170_v22  ;;  %v2013_v51 = vsel %vm16175_vm6, %v2011_v34, %v26172_v59  ;;  %v7800_v45 = vsel %vm7788_vm13, %v7750_v8, %v6640_v60  ;;  %v2007_v3 = vsel %vm16175_vm6, %v2005_v36, %v2006_v29  ;;  %v19063_v0 = vpop.permute.xlu0 %4761 }
 0x1bc   :  { %26166 = vst [vmem:[#allocation79_spill] sm:$0xff] %v19033_v25  ;;  %v7369_v22 = vcombine.low %v18952_v47, %v18972_v27  ;;  %v730_v32 = vcombine.high %v18935_v61, %v18935_v61  ;;  %v2010_v17 = vsel %vm16175_vm6, %v2008_v46, %v2009_v44  ;;  %v19072_v60 = vrot.slane %v714_v31, %v16028_v5  ;;  %v26177_v44 = vld [vmem:[#allocation38_spill] sm:$0xff]  ;;  %v26178_v46 = vld [vmem:[#allocation44_spill] sm:$0xff] }
 0x1bd   :  { %4775 = vrot.lane.b32.xlu0 %v26171_v11, %s15880_s26  ;;  %v26174_v11 = vld [vmem:[#allocation24_spill] sm:$0xff]  ;;  %v14251_v29 = vrot.slane %v18962_v6, 9  ;;  %v1526_v47 = vrot.slane %v19015_v35, 7  ;;  %v7370_v36 = vcombine.low %v18930_v54, %v18976_v10  ;;  %v26179_v31 = vcombine.low %v26177_v44, %v26178_v46 }
 0x1be   :  { %v26175_v34 = vcombine.low %v26173_v33, %v26174_v11  ;;  %26176 = vst [vmem:[#allocation25_spill] sm:$0xff] %v19072_v60  ;;  %v19083_v8 = vrot.slane %v730_v32, %v16028_v5  ;;  %v7224_v61 = vpop.permute.xlu1 %7223  ;;  %v7095_v25 = vcombine.low %v2004_v15, %v2007_v3  ;;  %v19094_v27 = vrot.slane %v5037_v18, %v16028_v5 }
 0x1bf   :  { %v7601_v59 = vsel %vm7588_vm9, %v26179_v31, %v3782_v7  ;;  %v1173_v54 = vcombine.high %v19072_v60, %v19072_v60  ;;  %v7096_v32 = vcombine.low %v2010_v17, %v2013_v51  ;;  %v19099_v48 = vrot.slane %v7369_v22, %v16028_v5  ;;  %v5230_v31 = vpop.permute.xlu0 %5229 }
 0x1c0   :  { %7237 = vrot.lane.b32.xlu1 %v26175_v34, %s15885_s16  ;;  %v26180_v34 = vld [vmem:[#allocation67_spill] sm:$0xff]  ;;  %26182 = vst [vmem:[#allocation63_spill] sm:$0xff] %v19094_v27  ;;  %v1528_v44 = vrot.slane %v1526_v47, 2  ;;  %v25553_v7 = vrot.slane %v19083_v8, 7  ;;  %v7850_v46 = vsel %vm7838_vm14, %v7800_v45, %v6916_v23  ;;  %v1527_v18 = vsel %vm16175_vm6, %v14251_v29, %v1526_v47  ;;  %v26187_v29 = vld [vmem:[#allocation69_spill] sm:$0xff] }
 0x1c1   :  { %v26181_v39 = vcombine.low %v26180_v34, %v18241_v13  ;;  %26183 = vst [vmem:[#allocation68_spill] sm:$0xff] %v19099_v48  ;;  %v19110_v51 = vcombine.high %v18892_v50, %v18892_v50  ;;  %v5760_v23 = vcombine.low %v18857_v30, %v18879_v24  ;;  %v6466_v45 = vcombine.low %v18748_v52, %v18792_v37  ;;  %v26188_v47 = vld [vmem:[#allocation71_spill] sm:$0xff] }
 0x1c2   :  { %v19116_v3 = vsel %vm16175_vm6, %v1528_v44, %v25553_v7  ;;  %v19123_v22 = vrot.slane %v144_v58, %v16028_v5  ;;  %v7900_v17 = vsel %vm7888_vm15, %v7850_v46, %v7224_v61  ;;  %v26189_v34 = vcombine.low %v26187_v29, %v26188_v47  ;;  %v7464_v15 = vpop.permute.xlu1 %7463  ;;  %v147_v37 = vld [vmem:[%s25399_s0 + $0x120] sm:$0xff] }
 0x1c3   :  { %5243 = vrot.lane.b32.xlu0 %v26181_v39, %s15881_s27  ;;  %v26184_v39 = vld [vmem:[#allocation70_spill] sm:$0xff]  ;;  %26185 = vst [vmem:[#allocation24_spill] sm:$0xff] %v19110_v51  ;;  %v26190_v44 = vrot.slane %v19072_v60, 7  ;;  %v1522_v12 = vrot.slane %v1173_v54, 7  ;;  %v1510_v30 = vrot.slane %v19110_v51, 7  ;;  %v7950_v52 = vsel %vm7938_vm0, %v7900_v17, %v7464_v15  ;;  %v6210_v46 = vpop.permute.xlu0 %6209  ;;  %v26192_v54 = vld [vmem:[#allocation72_spill] sm:$0xff] }
 0x1c4   :  { %7477 = vrot.lane.b32.xlu1 %v26184_v39, %s15884_s2  ;;  %26186 = vst [vmem:[#allocation38_spill] sm:$0xff] %v19123_v22  ;;  %v5761_v24 = vcombine.low %v1527_v18, %v19116_v3  ;;  %v2485_v58 = vcombine.low %v19015_v35, %v19083_v8  ;;  %v19142_v61 = vcombine.high %v19123_v22, %v19123_v22  ;;  %v26195_v15 = vrot.slane %v18892_v50, 7 }
 0x1c5   :  { %v1521_v7 = vrot.slane %v26190_v44, 2  ;;  %v26193_v29 = vcombine.low %v26192_v54, %v18317_v4  ;;  %14807 = vmatmul.mubr.msk.f32.gmra.mrb[22].mxu0 %vm25827_vm4, %v7950_v52  ;;  %v19150_v47 = vrot.slane %v7370_v36, %v16028_v5  ;;  %v1513_v35 = vrot.slane %v19123_v22, 7 }
 0x1c6   :  { %26191 = vst [vmem:[#allocation44_spill] sm:$0xff] %v19142_v61  ;;  %v1509_v17 = vrot.slane %v26195_v15, 2  ;;  %14809 = vmatprep.mubr.msk.f32.mxu0 %vm15888_vm8, %v25931_v42  ;;  %v19158_v44 = vrot.slane %v7095_v25, %v16028_v5  ;;  %v1516_v52 = vrot.slane %v19142_v61, 7  ;;  %v19164_v36 = vrot.slane %v147_v37, %v16028_v5  ;;  %v6642_v15 = vpop.permute.xlu1 %6641 }
 0x1c7   :  { %6223 = vrot.lane.b32.xlu0 %v26189_v34, %s15872_s12  ;;  %26194 = vst [vmem:[#allocation67_spill] sm:$0xff] %v19150_v47  ;;  %v1512_v34 = vrot.slane %v1510_v30, 2  ;;  %v19171_v50 = vrot.slane %v7096_v32, %v16028_v5  ;;  %v19174_v25 = vrot.slane %v5760_v23, %v16028_v5  ;;  %v763_v4 = vcombine.high %v147_v37, %v147_v37  ;;  %v3784_v32 = vpop.permute.xlu0 %3783  ;;  %v26201_v23 = vld [vmem:[#allocation29_spill] sm:$0xff] }
 0x1c8   :  { %6655 = vrot.lane.b32.xlu1 %v26193_v29, %s15879_s3  ;;  %v26196_v29 = vcombine.low %v18184_v40, %v18276_v14  ;;  %v1947_v54 = vcombine.high %v18897_v20, %v18897_v20  ;;  %v1523_v27 = vsel %vm16175_vm6, %v1521_v7, %v1522_v12  ;;  %v19181_v53 = vrot.slane %v5761_v24, %v16028_v5 }
 0x1c9   :  { %26197 = vst [vmem:[#allocation70_spill] sm:$0xff] %v19174_v25  ;;  %v19184_v40 = vrot.slane %v2485_v58, %v16028_v5  ;;  %v19187_v14 = vrot.slane %v6466_v45, %v16028_v5  ;;  %v1511_v20 = vsel %vm16175_vm6, %v1509_v17, %v1510_v30  ;;  %v1514_v12 = vsel %vm16175_vm6, %v1512_v34, %v1513_v35  ;;  %v26204_v17 = vld [vmem:[#allocation27_spill] sm:$0xff] }
 0x1ca   :  { %26198 = vst [vmem:[#allocation69_spill] sm:$0xff] %v19181_v53  ;;  %v1515_v7 = vrot.slane %v1513_v35, 2  ;;  %v19199_v24 = vcombine.high %v19164_v36, %v19164_v36  ;;  %v7651_v45 = vsel %vm25834_vm10, %v7601_v59, %v19063_v0  ;;  %v1518_v58 = vrot.slane %v1516_v52, 2  ;;  %v6918_v35 = vpop.permute.xlu1 %6917 }
 0x1cb   :  { %3797 = vrot.lane.b32.xlu0 %v26196_v29, %s15883_s13  ;;  %26199 = vst [vmem:[#allocation71_spill] sm:$0xff] %v19184_v40  ;;  %26200 = vst [vmem:[#allocation72_spill] sm:$0xff] %v19187_v14  ;;  %v26202_v29 = vld [vmem:[#allocation30_spill] sm:$0xff]  ;;  %v19204_v41 = vrot.slane %v1947_v54, %v16028_v5  ;;  %v7701_v30 = vsel %vm25826_vm11, %v7651_v45, %v5230_v31  ;;  %v26205_v34 = vcombine.low %v26204_v17, %v18238_v43  ;;  %v19225_v17 = vpop.permute.xlu0 %4763 }
 0x1cc   :  { %v26203_v37 = vcombine.low %v26201_v23, %v26202_v29  ;;  %v4329_v29 = vcombine.low %v19110_v51, %v19123_v22  ;;  %v19218_v59 = vrot.slane %v763_v4, %v16028_v5  ;;  %v7751_v54 = vsel %vm7738_vm12, %v7701_v30, %v6210_v46 }
 0x1cd   :  { %v19221_v22 = vcombine.low %v1523_v27, %v1527_v18  ;;  %v3349_v31 = vcombine.low %v1511_v20, %v1514_v12  ;;  %v1548_v45 = vrot.slane %v19199_v24, 7  ;;  %v7801_v43 = vsel %vm7788_vm13, %v7751_v54, %v6642_v15 }
 0x1ce   :  { %6931 = vrot.lane.b32.xlu1 %v26203_v37, %s15882_s11  ;;  %v1517_v27 = vsel %vm16175_vm6, %v1515_v7, %v1516_v52  ;;  %v26208_v18 = vrot.slane %v19072_v60, 7  ;;  %v4330_v20 = vcombine.low %v19142_v61, %v19072_v60  ;;  %v19244_v12 = vrot.slane %v4329_v29, %v16028_v5  ;;  %v26210_v29 = vld [vmem:[#allocation49_spill] sm:$0xff] }
 0x1cf   :  { %4777 = vrot.lane.b32.xlu0 %v26205_v34, %s15880_s26  ;;  %v26206_v34 = vld [vmem:[#allocation46_spill] sm:$0xff]  ;;  %v1996_v30 = vcombine.high %v19204_v41, %v19204_v41  ;;  %v14252_v52 = vrot.slane %v19164_v36, 9  ;;  %v1550_v7 = vrot.slane %v1548_v45, 2  ;;  %v7602_v46 = vsel %vm7588_vm9, %v26210_v29, %v3784_v32  ;;  %v5232_v51 = vpop.permute.xlu0 %5231 }
 0x1d0   :  { %v26207_v37 = vcombine.low %v26206_v34, %v18538_v49  ;;  %v1520_v15 = vsel %vm16175_vm6, %v1518_v58, %v26208_v18  ;;  %26209 = vst [vmem:[#allocation30_spill] sm:$0xff] %v19244_v12  ;;  %v2015_v58 = vrot.slane %v19204_v41, 7  ;;  %v146_v18 = vld [vmem:[%s25399_s0 + $0x118] sm:$0xff]  ;;  %v19259_v4 = vrot.slane %v3349_v31, %v16028_v5 }
 0x1d1   :  { %v2018_v61 = vrot.slane %v1996_v30, 7  ;;  %v26212_v54 = vcombine.low %v18513_v55, %v18516_v56  ;;  %v3350_v23 = vcombine.low %v1517_v27, %v1520_v15  ;;  %v2518_v40 = vcombine.low %v19164_v36, %v19199_v24  ;;  %v26213_v27 = vld [vmem:[#allocation39_spill] sm:$0xff]  ;;  %v26214_v15 = vld [vmem:[#allocation54_spill] sm:$0xff] }
 0x1d2   :  { %7239 = vrot.lane.b32.xlu1 %v26207_v37, %s15885_s16  ;;  %v7226_v37 = vpop.permute.xlu1 %7225  ;;  %v2017_v14 = vrot.slane %v2015_v58, 2  ;;  %v19271_v32 = vcombine.high %v19083_v8, %v19083_v8  ;;  %v7851_v31 = vsel %vm7838_vm14, %v7801_v43, %v6918_v35  ;;  %v6820_v29 = vcombine.low %v18976_v10, %v19204_v41 }
 0x1d3   :  { %5245 = vrot.lane.b32.xlu0 %v26184_v39, %s15881_s27  ;;  %v26211_v39 = vrot.slane %v18976_v10, 7  ;;  %v19277_v53 = vrot.slane %v146_v18, %v16028_v5  ;;  %v26215_v25 = vcombine.low %v26213_v27, %v26214_v15  ;;  %v19285_v48 = vrot.slane %v4330_v20, %v16028_v5 }
 0x1d4   :  { %v19289_v35 = vsel %vm16175_vm6, %v14252_v52, %v1548_v45  ;;  %v26217_v10 = vrot.slane %v19218_v59, 7  ;;  %v6212_v45 = vpop.permute.xlu0 %6211  ;;  %v26218_v52 = vld [vmem:[#allocation50_spill] sm:$0xff] }
 0x1d5   :  { %v2014_v0 = vrot.slane %v26211_v39, 2  ;;  %v747_v39 = vcombine.high %v146_v18, %v146_v18  ;;  %26216 = vst [vmem:[#allocation27_spill] sm:$0xff] %v19285_v48  ;;  %v19304_v20 = vcombine.high %v19277_v53, %v19277_v53  ;;  %v1535_v27 = vrot.slane %v19277_v53, 7  ;;  %v26235_v48 = vld [vmem:[#allocation41_spill] sm:$0xff] }
 0x1d6   :  { %7479 = vrot.lane.b32.xlu1 %v26212_v54, %s15884_s2  ;;  %v7901_v54 = vsel %vm7888_vm15, %v7851_v31, %v7226_v37  ;;  %v7466_v47 = vpop.permute.xlu1 %7465  ;;  %v19295_v43 = vsel %vm16175_vm6, %v1550_v7, %v26217_v10  ;;  %v26219_v31 = vcombine.low %v18320_v62, %v26218_v52  ;;  %v19321_v7 = vrot.slane %v2518_v40, %v16028_v5  ;;  %v26242_v62 = vld [vmem:[#allocation33_spill] sm:$0xff] }
 0x1d7   :  { %6225 = vrot.lane.b32.xlu0 %v26215_v25, %s15872_s12  ;;  %v7951_v37 = vsel %vm7938_vm0, %v7901_v54, %v7466_v47  ;;  %v2016_v18 = vsel %vm16175_vm6, %v2014_v0, %v2015_v58  ;;  %v2019_v25 = vsel %vm16175_vm6, %v2017_v14, %v2018_v61  ;;  %v19312_v47 = vrot.slane %v3350_v23, %v16028_v5 }
 0x1d8   :  { %14810 = vmatmul.mubr.msk.f32.gmra.mrb[24].mxu0 %vm25827_vm4, %v7951_v37  ;;  %v4380_v0 = vcombine.low %v19199_v24, %v19218_v59  ;;  %v7386_v61 = vcombine.low %v19204_v41, %v1996_v30  ;;  %v1532_v14 = vrot.slane %v19271_v32, 7  ;;  %26220 = vst [vmem:[#allocation46_spill] sm:$0xff] %v19321_v7  ;;  %v19324_v58 = vrot.slane %v747_v39, %v16028_v5 }
 0x1d9   :  { %14812 = vmatprep.mubr.msk.f32.mxu0 %vm15888_vm8, %v25931_v42  ;;  %v26221_v54 = vrot.slane %v19083_v8, 7  ;;  %v26222_v41 = vcombine.low %v18304_v28, %v26173_v33  ;;  %v3400_v30 = vcombine.low %v19289_v35, %v19295_v43  ;;  %v7112_v15 = vcombine.low %v2016_v18, %v2019_v25  ;;  %v26224_v18 = vld [vmem:[#allocation35_spill] sm:$0xff] }
 0x1da   :  { %6657 = vrot.lane.b32.xlu1 %v26219_v31, %s15879_s3  ;;  %v6644_v24 = vpop.permute.xlu1 %6643  ;;  %v1534_v40 = vrot.slane %v1532_v14, 2  ;;  %v1538_v10 = vrot.slane %v19304_v20, 7  ;;  %v19337_v39 = vrot.slane %v6820_v29, %v16028_v5  ;;  %v4347_v52 = vcombine.low %v19083_v8, %v19271_v32  ;;  %v3786_v31 = vpop.permute.xlu0 %3785 }
 0x1db   :  { %v1531_v23 = vrot.slane %v26221_v54, 2  ;;  %3799 = vrot.lane.b32.xlu0 %v26222_v41, %s15883_s13  ;;  %v4363_v28 = vcombine.low %v19277_v53, %v19304_v20  ;;  %v7652_v33 = vsel %vm25834_vm10, %v7602_v46, %v19225_v17  ;;  %v26225_v25 = vcombine.low %v26224_v18, %v18615_v9 }
 0x1dc   :  { %26223 = vst [vmem:[#allocation49_spill] sm:$0xff] %v19337_v39  ;;  %v19352_v29 = vrot.slane %v4380_v0, %v16028_v5  ;;  %v19355_v54 = vrot.slane %v7386_v61, %v16028_v5  ;;  %v1537_v41 = vrot.slane %v1535_v27, 2  ;;  %v19361_v37 = vsel %vm16175_vm6, %v1534_v40, %v1535_v27  ;;  %v26227_v0 = vld [vmem:[#allocation22_spill] sm:$0xff] }
 0x1dd   :  { %v1533_v8 = vsel %vm16175_vm6, %v1531_v23, %v1532_v14  ;;  %v1540_v17 = vrot.slane %v1538_v10, 2  ;;  %v25573_v46 = vrot.slane %v19324_v58, 7  ;;  %v7702_v18 = vsel %vm25826_vm11, %v7652_v33, %v5232_v51  ;;  %v148_v33 = vld [vmem:[%s25399_s0 + $0x128] sm:$0xff] }
 0x1de   :  { %6933 = vrot.lane.b32.xlu1 %v26225_v25, %s15882_s11  ;;  %26226 = vst [vmem:[#allocation39_spill] sm:$0xff] %v19355_v54  ;;  %v26228_v25 = vcombine.low %v18241_v13, %v26227_v0  ;;  %v6920_v61 = vpop.permute.xlu1 %6919  ;;  %v19372_v14 = vrot.slane %v3400_v30, %v16028_v5  ;;  %v19375_v23 = vrot.slane %v7112_v15, %v16028_v5  ;;  %v4766_v0 = vpop.permute.xlu0 %4765 }
 0x1df   :  { %v7752_v27 = vsel %vm7738_vm12, %v7702_v18, %v6212_v45  ;;  %v19381_v40 = vrot.slane %v4347_v52, %v16028_v5  ;;  %v19384_v13 = vrot.slane %v4363_v28, %v16028_v5  ;;  %v26231_v45 = vcombine.low %v18680_v26, %v18691_v38 }
 0x1e0   :  { %4779 = vrot.lane.b32.xlu0 %v26228_v25, %s15880_s26  ;;  %26229 = vst [vmem:[#allocation54_spill] sm:$0xff] %v19375_v23  ;;  %v7802_v30 = vsel %vm7788_vm13, %v7752_v27, %v6644_v24  ;;  %v19398_v52 = vsel %vm16175_vm6, %v1537_v41, %v1538_v10  ;;  %v5777_v28 = vcombine.low %v1533_v8, %v19361_v37 }
 0x1e1   :  { %26230 = vst [vmem:[#allocation50_spill] sm:$0xff] %v19381_v40  ;;  %v19405_v24 = vsel %vm16175_vm6, %v1540_v17, %v25573_v46  ;;  %v2501_v18 = vcombine.low %v19271_v32, %v19277_v53  ;;  %v19411_v25 = vcombine.high %v19218_v59, %v19218_v59  ;;  %v780_v27 = vcombine.high %v148_v33, %v148_v33  ;;  %v26234_v32 = vld [vmem:[#allocation48_spill] sm:$0xff] }
 0x1e2   :  { %7241 = vrot.lane.b32.xlu1 %v26231_v45, %s15885_s16  ;;  %v26232_v45 = vld [vmem:[#allocation73_spill] sm:$0xff]  ;;  %v7228_v41 = vpop.permute.xlu1 %7227  ;;  %v3367_v17 = vcombine.low %v19116_v3, %v1533_v8  ;;  %v2502_v51 = vcombine.low %v19304_v20, %v19324_v58  ;;  %v19423_v53 = vrot.slane %v148_v33, %v16028_v5  ;;  %v26236_v46 = vcombine.low %v26234_v32, %v26235_v48  ;;  %v5234_v3 = vpop.permute.xlu0 %5233 }
 0x1e3   :  { %v26233_v10 = vcombine.low %v26232_v45, %v18516_v56  ;;  %v7852_v45 = vsel %vm7838_vm14, %v7802_v30, %v6920_v61  ;;  %v26237_v20 = vcombine.low %v18639_v63, %v18642_v1  ;;  %v5778_v8 = vcombine.low %v19398_v52, %v19405_v24 }
 0x1e4   :  { %v7603_v54 = vsel %vm7588_vm9, %v26236_v46, %v3786_v31  ;;  %v19441_v48 = vrot.slane %v780_v27, %v16028_v5  ;;  %v795_v31 = vcombine.high %v19423_v53, %v19423_v53  ;;  %v1554_v46 = vrot.slane %v19411_v25, 7  ;;  %v26239_v27 = vld [vmem:[#allocation47_spill] sm:$0xff] }
 0x1e5   :  { %5247 = vrot.lane.b32.xlu0 %v26233_v10, %s15881_s27  ;;  %v19447_v61 = vrot.slane %v5777_v28, %v16028_v5  ;;  %v2509_v33 = vrot.slane %v2501_v18, %v16028_v5  ;;  %v3374_v30 = vrot.slane %v19221_v22, %v16028_v5  ;;  %v1557_v32 = vrot.slane %v19423_v53, 7 }
 0x1e6   :  { %7481 = vrot.lane.b32.xlu1 %v26237_v20, %s15884_s2  ;;  %v7902_v20 = vsel %vm7888_vm15, %v7852_v45, %v7228_v41  ;;  %v26240_v10 = vcombine.low %v18632_v57, %v26239_v27  ;;  %v7468_v15 = vpop.permute.xlu1 %7467  ;;  %v2516_v23 = vrot.slane %v2502_v51, %v16028_v5  ;;  %v26241_v28 = vrot.slane %v19218_v59, 7  ;;  %v6214_v45 = vpop.permute.xlu0 %6213 }
 0x1e7   :  { %26238 = vst [vmem:[#allocation35_spill] sm:$0xff] %v19447_v61  ;;  %v1556_v7 = vrot.slane %v1554_v46, 2  ;;  %v7952_v18 = vsel %vm7938_vm0, %v7902_v20, %v7468_v15  ;;  %v3381_v22 = vrot.slane %v3367_v17, %v16028_v5  ;;  %v14275_v39 = vcombine.high %v19072_v60, %v18962_v6 }
 0x1e8   :  { %v1553_v12 = vrot.slane %v26241_v28, 2  ;;  %v1560_v41 = vrot.slane %v795_v31, 7  ;;  %14813 = vmatmul.mubr.msk.f32.gmra.mrb[26].mxu0 %vm25827_vm4, %v7952_v18  ;;  %v2519_v57 = vcombine.low %v19218_v59, %v19411_v25  ;;  %v2535_v51 = vcombine.low %v19423_v53, %v795_v31 }
 0x1e9   :  { %6227 = vrot.lane.b32.xlu0 %v26240_v10, %s15872_s12  ;;  %v1559_v10 = vrot.slane %v1557_v32, 2  ;;  %v7653_v17 = vsel %vm25834_vm10, %v7603_v54, %v4766_v0  ;;  %14815 = vmatprep.mubr.msk.f32.mxu0 %vm15888_vm8, %v25931_v42  ;;  %v5054_v18 = vcombine.low %v19324_v58, %v19164_v36  ;;  %v26245_v59 = vcombine.low %v26174_v11, %v26206_v34 }
 0x1ea   :  { %6659 = vrot.lane.b32.xlu1 %v26242_v62, %s15879_s3  ;;  %v1562_v60 = vrot.slane %v1560_v41, 2  ;;  %v6646_v62 = vpop.permute.xlu1 %6645  ;;  %v19484_v15 = vrot.slane %v5778_v8, %v16028_v5  ;;  %v19486_v54 = vcombine.low %v2509_v33, %v2516_v23  ;;  %v19490_v0 = vsel %vm16175_vm6, %v1553_v12, %v1554_v46  ;;  %v149_v12 = vld [vmem:[%s25399_s0 + $0x130] sm:$0xff]  ;;  %v3788_v8 = vpop.permute.xlu0 %3787 }
 0x1eb   :  { %v19494_v28 = vsel %vm16175_vm6, %v1556_v7, %v1557_v32  ;;  %v19497_v6 = vrot.slane %v14275_v39, %v16028_v5  ;;  %v4381_v11 = vcombine.low %v19411_v25, %v19423_v53  ;;  %v4397_v34 = vcombine.low %v795_v31, %v19441_v48  ;;  %v26249_v7 = vld [vmem:[#allocation43_spill] sm:$0xff] }
 0x1ec   :  { %26246 = vst [vmem:[#allocation22_spill] sm:$0xff] %v19484_v15  ;;  %26247 = vst [vmem:[#allocation73_spill] sm:$0xff] %v19486_v54  ;;  %v19504_v23 = vcombine.high %v19324_v58, %v19324_v58  ;;  %v26250_v46 = vcombine.low %v26249_v7, %v18724_v21  ;;  %v19514_v39 = vrot.slane %v2519_v57, %v16028_v5  ;;  %v26253_v31 = vrot.slane %v19441_v48, 7 }
 0x1ed   :  { %3801 = vrot.lane.b32.xlu0 %v26245_v59, %s15883_s13  ;;  %26248 = vst [vmem:[#allocation48_spill] sm:$0xff] %v19497_v6  ;;  %v19517_v25 = vrot.slane %v2535_v51, %v16028_v5  ;;  %v19521_v53 = vsel %vm16175_vm6, %v1559_v10, %v1560_v41  ;;  %v3401_v32 = vcombine.low %v19490_v0, %v19494_v28  ;;  %v26255_v57 = vrot.slane %v19324_v58, 7  ;;  %v26256_v10 = vld [vmem:[#allocation40_spill] sm:$0xff] }
 0x1ee   :  { %6935 = vrot.lane.b32.xlu1 %v26250_v46, %s15882_s11  ;;  %26251 = vst [vmem:[#allocation41_spill] sm:$0xff] %v19514_v39  ;;  %v19527_v33 = vsel %vm16175_vm6, %v1562_v60, %v26253_v31  ;;  %v19532_v59 = vrot.slane %v5054_v18, %v16028_v5  ;;  %v1544_v7 = vrot.slane %v19504_v23, 7  ;;  %v7703_v41 = vsel %vm25826_vm11, %v7653_v17, %v5234_v3  ;;  %v6922_v60 = vpop.permute.xlu1 %6921 }
 0x1ef   :  { %26252 = vst [vmem:[#allocation47_spill] sm:$0xff] %v19517_v25  ;;  %v1543_v51 = vrot.slane %v26255_v57, 2  ;;  %v26257_v46 = vcombine.low %v26256_v10, %v18513_v55  ;;  %v19544_v20 = vcombine.low %v3374_v30, %v3381_v22  ;;  %v796_v18 = vcombine.high %v149_v12, %v149_v12  ;;  %v19558_v10 = vpop.permute.xlu0 %4767 }
 0x1f0   :  { %26254 = vst [vmem:[#allocation43_spill] sm:$0xff] %v19532_v59  ;;  %v3417_v27 = vcombine.low %v19521_v53, %v19527_v33  ;;  %v19549_v57 = vrot.slane %v4381_v11, %v16028_v5  ;;  %v19552_v3 = vrot.slane %v4397_v34, %v16028_v5  ;;  %v19555_v17 = vrot.slane %v149_v12, %v16028_v5  ;;  %v26274_v59 = vld [vmem:[#allocation37_spill] sm:$0xff] }
 0x1f1   :  { %4781 = vrot.lane.b32.xlu0 %v26257_v46, %s15880_s26  ;;  %26258 = vst [vmem:[#allocation40_spill] sm:$0xff] %v19544_v20  ;;  %v7753_v55 = vsel %vm7738_vm12, %v7703_v41, %v6214_v45  ;;  %v26261_v30 = vcombine.low %v18816_v19, %v18819_v16  ;;  %v19569_v34 = vrot.slane %v796_v18, %v16028_v5  ;;  %v26263_v16 = vld [vmem:[#allocation31_spill] sm:$0xff]  ;;  %v26264_v46 = vld [vmem:[#allocation52_spill] sm:$0xff] }
 0x1f2   :  { %26259 = vst [vmem:[#allocation82_spill] sm:$0xff] %v19549_v57  ;;  %26260 = vst [vmem:[#allocation83_spill] sm:$0xff] %v19552_v3  ;;  %v7803_v12 = vsel %vm7788_vm13, %v7753_v55, %v6646_v62  ;;  %v19573_v45 = vrot.slane %v3401_v32, %v16028_v5  ;;  %v1545_v19 = vsel %vm16175_vm6, %v1543_v51, %v1544_v7  ;;  %v26266_v18 = vld [vmem:[#allocation59_spill] sm:$0xff]  ;;  %v7230_v62 = vpop.permute.xlu1 %7229  ;;  %v19589_v32 = vld [vmem:[#allocation5] ss:$0 sm:$0xff]  ;;  %v14253_v20 = vrot.slane %v19555_v17, 9 }
 0x1f3   :  { %7243 = vrot.lane.b32.xlu1 %v26261_v30, %s15885_s16  ;;  %v26265_v30 = vcombine.low %v26263_v16, %v26264_v46  ;;  %v26267_v11 = vcombine.low %v18639_v63, %v26266_v18  ;;  %v5795_v55 = vcombine.low %v19295_v43, %v19490_v0  ;;  %v14289_v51 = vcombine.high %v19324_v58, %v19164_v36  ;;  %v8212_v0 = vpop.f32.mrb[0].mxu0 }
 0x1f4   :  { %26262 = vst [vmem:[#allocation84_spill] sm:$0xff] %v19573_v45  ;;  %v19597_v7 = vcombine.high %v19555_v17, %v19555_v17  ;;  %v19604_v16 = vcombine.low %v19549_v57, %v19552_v3  ;;  %v19614_v36 = vcombine.high %v19441_v48, %v19441_v48  ;;  %v7853_v43 = vsel %vm7838_vm14, %v7803_v12, %v6922_v60  ;;  %v14775_v31 = vpop.f32.mrb[1].mxu0 }
 0x1f5   :  { %v19583_v22 = vsel %vm7588_vm9, %v26265_v30, %v3788_v8  ;;  %5249 = vrot.lane.b32.xlu0 %v26267_v11, %s15881_s27  ;;  %v19600_v8 = vrot.slane %v3417_v27, %v16028_v5  ;;  %v26270_v11 = vcombine.low %v19361_v37, %v19398_v52  ;;  %v5236_v30 = vpop.permute.xlu0 %5235  ;;  %v26272_v27 = vld [vmem:[#allocation32_spill] sm:$0xff]  ;;  %v3384_v18 = vcombine.low %v19405_v24, %v1545_v19  ;;  %v26275_v24 = vld [vmem:[#allocation45_spill] sm:$0xff] }
 0x1f6   :  { %26269 = vst [vmem:[#allocation52_spill] sm:$0xff] %v19604_v16  ;;  %v5794_v41 = vcombine.low %v1545_v19, %v19289_v35  ;;  %v19623_v37 = vcombine.high %v19569_v34, %v19569_v34  ;;  %v7903_v52 = vsel %vm7888_vm15, %v7853_v43, %v7230_v62  ;;  %v2536_v60 = vcombine.low %v19441_v48, %v19555_v17  ;;  %v7470_v35 = vpop.permute.xlu1 %7469 }
 0x1f7   :  { %26268 = vst [vmem:[#allocation31_spill] sm:$0xff] %v19600_v8  ;;  %v19610_v46 = vrot.slane %v26270_v11, %v16028_v5  ;;  %7483 = vrot.lane.b32.xlu1 %v26272_v27, %s15884_s2  ;;  %v8213_v11 = vadd.f32 %v19589_v32, %v8212_v0  ;;  %v26273_v12 = vrot.slane %v19441_v48, 7  ;;  %v26276_v6 = vcombine.low %v26274_v59, %v26275_v24 }
 0x1f8   :  { %v1566_v19 = vrot.slane %v19614_v36, 7  ;;  %v1570_v62 = vrot.slane %v19597_v7, 7  ;;  %v1573_v31 = vrot.slane %v19569_v34, 7  ;;  %v7953_v0 = vsel %vm7938_vm0, %v7903_v52, %v7470_v35 }
 0x1f9   :  { %26271 = vst [vmem:[#allocation59_spill] sm:$0xff] %v19610_v46  ;;  %v1565_v16 = vrot.slane %v26273_v12, 2  ;;  %6229 = vrot.lane.b32.xlu0 %v26276_v6, %s15872_s12  ;;  %v8456_v43 = vmax.f32 %v8213_v11, 0.0  ;;  %v2552_v12 = vcombine.low %v19597_v7, %v19569_v34  ;;  %v4364_v54 = vcombine.low %v19324_v58, %v19504_v23  ;;  %v6216_v59 = vpop.permute.xlu0 %6215  ;;  %v26277_v6 = vld [vmem:[#allocation34_spill] sm:$0xff]  ;;  %14816 = vmatmul.mubr.msk.f32.gmra.mrb[28].mxu0 %vm25827_vm4, %v7953_v0 }
 0x1fa   :  { %v26278_v24 = vcombine.low %v18615_v9, %v26277_v6  ;;  %v19650_v15 = vrot.slane %v5795_v55, %v16028_v5  ;;  %v1572_v11 = vrot.slane %v1570_v62, 2  ;;  %v1575_v61 = vrot.slane %v1573_v31, 2  ;;  %14818 = vmatprep.mubr.msk.f32.mxu0 %vm15888_vm8, %v25931_v42 }
 0x1fb   :  { %v19658_v23 = vrot.slane %v5794_v41, %v16028_v5  ;;  %v19661_v35 = vrot.slane %v14289_v51, %v16028_v5  ;;  %v19664_v0 = vrot.slane %v3384_v18, %v16028_v5  ;;  %v8554_v55 = vcombine.high %v8456_v43, %v8456_v43  ;;  %v8217_v18 = vpop.f32.mrb[2].mxu0 }
 0x1fc   :  { %6661 = vrot.lane.b32.xlu1 %v26278_v24, %s15879_s3  ;;  %26279 = vst [vmem:[#allocation32_spill] sm:$0xff] %v19650_v15  ;;  %v26283_v6 = vcombine.low %v18538_v49, %v18680_v26  ;;  %v6648_v24 = vpop.permute.xlu1 %6647  ;;  %v19671_v52 = vrot.slane %v2536_v60, %v16028_v5  ;;  %v19675_v41 = vsel %vm16175_vm6, %v1565_v16, %v1566_v19  ;;  %v26286_v19 = vld [vmem:[#allocation64_spill] sm:$0xff]  ;;  %v26289_v40 = vrot.slane %v19623_v37, 7 }
 0x1fd   :  { %26280 = vst [vmem:[#allocation37_spill] sm:$0xff] %v19658_v23  ;;  %26281 = vst [vmem:[#allocation45_spill] sm:$0xff] %v19661_v35  ;;  %v19679_v51 = vsel %vm16175_vm6, %v14253_v20, %v1570_v62  ;;  %v19682_v58 = vrot.slane %v2552_v12, %v16028_v5  ;;  %v19685_v9 = vrot.slane %v4364_v54, %v16028_v5  ;;  %v3790_v60 = vpop.permute.xlu0 %3789  ;;  %v26287_v62 = vld [vmem:[#allocation21_spill] sm:$0xff] }
 0x1fe   :  { %26282 = vst [vmem:[#allocation34_spill] sm:$0xff] %v19664_v0  ;;  %3803 = vrot.lane.b32.xlu0 %v26283_v6, %s15883_s13  ;;  %26284 = vst [vmem:[#allocation85_spill] sm:$0xff] %v19671_v52  ;;  %v14276_v49 = vcombine.high %v19441_v48, %v19555_v17  ;;  %v4414_v26 = vcombine.low %v19569_v34, %v19623_v37  ;;  %v19692_v16 = vrot.slane %v8456_v43, %v16028_v5  ;;  %v14778_v6 = vpop.f32.mrb[3].mxu0  ;;  %v26313_v23 = vld [vmem:[#allocation81_spill] sm:$0xff] }
 0x1ff   :  { %26285 = vst [vmem:[#allocation86_spill] sm:$0xff] %v19685_v9  ;;  %v8218_v20 = vadd.f32 %v19589_v32, %v8217_v18  ;;  %v26288_v12 = vcombine.low %v26286_v19, %v26287_v62  ;;  %v19701_v54 = vsel %vm16175_vm6, %v1572_v11, %v1573_v31  ;;  %v19707_v34 = vsel %vm16175_vm6, %v1575_v61, %v26289_v40  ;;  %v150_v6 = vld [vmem:[%s25399_s0 + $0x138] sm:$0xff]  ;;  %v26292_v18 = vld [vmem:[#allocation76_spill] sm:$0xff] }
 0x200   :  { %v7654_v43 = vsel %vm25834_vm10, %v19583_v22, %v19558_v10  ;;  %v3418_v31 = vcombine.low %v19675_v41, %v19679_v51  ;;  %v19719_v11 = vrot.slane %v8554_v55, %v16028_v5  ;;  %v26290_v61 = vcombine.low %v18516_v56, %v18639_v63  ;;  %v6924_v10 = vpop.permute.xlu1 %6923  ;;  %v26291_v62 = vld [vmem:[#allocation42_spill] sm:$0xff]  ;;  %v26303_v9 = vld [vmem:[#allocation28_spill] sm:$0xff] }
 0x201   :  { %6937 = vrot.lane.b32.xlu1 %v26288_v12, %s15882_s11  ;;  %v7704_v12 = vsel %vm25826_vm11, %v7654_v43, %v5236_v30  ;;  %v8457_v40 = vmax.f32 %v8218_v20, 0.0  ;;  %v3434_v30 = vcombine.low %v19701_v54, %v19707_v34  ;;  %v19736_v20 = vrot.slane %v14276_v49, %v16028_v5  ;;  %v4770_v22 = vpop.permute.xlu0 %4769 }
 0x202   :  { %4783 = vrot.lane.b32.xlu0 %v26290_v61, %s15880_s26  ;;  %v19739_v56 = vrot.slane %v4414_v26, %v16028_v5  ;;  %v7754_v43 = vsel %vm7738_vm12, %v7704_v12, %v6216_v59  ;;  %v26293_v55 = vcombine.low %v26291_v62, %v26292_v18  ;;  %v19752_v26 = vrot.slane %v3418_v31, %v16028_v5  ;;  %v26295_v12 = vld [vmem:[#allocation36_spill] sm:$0xff] }
 0x203   :  { %v8571_v61 = vcombine.high %v8457_v40, %v8457_v40  ;;  %v7804_v49 = vsel %vm7788_vm13, %v7754_v43, %v6648_v24  ;;  %v5811_v63 = vcombine.low %v19494_v28, %v19521_v53  ;;  %v813_v0 = vcombine.high %v150_v6, %v150_v6 }
 0x204   :  { %26294 = vst [vmem:[#allocation64_spill] sm:$0xff] %v19752_v26  ;;  %v7605_v46 = vsel %vm7588_vm9, %v26295_v12, %v3790_v60  ;;  %v7232_v24 = vpop.permute.xlu1 %7231  ;;  %v19766_v62 = vrot.slane %v150_v6, %v16028_v5  ;;  %v19769_v31 = vrot.slane %v3434_v30, %v16028_v5  ;;  %v5812_v53 = vcombine.low %v19527_v33, %v19675_v41  ;;  %v26298_v6 = vld [vmem:[#allocation56_spill] sm:$0xff] }
 0x205   :  { %7245 = vrot.lane.b32.xlu1 %v26293_v55, %s15885_s16  ;;  %v19761_v18 = vrot.slane %v8571_v61, %v16028_v5  ;;  %v19776_v60 = vrot.slane %v813_v0, %v16028_v5  ;;  %v5238_v43 = vpop.permute.xlu0 %5237  ;;  %v26299_v61 = vld [vmem:[#allocation61_spill] sm:$0xff]  ;;  %v19792_v41 = vrot.slane %v5811_v63, %v16028_v5 }
 0x206   :  { %5251 = vrot.lane.b32.xlu0 %v26272_v27, %s15881_s27  ;;  %26297 = vst [vmem:[#allocation42_spill] sm:$0xff] %v19769_v31  ;;  %v7854_v27 = vsel %vm7838_vm14, %v7804_v49, %v6924_v10  ;;  %v26300_v30 = vcombine.low %v26298_v6, %v26299_v61  ;;  %v19787_v12 = vcombine.high %v19766_v62, %v19766_v62  ;;  %v1579_v33 = vrot.slane %v19766_v62, 7 }
 0x207   :  { %26296 = vst [vmem:[#allocation21_spill] sm:$0xff] %v19761_v18  ;;  %v8587_v55 = vcombine.high %v19761_v18, %v19761_v18  ;;  %v7904_v0 = vsel %vm7888_vm15, %v7854_v27, %v7232_v24  ;;  %v6484_v10 = vcombine.low %v19441_v48, %v19614_v36  ;;  %v26301_v49 = vrot.slane %v19623_v37, 7 }
 0x208   :  { %v7472_v52 = vpop.permute.xlu1 %7471  ;;  %v2553_v24 = vcombine.low %v19623_v37, %v19766_v62  ;;  %v19807_v63 = vcombine.high %v19776_v60, %v19776_v60  ;;  %v1585_v48 = vrot.slane %v19776_v60, 7  ;;  %v1581_v27 = vrot.slane %v1579_v33, 2 }
 0x209   :  { %7485 = vrot.lane.b32.xlu1 %v26300_v30, %s15884_s2  ;;  %v1578_v28 = vrot.slane %v26301_v49, 2  ;;  %v9583_v61 = vmax.f32 %v19692_v16, %v8587_v55  ;;  %v26302_v30 = vld [vmem:[#allocation51_spill] sm:$0xff]  ;;  %v7954_v36 = vsel %vm7938_vm0, %v7904_v0, %v7472_v52  ;;  %v2569_v55 = vcombine.low %v19787_v12, %v19776_v60 }
 0x20a   :  { %v26304_v59 = vcombine.low %v26302_v30, %v26303_v9  ;;  %v1582_v49 = vrot.slane %v19787_v12, 7  ;;  %v26305_v9 = vld [vmem:[#allocation19_spill] sm:$0xff]  ;;  %v6218_v30 = vpop.permute.xlu0 %6217  ;;  %v26307_v37 = vcombine.low %v18724_v21, %v26286_v19  ;;  %14819 = vmatmul.mubr.msk.f32.gmra.mrb[30].mxu0 %vm25827_vm4, %v7954_v36  ;;  %v19823_v35 = vrot.slane %v5812_v53, %v16028_v5 }
 0x20b   :  { %v5064_v0 = vcombine.low %v19555_v17, %v19597_v7  ;;  %v14349_v15 = vrot.slane %v9583_v61, 9  ;;  %14821 = vmatprep.mubr.msk.f32.mxu0 %vm15888_vm8, %v25931_v42  ;;  %v19837_v19 = vrot.slane %v6484_v10, %v16028_v5  ;;  %v7655_v53 = vsel %vm25834_vm10, %v7605_v46, %v4770_v22  ;;  %v26308_v36 = vld [vmem:[#allocation79_spill] sm:$0xff]  ;;  %v8222_v10 = vpop.f32.mrb[4].mxu0 }
 0x20c   :  { %6231 = vrot.lane.b32.xlu0 %v26304_v59, %s15872_s12  ;;  %v19815_v59 = vsub.s32 0, %v26305_v9  ;;  %v19830_v9 = vrot.slane %v8457_v40, %v16028_v5  ;;  %v6650_v17 = vpop.permute.xlu1 %6649  ;;  %v19845_v7 = vrot.slane %v2553_v24, %v16028_v5  ;;  %v19849_v40 = vsel %vm16175_vm6, %v1578_v28, %v1579_v33  ;;  %v14781_v33 = vpop.f32.mrb[5].mxu0 }
 0x20d   :  { %6663 = vrot.lane.b32.xlu1 %v26307_v37, %s15879_s3  ;;  %v26309_v37 = vcombine.low %v18691_v38, %v26308_v36  ;;  %v19853_v52 = vsel %vm16175_vm6, %v1581_v27, %v1582_v49  ;;  %v19856_v46 = vrot.slane %v2569_v55, %v16028_v5  ;;  %v1584_v22 = vrot.slane %v1582_v49, 2  ;;  %v26318_v33 = vld [vmem:[#allocation78_spill] sm:$0xff] }
 0x20e   :  { %26306 = vst [vmem:[#allocation76_spill] sm:$0xff] %v19815_v59  ;;  %26310 = vst [vmem:[#allocation36_spill] sm:$0xff] %v19845_v7  ;;  %v1587_v21 = vrot.slane %v1585_v48, 2  ;;  %v1588_v38 = vrot.slane %v19807_v63, 7  ;;  %v3792_v36 = vpop.permute.xlu0 %3791  ;;  %v8223_v24 = vadd.f32 %v19589_v32, %v8222_v10  ;;  %v19869_v49 = vrot.slane %v5064_v0, %v16028_v5 }
 0x20f   :  { %26311 = vst [vmem:[#allocation56_spill] sm:$0xff] %v19856_v46  ;;  %v19873_v18 = vmax.f32 %v9583_v61, %v14349_v15  ;;  %v3435_v10 = vcombine.low %v19849_v40, %v19853_v52  ;;  %v26319_v55 = vcombine.low %v18642_v1, %v26318_v33  ;;  %v151_v61 = vld [vmem:[%s25399_s0 + $0x140] sm:$0xff]  ;;  %v19896_v1 = vsel %vm16175_vm6, %v1584_v22, %v1585_v48 }
 0x210   :  { %3805 = vrot.lane.b32.xlu0 %v26309_v37, %s15883_s13  ;;  %v26312_v37 = vld [vmem:[#allocation80_spill] sm:$0xff]  ;;  %26317 = vst [vmem:[#allocation61_spill] sm:$0xff] %v19869_v49  ;;  %v6926_v0 = vpop.permute.xlu1 %6925  ;;  %v829_v22 = vcombine.high %v151_v61, %v151_v61 }
 0x211   :  { %v26314_v28 = vcombine.low %v26312_v37, %v26313_v23  ;;  %v4415_v23 = vcombine.low %v19766_v62, %v19787_v12  ;;  %v7705_v37 = vsel %vm25826_vm11, %v7655_v53, %v5238_v43  ;;  %v19900_v12 = vsel %vm16175_vm6, %v1587_v21, %v1588_v38 }
 0x212   :  { %v7755_v62 = vsel %vm7738_vm12, %v7705_v37, %v6218_v30  ;;  %v4772_v33 = vpop.permute.xlu0 %4771  ;;  %v26320_v30 = vcombine.low %v19158_v44, %v19171_v50  ;;  %v10261_v48 = vrot.slane %v19873_v18, %v19815_v59  ;;  %v19913_v21 = vrot.slane %v3435_v10, %v16028_v5  ;;  %v26325_v37 = vld [vmem:[#allocation57_spill] sm:$0xff] }
 0x213   :  { %6939 = vrot.lane.b32.xlu1 %v26314_v28, %s15882_s11  ;;  %v8458_v28 = vmax.f32 %v8223_v24, 0.0  ;;  %v7805_v53 = vsel %vm7788_vm13, %v7755_v62, %v6650_v17  ;;  %v19916_v17 = vrot.slane %v4415_v23, %v16028_v5  ;;  %v26322_v50 = vcombine.high %v19692_v16, %v19692_v16  ;;  %v26323_v62 = vld [vmem:[#allocation63_spill] sm:$0xff]  ;;  %v26326_v23 = vld [vmem:[#allocation60_spill] sm:$0xff] }
 0x214   :  { %4785 = vrot.lane.b32.xlu0 %v26319_v55, %s15880_s26  ;;  %26321 = vst [vmem:[#allocation51_spill] sm:$0xff] %v19913_v21  ;;  %v7234_v18 = vpop.permute.xlu1 %7233  ;;  %v3451_v10 = vcombine.low %v19896_v1, %v19900_v12  ;;  %v26327_v15 = vcombine.low %v26325_v37, %v26326_v23  ;;  %v4431_v16 = vcombine.low %v19776_v60, %v19807_v63  ;;  %v26329_v37 = vld [vmem:[#allocation68_spill] sm:$0xff]  ;;  %v26395_v21 = vld [vmem:[#allocation37_spill] sm:$0xff] }
 0x215   :  { %v8588_v24 = vcombine.high %v8458_v28, %v8458_v28  ;;  %v8595_v55 = vrot.slane %v8458_v28, %v16028_v5  ;;  %v5828_v63 = vcombine.low %v19679_v51, %v19701_v54  ;;  %v19965_v54 = vcombine.low %v19682_v58, %v19845_v7 }
 0x216   :  { %v7606_v43 = vsel %vm7588_vm9, %v26327_v15, %v3792_v36  ;;  %v5240_v39 = vpop.permute.xlu0 %5239  ;;  %v26330_v36 = vld [vmem:[#allocation67_spill] sm:$0xff]  ;;  %v19961_v51 = vrot.slane %v3451_v10, %v16028_v5  ;;  %v19980_v10 = vrot.slane %v4431_v16, %v16028_v5  ;;  %v26343_v16 = vcombine.low %v19259_v4, %v19312_v47  ;;  %v152_v4 = vld [vmem:[%s25399_s0 + $0x148] sm:$0xff] }
 0x217   :  { %7247 = vrot.lane.b32.xlu1 %v26320_v30, %s15885_s16  ;;  %v8602_v38 = vrot.slane %v8588_v24, %v16028_v5  ;;  %v8603_v28 = vcombine.high %v8595_v55, %v8595_v55  ;;  %v9584_v44 = vmax.f32 %v26322_v50, %v8595_v55  ;;  %v26324_v30 = vcombine.low %v26298_v6, %v26323_v62 }
 0x218   :  { %v7855_v24 = vsel %vm7838_vm14, %v7805_v53, %v6926_v0  ;;  %v19936_v55 = vrot.slane %v151_v61, %v16028_v5  ;;  %v26328_v62 = vcombine.high %v19719_v11, %v19719_v11  ;;  %v26331_v15 = vcombine.low %v26329_v37, %v26330_v36  ;;  %v26333_v37 = vld [vmem:[#allocation69_spill] sm:$0xff]  ;;  %26335 = vst [vmem:[#allocation28_spill] sm:$0xff] %v19961_v51 }
 0x219   :  { %5253 = vrot.lane.b32.xlu0 %v26324_v30, %s15881_s27  ;;  %v8604_v50 = vcombine.high %v8602_v38, %v8602_v38  ;;  %v9585_v6 = vmax.f32 %v19719_v11, %v8603_v28  ;;  %v14350_v27 = vrot.slane %v9584_v44, 9  ;;  %v7905_v0 = vsel %vm7888_vm15, %v7855_v24, %v7234_v18  ;;  %v7474_v18 = vpop.permute.xlu1 %7473  ;;  %26336 = vst [vmem:[#allocation79_spill] sm:$0xff] %v19965_v54 }
 0x21a   :  { %v9586_v30 = vmax.f32 %v26328_v62, %v8602_v38  ;;  %v5829_v61 = vcombine.low %v19707_v34, %v19849_v40  ;;  %v19952_v53 = vrot.slane %v829_v22, %v16028_v5  ;;  %v26332_v62 = vld [vmem:[#allocation70_spill] sm:$0xff]  ;;  %v7955_v24 = vsel %vm7938_vm0, %v7905_v0, %v7474_v18  ;;  %26340 = vst [vmem:[#allocation80_spill] sm:$0xff] %v19980_v10  ;;  %v8227_v18 = vpop.f32.mrb[6].mxu0 }
 0x21b   :  { %7487 = vrot.lane.b32.xlu1 %v26331_v15, %s15884_s2  ;;  %v9587_v11 = vmax.f32 %v19830_v9, %v8604_v50  ;;  %v14351_v38 = vrot.slane %v9585_v6, 9  ;;  %v10074_v23 = vmax.f32 %v9584_v44, %v14350_v27  ;;  %v26334_v36 = vcombine.low %v26332_v62, %v26333_v37  ;;  %v6220_v44 = vpop.permute.xlu0 %6219  ;;  %v26337_v50 = vld [vmem:[#allocation72_spill] sm:$0xff]  ;;  %v26338_v15 = vld [vmem:[#allocation71_spill] sm:$0xff]  ;;  %14822 = vmatmul.mubr.msk.f32.gmra.mrb[32].mxu0 %vm25827_vm4, %v7955_v24  ;;  %v14784_v24 = vpop.f32.mrb[7].mxu0 }
 0x21c   :  { %v14352_v28 = vrot.slane %v9586_v30, 9  ;;  %v19969_v34 = vcombine.high %v19936_v55, %v19936_v55  ;;  %v26339_v0 = vcombine.low %v26337_v50, %v26338_v15  ;;  %14824 = vmatprep.mubr.msk.f32.mxu0 %vm15888_vm8, %v25931_v42 }
 0x21d   :  { %6233 = vrot.lane.b32.xlu0 %v26334_v36, %s15872_s12  ;;  %v10075_v40 = vmax.f32 %v9585_v6, %v14351_v38  ;;  %v10265_v22 = vrot.slane %v10074_v23, %v19815_v59  ;;  %v19983_v6 = vrot.slane %v5828_v63, %v16028_v5  ;;  %v6652_v37 = vpop.permute.xlu1 %6651  ;;  %v19999_v63 = vcombine.high %v19952_v53, %v19952_v53 }
 0x21e   :  { %v10076_v27 = vmax.f32 %v9586_v30, %v14352_v28  ;;  %v19986_v30 = vrot.slane %v5829_v61, %v16028_v5  ;;  %v14353_v61 = vrot.slane %v9587_v11, 9  ;;  %v7656_v36 = vsel %vm25834_vm10, %v7606_v43, %v4772_v33  ;;  %v26346_v43 = vld [vmem:[#allocation49_spill] sm:$0xff]  ;;  %v26347_v33 = vld [vmem:[#allocation46_spill] sm:$0xff] }
 0x21f   :  { %6665 = vrot.lane.b32.xlu1 %v26339_v0, %s15879_s3  ;;  %26341 = vst [vmem:[#allocation81_spill] sm:$0xff] %v19983_v6  ;;  %v10269_v28 = vrot.slane %v10075_v40, %v19815_v59  ;;  %v10459_v62 = vsel %vm10458_vm5, %v10265_v22, %v10261_v48  ;;  %v26348_v38 = vcombine.low %v26346_v43, %v26347_v33  ;;  %v1592_v15 = vrot.slane %v19969_v34, 7 }
 0x220   :  { %26342 = vst [vmem:[#allocation78_spill] sm:$0xff] %v19986_v30  ;;  %v10273_v23 = vrot.slane %v10076_v27, %v19815_v59  ;;  %v26351_v27 = vld [vmem:[#allocation27_spill] sm:$0xff]  ;;  %v2586_v24 = vcombine.low %v19952_v53, %v19999_v63 }
 0x221   :  { %3807 = vrot.lane.b32.xlu0 %v26343_v16, %s15883_s13  ;;  %v10460_v47 = vsel %vm1188_vm1, %v10269_v28, %v10459_v62  ;;  %v10562_v50 = vsel %vm10458_vm5, %v10269_v28, %v10265_v22  ;;  %v3794_v16 = vpop.permute.xlu0 %3793  ;;  %v8228_v62 = vadd.f32 %v19589_v32, %v8227_v18  ;;  %v2570_v22 = vcombine.low %v19936_v55, %v19969_v34  ;;  %v6928_v43 = vpop.permute.xlu1 %6927 }
 0x222   :  { %v10676_v0 = vsel %vm10458_vm5, %v10273_v23, %v10269_v28  ;;  %v20018_v48 = vsel %vm10461_vm7, %v10273_v23, %v10460_v47  ;;  %v10563_v40 = vsel %vm1188_vm1, %v10273_v23, %v10562_v50  ;;  %v26350_v28 = vld [vmem:[#allocation30_spill] sm:$0xff]  ;;  %v20033_v47 = vrot.slane %v152_v4, %v16028_v5 }
 0x223   :  { %6941 = vrot.lane.b32.xlu1 %v26348_v38, %s15882_s11  ;;  %26349 = vst [vmem:[#allocation63_spill] sm:$0xff] %v20018_v48  ;;  %v26352_v54 = vcombine.low %v26350_v28, %v26351_v27  ;;  %v1595_v23 = vrot.slane %v19952_v53, 7  ;;  %v10077_v18 = vmax.f32 %v9587_v11, %v14353_v61  ;;  %v8459_v50 = vmax.f32 %v8228_v62, 0.0  ;;  %v26353_v38 = vld [vmem:[#allocation54_spill] sm:$0xff] }
 0x224   :  { %v1598_v27 = vrot.slane %v19999_v63, 7  ;;  %v26354_v33 = vcombine.low %v26353_v38, %v19372_v14  ;;  %v14254_v11 = vrot.slane %v19936_v55, 9  ;;  %v1594_v61 = vrot.slane %v1592_v15, 2 }
 0x225   :  { %4787 = vrot.lane.b32.xlu0 %v26352_v54, %s15880_s26  ;;  %v7706_v54 = vsel %vm25826_vm11, %v7656_v36, %v5240_v39  ;;  %v20040_v28 = vpop.permute.xlu0 %4773  ;;  %v8612_v48 = vrot.slane %v8459_v50, %v16028_v5  ;;  %v20052_v45 = vrot.slane %v2570_v22, %v16028_v5  ;;  %v846_v39 = vcombine.high %v152_v4, %v152_v4  ;;  %v26356_v36 = vld [vmem:[#allocation50_spill] sm:$0xff] }
 0x226   :  { %v7756_v62 = vsel %vm7738_vm12, %v7706_v54, %v6220_v44  ;;  %v26357_v30 = vcombine.low %v26356_v36, %v19384_v13  ;;  %v20059_v38 = vrot.slane %v2586_v24, %v16028_v5  ;;  %v1597_v31 = vrot.slane %v1595_v23, 2  ;;  %v26361_v24 = vld [vmem:[#allocation39_spill] sm:$0xff] }
 0x227   :  { %7249 = vrot.lane.b32.xlu1 %v26354_v33, %s15885_s16  ;;  %26355 = vst [vmem:[#allocation57_spill] sm:$0xff] %v20052_v45  ;;  %v7236_v33 = vpop.permute.xlu1 %7235  ;;  %v1600_v3 = vrot.slane %v1598_v27, 2  ;;  %v20063_v44 = vrot.slane %v10077_v18, %v19815_v59  ;;  %v7806_v22 = vsel %vm7788_vm13, %v7756_v62, %v6652_v37  ;;  %v8620_v54 = vcombine.high %v8612_v48, %v8612_v48  ;;  %v26363_v18 = vld [vmem:[#allocation21_spill] sm:$0xff] }
 0x228   :  { %26358 = vst [vmem:[#allocation60_spill] sm:$0xff] %v20059_v38  ;;  %v26360_v4 = vcombine.high %v19830_v9, %v19830_v9  ;;  %v26362_v7 = vcombine.low %v26361_v24, %v19352_v29  ;;  %v20076_v6 = vsel %vm16175_vm6, %v14254_v11, %v1592_v15  ;;  %v20080_v37 = vsel %vm16175_vm6, %v1594_v61, %v1595_v23  ;;  %v26365_v15 = vld [vmem:[#allocation22_spill] sm:$0xff] }
 0x229   :  { %5255 = vrot.lane.b32.xlu0 %v26357_v30, %s15881_s27  ;;  %26359 = vst [vmem:[#allocation68_spill] sm:$0xff] %v20063_v44  ;;  %v7856_v30 = vsel %vm7838_vm14, %v7806_v22, %v6928_v43  ;;  %v5242_v57 = vpop.permute.xlu0 %5241  ;;  %v5073_v9 = vcombine.low %v19776_v60, %v19936_v55  ;;  %v9589_v43 = vmax.f32 %v26363_v18, %v8620_v54 }
 0x22a   :  { %v9588_v49 = vmax.f32 %v26360_v4, %v8612_v48  ;;  %v8605_v48 = vcombine.high %v8459_v50, %v8459_v50  ;;  %v4432_v22 = vcombine.low %v19969_v34, %v19952_v53  ;;  %v26364_v4 = vld [vmem:[#allocation35_spill] sm:$0xff]  ;;  %v20094_v23 = vsel %vm16175_vm6, %v1597_v31, %v1598_v27  ;;  %v26368_v31 = vld [vmem:[#allocation62_spill] sm:$0xff] }
 0x22b   :  { %7489 = vrot.lane.b32.xlu1 %v26362_v7, %s15884_s2  ;;  %v7906_v7 = vsel %vm7888_vm15, %v7856_v30, %v7236_v33  ;;  %v26366_v11 = vcombine.low %v26364_v4, %v26365_v15  ;;  %v7476_v24 = vpop.permute.xlu1 %7475  ;;  %v26367_v50 = vrot.slane %v20033_v47, 7  ;;  %v4448_v53 = vcombine.low %v19999_v63, %v20033_v47 }
 0x22c   :  { %v14354_v62 = vrot.slane %v9588_v49, 9  ;;  %v7956_v33 = vsel %vm7938_vm0, %v7906_v7, %v7476_v24  ;;  %v20108_v30 = vrot.slane %v846_v39, %v16028_v5  ;;  %v7607_v27 = vsel %vm7588_vm9, %v26368_v31, %v3794_v16  ;;  %v26371_v7 = vld [vmem:[#allocation40_spill] sm:$0xff] }
 0x22d   :  { %6235 = vrot.lane.b32.xlu0 %v26366_v11, %s15872_s12  ;;  %v20100_v61 = vsel %vm16175_vm6, %v1600_v3, %v26367_v50  ;;  %v10564_v18 = vsel %vm10461_vm7, %v20063_v44, %v10563_v40  ;;  %v10677_v3 = vsel %vm1188_vm1, %v20063_v44, %v10676_v0  ;;  %v6222_v4 = vpop.permute.xlu0 %6221  ;;  %14825 = vmatmul.mubr.msk.f32.gmra.mrb[34].mxu0 %vm25827_vm4, %v7956_v33  ;;  %v20132_v0 = vld [vmem:[%s25399_s0 + $0x150] sm:$0xff]  ;;  %v14355_v50 = vrot.slane %v9589_v43, 9  ;;  %v8232_v33 = vpop.f32.mrb[8].mxu0 }
 0x22e   :  { %v10078_v34 = vmax.f32 %v9588_v49, %v14354_v62  ;;  %v26369_v49 = vld [vmem:[#allocation73_spill] sm:$0xff]  ;;  %14827 = vmatprep.mubr.msk.f32.mxu0 %vm15888_vm8, %v25931_v42  ;;  %v3452_v16 = vcombine.low %v20076_v6, %v20080_v37  ;;  %v3468_v40 = vcombine.low %v20094_v23, %v20100_v61  ;;  %v20127_v39 = vrot.slane %v5073_v9, %v16028_v5  ;;  %v14787_v44 = vpop.f32.mrb[9].mxu0 }
 0x22f   :  { %6667 = vrot.lane.b32.xlu1 %v26369_v49, %s15879_s3  ;;  %v20135_v62 = vrot.slane %v8605_v48, %v16028_v5  ;;  %v6654_v15 = vpop.permute.xlu1 %6653  ;;  %v20140_v11 = vrot.slane %v4432_v22, %v16028_v5  ;;  %v20143_v24 = vrot.slane %v4448_v53, %v16028_v5  ;;  %v20147_v9 = vcombine.high %v20033_v47, %v20033_v47 }
 0x230   :  { %v10525_v63 = vrot.slane %v10078_v34, %v19815_v59  ;;  %26370 = vst [vmem:[#allocation67_spill] sm:$0xff] %v20127_v39  ;;  %v5845_v31 = vcombine.low %v19853_v52, %v19896_v1  ;;  %v8233_v53 = vadd.f32 %v19589_v32, %v8232_v33  ;;  %v7657_v52 = vsel %vm25834_vm10, %v7607_v27, %v20040_v28 }
 0x231   :  { %3809 = vrot.lane.b32.xlu0 %v26371_v7, %s15883_s13  ;;  %26372 = vst [vmem:[#allocation70_spill] sm:$0xff] %v20140_v11  ;;  %26373 = vst [vmem:[#allocation69_spill] sm:$0xff] %v20143_v24  ;;  %v20157_v22 = vpop.permute.xlu0 %3795  ;;  %v26376_v7 = vld [vmem:[#allocation41_spill] sm:$0xff]  ;;  %v20175_v1 = vrot.slane %v3452_v16, %v16028_v5  ;;  %v20178_v33 = vrot.slane %v3468_v40, %v16028_v5  ;;  %v1604_v27 = vrot.slane %v20147_v9, 7 }
 0x232   :  { %v20150_v34 = vsel %vm1190_vm2, %v10525_v63, %v10564_v18  ;;  %v20153_v48 = vsel %vm10461_vm7, %v10525_v63, %v10677_v3  ;;  %v26377_v54 = vcombine.low %v26376_v7, %v19517_v25  ;;  %v5846_v18 = vcombine.low %v19900_v12, %v20076_v6 }
 0x233   :  { %26374 = vst [vmem:[#allocation72_spill] sm:$0xff] %v20150_v34  ;;  %26375 = vst [vmem:[#allocation49_spill] sm:$0xff] %v20153_v48  ;;  %v14290_v3 = vcombine.high %v19776_v60, %v19936_v55  ;;  %v20170_v63 = vrot.slane %v20132_v0, %v16028_v5  ;;  %v7707_v60 = vsel %vm25826_vm11, %v7657_v52, %v5242_v57  ;;  %v26380_v55 = vld [vmem:[#allocation48_spill] sm:$0xff]  ;;  %v6930_v28 = vpop.permute.xlu1 %6929  ;;  %v8460_v52 = vmax.f32 %v8233_v53, 0.0 }
 0x234   :  { %6943 = vrot.lane.b32.xlu1 %v26377_v54, %s15882_s11  ;;  %26378 = vst [vmem:[#allocation30_spill] sm:$0xff] %v20175_v1  ;;  %26379 = vst [vmem:[#allocation27_spill] sm:$0xff] %v20178_v33  ;;  %v26381_v6 = vcombine.low %v26380_v55, %v26356_v36  ;;  %v20191_v54 = vcombine.high %v20108_v30, %v20108_v30  ;;  %v20194_v16 = vmax.f32 %v9589_v43, %v14355_v50  ;;  %v26394_v33 = vld [vmem:[#allocation52_spill] sm:$0xff] }
 0x235   :  { %v20198_v40 = vcombine.low %v20140_v11, %v20143_v24  ;;  %v20202_v57 = vcombine.high %v20170_v63, %v20170_v63  ;;  %v1607_v36 = vrot.slane %v20108_v30, 7  ;;  %v4776_v55 = vpop.permute.xlu0 %4775  ;;  %v20210_v43 = vrot.slane %v5845_v31, %v16028_v5 }
 0x236   :  { %4789 = vrot.lane.b32.xlu0 %v26381_v6, %s15880_s26  ;;  %26382 = vst [vmem:[#allocation54_spill] sm:$0xff] %v20191_v54  ;;  %26383 = vst [vmem:[#allocation50_spill] sm:$0xff] %v20194_v16  ;;  %v26385_v6 = vld [vmem:[#allocation84_spill] sm:$0xff]  ;;  %v20213_v50 = vrot.slane %v5846_v18, %v16028_v5  ;;  %v20216_v12 = vrot.slane %v14290_v3, %v16028_v5  ;;  %v7757_v34 = vsel %vm7738_vm12, %v7707_v60, %v6222_v4 }
 0x237   :  { %26384 = vst [vmem:[#allocation39_spill] sm:$0xff] %v20198_v40  ;;  %v26386_v44 = vcombine.low %v26385_v6, %v19600_v8  ;;  %26387 = vst [vmem:[#allocation21_spill] sm:$0xff] %v20210_v43  ;;  %v26390_v48 = vrot.slane %v20033_v47, 7  ;;  %v1606_v40 = vrot.slane %v1604_v27, 2  ;;  %v7238_v39 = vpop.permute.xlu1 %7237  ;;  %v2587_v18 = vcombine.low %v20033_v47, %v20147_v9 }
 0x238   :  { %26388 = vst [vmem:[#allocation35_spill] sm:$0xff] %v20213_v50  ;;  %26389 = vst [vmem:[#allocation22_spill] sm:$0xff] %v20216_v12  ;;  %v2603_v3 = vcombine.low %v20108_v30, %v20170_v63  ;;  %v1609_v4 = vrot.slane %v1607_v36, 2  ;;  %v1610_v60 = vrot.slane %v20191_v54, 7  ;;  %v14255_v45 = vrot.slane %v20170_v63, 9  ;;  %v26396_v54 = vld [vmem:[#allocation32_spill] sm:$0xff] }
 0x239   :  { %7251 = vrot.lane.b32.xlu1 %v26386_v44, %s15885_s16  ;;  %v1603_v49 = vrot.slane %v26390_v48, 2  ;;  %v26391_v44 = vld [vmem:[#allocation43_spill] sm:$0xff]  ;;  %v26393_v48 = vld [vmem:[#allocation42_spill] sm:$0xff]  ;;  %v8622_v8 = vcombine.high %v8460_v52, %v8460_v52  ;;  %v5244_v47 = vpop.permute.xlu0 %5243  ;;  %v20246_v16 = vrot.slane %v8460_v52, %v16028_v5  ;;  %v26397_v50 = vcombine.low %v26395_v21, %v26396_v54 }
 0x23a   :  { %v26392_v31 = vcombine.low %v26391_v44, %v19352_v29  ;;  %v20261_v52 = vrot.slane %v2587_v18, %v16028_v5  ;;  %v4449_v21 = vcombine.low %v20147_v9, %v20108_v30  ;;  %v14277_v54 = vcombine.high %v20108_v30, %v20170_v63  ;;  %v26404_v9 = vld [vmem:[#allocation45_spill] sm:$0xff] }
 0x23b   :  { %v1605_v44 = vsel %vm16175_vm6, %v1603_v49, %v1604_v27  ;;  %v7478_v53 = vpop.permute.xlu1 %7477  ;;  %v20268_v49 = vsel %vm16175_vm6, %v1609_v4, %v1610_v60  ;;  %v26405_v4 = vcombine.low %v26404_v9, %v26376_v7 }
 0x23c   :  { %5257 = vrot.lane.b32.xlu0 %v26392_v31, %s15881_s27  ;;  %v7807_v31 = vsel %vm7788_vm13, %v7757_v34, %v6654_v15  ;;  %v20253_v15 = vsel %vm16175_vm6, %v1606_v40, %v1607_v36  ;;  %26398 = vst [vmem:[#allocation62_spill] sm:$0xff] %v20261_v52  ;;  %v20284_v40 = vld [vmem:[%s25399_s0 + $0x158] sm:$0xff] }
 0x23d   :  { %7491 = vrot.lane.b32.xlu1 %v26394_v33, %s15884_s2  ;;  %v7857_v24 = vsel %vm7838_vm14, %v7807_v31, %v6930_v28  ;;  %v20264_v28 = vrot.slane %v2603_v3, %v16028_v5  ;;  %v26401_v36 = vld [vmem:[#allocation23_spill] sm:$0xff]  ;;  %v6224_v3 = vpop.permute.xlu0 %6223  ;;  %v3469_v60 = vcombine.low %v1605_v44, %v20253_v15  ;;  %v20321_v9 = vrot.slane %v20284_v40, %v16028_v5 }
 0x23e   :  { %v7907_v34 = vsel %vm7888_vm15, %v7857_v24, %v7238_v39  ;;  %v26400_v39 = vrot.slane %v20202_v57, 7 }
 0x23f   :  { %26399 = vst [vmem:[#allocation40_spill] sm:$0xff] %v20264_v28  ;;  %v7957_v27 = vsel %vm7938_vm0, %v7907_v34, %v7478_v53 }
 0x240   :  { %6237 = vrot.lane.b32.xlu0 %v26397_v50, %s15872_s12  ;;  %v20275_v24 = vsel %vm16175_vm6, %v14255_v45, %v26400_v39  ;;  %v26402_v50 = vld [vmem:[#allocation20_spill] sm:$0xff]  ;;  %v20292_v45 = vrot.slane %v8622_v8, %v16028_v5  ;;  %14828 = vmatmul.mubr.msk.f32.gmra.mrb[36].mxu0 %vm25827_vm4, %v7957_v27  ;;  %v26406_v39 = vld [vmem:[#allocation59_spill] sm:$0xff] }
 0x241   :  { %v26403_v53 = vcombine.low %v26401_v36, %v26402_v50  ;;  %6669 = vrot.lane.b32.xlu1 %v26405_v4, %s15879_s3  ;;  %14830 = vmatprep.mubr.msk.f32.mxu0 %vm15888_vm8, %v25931_v42  ;;  %v26407_v36 = vld [vmem:[#allocation34_spill] sm:$0xff]  ;;  %v6656_v50 = vpop.permute.xlu1 %6655  ;;  %v20324_v4 = vrot.slane %v4449_v21, %v16028_v5  ;;  %v26410_v21 = vld [vmem:[#allocation85_spill] sm:$0xff] }
 0x242   :  { %v26408_v27 = vcombine.low %v26406_v39, %v26407_v36  ;;  %v20327_v39 = vrot.slane %v14277_v54, %v16028_v5  ;;  %v5863_v36 = vcombine.low %v20100_v61, %v1605_v44  ;;  %v26411_v31 = vcombine.low %v26410_v21, %v19682_v58  ;;  %v26412_v58 = vld [vmem:[#allocation86_spill] sm:$0xff] }
 0x243   :  { %v7608_v18 = vsel %vm7588_vm9, %v26403_v53, %v20157_v22  ;;  %v862_v22 = vcombine.high %v20132_v0, %v20132_v0  ;;  %v8237_v0 = vpop.f32.mrb[10].mxu0  ;;  %v20344_v61 = vrot.slane %v3469_v60, %v16028_v5  ;;  %v20368_v21 = vcombine.low %v20059_v38, %v20261_v52 }
 0x244   :  { %v7658_v34 = vsel %vm25834_vm10, %v7608_v18, %v4776_v55  ;;  %3811 = vrot.lane.b32.xlu0 %v26408_v27, %s15883_s13  ;;  %v3485_v55 = vcombine.low %v20268_v49, %v20275_v24  ;;  %v5862_v18 = vcombine.low %v20080_v37, %v20094_v23  ;;  %26409 = vst [vmem:[#allocation48_spill] sm:$0xff] %v20327_v39  ;;  %v20336_v23 = vpop.permute.xlu0 %3797  ;;  %v14790_v54 = vpop.f32.mrb[11].mxu0 }
 0x245   :  { %v20331_v27 = vrot.slane %v862_v22, %v16028_v5  ;;  %v7708_v37 = vsel %vm25826_vm11, %v7658_v34, %v5244_v47  ;;  %v8238_v53 = vadd.f32 %v19589_v32, %v8237_v0  ;;  %6945 = vrot.lane.b32.xlu1 %v26411_v31, %s15882_s11  ;;  %v20352_v47 = vcombine.high %v20321_v9, %v20321_v9  ;;  %v6932_v60 = vpop.permute.xlu1 %6931 }
 0x246   :  { %v1623_v22 = vrot.slane %v20321_v9, 7  ;;  %v26413_v31 = vcombine.low %v19384_v13, %v26412_v58  ;;  %v20361_v54 = vrot.slane %v3485_v55, %v16028_v5  ;;  %v20364_v8 = vrot.slane %v5862_v18, %v16028_v5  ;;  %26415 = vst [vmem:[#allocation43_spill] sm:$0xff] %v20368_v21  ;;  %v26416_v58 = vld [vmem:[#allocation75_spill] sm:$0xff] }
 0x247   :  { %v20348_v44 = vcombine.high %v20331_v27, %v20331_v27  ;;  %v1617_v34 = vrot.slane %v20331_v27, 7  ;;  %v8461_v0 = vmax.f32 %v8238_v53, 0.0  ;;  %v20373_v53 = vrot.slane %v5863_v36, %v16028_v5 }
 0x248   :  { %4791 = vrot.lane.b32.xlu0 %v26413_v31, %s15880_s26  ;;  %26414 = vst [vmem:[#allocation84_spill] sm:$0xff] %v20361_v54  ;;  %v26417_v31 = vld [vmem:[#allocation53_spill] sm:$0xff]  ;;  %v20382_v12 = vpop.permute.xlu0 %4777  ;;  %v26418_v21 = vcombine.low %v19752_v26, %v26393_v48  ;;  %v26419_v36 = vrot.slane %v20202_v57, 7  ;;  %v7758_v13 = vsel %vm7738_vm12, %v7708_v37, %v6224_v3  ;;  %v879_v37 = vcombine.high %v20284_v40, %v20284_v40 }
 0x249   :  { %v2451_v55 = vcombine.low %v26417_v31, %v26416_v58  ;;  %v8639_v28 = vcombine.high %v8461_v0, %v8461_v0  ;;  %v20380_v18 = vrot.slane %v8461_v0, %v16028_v5  ;;  %v1620_v39 = vrot.slane %v20348_v44, 7 }
 0x24a   :  { %7253 = vrot.lane.b32.xlu1 %v26418_v21, %s15885_s16  ;;  %v1616_v7 = vrot.slane %v26419_v36, 2  ;;  %v1619_v52 = vrot.slane %v1617_v34, 2  ;;  %v1625_v58 = vrot.slane %v1623_v22, 2  ;;  %v7240_v21 = vpop.permute.xlu1 %7239  ;;  %v7808_v1 = vsel %vm7788_vm13, %v7758_v13, %v6656_v50 }
 0x24b   :  { %v8653_v0 = vrot.slane %v8639_v28, %v16028_v5  ;;  %v8654_v43 = vcombine.high %v20380_v18, %v20380_v18  ;;  %v1622_v48 = vrot.slane %v1620_v39, 2  ;;  %v5083_v28 = vcombine.low %v20170_v63, %v20202_v57 }
 0x24c   :  { %5259 = vrot.lane.b32.xlu0 %v26394_v33, %s15881_s27  ;;  %v26420_v33 = vcombine.high %v20135_v62, %v20135_v62  ;;  %v7858_v36 = vsel %vm7838_vm14, %v7808_v1, %v6932_v60  ;;  %v5246_v54 = vpop.permute.xlu0 %5245  ;;  %v26421_v50 = vcombine.low %v19736_v20, %v19739_v56  ;;  %v1618_v40 = vsel %vm16175_vm6, %v1616_v7, %v1617_v34 }
 0x24d   :  { %v8655_v31 = vcombine.high %v8653_v0, %v8653_v0  ;;  %v9590_v38 = vmax.f32 %v20135_v62, %v8654_v43  ;;  %v20420_v63 = vsel %vm16175_vm6, %v1619_v52, %v1620_v39  ;;  %v20424_v43 = vsel %vm16175_vm6, %v1622_v48, %v1623_v22 }
 0x24e   :  { %v9591_v26 = vmax.f32 %v26420_v33, %v8653_v0  ;;  %7493 = vrot.lane.b32.xlu1 %v26421_v50, %s15884_s2  ;;  %v26422_v62 = vrot.slane %v20352_v47, 7  ;;  %v7908_v13 = vsel %vm7888_vm15, %v7858_v36, %v7240_v21  ;;  %v26423_v7 = vcombine.low %v19792_v41, %v19823_v35  ;;  %v7480_v52 = vpop.permute.xlu1 %7479 }
 0x24f   :  { %v9592_v60 = vmax.f32 %v20246_v16, %v8655_v31  ;;  %v2604_v48 = vcombine.low %v20202_v57, %v20331_v27  ;;  %v2620_v39 = vcombine.low %v20348_v44, %v20321_v9  ;;  %v14356_v34 = vrot.slane %v9590_v38, 9 }
 0x250   :  { %v20430_v1 = vsel %vm16175_vm6, %v1625_v58, %v26422_v62  ;;  %6239 = vrot.lane.b32.xlu0 %v26423_v7, %s15872_s12  ;;  %v14357_v22 = vrot.slane %v9591_v26, 9  ;;  %v7958_v58 = vsel %vm7938_vm0, %v7908_v13, %v7480_v52  ;;  %v20444_v31 = vrot.slane %v2451_v55, %v16028_v5  ;;  %v6226_v0 = vpop.permute.xlu0 %6225 }
 0x251   :  { %v26425_v35 = vcombine.low %v19517_v25, %v19837_v19  ;;  %14831 = vmatmul.mubr.msk.f32.gmra.mrb[38].mxu0 %vm25827_vm4, %v7958_v58  ;;  %v3486_v57 = vcombine.low %v1618_v40, %v20420_v63  ;;  %v3502_v21 = vcombine.low %v20424_v43, %v20430_v1  ;;  %v4466_v55 = vcombine.low %v20331_v27, %v20348_v44  ;;  %v8242_v44 = vpop.f32.mrb[12].mxu0 }
 0x252   :  { %26424 = vst [vmem:[#allocation52_spill] sm:$0xff] %v20444_v31  ;;  %14833 = vmatprep.mubr.msk.f32.mxu0 %vm15888_vm8, %v25931_v42  ;;  %v4482_v19 = vcombine.low %v20321_v9, %v20352_v47  ;;  %v5879_v36 = vcombine.low %v20253_v15, %v20268_v49  ;;  %v5880_v33 = vcombine.low %v20275_v24, %v1618_v40  ;;  %v6658_v62 = vpop.permute.xlu1 %6657  ;;  %v14358_v15 = vrot.slane %v9592_v60, 9  ;;  %v26430_v40 = vld [vmem:[#allocation26_spill] sm:$0xff] }
 0x253   :  { %6671 = vrot.lane.b32.xlu1 %v26425_v35, %s15879_s3  ;;  %v26426_v50 = vcombine.low %v19372_v14, %v26385_v6  ;;  %v20470_v13 = vrot.slane %v879_v37, %v16028_v5  ;;  %v20473_v7 = vrot.slane %v2604_v48, %v16028_v5  ;;  %v20476_v27 = vrot.slane %v2620_v39, %v16028_v5  ;;  %v26431_v39 = vld [vmem:[#allocation36_spill] sm:$0xff] }
 0x254   :  { %v20479_v9 = vrot.slane %v5083_v28, %v16028_v5  ;;  %v10080_v49 = vmax.f32 %v9590_v38, %v14356_v34  ;;  %v10081_v24 = vmax.f32 %v9591_v26, %v14357_v22  ;;  %v7609_v37 = vsel %vm7588_vm9, %v26430_v40, %v20336_v23  ;;  %v3800_v52 = vpop.permute.xlu0 %3799  ;;  %v14793_v28 = vpop.f32.mrb[13].mxu0 }
 0x255   :  { %3813 = vrot.lane.b32.xlu0 %v26426_v50, %s15883_s13  ;;  %26427 = vst [vmem:[#allocation37_spill] sm:$0xff] %v20473_v7  ;;  %v8243_v48 = vadd.f32 %v19589_v32, %v8242_v44  ;;  %v26432_v58 = vcombine.low %v26431_v39, %v19856_v46  ;;  %v20492_v38 = vrot.slane %v3486_v57, %v16028_v5  ;;  %v26442_v28 = vld [vmem:[#allocation51_spill] sm:$0xff] }
 0x256   :  { %26428 = vst [vmem:[#allocation32_spill] sm:$0xff] %v20479_v9  ;;  %v20495_v26 = vrot.slane %v3502_v21, %v16028_v5  ;;  %v20498_v34 = vrot.slane %v4466_v55, %v16028_v5  ;;  %v20501_v23 = vrot.slane %v4482_v19, %v16028_v5  ;;  %v20504_v32 = vrot.slane %v5879_v36, %v16028_v5  ;;  %v26438_v21 = vld [vmem:[#allocation82_spill] sm:$0xff]  ;;  %v6934_v55 = vpop.permute.xlu1 %6933  ;;  %v26450_v36 = vld [vmem:[#allocation27_spill] sm:$0xff]  ;;  %v8247_v9 = vpop.f32.mrb[14].mxu0 }
 0x257   :  { %6947 = vrot.lane.b32.xlu1 %v26432_v58, %s15882_s11  ;;  %v20507_v22 = vrot.slane %v5880_v33, %v16028_v5  ;;  %v7659_v35 = vsel %vm25834_vm10, %v7609_v37, %v20382_v12  ;;  %v8462_v57 = vmax.f32 %v8243_v48, 0.0  ;;  %v26439_v50 = vcombine.low %v19352_v29, %v26438_v21  ;;  %v155_v33 = vld [vmem:[%s25399_s0 + $0x160] sm:$0xff] }
 0x258   :  { %26433 = vst [vmem:[#allocation23_spill] sm:$0xff] %v20495_v26  ;;  %26434 = vst [vmem:[#allocation20_spill] sm:$0xff] %v20498_v34  ;;  %v10082_v44 = vmax.f32 %v9592_v60, %v14358_v15  ;;  %v20523_v12 = vrot.slane %v10080_v49, %v19815_v59  ;;  %v20526_v40 = vrot.slane %v10081_v24, %v19815_v59  ;;  %v20531_v58 = vpop.permute.xlu0 %4779 }
 0x259   :  { %26435 = vst [vmem:[#allocation45_spill] sm:$0xff] %v20501_v23  ;;  %26436 = vst [vmem:[#allocation59_spill] sm:$0xff] %v20504_v32  ;;  %4793 = vrot.lane.b32.xlu0 %v26439_v50, %s15880_s26  ;;  %v7709_v29 = vsel %vm25826_vm11, %v7659_v35, %v5246_v54  ;;  %v8656_v48 = vcombine.high %v8462_v57, %v8462_v57  ;;  %v8663_v39 = vrot.slane %v8462_v57, %v16028_v5  ;;  %v26463_v32 = vld [vmem:[#allocation79_spill] sm:$0xff] }
 0x25a   :  { %26437 = vst [vmem:[#allocation34_spill] sm:$0xff] %v20507_v22  ;;  %26440 = vst [vmem:[#allocation86_spill] sm:$0xff] %v20523_v12  ;;  %v7759_v37 = vsel %vm7738_vm12, %v7709_v29, %v6226_v0  ;;  %v26443_v21 = vcombine.low %v26442_v28, %v19961_v51  ;;  %v20542_v54 = vcombine.low %v20498_v34, %v20501_v23  ;;  %v26446_v29 = vld [vmem:[#allocation61_spill] sm:$0xff]  ;;  %v26461_v23 = vld [vmem:[#allocation44_spill] sm:$0xff] }
 0x25b   :  { %26441 = vst [vmem:[#allocation75_spill] sm:$0xff] %v20526_v40  ;;  %v7809_v15 = vsel %vm7788_vm13, %v7759_v37, %v6658_v62  ;;  %v20547_v49 = vrot.slane %v155_v33, %v16028_v5  ;;  %v8670_v24 = vrot.slane %v8656_v48, %v16028_v5  ;;  %v8671_v35 = vcombine.high %v8663_v39, %v8663_v39  ;;  %v7242_v37 = vpop.permute.xlu1 %7241  ;;  %v26462_v22 = vld [vmem:[#allocation38_spill] sm:$0xff] }
 0x25c   :  { %7255 = vrot.lane.b32.xlu1 %v26443_v21, %s15885_s16  ;;  %26444 = vst [vmem:[#allocation53_spill] sm:$0xff] %v20542_v54  ;;  %v26445_v57 = vcombine.high %v20246_v16, %v20246_v16  ;;  %v26447_v62 = vcombine.low %v26446_v29, %v19739_v56  ;;  %v26448_v21 = vld [vmem:[#allocation54_spill] sm:$0xff]  ;;  %v20560_v0 = vrot.slane %v10082_v44, %v19815_v59  ;;  %v20571_v41 = vpop.permute.xlu0 %5247  ;;  %v26454_v16 = vld [vmem:[#allocation55_spill] sm:$0xff] }
 0x25d   :  { %v6502_v6 = vcombine.low %v20108_v30, %v26448_v21  ;;  %v10790_v48 = vsel %vm10458_vm5, %v20526_v40, %v20523_v12  ;;  %v9594_v60 = vmax.f32 %v20292_v45, %v8671_v35  ;;  %v26451_v29 = vcombine.high %v20292_v45, %v20292_v45  ;;  %v26453_v21 = vld [vmem:[#allocation24_spill] sm:$0xff]  ;;  %v26455_v12 = vld [vmem:[#allocation81_spill] sm:$0xff]  ;;  %v26456_v40 = vld [vmem:[#allocation78_spill] sm:$0xff] }
 0x25e   :  { %v9593_v50 = vmax.f32 %v26445_v57, %v8663_v39  ;;  %5261 = vrot.lane.b32.xlu0 %v26447_v62, %s15881_s27  ;;  %26449 = vst [vmem:[#allocation26_spill] sm:$0xff] %v20560_v0  ;;  %v895_v39 = vcombine.high %v155_v33, %v155_v33  ;;  %v8672_v57 = vcombine.high %v8670_v24, %v8670_v24  ;;  %v14256_v11 = vrot.slane %v20547_v49, 9 }
 0x25f   :  { %v9595_v62 = vmax.f32 %v26451_v29, %v8670_v24  ;;  %v26452_v30 = vcombine.low %v19916_v17, %v19980_v10  ;;  %v20579_v44 = vcombine.high %v20470_v13, %v20470_v13  ;;  %v7859_v33 = vsel %vm7838_vm14, %v7809_v15, %v6934_v55  ;;  %v7482_v55 = vpop.permute.xlu1 %7481  ;;  %v26458_v15 = vld [vmem:[#allocation65_spill] sm:$0xff] }
 0x260   :  { %v2467_v35 = vcombine.low %v26454_v16, %v26453_v21  ;;  %v20586_v45 = vcombine.high %v20547_v49, %v20547_v49  ;;  %v1629_v24 = vrot.slane %v20470_v13, 7  ;;  %v9596_v29 = vmax.f32 %v20380_v18, %v8672_v57  ;;  %v26459_v16 = vld [vmem:[#allocation58_spill] sm:$0xff] }
 0x261   :  { %7495 = vrot.lane.b32.xlu1 %v26452_v30, %s15884_s2  ;;  %v14360_v19 = vrot.slane %v9594_v60, 9  ;;  %v14361_v3 = vrot.slane %v9595_v62, 9  ;;  %v7909_v30 = vsel %vm7888_vm15, %v7859_v33, %v7242_v37  ;;  %v26457_v25 = vcombine.low %v26455_v12, %v26456_v40  ;;  %v6228_v33 = vpop.permute.xlu0 %6227 }
 0x262   :  { %v26460_v21 = vcombine.low %v26458_v15, %v26459_v16  ;;  %v7959_v14 = vsel %vm7938_vm0, %v7909_v30, %v7482_v55  ;;  %v2468_v18 = vcombine.low %v26462_v22, %v26461_v23  ;;  %v20603_v57 = vrot.slane %v895_v39, %v16028_v5  ;;  %v26466_v16 = vld [vmem:[#allocation31_spill] sm:$0xff] }
 0x263   :  { %6241 = vrot.lane.b32.xlu0 %v26457_v25, %s15872_s12  ;;  %v14362_v37 = vrot.slane %v9596_v29, 9  ;;  %14834 = vmatmul.mubr.msk.f32.gmra.mrb[40].mxu0 %vm25827_vm4, %v7959_v14  ;;  %v26464_v25 = vrot.slane %v20352_v47, 7  ;;  %v1631_v40 = vrot.slane %v1629_v24, 2  ;;  %v14359_v30 = vrot.slane %v9593_v50, 9 }
 0x264   :  { %v7610_v31 = vsel %vm7588_vm9, %v26460_v21, %v3800_v52  ;;  %v1632_v52 = vrot.slane %v20579_v44, 7  ;;  %14836 = vmatprep.mubr.msk.f32.mxu0 %vm15888_vm8, %v25931_v42  ;;  %v2621_v23 = vcombine.low %v20352_v47, %v20470_v13  ;;  %v2637_v22 = vcombine.low %v20547_v49, %v20586_v45  ;;  %v26467_v21 = vld [vmem:[#allocation64_spill] sm:$0xff] }
 0x265   :  { %6673 = vrot.lane.b32.xlu1 %v26463_v32, %s15879_s3  ;;  %v1628_v12 = vrot.slane %v26464_v25, 2  ;;  %v1636_v39 = vrot.slane %v20586_v45, 7  ;;  %v20620_v14 = vsel %vm1188_vm1, %v20560_v0, %v10790_v48  ;;  %v10084_v55 = vmax.f32 %v9594_v60, %v14360_v19  ;;  %v6660_v32 = vpop.permute.xlu1 %6659  ;;  %v3802_v48 = vpop.permute.xlu0 %3801  ;;  %v26469_v19 = vld [vmem:[#allocation57_spill] sm:$0xff] }
 0x266   :  { %26465 = vst [vmem:[#allocation36_spill] sm:$0xff] %v20620_v14  ;;  %v10085_v15 = vmax.f32 %v9595_v62, %v14361_v3  ;;  %v26468_v25 = vcombine.low %v26466_v16, %v26467_v21  ;;  %v20627_v54 = vrot.slane %v6502_v6, %v16028_v5  ;;  %v10086_v47 = vmax.f32 %v9596_v29, %v14362_v37  ;;  %v26470_v3 = vld [vmem:[#allocation60_spill] sm:$0xff]  ;;  %v14796_v62 = vpop.f32.mrb[15].mxu0  ;;  %v26492_v14 = vld [vmem:[#allocation21_spill] sm:$0xff] }
 0x267   :  { %v1638_v10 = vrot.slane %v1636_v39, 2  ;;  %v25662_v51 = vrot.slane %v20603_v57, 7  ;;  %v26471_v60 = vcombine.low %v26469_v19, %v26470_v3  ;;  %v20636_v16 = vrot.slane %v2467_v35, %v16028_v5  ;;  %v8252_v0 = vpop.f32.mrb[16].mxu0  ;;  %v26506_v19 = vld [vmem:[#allocation62_spill] sm:$0xff] }
 0x268   :  { %3815 = vrot.lane.b32.xlu0 %v26468_v25, %s15883_s13  ;;  %v20639_v6 = vrot.slane %v2468_v18, %v16028_v5  ;;  %v20643_v29 = vsel %vm16175_vm6, %v1628_v12, %v1629_v24  ;;  %v20647_v37 = vsel %vm16175_vm6, %v1631_v40, %v1632_v52  ;;  %v10083_v21 = vmax.f32 %v9593_v50, %v14359_v30  ;;  %v20649_v25 = vld [vmem:[#allocation5] ss:$0 sm:$0xff]  ;;  %v26477_v50 = vld [vmem:[#allocation83_spill] sm:$0xff] }
 0x269   :  { %6949 = vrot.lane.b32.xlu1 %v26471_v60, %s15882_s11  ;;  %26472 = vst [vmem:[#allocation82_spill] sm:$0xff] %v20636_v16  ;;  %v8248_v3 = vadd.f32 %v20649_v25, %v8247_v9  ;;  %v20653_v60 = vrot.slane %v2621_v23, %v16028_v5  ;;  %v20656_v35 = vrot.slane %v2637_v22, %v16028_v5  ;;  %v6936_v9 = vpop.permute.xlu1 %6935  ;;  %v4782_v22 = vpop.permute.xlu0 %4781 }
 0x26a   :  { %26473 = vst [vmem:[#allocation51_spill] sm:$0xff] %v20639_v6  ;;  %v20659_v18 = vrot.slane %v10084_v55, %v19815_v59  ;;  %v20662_v24 = vrot.slane %v10085_v15, %v19815_v59  ;;  %v7660_v12 = vsel %vm25834_vm10, %v7610_v31, %v20531_v58  ;;  %v26478_v40 = vcombine.low %v26477_v50, %v19736_v20  ;;  %v26480_v55 = vld [vmem:[#allocation30_spill] sm:$0xff]  ;;  %v14799_v16 = vpop.f32.mrb[17].mxu0 }
 0x26b   :  { %26474 = vst [vmem:[#allocation61_spill] sm:$0xff] %v20656_v35  ;;  %v20673_v30 = vrot.slane %v10086_v47, %v19815_v59  ;;  %v20677_v23 = vsel %vm16175_vm6, %v14256_v11, %v1636_v39  ;;  %v20683_v31 = vsel %vm16175_vm6, %v1638_v10, %v25662_v51  ;;  %v3503_v20 = vcombine.low %v20643_v29, %v20647_v37  ;;  %v26485_v11 = vld [vmem:[#allocation66_spill] sm:$0xff] }
 0x26c   :  { %26475 = vst [vmem:[#allocation54_spill] sm:$0xff] %v20659_v18  ;;  %26476 = vst [vmem:[#allocation27_spill] sm:$0xff] %v20662_v24  ;;  %4795 = vrot.lane.b32.xlu0 %v26478_v40, %s15880_s26  ;;  %v7710_v58 = vsel %vm25826_vm11, %v7660_v12, %v20571_v41  ;;  %v26481_v15 = vcombine.low %v26480_v55, %v26450_v36  ;;  %v4483_v10 = vcombine.low %v20470_v13, %v20579_v44  ;;  %v156_v40 = vld [vmem:[%s25399_s0 + $0x168] sm:$0xff] }
 0x26d   :  { %26479 = vst [vmem:[#allocation24_spill] sm:$0xff] %v20673_v30  ;;  %v20700_v62 = vrot.slane %v10083_v21, %v19815_v59  ;;  %v7760_v41 = vsel %vm7738_vm12, %v7710_v58, %v6228_v33  ;;  %v8463_v12 = vmax.f32 %v8248_v3, 0.0  ;;  %v26486_v21 = vld [vmem:[#allocation29_spill] sm:$0xff]  ;;  %v26488_v3 = vld [vmem:[#allocation67_spill] sm:$0xff]  ;;  %v7244_v50 = vpop.permute.xlu1 %7243  ;;  %v3519_v52 = vcombine.low %v20677_v23, %v20683_v31 }
 0x26e   :  { %7257 = vrot.lane.b32.xlu1 %v26481_v15, %s15885_s16  ;;  %v20711_v15 = vsel %vm10458_vm5, %v20662_v24, %v20659_v18  ;;  %v7810_v44 = vsel %vm7788_vm13, %v7760_v41, %v6660_v32  ;;  %v26487_v47 = vcombine.low %v26485_v11, %v26486_v21  ;;  %v26489_v58 = vcombine.low %v19916_v17, %v26488_v3  ;;  %v26491_v41 = vld [vmem:[#allocation39_spill] sm:$0xff] }
 0x26f   :  { %26483 = vst [vmem:[#allocation55_spill] sm:$0xff] %v20700_v62  ;;  %26484 = vst [vmem:[#allocation81_spill] sm:$0xff] %v20711_v15  ;;  %v20727_v51 = vsel %vm10458_vm5, %v20673_v30, %v20662_v24  ;;  %v7860_v32 = vsel %vm7838_vm14, %v7810_v44, %v6936_v9  ;;  %v20731_v11 = vrot.slane %v3503_v20, %v16028_v5 }
 0x270   :  { %v7611_v33 = vsel %vm7588_vm9, %v26487_v47, %v3802_v48  ;;  %5263 = vrot.lane.b32.xlu0 %v26489_v58, %s15881_s27  ;;  %26490 = vst [vmem:[#allocation78_spill] sm:$0xff] %v20727_v51  ;;  %v4499_v48 = vcombine.low %v20586_v45, %v20603_v57  ;;  %v5250_v47 = vpop.permute.xlu0 %5249  ;;  %v20738_v21 = vrot.slane %v4483_v10, %v16028_v5 }
 0x271   :  { %v5896_v3 = vcombine.low %v20420_v63, %v20424_v43  ;;  %v20744_v58 = vcombine.high %v20603_v57, %v20603_v57  ;;  %v20747_v9 = vrot.slane %v156_v40, %v16028_v5  ;;  %v8673_v20 = vcombine.high %v8463_v12, %v8463_v12  ;;  %v26493_v63 = vld [vmem:[#allocation35_spill] sm:$0xff]  ;;  %v7484_v15 = vpop.permute.xlu1 %7483 }
 0x272   :  { %7497 = vrot.lane.b32.xlu1 %v26491_v41, %s15884_s2  ;;  %v20750_v45 = vrot.slane %v8463_v12, %v16028_v5  ;;  %v5897_v44 = vcombine.low %v20430_v1, %v20643_v29  ;;  %v912_v51 = vcombine.high %v156_v40, %v156_v40  ;;  %v7910_v10 = vsel %vm7888_vm15, %v7860_v32, %v7244_v50  ;;  %v26495_v40 = vld [vmem:[#allocation77_spill] sm:$0xff] }
 0x273   :  { %v26494_v43 = vcombine.low %v26492_v14, %v26493_v63  ;;  %v20760_v30 = vrot.slane %v3519_v52, %v16028_v5  ;;  %v20764_v24 = vcombine.high %v20747_v9, %v20747_v9  ;;  %v1642_v12 = vrot.slane %v20744_v58, 7  ;;  %v26496_v14 = vld [vmem:[#allocation25_spill] sm:$0xff]  ;;  %v26497_v52 = vld [vmem:[#allocation22_spill] sm:$0xff] }
 0x274   :  { %v7661_v1 = vsel %vm25834_vm10, %v7611_v33, %v4782_v22  ;;  %v7960_v29 = vsel %vm7938_vm0, %v7910_v10, %v7484_v15  ;;  %v20770_v50 = vrot.slane %v4499_v48, %v16028_v5  ;;  %v2484_v32 = vcombine.low %v26496_v14, %v26495_v40  ;;  %v6230_v63 = vpop.permute.xlu0 %6229 }
 0x275   :  { %6243 = vrot.lane.b32.xlu0 %v26494_v43, %s15872_s12  ;;  %v26498_v43 = vcombine.low %v19856_v46, %v26497_v52  ;;  %14837 = vmatmul.mubr.msk.f32.gmra.mrb[42].mxu0 %vm25827_vm4, %v7960_v29  ;;  %v20780_v18 = vrot.slane %v5896_v3, %v16028_v5  ;;  %v2638_v22 = vcombine.low %v20603_v57, %v20744_v58  ;;  %v26500_v15 = vrot.slane %v20603_v57, 7  ;;  %v26501_v57 = vld [vmem:[#allocation42_spill] sm:$0xff] }
 0x276   :  { %v1644_v48 = vrot.slane %v1642_v12, 2  ;;  %14839 = vmatprep.mubr.msk.f32.mxu0 %vm15888_vm8, %v25931_v42  ;;  %v20789_v10 = vrot.slane %v912_v51, %v16028_v5  ;;  %v2654_v40 = vcombine.low %v20747_v9, %v20764_v24  ;;  %v1645_v29 = vrot.slane %v20747_v9, 7 }
 0x277   :  { %6675 = vrot.lane.b32.xlu1 %v26498_v43, %s15879_s3  ;;  %26499 = vst [vmem:[#allocation65_spill] sm:$0xff] %v20780_v18  ;;  %v1641_v33 = vrot.slane %v26500_v15, 2  ;;  %v1648_v3 = vrot.slane %v20764_v24, 7  ;;  %v20796_v14 = vrot.slane %v8673_v20, %v16028_v5  ;;  %v26502_v52 = vcombine.low %v26501_v57, %v26442_v28  ;;  %v6662_v43 = vpop.permute.xlu1 %6661 }
 0x278   :  { %v20803_v15 = vrot.slane %v5897_v44, %v16028_v5  ;;  %v20807_v51 = vcombine.low %v20476_v27, %v20653_v60  ;;  %v5093_v62 = vcombine.low %v20470_v13, %v20547_v49  ;;  %v20818_v44 = vrot.slane %v2484_v32, %v16028_v5  ;;  %v3804_v57 = vpop.permute.xlu0 %3803 }
 0x279   :  { %3817 = vrot.lane.b32.xlu0 %v26502_v52, %s15883_s13  ;;  %v8253_v52 = vadd.f32 %v20649_v25, %v8252_v0  ;;  %v20826_v20 = vrot.slane %v2638_v22, %v16028_v5  ;;  %v20830_v46 = vsel %vm16175_vm6, %v1641_v33, %v1642_v12  ;;  %v20834_v32 = vsel %vm16175_vm6, %v1644_v48, %v1645_v29  ;;  %v26512_v33 = vld [vmem:[#allocation84_spill] sm:$0xff] }
 0x27a   :  { %26503 = vst [vmem:[#allocation58_spill] sm:$0xff] %v20803_v15  ;;  %26504 = vst [vmem:[#allocation44_spill] sm:$0xff] %v20807_v51  ;;  %v26507_v51 = vld [vmem:[#allocation40_spill] sm:$0xff]  ;;  %v20837_v28 = vrot.slane %v2654_v40, %v16028_v5  ;;  %v1647_v0 = vrot.slane %v1645_v29, 2  ;;  %v1650_v39 = vrot.slane %v1648_v3, 2  ;;  %v26511_v16 = vcombine.low %v19739_v56, %v19916_v17  ;;  %v157_v17 = vld [vmem:[%s25399_s0 + $0x170] sm:$0xff] }
 0x27b   :  { %26505 = vst [vmem:[#allocation38_spill] sm:$0xff] %v20818_v44  ;;  %v26508_v6 = vcombine.low %v26506_v19, %v26507_v51  ;;  %26509 = vst [vmem:[#allocation31_spill] sm:$0xff] %v20826_v20  ;;  %v1651_v19 = vrot.slane %v20789_v10, 7  ;;  %v6938_v22 = vpop.permute.xlu1 %6937  ;;  %v20849_v40 = vrot.slane %v5093_v62, %v16028_v5  ;;  %v3520_v51 = vcombine.low %v20830_v46, %v20834_v32  ;;  %v26516_v29 = vld [vmem:[#allocation48_spill] sm:$0xff] }
 0x27c   :  { %26510 = vst [vmem:[#allocation64_spill] sm:$0xff] %v20837_v28  ;;  %v4500_v56 = vcombine.low %v20744_v58, %v20747_v9  ;;  %v4784_v62 = vpop.permute.xlu0 %4783  ;;  %v26514_v12 = vcombine.low %v20344_v61, %v26512_v33  ;;  %v928_v15 = vcombine.high %v157_v17, %v157_v17  ;;  %v20899_v9 = vrot.slane %v157_v17, %v16028_v5 }
 0x27d   :  { %6951 = vrot.lane.b32.xlu1 %v26508_v6, %s15882_s11  ;;  %v8464_v6 = vmax.f32 %v8253_v52, 0.0  ;;  %4797 = vrot.lane.b32.xlu0 %v26511_v16, %s15880_s26  ;;  %26513 = vst [vmem:[#allocation60_spill] sm:$0xff] %v20849_v40  ;;  %v7711_v52 = vsel %vm25826_vm11, %v7661_v1, %v5250_v47  ;;  %v5914_v47 = vcombine.low %v20683_v31, %v20830_v46 }
 0x27e   :  { %v7761_v16 = vsel %vm7738_vm12, %v7711_v52, %v6230_v63  ;;  %v20875_v63 = vsel %vm16175_vm6, %v1647_v0, %v1648_v3  ;;  %v20879_v52 = vsel %vm16175_vm6, %v1650_v39, %v1651_v19  ;;  %v26518_v3 = vld [vmem:[#allocation33_spill] sm:$0xff]  ;;  %v20893_v39 = vrot.slane %v3520_v51, %v16028_v5 }
 0x27f   :  { %v8690_v48 = vcombine.high %v8464_v6, %v8464_v6  ;;  %v7811_v58 = vsel %vm7788_vm13, %v7761_v16, %v6662_v43  ;;  %v7246_v1 = vpop.permute.xlu1 %7245  ;;  %v4516_v16 = vcombine.low %v20764_v24, %v20789_v10  ;;  %v7612_v0 = vsel %vm7588_vm9, %v26518_v3, %v3804_v57 }
 0x280   :  { %v5252_v43 = vpop.permute.xlu0 %5251  ;;  %v26519_v24 = vcombine.low %v20324_v4, %v26516_v29  ;;  %v3536_v57 = vcombine.low %v20875_v63, %v20879_v52  ;;  %v20910_v51 = vrot.slane %v928_v15, %v16028_v5  ;;  %v7861_v17 = vsel %vm7838_vm14, %v7811_v58, %v6938_v22 }
 0x281   :  { %7259 = vrot.lane.b32.xlu1 %v26514_v12, %s15885_s16  ;;  %v20882_v12 = vrot.slane %v8690_v48, %v16028_v5  ;;  %5265 = vrot.lane.b32.xlu0 %v26491_v41, %s15881_s27  ;;  %v20896_v48 = vrot.slane %v4500_v56, %v16028_v5  ;;  %v20914_v56 = vcombine.high %v20789_v10, %v20789_v10 }
 0x282   :  { %v5913_v3 = vcombine.low %v20647_v37, %v20677_v23  ;;  %v7911_v15 = vsel %vm7888_vm15, %v7861_v17, %v7246_v1  ;;  %v26520_v40 = vcombine.low %v20364_v8, %v20373_v53  ;;  %v20932_v58 = vrot.slane %v4516_v16, %v16028_v5  ;;  %v26522_v53 = vld [vmem:[#allocation43_spill] sm:$0xff] }
 0x283   :  { %26517 = vst [vmem:[#allocation83_spill] sm:$0xff] %v20882_v12  ;;  %v8706_v41 = vcombine.high %v20882_v12, %v20882_v12  ;;  %v7486_v22 = vpop.permute.xlu1 %7485  ;;  %v20936_v46 = vcombine.high %v20910_v51, %v20910_v51  ;;  %v14291_v23 = vcombine.high %v20470_v13, %v20547_v49  ;;  %v1654_v16 = vrot.slane %v20914_v56, 7  ;;  %v26532_v12 = vld [vmem:[#allocation70_spill] sm:$0xff] }
 0x284   :  { %26521 = vst [vmem:[#allocation30_spill] sm:$0xff] %v20932_v58  ;;  %v7961_v37 = vsel %vm7938_vm0, %v7911_v15, %v7486_v22  ;;  %v6232_v8 = vpop.permute.xlu0 %6231  ;;  %v1661_v17 = vrot.slane %v20910_v51, 7  ;;  %v20951_v13 = vrot.slane %v8464_v6, %v16028_v5  ;;  %v20956_v49 = vrot.slane %v3536_v57, %v16028_v5  ;;  %v26526_v22 = vld [vmem:[#allocation28_spill] sm:$0xff] }
 0x285   :  { %7499 = vrot.lane.b32.xlu1 %v26519_v24, %s15884_s2  ;;  %v20923_v24 = vcombine.high %v20899_v9, %v20899_v9  ;;  %v9597_v44 = vmax.f32 %v20750_v45, %v8706_v41  ;;  %6245 = vrot.lane.b32.xlu0 %v26520_v40, %s15872_s12  ;;  %v1653_v40 = vrot.slane %v1651_v19, 2  ;;  %v14257_v41 = vrot.slane %v20899_v9, 9 }
 0x286   :  { %14840 = vmatmul.mubr.msk.f32.gmra.mrb[44].mxu0 %vm25827_vm4, %v7961_v37  ;;  %26523 = vst [vmem:[#allocation66_spill] sm:$0xff] %v20956_v49  ;;  %v20959_v15 = vrot.slane %v5913_v3, %v16028_v5  ;;  %v20962_v19 = vrot.slane %v5914_v47, %v16028_v5  ;;  %v26527_v37 = vcombine.low %v26526_v22, %v26480_v55  ;;  %v1663_v34 = vrot.slane %v1661_v17, 2  ;;  %v8257_v3 = vpop.f32.mrb[18].mxu0 }
 0x287   :  { %v1658_v1 = vrot.slane %v20923_v24, 7  ;;  %14842 = vmatprep.mubr.msk.f32.mxu0 %vm15888_vm8, %v25931_v42  ;;  %v6664_v31 = vpop.permute.xlu1 %6663  ;;  %v2655_v6 = vcombine.low %v20789_v10, %v20899_v9  ;;  %v7662_v29 = vsel %vm25834_vm10, %v7612_v0, %v4784_v62  ;;  %v20974_v47 = vcombine.low %v20896_v48, %v20932_v58  ;;  %v14802_v0 = vpop.f32.mrb[19].mxu0  ;;  %v26538_v58 = vld [vmem:[#allocation32_spill] sm:$0xff] }
 0x288   :  { %26524 = vst [vmem:[#allocation29_spill] sm:$0xff] %v20959_v15  ;;  %26525 = vst [vmem:[#allocation67_spill] sm:$0xff] %v20962_v19  ;;  %v20977_v33 = vrot.slane %v14291_v23, %v16028_v5  ;;  %v2671_v55 = vcombine.low %v20923_v24, %v20910_v51  ;;  %v14363_v22 = vrot.slane %v9597_v44, 9  ;;  %v8258_v18 = vadd.f32 %v20649_v25, %v8257_v3  ;;  %v26531_v0 = vld [vmem:[#allocation80_spill] sm:$0xff]  ;;  %v26561_v19 = vld [vmem:[#allocation69_spill] sm:$0xff] }
 0x289   :  { %6677 = vrot.lane.b32.xlu1 %v26522_v53, %s15879_s3  ;;  %3819 = vrot.lane.b32.xlu0 %v26527_v37, %s15883_s13  ;;  %v1660_v53 = vrot.slane %v1658_v1, 2  ;;  %26528 = vst [vmem:[#allocation39_spill] sm:$0xff] %v20974_v47  ;;  %v20981_v37 = vpop.permute.xlu0 %3805  ;;  %v26530_v62 = vcombine.low %v20473_v7, %v20476_v27  ;;  %v1655_v57 = vsel %vm16175_vm6, %v1653_v40, %v1654_v16 }
 0x28a   :  { %26529 = vst [vmem:[#allocation21_spill] sm:$0xff] %v20977_v33  ;;  %v20992_v23 = vsel %vm16175_vm6, %v14257_v41, %v1658_v1  ;;  %v7712_v47 = vsel %vm25826_vm11, %v7662_v29, %v5252_v43  ;;  %v26533_v40 = vcombine.low %v26531_v0, %v26532_v12  ;;  %v21006_v1 = vrot.slane %v2655_v6, %v16028_v5 }
 0x28b   :  { %v6940_v16 = vpop.permute.xlu1 %6939  ;;  %v21010_v41 = vsel %vm16175_vm6, %v1660_v53, %v1661_v17  ;;  %v26535_v29 = vrot.slane %v20936_v46, 7  ;;  %v3537_v27 = vcombine.low %v1655_v57, %v20992_v23  ;;  %v14278_v12 = vcombine.high %v20789_v10, %v20899_v9 }
 0x28c   :  { %26534 = vst [vmem:[#allocation35_spill] sm:$0xff] %v21006_v1  ;;  %v4533_v6 = vcombine.low %v20910_v51, %v20936_v46  ;;  %v10087_v0 = vmax.f32 %v9597_v44, %v14363_v22  ;;  %v5930_v51 = vcombine.low %v20834_v32, %v20875_v63  ;;  %v5931_v22 = vcombine.low %v20879_v52, %v1655_v57 }
 0x28d   :  { %6953 = vrot.lane.b32.xlu1 %v26530_v62, %s15882_s11  ;;  %v8465_v62 = vmax.f32 %v8258_v18, 0.0  ;;  %4799 = vrot.lane.b32.xlu0 %v26533_v40, %s15880_s26  ;;  %v21016_v43 = vsel %vm16175_vm6, %v1663_v34, %v26535_v29  ;;  %v7762_v18 = vsel %vm7738_vm12, %v7712_v47, %v6232_v8  ;;  %v4786_v17 = vpop.permute.xlu0 %4785  ;;  %v26536_v34 = vcombine.low %v20492_v38, %v20495_v26  ;;  %v158_v47 = vld [vmem:[%s25399_s0 + $0x178] sm:$0xff] }
 0x28e   :  { %v21030_v8 = vrot.slane %v2671_v55, %v16028_v5  ;;  %v7812_v29 = vsel %vm7788_vm13, %v7762_v18, %v6664_v31  ;;  %v3553_v44 = vcombine.low %v21010_v41, %v21016_v43  ;;  %v26537_v55 = vcombine.high %v20750_v45, %v20750_v45 }
 0x28f   :  { %v8707_v40 = vcombine.high %v8465_v62, %v8465_v62  ;;  %v8714_v53 = vrot.slane %v8465_v62, %v16028_v5  ;;  %v26539_v31 = vcombine.low %v20324_v4, %v26538_v58  ;;  %v7248_v18 = vpop.permute.xlu1 %7247  ;;  %v6520_v26 = vcombine.low %v20789_v10, %v20914_v56  ;;  %v26542_v56 = vld [vmem:[#allocation53_spill] sm:$0xff] }
 0x290   :  { %v21054_v32 = vrot.slane %v3537_v27, %v16028_v5  ;;  %v21057_v63 = vrot.slane %v14278_v12, %v16028_v5  ;;  %v21060_v52 = vrot.slane %v4533_v6, %v16028_v5  ;;  %v945_v45 = vcombine.high %v158_v47, %v158_v47 }
 0x291   :  { %7261 = vrot.lane.b32.xlu1 %v26536_v34, %s15885_s16  ;;  %v8721_v62 = vrot.slane %v8707_v40, %v16028_v5  ;;  %v8722_v34 = vcombine.high %v8714_v53, %v8714_v53  ;;  %v21045_v3 = vmax.f32 %v26537_v55, %v8714_v53  ;;  %5267 = vrot.lane.b32.xlu0 %v26539_v31, %s15881_s27  ;;  %v5254_v10 = vpop.permute.xlu0 %5253 }
 0x292   :  { %26540 = vst [vmem:[#allocation77_spill] sm:$0xff] %v21057_v63  ;;  %v26541_v58 = vcombine.high %v20796_v14, %v20796_v14  ;;  %v7862_v55 = vsel %vm7838_vm14, %v7812_v29, %v6940_v16  ;;  %v21070_v27 = vrot.slane %v3553_v44, %v16028_v5  ;;  %v21073_v12 = vrot.slane %v5930_v51, %v16028_v5  ;;  %v26546_v29 = vld [vmem:[#allocation59_spill] sm:$0xff] }
 0x293   :  { %v8723_v57 = vcombine.high %v8721_v62, %v8721_v62  ;;  %v9599_v40 = vmax.f32 %v20796_v14, %v8722_v34  ;;  %v21076_v6 = vrot.slane %v5931_v22, %v16028_v5  ;;  %v21079_v34 = vrot.slane %v158_v47, %v16028_v5  ;;  %v7488_v44 = vpop.permute.xlu1 %7487 }
 0x294   :  { %v9600_v53 = vmax.f32 %v26541_v58, %v8721_v62  ;;  %26543 = vst [vmem:[#allocation25_spill] sm:$0xff] %v21070_v27  ;;  %26544 = vst [vmem:[#allocation22_spill] sm:$0xff] %v21073_v12  ;;  %v7912_v16 = vsel %vm7888_vm15, %v7862_v55, %v7248_v18  ;;  %v26547_v62 = vld [vmem:[#allocation34_spill] sm:$0xff]  ;;  %v21088_v58 = vrot.slane %v6520_v26, %v16028_v5  ;;  %v26560_v12 = vrot.slane %v20936_v46, 7 }
 0x295   :  { %7501 = vrot.lane.b32.xlu1 %v26542_v56, %s15884_s2  ;;  %26545 = vst [vmem:[#allocation42_spill] sm:$0xff] %v21076_v6  ;;  %v9601_v14 = vmax.f32 %v20951_v13, %v8723_v57  ;;  %v26548_v31 = vcombine.low %v26546_v29, %v26547_v62  ;;  %v21091_v51 = vrot.slane %v945_v45, %v16028_v5  ;;  %v26552_v26 = vld [vmem:[#allocation74_spill] sm:$0xff]  ;;  %v26553_v62 = vld [vmem:[#allocation52_spill] sm:$0xff] }
 0x296   :  { %26549 = vst [vmem:[#allocation62_spill] sm:$0xff] %v21088_v58  ;;  %v7962_v22 = vsel %vm7938_vm0, %v7912_v16, %v7488_v44  ;;  %v21100_v55 = vcombine.high %v21079_v34, %v21079_v34  ;;  %v21103_v29 = vrot.slane %v10087_v0, %v19815_v59  ;;  %v26554_v45 = vcombine.low %v26552_v26, %v26553_v62  ;;  %v6234_v16 = vpop.permute.xlu0 %6233  ;;  %v8262_v26 = vpop.f32.mrb[20].mxu0 }
 0x297   :  { %6247 = vrot.lane.b32.xlu0 %v26548_v31, %s15872_s12  ;;  %v26555_v44 = vcombine.low %v20627_v54, %v20473_v7  ;;  %14843 = vmatmul.mubr.msk.f32.gmra.mrb[46].mxu0 %vm25827_vm4, %v7962_v22  ;;  %v26556_v22 = vcombine.low %v26450_v36, %v20344_v61  ;;  %v6666_v62 = vpop.permute.xlu1 %6665  ;;  %v14364_v54 = vrot.slane %v21045_v3, 9  ;;  %v1673_v36 = vrot.slane %v21091_v51, 7 }
 0x298   :  { %26551 = vst [vmem:[#allocation33_spill] sm:$0xff] %v21103_v29  ;;  %v7613_v31 = vsel %vm7588_vm9, %v26554_v45, %v20981_v37  ;;  %14845 = vmatprep.mubr.msk.f32.mxu0 %vm15888_vm8, %v25931_v42  ;;  %v14367_v37 = vrot.slane %v9601_v14, 9  ;;  %v1670_v61 = vrot.slane %v21100_v55, 7  ;;  %v14366_v18 = vrot.slane %v9600_v53, 9  ;;  %v14805_v29 = vpop.f32.mrb[21].mxu0 }
 0x299   :  { %6679 = vrot.lane.b32.xlu1 %v26555_v44, %s15879_s3  ;;  %v7663_v0 = vsel %vm25834_vm10, %v7613_v31, %v4786_v17  ;;  %v21136_v31 = vcombine.high %v21091_v51, %v21091_v51  ;;  %v1667_v44 = vrot.slane %v21079_v34, 7  ;;  %v8263_v47 = vadd.f32 %v20649_v25, %v8262_v26 }
 0x29a   :  { %v3808_v17 = vpop.permute.xlu0 %3807  ;;  %v26557_v45 = vcombine.low %v20653_v60, %v20656_v35  ;;  %v1666_v27 = vrot.slane %v26560_v12, 2  ;;  %v1672_v1 = vrot.slane %v1670_v61, 2  ;;  %v1675_v33 = vrot.slane %v1673_v36, 2 }
 0x29b   :  { %3821 = vrot.lane.b32.xlu0 %v26556_v22, %s15883_s13  ;;  %v14365_v22 = vrot.slane %v9599_v40, 9  ;;  %v1669_v57 = vrot.slane %v1667_v44, 2  ;;  %v8466_v63 = vmax.f32 %v8263_v47, 0.0  ;;  %v26562_v26 = vcombine.low %v26561_v19, %v20324_v4  ;;  %v6942_v15 = vpop.permute.xlu1 %6941 }
 0x29c   :  { %v2672_v60 = vcombine.low %v20936_v46, %v21079_v34  ;;  %v2688_v29 = vcombine.low %v21100_v55, %v21091_v51  ;;  %v10088_v12 = vmax.f32 %v21045_v3, %v14364_v54  ;;  %v10091_v6 = vmax.f32 %v9601_v14, %v14367_v37 }
 0x29d   :  { %6955 = vrot.lane.b32.xlu1 %v26557_v45, %s15882_s11  ;;  %v1676_v45 = vrot.slane %v21136_v31, 7  ;;  %v7713_v35 = vsel %vm25826_vm11, %v7663_v0, %v5254_v10  ;;  %v10089_v7 = vmax.f32 %v9599_v40, %v14365_v22  ;;  %v10090_v4 = vmax.f32 %v9600_v53, %v14366_v18 }
 0x29e   :  { %v7763_v19 = vsel %vm7738_vm12, %v7713_v35, %v6234_v16  ;;  %v4788_v46 = vpop.permute.xlu0 %4787  ;;  %v26563_v58 = vcombine.low %v20731_v11, %v20760_v30  ;;  %v21172_v3 = vsel %vm16175_vm6, %v1666_v27, %v1667_v44  ;;  %v21176_v10 = vsel %vm16175_vm6, %v1669_v57, %v1670_v61 }
 0x29f   :  { %4801 = vrot.lane.b32.xlu0 %v26562_v26, %s15880_s26  ;;  %v8731_v26 = vrot.slane %v8466_v63, %v16028_v5  ;;  %v21180_v40 = vsel %vm16175_vm6, %v1672_v1, %v1673_v36  ;;  %v21184_v35 = vsel %vm16175_vm6, %v1675_v33, %v1676_v45  ;;  %v26564_v14 = vcombine.high %v20951_v13, %v20951_v13  ;;  %v7250_v27 = vpop.permute.xlu1 %7249  ;;  %v26575_v45 = vld [vmem:[#allocation65_spill] sm:$0xff] }
 0x2a0   :  { %v21192_v57 = vrot.slane %v2672_v60, %v16028_v5  ;;  %v21195_v18 = vrot.slane %v2688_v29, %v16028_v5  ;;  %v21198_v1 = vrot.slane %v10088_v12, %v19815_v59  ;;  %v21201_v33 = vrot.slane %v10091_v6, %v19815_v59  ;;  %v26576_v12 = vld [vmem:[#allocation58_spill] sm:$0xff] }
 0x2a1   :  { %7263 = vrot.lane.b32.xlu1 %v26563_v58, %s15885_s16  ;;  %v8739_v53 = vcombine.high %v8731_v26, %v8731_v26  ;;  %v9602_v58 = vmax.f32 %v26564_v14, %v8731_v26  ;;  %v7813_v16 = vsel %vm7788_vm13, %v7763_v19, %v6666_v62  ;;  %v5103_v13 = vcombine.low %v20899_v9, %v20923_v24  ;;  %v26572_v24 = vld [vmem:[#allocation82_spill] sm:$0xff] }
 0x2a2   :  { %26565 = vst [vmem:[#allocation28_spill] sm:$0xff] %v21195_v18  ;;  %26566 = vst [vmem:[#allocation80_spill] sm:$0xff] %v21198_v1  ;;  %v8724_v0 = vcombine.high %v8466_v63, %v8466_v63  ;;  %v5256_v54 = vpop.permute.xlu0 %5255  ;;  %v26569_v44 = vcombine.low %v20738_v21, %v20770_v50  ;;  %v3554_v61 = vcombine.low %v21172_v3, %v21176_v10  ;;  %v26573_v63 = vld [vmem:[#allocation51_spill] sm:$0xff] }
 0x2a3   :  { %5269 = vrot.lane.b32.xlu0 %v26542_v56, %s15881_s27  ;;  %26567 = vst [vmem:[#allocation70_spill] sm:$0xff] %v21201_v33  ;;  %v26568_v56 = vld [vmem:[#allocation83_spill] sm:$0xff]  ;;  %v3570_v6 = vcombine.low %v21180_v40, %v21184_v35  ;;  %v21216_v62 = vrot.slane %v10089_v7, %v19815_v59  ;;  %v21219_v9 = vrot.slane %v10090_v4, %v19815_v59  ;;  %v7490_v26 = vpop.permute.xlu1 %7489 }
 0x2a4   :  { %v9603_v37 = vmax.f32 %v26568_v56, %v8739_v53  ;;  %v26574_v36 = vcombine.low %v26572_v24, %v26573_v63  ;;  %v7863_v60 = vsel %vm7838_vm14, %v7813_v16, %v6942_v15  ;;  %v26577_v19 = vcombine.low %v26575_v45, %v26576_v12  ;;  %v159_v15 = vld [vmem:[%s25399_s0 + $0x180] sm:$0xff] }
 0x2a5   :  { %7503 = vrot.lane.b32.xlu1 %v26569_v44, %s15884_s2  ;;  %26570 = vst [vmem:[#allocation32_spill] sm:$0xff] %v21216_v62  ;;  %26571 = vst [vmem:[#allocation53_spill] sm:$0xff] %v21219_v9  ;;  %v7913_v29 = vsel %vm7888_vm15, %v7863_v60, %v7250_v27  ;;  %v4534_v4 = vcombine.low %v21079_v34, %v21100_v55  ;;  %v4550_v53 = vcombine.low %v21091_v51, %v21136_v31  ;;  %v26579_v31 = vld [vmem:[#allocation44_spill] sm:$0xff] }
 0x2a6   :  { %v7614_v22 = vsel %vm7588_vm9, %v26574_v36, %v3808_v17  ;;  %v14368_v17 = vrot.slane %v9602_v58, 9  ;;  %v7963_v14 = vsel %vm7938_vm0, %v7913_v29, %v7490_v26  ;;  %v21244_v27 = vsel %vm10458_vm5, %v21201_v33, %v21219_v9  ;;  %v6236_v55 = vpop.permute.xlu0 %6235  ;;  %v26581_v60 = vld [vmem:[#allocation84_spill] sm:$0xff] }
 0x2a7   :  { %6249 = vrot.lane.b32.xlu0 %v26577_v19, %s15872_s12  ;;  %26578 = vst [vmem:[#allocation59_spill] sm:$0xff] %v21244_v27  ;;  %v21247_v16 = vrot.slane %v5103_v13, %v16028_v5  ;;  %v21250_v34 = vrot.slane %v8724_v0, %v16028_v5  ;;  %14846 = vmatmul.mubr.msk.f32.gmra.mrb[48].mxu0 %vm25827_vm4, %v7963_v14  ;;  %v14369_v36 = vrot.slane %v9603_v37, 9  ;;  %v6668_v29 = vpop.permute.xlu1 %6667 }
 0x2a8   :  { %v21256_v56 = vrot.slane %v3554_v61, %v16028_v5  ;;  %v21259_v44 = vrot.slane %v3570_v6, %v16028_v5  ;;  %14848 = vmatprep.mubr.msk.f32.mxu0 %vm15888_vm8, %v25931_v42  ;;  %v5947_v13 = vcombine.low %v20992_v23, %v21010_v41  ;;  %v5948_v0 = vcombine.low %v21016_v43, %v21172_v3  ;;  %v8267_v43 = vpop.f32.mrb[22].mxu0 }
 0x2a9   :  { %6681 = vrot.lane.b32.xlu1 %v26579_v31, %s15879_s3  ;;  %v961_v24 = vcombine.high %v159_v15, %v159_v15  ;;  %v21268_v63 = vrot.slane %v159_v15, %v16028_v5  ;;  %v7664_v61 = vsel %vm25834_vm10, %v7614_v22, %v4788_v46  ;;  %v26582_v6 = vcombine.low %v26581_v60, %v20492_v38  ;;  %v160_v15 = vld [vmem:[%s25399_s0 + $0x188] sm:$0xff]  ;;  %v26596_v31 = vld [vmem:[#allocation38_spill] sm:$0xff] }
 0x2aa   :  { %26580 = vst [vmem:[#allocation34_spill] sm:$0xff] %v21256_v56  ;;  %v21276_v45 = vrot.slane %v4534_v4, %v16028_v5  ;;  %v21279_v23 = vrot.slane %v4550_v53, %v16028_v5  ;;  %v10092_v41 = vmax.f32 %v9602_v58, %v14368_v17  ;;  %v7714_v22 = vsel %vm25826_vm11, %v7664_v61, %v5256_v54  ;;  %v3810_v19 = vpop.permute.xlu0 %3809  ;;  %v14808_v4 = vpop.f32.mrb[23].mxu0  ;;  %v26594_v38 = vld [vmem:[#allocation60_spill] sm:$0xff] }
 0x2ab   :  { %3823 = vrot.lane.b32.xlu0 %v26582_v6, %s15883_s13  ;;  %v21284_v12 = vrot.slane %v961_v24, %v16028_v5  ;;  %v21288_v46 = vcombine.high %v21268_v63, %v21268_v63  ;;  %v8268_v26 = vadd.f32 %v20649_v25, %v8267_v43  ;;  %v26583_v58 = vcombine.low %v20826_v20, %v20837_v28  ;;  %v26586_v6 = vld [vmem:[#allocation48_spill] sm:$0xff] }
 0x2ac   :  { %v21304_v17 = vrot.slane %v5947_v13, %v16028_v5  ;;  %v21307_v54 = vrot.slane %v5948_v0, %v16028_v5  ;;  %v21311_v14 = vcombine.low %v21030_v8, %v21192_v57  ;;  %v10093_v61 = vmax.f32 %v9603_v37, %v14369_v36  ;;  %v26587_v43 = vld [vmem:[#allocation20_spill] sm:$0xff]  ;;  %v6944_v13 = vpop.permute.xlu1 %6943 }
 0x2ad   :  { %6957 = vrot.lane.b32.xlu1 %v26583_v58, %s15882_s11  ;;  %v21315_v24 = vcombine.high %v21284_v12, %v21284_v12  ;;  %v8467_v60 = vmax.f32 %v8268_v26, 0.0  ;;  %v26588_v58 = vcombine.low %v26586_v6, %v26587_v43  ;;  %v1680_v4 = vrot.slane %v21288_v46, 7  ;;  %v26597_v43 = vld [vmem:[#allocation71_spill] sm:$0xff] }
 0x2ae   :  { %26584 = vst [vmem:[#allocation74_spill] sm:$0xff] %v21307_v54  ;;  %26585 = vst [vmem:[#allocation52_spill] sm:$0xff] %v21311_v14  ;;  %v21325_v3 = vrot.slane %v10092_v41, %v19815_v59  ;;  %v978_v47 = vcombine.high %v160_v15, %v160_v15  ;;  %v21330_v37 = vrot.slane %v160_v15, %v16028_v5  ;;  %v4790_v26 = vpop.permute.xlu0 %4789 }
 0x2af   :  { %4803 = vrot.lane.b32.xlu0 %v26588_v58, %s15880_s26  ;;  %v7764_v36 = vsel %vm7738_vm12, %v7714_v22, %v6236_v55  ;;  %v26590_v6 = vcombine.low %v20893_v39, %v20956_v49  ;;  %v2689_v41 = vcombine.low %v21268_v63, %v21288_v46  ;;  %v2705_v53 = vcombine.low %v21284_v12, %v21315_v24 }
 0x2b0   :  { %26589 = vst [vmem:[#allocation69_spill] sm:$0xff] %v21325_v3  ;;  %v14258_v55 = vrot.slane %v21268_v63, 9  ;;  %v1683_v22 = vrot.slane %v21284_v12, 7  ;;  %v5112_v7 = vcombine.low %v21091_v51, %v21268_v63  ;;  %v8741_v0 = vcombine.high %v8467_v60, %v8467_v60  ;;  %v7252_v9 = vpop.permute.xlu1 %7251 }
 0x2b1   :  { %7265 = vrot.lane.b32.xlu1 %v26590_v6, %s15885_s16  ;;  %v21350_v6 = vrot.slane %v10093_v61, %v19815_v59  ;;  %v26595_v33 = vcombine.low %v26594_v38, %v20770_v50  ;;  %v1682_v62 = vrot.slane %v1680_v4, 2  ;;  %v1686_v15 = vrot.slane %v21315_v24, 7  ;;  %v26599_v38 = vld [vmem:[#allocation39_spill] sm:$0xff] }
 0x2b2   :  { %v7814_v1 = vsel %vm7788_vm13, %v7764_v36, %v6668_v29  ;;  %v26598_v58 = vcombine.low %v26596_v31, %v26597_v43  ;;  %v21363_v61 = vrot.slane %v978_v47, %v16028_v5  ;;  %v1689_v49 = vrot.slane %v21330_v37, 7 }
 0x2b3   :  { %26593 = vst [vmem:[#allocation83_spill] sm:$0xff] %v21350_v6  ;;  %5271 = vrot.lane.b32.xlu0 %v26595_v33, %s15881_s27  ;;  %v21367_v59 = vrot.slane %v8467_v60, %v16028_v5  ;;  %v5258_v33 = vpop.permute.xlu0 %5257  ;;  %v21372_v14 = vrot.slane %v2689_v41, %v16028_v5  ;;  %v21375_v29 = vrot.slane %v2705_v53, %v16028_v5  ;;  %v1685_v60 = vrot.slane %v1683_v22, 2  ;;  %v26602_v53 = vld [vmem:[#allocation29_spill] sm:$0xff]  ;;  %v26603_v41 = vld [vmem:[#allocation67_spill] sm:$0xff] }
 0x2b4   :  { %v7615_v27 = vsel %vm7588_vm9, %v26598_v58, %v3810_v19  ;;  %v4551_v31 = vcombine.low %v21288_v46, %v21284_v12  ;;  %v7864_v47 = vsel %vm7838_vm14, %v7814_v1, %v6944_v13  ;;  %v1681_v19 = vsel %vm16175_vm6, %v14258_v55, %v1680_v4  ;;  %v7492_v12 = vpop.permute.xlu1 %7491  ;;  %v26613_v55 = vld [vmem:[#allocation35_spill] sm:$0xff] }
 0x2b5   :  { %7505 = vrot.lane.b32.xlu1 %v26599_v38, %s15884_s2  ;;  %26600 = vst [vmem:[#allocation82_spill] sm:$0xff] %v21372_v14  ;;  %v21383_v36 = vrot.slane %v5112_v7, %v16028_v5  ;;  %v21386_v43 = vrot.slane %v8741_v0, %v16028_v5  ;;  %v7914_v58 = vsel %vm7888_vm15, %v7864_v47, %v7252_v9  ;;  %v1688_v46 = vrot.slane %v1686_v15, 2  ;;  %v21400_v7 = vld [vmem:[%s25399_s0 + $0x190] sm:$0xff] }
 0x2b6   :  { %v26604_v54 = vcombine.low %v26602_v53, %v26603_v41  ;;  %v21395_v1 = vsel %vm16175_vm6, %v1682_v62, %v1683_v22  ;;  %v21405_v9 = vsel %vm10458_vm5, %v21350_v6, %v21325_v3  ;;  %v7665_v13 = vsel %vm25834_vm10, %v7615_v27, %v4790_v26  ;;  %v26606_v0 = vld [vmem:[#allocation77_spill] sm:$0xff] }
 0x2b7   :  { %26601 = vst [vmem:[#allocation51_spill] sm:$0xff] %v21383_v36  ;;  %26605 = vst [vmem:[#allocation65_spill] sm:$0xff] %v21405_v9  ;;  %v6238_v22 = vpop.permute.xlu0 %6237  ;;  %v26608_v47 = vld [vmem:[#allocation21_spill] sm:$0xff]  ;;  %v21421_v27 = vrot.slane %v4551_v31, %v16028_v5  ;;  %v21427_v26 = vsel %vm16175_vm6, %v1685_v60, %v1686_v15  ;;  %v21446_v60 = vsel %vm16175_vm6, %v1688_v46, %v1689_v49  ;;  %v8272_v31 = vpop.f32.mrb[24].mxu0 }
 0x2b8   :  { %6251 = vrot.lane.b32.xlu0 %v26604_v54, %s15872_s12  ;;  %v7964_v54 = vsel %vm7938_vm0, %v7914_v58, %v7492_v12  ;;  %v26609_v53 = vcombine.low %v26608_v47, %v20826_v20  ;;  %v3571_v58 = vcombine.low %v1681_v19, %v21395_v1  ;;  %v21432_v12 = vcombine.high %v21330_v37, %v21330_v37  ;;  %v26610_v47 = vld [vmem:[#allocation23_spill] sm:$0xff]  ;;  %v6670_v15 = vpop.permute.xlu1 %6669 }
 0x2b9   :  { %14849 = vmatmul.mubr.msk.f32.gmra.mrb[50].mxu0 %vm25827_vm4, %v7964_v54  ;;  %v21436_v54 = vrot.slane %v21400_v7, %v16028_v5  ;;  %v21452_v41 = vcombine.high %v21363_v61, %v21363_v61  ;;  %v7715_v62 = vsel %vm25826_vm11, %v7665_v13, %v5258_v33  ;;  %v4567_v6 = vcombine.low %v21315_v24, %v21330_v37  ;;  %v14811_v33 = vpop.f32.mrb[25].mxu0 }
 0x2ba   :  { %6683 = vrot.lane.b32.xlu1 %v26609_v53, %s15879_s3  ;;  %14851 = vmatprep.mubr.msk.f32.mxu0 %vm15888_vm8, %v25931_v42  ;;  %v26611_v53 = vcombine.low %v26610_v47, %v20731_v11  ;;  %v5964_v11 = vcombine.low %v21176_v10, %v21180_v40  ;;  %v26614_v3 = vcombine.low %v26613_v55, %v21030_v8  ;;  %v1692_v24 = vrot.slane %v21432_v12, 7  ;;  %v26615_v8 = vld [vmem:[#allocation45_spill] sm:$0xff] }
 0x2bb   :  { %26612 = vst [vmem:[#allocation58_spill] sm:$0xff] %v21452_v41  ;;  %v21461_v46 = vcombine.high %v21436_v54, %v21436_v54  ;;  %v21463_v47 = vpop.permute.xlu0 %3811  ;;  %v5965_v13 = vcombine.low %v21184_v35, %v1681_v19  ;;  %v1695_v10 = vrot.slane %v21363_v61, 7  ;;  %v21474_v40 = vrot.slane %v3571_v58, %v16028_v5 }
 0x2bc   :  { %3825 = vrot.lane.b32.xlu0 %v26611_v53, %s15883_s13  ;;  %v8273_v53 = vadd.f32 %v20649_v25, %v8272_v31  ;;  %v3587_v9 = vcombine.low %v21427_v26, %v21446_v60  ;;  %v1691_v20 = vrot.slane %v1689_v49, 2  ;;  %v1698_v31 = vrot.slane %v21452_v41, 7  ;;  %v6946_v35 = vpop.permute.xlu1 %6945 }
 0x2bd   :  { %v1694_v19 = vrot.slane %v1692_v24, 2  ;;  %v1697_v33 = vrot.slane %v1695_v10, 2  ;;  %v14259_v55 = vrot.slane %v21436_v54, 9  ;;  %v21485_v58 = vrot.slane %v4567_v6, %v16028_v5 }
 0x2be   :  { %6959 = vrot.lane.b32.xlu1 %v26614_v3, %s15882_s11  ;;  %v8468_v36 = vmax.f32 %v8273_v53, 0.0  ;;  %v26616_v3 = vcombine.low %v26615_v8, %v20738_v21  ;;  %v21488_v4 = vrot.slane %v5964_v11, %v16028_v5  ;;  %v14292_v49 = vcombine.high %v21091_v51, %v21268_v63 }
 0x2bf   :  { %26617 = vst [vmem:[#allocation84_spill] sm:$0xff] %v21485_v58  ;;  %v4792_v8 = vpop.permute.xlu0 %4791  ;;  %v21501_v6 = vrot.slane %v5965_v13, %v16028_v5  ;;  %v7765_v51 = vsel %vm7738_vm12, %v7715_v62, %v6238_v22  ;;  %v21507_v63 = vrot.slane %v3587_v9, %v16028_v5  ;;  %v21513_v53 = vsel %vm16175_vm6, %v1694_v19, %v1695_v10 }
 0x2c0   :  { %4805 = vrot.lane.b32.xlu0 %v26616_v3, %s15880_s26  ;;  %v8758_v41 = vcombine.high %v8468_v36, %v8468_v36  ;;  %v21494_v21 = vrot.slane %v8468_v36, %v16028_v5  ;;  %v26618_v3 = vld [vmem:[#allocation25_spill] sm:$0xff]  ;;  %v1693_v36 = vsel %vm16175_vm6, %v1691_v20, %v1692_v24  ;;  %v7254_v11 = vpop.permute.xlu1 %7253  ;;  %v21522_v9 = vsel %vm16175_vm6, %v1697_v33, %v1698_v31 }
 0x2c1   :  { %v26619_v14 = vcombine.low %v21054_v32, %v26618_v3  ;;  %v26620_v62 = vrot.slane %v21461_v46, 7  ;;  %v7815_v22 = vsel %vm7788_vm13, %v7765_v51, %v6670_v15  ;;  %v21536_v24 = vrot.slane %v14292_v49, %v16028_v5 }
 0x2c2   :  { %v8773_v13 = vcombine.high %v21494_v21, %v21494_v21  ;;  %v26623_v33 = vcombine.low %v26606_v0, %v21060_v52  ;;  %v2722_v49 = vcombine.low %v21363_v61, %v21436_v54 }
 0x2c3   :  { %7267 = vrot.lane.b32.xlu1 %v26619_v14, %s15885_s16  ;;  %v8772_v14 = vrot.slane %v8758_v41, %v16028_v5  ;;  %v21528_v20 = vsel %vm16175_vm6, %v14259_v55, %v26620_v62  ;;  %v21533_v41 = vcombine.low %v21421_v27, %v21485_v58  ;;  %26621 = vst [vmem:[#allocation48_spill] sm:$0xff] %v21536_v24  ;;  %v5260_v15 = vpop.permute.xlu0 %5259 }
 0x2c4   :  { %5273 = vrot.lane.b32.xlu0 %v26599_v38, %s15881_s27  ;;  %v2706_v38 = vcombine.low %v21330_v37, %v21432_v12  ;;  %v21541_v31 = vmax.f32 %v21250_v34, %v8773_v13  ;;  %v26622_v55 = vcombine.high %v21250_v34, %v21250_v34  ;;  %v7865_v37 = vsel %vm7838_vm14, %v7815_v22, %v6946_v35  ;;  %v7494_v3 = vpop.permute.xlu1 %7493 }
 0x2c5   :  { %v8774_v10 = vcombine.high %v8772_v14, %v8772_v14  ;;  %v3588_v13 = vcombine.low %v1693_v36, %v21513_v53  ;;  %v3604_v34 = vcombine.low %v21522_v9, %v21528_v20  ;;  %v7915_v62 = vsel %vm7888_vm15, %v7865_v37, %v7254_v11 }
 0x2c6   :  { %v21546_v19 = vmax.f32 %v26622_v55, %v8772_v14  ;;  %v26624_v55 = vld [vmem:[#allocation22_spill] sm:$0xff]  ;;  %v4568_v35 = vcombine.low %v21432_v12, %v21363_v61  ;;  %v14279_v22 = vcombine.high %v21363_v61, %v21436_v54  ;;  %v7965_v51 = vsel %vm7938_vm0, %v7915_v62, %v7494_v3  ;;  %v8277_v3 = vpop.f32.mrb[26].mxu0 }
 0x2c7   :  { %7507 = vrot.lane.b32.xlu1 %v26623_v33, %s15884_s2  ;;  %v21561_v14 = vmax.f32 %v21367_v59, %v8774_v10  ;;  %v26625_v33 = vld [vmem:[#allocation42_spill] sm:$0xff]  ;;  %v5981_v11 = vcombine.low %v21395_v1, %v21427_v26  ;;  %v5982_v37 = vcombine.low %v21446_v60, %v1693_v36  ;;  %14852 = vmatmul.mubr.msk.f32.gmra.mrb[52].mxu0 %vm25827_vm4, %v7965_v51 }
 0x2c8   :  { %v26626_v58 = vcombine.low %v26624_v55, %v26625_v33  ;;  %v6240_v55 = vpop.permute.xlu0 %6239  ;;  %v26627_v12 = vld [vmem:[#allocation62_spill] sm:$0xff]  ;;  %v21591_v1 = vrot.slane %v2706_v38, %v16028_v5  ;;  %v21594_v26 = vrot.slane %v2722_v49, %v16028_v5  ;;  %14854 = vmatprep.mubr.msk.f32.mxu0 %vm15888_vm8, %v25931_v42  ;;  %v21601_v36 = vrot.slane %v3588_v13, %v16028_v5  ;;  %v26633_v38 = vld [vmem:[#allocation73_spill] sm:$0xff] }
 0x2c9   :  { %v26628_v33 = vcombine.low %v20837_v28, %v26627_v12  ;;  %v21604_v51 = vrot.slane %v3604_v34, %v16028_v5  ;;  %v994_v62 = vcombine.high %v21400_v7, %v21400_v7  ;;  %v7616_v49 = vsel %vm7588_vm9, %v26633_v38, %v21463_v47 }
 0x2ca   :  { %6253 = vrot.lane.b32.xlu0 %v26626_v58, %s15872_s12  ;;  %v21581_v58 = vld [vmem:[%s25399_s0 + $0x198] sm:$0xff]  ;;  %26629 = vst [vmem:[#allocation20_spill] sm:$0xff] %v21591_v1  ;;  %26630 = vst [vmem:[#allocation60_spill] sm:$0xff] %v21594_v26  ;;  %v26634_v12 = vcombine.low %v20760_v30, %v20893_v39  ;;  %v21616_v60 = vrot.slane %v4568_v35, %v16028_v5  ;;  %v21619_v13 = vrot.slane %v14279_v22, %v16028_v5 }
 0x2cb   :  { %6685 = vrot.lane.b32.xlu1 %v26628_v33, %s15879_s3  ;;  %26631 = vst [vmem:[#allocation38_spill] sm:$0xff] %v21601_v36  ;;  %26632 = vst [vmem:[#allocation71_spill] sm:$0xff] %v21604_v51  ;;  %v6672_v33 = vpop.permute.xlu1 %6671  ;;  %v21623_v34 = vrot.slane %v21581_v58, %v16028_v5  ;;  %v7666_v7 = vsel %vm25834_vm10, %v7616_v49, %v4792_v8  ;;  %v21627_v47 = vrot.slane %v5981_v11, %v16028_v5  ;;  %v14814_v11 = vpop.f32.mrb[27].mxu0 }
 0x2cc   :  { %26635 = vst [vmem:[#allocation39_spill] sm:$0xff] %v21619_v13  ;;  %v21630_v30 = vrot.slane %v5982_v37, %v16028_v5  ;;  %v21633_v39 = vrot.slane %v994_v62, %v16028_v5  ;;  %v14370_v35 = vrot.slane %v21541_v31, 9  ;;  %v7716_v22 = vsel %vm25826_vm11, %v7666_v7, %v5260_v15  ;;  %v21637_v38 = vpop.permute.xlu0 %3813 }
 0x2cd   :  { %26636 = vst [vmem:[#allocation29_spill] sm:$0xff] %v21627_v47  ;;  %v26638_v8 = vcombine.low %v21192_v57, %v21195_v18  ;;  %v14371_v62 = vrot.slane %v21546_v19, 9  ;;  %v26639_v57 = vcombine.low %v20770_v50, %v20896_v48  ;;  %v1711_v49 = vrot.slane %v21623_v34, 7 }
 0x2ce   :  { %3827 = vrot.lane.b32.xlu0 %v26634_v12, %s15883_s13  ;;  %26637 = vst [vmem:[#allocation67_spill] sm:$0xff] %v21630_v30  ;;  %v8278_v12 = vadd.f32 %v20649_v25, %v8277_v3  ;;  %v21651_v15 = vcombine.high %v21633_v39, %v21633_v39  ;;  %v21655_v25 = vcombine.high %v21623_v34, %v21623_v34  ;;  %v1705_v11 = vrot.slane %v21633_v39, 7 }
 0x2cf   :  { %6961 = vrot.lane.b32.xlu1 %v26638_v8, %s15882_s11  ;;  %v6948_v7 = vpop.permute.xlu1 %6947  ;;  %v14372_v37 = vrot.slane %v21561_v14, 9  ;;  %v7766_v48 = vsel %vm7738_vm12, %v7716_v22, %v6240_v55  ;;  %v26641_v13 = vcombine.low %v21256_v56, %v21259_v44  ;;  %v26642_v51 = vrot.slane %v21461_v46, 7 }
 0x2d0   :  { %v8469_v3 = vmax.f32 %v8278_v12, 0.0  ;;  %v21670_v12 = vcombine.low %v21375_v29, %v21591_v1  ;;  %v1708_v50 = vrot.slane %v21651_v15, 7  ;;  %v4794_v28 = vpop.permute.xlu0 %4793  ;;  %v1707_v30 = vrot.slane %v1705_v11, 2 }
 0x2d1   :  { %v1704_v10 = vrot.slane %v26642_v51, 2  ;;  %v1713_v26 = vrot.slane %v1711_v49, 2  ;;  %v7816_v1 = vsel %vm7788_vm13, %v7766_v48, %v6672_v33  ;;  %v10094_v56 = vmax.f32 %v21541_v31, %v14370_v35 }
 0x2d2   :  { %4807 = vrot.lane.b32.xlu0 %v26639_v57, %s15880_s26  ;;  %26640 = vst [vmem:[#allocation77_spill] sm:$0xff] %v21670_v12  ;;  %v8775_v57 = vcombine.high %v8469_v3, %v8469_v3  ;;  %v8782_v8 = vrot.slane %v8469_v3, %v16028_v5  ;;  %v1710_v47 = vrot.slane %v1708_v50, 2  ;;  %v26643_v3 = vcombine.high %v21367_v59, %v21367_v59 }
 0x2d3   :  { %7269 = vrot.lane.b32.xlu1 %v26641_v13, %s15885_s16  ;;  %v26644_v13 = vcombine.low %v21247_v16, %v21060_v52  ;;  %v7256_v51 = vpop.permute.xlu1 %7255  ;;  %v10095_v24 = vmax.f32 %v21546_v19, %v14371_v62  ;;  %v7866_v12 = vsel %vm7838_vm14, %v7816_v1, %v6948_v7  ;;  %v2723_v33 = vcombine.low %v21461_v46, %v21633_v39 }
 0x2d4   :  { %v8789_v55 = vrot.slane %v8775_v57, %v16028_v5  ;;  %v8790_v22 = vcombine.high %v8782_v8, %v8782_v8  ;;  %v9607_v36 = vmax.f32 %v26643_v3, %v8782_v8  ;;  %v26645_v59 = vcombine.high %v21386_v43, %v21386_v43  ;;  %v5262_v3 = vpop.permute.xlu0 %5261 }
 0x2d5   :  { %v26646_v16 = vcombine.low %v21276_v45, %v21279_v23  ;;  %v2739_v31 = vcombine.low %v21651_v15, %v21623_v34  ;;  %v21708_v19 = vsel %vm16175_vm6, %v1704_v10, %v1705_v11  ;;  %v21712_v1 = vsel %vm16175_vm6, %v1707_v30, %v1708_v50  ;;  %v26648_v11 = vld [vmem:[#allocation74_spill] sm:$0xff] }
 0x2d6   :  { %5275 = vrot.lane.b32.xlu0 %v26644_v13, %s15881_s27  ;;  %v8791_v48 = vcombine.high %v8789_v55, %v8789_v55  ;;  %v9608_v57 = vmax.f32 %v21386_v43, %v8790_v22  ;;  %v9609_v8 = vmax.f32 %v26645_v59, %v8789_v55  ;;  %v21716_v43 = vsel %vm16175_vm6, %v1710_v47, %v1711_v49  ;;  %v26705_v13 = vld [vmem:[#allocation67_spill] sm:$0xff] }
 0x2d7   :  { %7509 = vrot.lane.b32.xlu1 %v26646_v16, %s15884_s2  ;;  %v26647_v35 = vrot.slane %v21655_v25, 7  ;;  %v14373_v55 = vrot.slane %v9607_v36, 9  ;;  %v7916_v10 = vsel %vm7888_vm15, %v7866_v12, %v7256_v51  ;;  %v26649_v30 = vcombine.low %v21304_v17, %v26648_v11  ;;  %v7496_v50 = vpop.permute.xlu1 %7495  ;;  %v26652_v51 = vld [vmem:[#allocation52_spill] sm:$0xff] }
 0x2d8   :  { %v9610_v7 = vmax.f32 %v21494_v21, %v8791_v48  ;;  %v1011_v47 = vcombine.high %v21581_v58, %v21581_v58  ;;  %v10096_v49 = vmax.f32 %v21561_v14, %v14372_v37  ;;  %v7966_v22 = vsel %vm7938_vm0, %v7916_v10, %v7496_v50  ;;  %v6242_v12 = vpop.permute.xlu0 %6241  ;;  %v26653_v37 = vld [vmem:[#allocation76_spill] sm:$0xff]  ;;  %v26661_v48 = vld [vmem:[#allocation41_spill] sm:$0xff] }
 0x2d9   :  { %v21722_v62 = vsel %vm16175_vm6, %v1713_v26, %v26647_v35  ;;  %14855 = vmatmul.mubr.msk.f32.gmra.mrb[54].mxu0 %vm25827_vm4, %v7966_v22  ;;  %v3605_v17 = vcombine.low %v21708_v19, %v21712_v1  ;;  %v5122_v58 = vcombine.low %v21436_v54, %v21461_v46  ;;  %v21748_v59 = vrot.slane %v10094_v56, %v26653_v37  ;;  %v26657_v54 = vld [vmem:[#allocation66_spill] sm:$0xff] }
 0x2da   :  { %6255 = vrot.lane.b32.xlu0 %v26649_v30, %s15872_s12  ;;  %v3621_v14 = vcombine.low %v21716_v43, %v21722_v62  ;;  %v21751_v16 = vrot.slane %v10095_v24, %v26653_v37  ;;  %14857 = vmatprep.mubr.msk.f32.mxu0 %vm15888_vm8, %v25931_v42  ;;  %v21756_v35 = vrot.slane %v2723_v33, %v16028_v5  ;;  %v14374_v11 = vrot.slane %v9608_v57, 9  ;;  %v26660_v33 = vld [vmem:[#allocation46_spill] sm:$0xff] }
 0x2db   :  { %6687 = vrot.lane.b32.xlu1 %v26652_v51, %s15879_s3  ;;  %26654 = vst [vmem:[#allocation21_spill] sm:$0xff] %v21748_v59  ;;  %v21759_v10 = vrot.slane %v2739_v31, %v16028_v5  ;;  %v14375_v30 = vrot.slane %v9609_v8, 9  ;;  %v10097_v50 = vmax.f32 %v9607_v36, %v14373_v55  ;;  %v26658_v56 = vcombine.low %v26657_v54, %v21054_v32  ;;  %v6674_v46 = vpop.permute.xlu1 %6673  ;;  %v8282_v36 = vpop.f32.mrb[28].mxu0  ;;  %v26669_v55 = vld [vmem:[#allocation30_spill] sm:$0xff] }
 0x2dc   :  { %26655 = vst [vmem:[#allocation23_spill] sm:$0xff] %v21751_v16  ;;  %26656 = vst [vmem:[#allocation45_spill] sm:$0xff] %v21756_v35  ;;  %v21766_v24 = vrot.slane %v1011_v47, %v16028_v5  ;;  %v21769_v22 = vrot.slane %v10096_v49, %v26653_v37  ;;  %v26662_v31 = vcombine.low %v26660_v33, %v26661_v48  ;;  %v14376_v16 = vrot.slane %v9610_v7, 9  ;;  %v3816_v54 = vpop.permute.xlu0 %3815  ;;  %v26663_v47 = vld [vmem:[#allocation82_spill] sm:$0xff]  ;;  %v14817_v49 = vpop.f32.mrb[29].mxu0 }
 0x2dd   :  { %v21787_v48 = vrot.slane %v3621_v14, %v16028_v5  ;;  %v21807_v49 = vrot.slane %v10097_v50, %v26653_v37  ;;  %v26670_v51 = vcombine.low %v26669_v55, %v26606_v0  ;;  %v4601_v14 = vcombine.low %v21623_v34, %v21655_v25 }
 0x2de   :  { %3829 = vrot.lane.b32.xlu0 %v26658_v56, %s15883_s13  ;;  %26659 = vst [vmem:[#allocation22_spill] sm:$0xff] %v21769_v22  ;;  %v7617_v26 = vsel %vm7588_vm9, %v26662_v31, %v21637_v38  ;;  %v26664_v56 = vcombine.low %v26663_v47, %v21375_v29  ;;  %v21784_v22 = vrot.slane %v3605_v17, %v16028_v5  ;;  %v21801_v31 = vld [vmem:[#allocation5] ss:$0 sm:$0xff] }
 0x2df   :  { %v7667_v32 = vsel %vm25834_vm10, %v7617_v26, %v4794_v28  ;;  %26665 = vst [vmem:[#allocation42_spill] sm:$0xff] %v21787_v48  ;;  %v21790_v38 = vrot.slane %v5122_v58, %v16028_v5  ;;  %v163_v28 = vld [vmem:[%s25399_s0 + $0x1a0] sm:$0xff]  ;;  %v8283_v17 = vadd.f32 %v21801_v31, %v8282_v36  ;;  %v10098_v58 = vmax.f32 %v9608_v57, %v14374_v11 }
 0x2e0   :  { %6963 = vrot.lane.b32.xlu1 %v26664_v56, %s15882_s11  ;;  %v26666_v26 = vld [vmem:[#allocation59_spill] sm:$0xff]  ;;  %v7717_v29 = vsel %vm25826_vm11, %v7667_v32, %v5262_v3  ;;  %v10099_v56 = vmax.f32 %v9609_v8, %v14375_v30  ;;  %26668 = vst [vmem:[#allocation73_spill] sm:$0xff] %v21807_v49  ;;  %v4585_v3 = vcombine.low %v21633_v39, %v21651_v15  ;;  %v4796_v8 = vpop.permute.xlu0 %4795 }
 0x2e1   :  { %v21798_v33 = vsel %vm1188_vm1, %v21748_v59, %v26666_v26  ;;  %v6950_v26 = vpop.permute.xlu1 %6949  ;;  %v10100_v32 = vmax.f32 %v9610_v7, %v14376_v16  ;;  %v7767_v36 = vsel %vm7738_vm12, %v7717_v29, %v6242_v12  ;;  %v21819_v57 = vrot.slane %v163_v28, %v16028_v5 }
 0x2e2   :  { %26667 = vst [vmem:[#allocation62_spill] sm:$0xff] %v21798_v33  ;;  %4809 = vrot.lane.b32.xlu0 %v26670_v51, %s15880_s26  ;;  %v26671_v11 = vcombine.low %v21474_v40, %v21507_v63  ;;  %v5998_v15 = vcombine.low %v21513_v53, %v21522_v9  ;;  %v1027_v7 = vcombine.high %v163_v28, %v163_v28  ;;  %v8470_v34 = vmax.f32 %v8283_v17, 0.0  ;;  %v26672_v51 = vld [vmem:[#allocation58_spill] sm:$0xff]  ;;  %v26675_v9 = vld [vmem:[#allocation51_spill] sm:$0xff] }
 0x2e3   :  { %v5999_v12 = vcombine.low %v21528_v20, %v21708_v19  ;;  %v6538_v16 = vcombine.low %v21363_v61, %v26672_v51  ;;  %v21837_v30 = vcombine.high %v21819_v57, %v21819_v57  ;;  %v21840_v50 = vrot.slane %v10098_v58, %v26653_v37  ;;  %v26680_v58 = vld [vmem:[#allocation47_spill] sm:$0xff] }
 0x2e4   :  { %7271 = vrot.lane.b32.xlu1 %v26671_v11, %s15885_s16  ;;  %v21843_v55 = vrot.slane %v10099_v56, %v26653_v37  ;;  %v7817_v53 = vsel %vm7788_vm13, %v7767_v36, %v6674_v46  ;;  %v26676_v28 = vcombine.low %v21276_v45, %v26675_v9  ;;  %v21851_v61 = vrot.slane %v4585_v3, %v16028_v5  ;;  %v26681_v56 = vld [vmem:[#allocation85_spill] sm:$0xff]  ;;  %v5264_v51 = vpop.permute.xlu0 %5263 }
 0x2e5   :  { %26673 = vst [vmem:[#allocation74_spill] sm:$0xff] %v21840_v50  ;;  %v7258_v20 = vpop.permute.xlu1 %7257  ;;  %v21854_v19 = vrot.slane %v10100_v32, %v26653_v37  ;;  %v21857_v29 = vrot.slane %v4601_v14, %v16028_v5  ;;  %v21861_v17 = vcombine.high %v21766_v24, %v21766_v24  ;;  %v1717_v46 = vrot.slane %v21766_v24, 7 }
 0x2e6   :  { %26674 = vst [vmem:[#allocation66_spill] sm:$0xff] %v21843_v55  ;;  %5277 = vrot.lane.b32.xlu0 %v26676_v28, %s15881_s27  ;;  %26677 = vst [vmem:[#allocation46_spill] sm:$0xff] %v21851_v61  ;;  %v26682_v36 = vcombine.low %v26680_v58, %v26681_v56  ;;  %v21871_v3 = vrot.slane %v5998_v15, %v16028_v5  ;;  %v21874_v14 = vrot.slane %v1027_v7, %v16028_v5  ;;  %v26689_v55 = vld [vmem:[#allocation34_spill] sm:$0xff] }
 0x2e7   :  { %26678 = vst [vmem:[#allocation41_spill] sm:$0xff] %v21854_v19  ;;  %26679 = vst [vmem:[#allocation59_spill] sm:$0xff] %v21857_v29  ;;  %v1724_v32 = vrot.slane %v21837_v30, 7  ;;  %v8792_v9 = vcombine.high %v8470_v34, %v8470_v34  ;;  %v7867_v28 = vsel %vm7838_vm14, %v7817_v53, %v6950_v26  ;;  %v21879_v39 = vrot.slane %v5999_v12, %v16028_v5 }
 0x2e8   :  { %v7618_v11 = vsel %vm7588_vm9, %v26682_v36, %v3816_v54  ;;  %7511 = vrot.lane.b32.xlu1 %v21533_v41, %s15884_s2  ;;  %v21882_v54 = vrot.slane %v6538_v16, %v16028_v5  ;;  %v7917_v58 = vsel %vm7888_vm15, %v7867_v28, %v7258_v20  ;;  %v26683_v15 = vcombine.low %v21488_v4, %v21501_v6  ;;  %v6244_v0 = vpop.permute.xlu0 %6243  ;;  %v26685_v4 = vld [vmem:[#allocation48_spill] sm:$0xff] }
 0x2e9   :  { %v7498_v7 = vpop.permute.xlu1 %7497  ;;  %v2740_v56 = vcombine.low %v21655_v25, %v21766_v24  ;;  %v2756_v26 = vcombine.low %v21819_v57, %v21837_v30  ;;  %v26684_v12 = vrot.slane %v21655_v25, 7  ;;  %v1719_v36 = vrot.slane %v1717_v46, 2  ;;  %v26687_v25 = vld [vmem:[#allocation38_spill] sm:$0xff] }
 0x2ea   :  { %6257 = vrot.lane.b32.xlu0 %v26683_v15, %s15872_s12  ;;  %v7967_v16 = vsel %vm7938_vm0, %v7917_v58, %v7498_v7  ;;  %v1720_v20 = vrot.slane %v21861_v17, 7  ;;  %v14260_v28 = vrot.slane %v21819_v57, 9  ;;  %v26686_v6 = vcombine.low %v21195_v18, %v26685_v4  ;;  %v26688_v58 = vld [vmem:[#allocation25_spill] sm:$0xff]  ;;  %v26695_v18 = vld [vmem:[#allocation60_spill] sm:$0xff] }
 0x2eb   :  { %v1716_v53 = vrot.slane %v26684_v12, 2  ;;  %14858 = vmatmul.mubr.msk.f32.gmra.mrb[56].mxu0 %vm25827_vm4, %v7967_v16  ;;  %v21905_v15 = vcombine.low %v21851_v61, %v21857_v29  ;;  %v1726_v7 = vrot.slane %v1724_v32, 2  ;;  %v1727_v12 = vrot.slane %v21874_v14, 7  ;;  %v164_v4 = vld [vmem:[%s25399_s0 + $0x1a8] sm:$0xff] }
 0x2ec   :  { %6689 = vrot.lane.b32.xlu1 %v26686_v6, %s15879_s3  ;;  %v21911_v33 = vrot.slane %v8470_v34, %v16028_v5  ;;  %v21914_v19 = vrot.slane %v8792_v9, %v16028_v5  ;;  %14860 = vmatprep.mubr.msk.f32.mxu0 %vm15888_vm8, %v25931_v42  ;;  %v7668_v6 = vsel %vm25834_vm10, %v7618_v11, %v4796_v8  ;;  %v8287_v8 = vpop.f32.mrb[30].mxu0  ;;  %v26694_v16 = vld [vmem:[#allocation20_spill] sm:$0xff] }
 0x2ed   :  { %v26690_v50 = vcombine.low %v26688_v58, %v26689_v55  ;;  %v6676_v34 = vpop.permute.xlu1 %6675  ;;  %v21928_v9 = vrot.slane %v2740_v56, %v16028_v5  ;;  %v21931_v49 = vrot.slane %v2756_v26, %v16028_v5  ;;  %v21940_v11 = vsel %vm16175_vm6, %v1716_v53, %v1717_v46  ;;  %v21952_v26 = vpop.permute.xlu0 %3817 }
 0x2ee   :  { %v21948_v55 = vsel %vm16175_vm6, %v14260_v28, %v1724_v32  ;;  %v4602_v56 = vcombine.low %v21766_v24, %v21861_v17  ;;  %v8288_v58 = vadd.f32 %v21801_v31, %v8287_v8  ;;  %v26696_v46 = vcombine.low %v26694_v16, %v26695_v18  ;;  %v14820_v53 = vpop.f32.mrb[31].mxu0 }
 0x2ef   :  { %3831 = vrot.lane.b32.xlu0 %v26690_v50, %s15883_s13  ;;  %26691 = vst [vmem:[#allocation30_spill] sm:$0xff] %v21928_v9  ;;  %26692 = vst [vmem:[#allocation58_spill] sm:$0xff] %v21931_v49  ;;  %v21944_v50 = vsel %vm16175_vm6, %v1719_v36, %v1720_v20  ;;  %v21961_v36 = vsel %vm16175_vm6, %v1726_v7, %v1727_v12  ;;  %v21965_v32 = vcombine.high %v21874_v14, %v21874_v14 }
 0x2f0   :  { %6965 = vrot.lane.b32.xlu1 %v26696_v46, %s15882_s11  ;;  %v1044_v20 = vcombine.high %v164_v4, %v164_v4  ;;  %v4618_v16 = vcombine.low %v21837_v30, %v21874_v14  ;;  %v21974_v8 = vrot.slane %v164_v4, %v16028_v5  ;;  %v7718_v7 = vsel %vm25826_vm11, %v7668_v6, %v5264_v51 }
 0x2f1   :  { %v8471_v46 = vmax.f32 %v8288_v58, 0.0  ;;  %v26697_v53 = vcombine.low %v21060_v52, %v21276_v45  ;;  %v6952_v18 = vpop.permute.xlu1 %6951  ;;  %v3622_v28 = vcombine.low %v21940_v11, %v21944_v50  ;;  %v3638_v30 = vcombine.low %v21948_v55, %v21961_v36  ;;  %v4798_v6 = vpop.permute.xlu0 %4797  ;;  %v26698_v58 = vld [vmem:[#allocation71_spill] sm:$0xff] }
 0x2f2   :  { %v6015_v4 = vcombine.low %v21712_v1, %v21716_v43  ;;  %v21991_v51 = vcombine.high %v21974_v8, %v21974_v8  ;;  %v1730_v52 = vrot.slane %v21965_v32, 7  ;;  %v21999_v17 = vrot.slane %v4602_v56, %v16028_v5 }
 0x2f3   :  { %4811 = vrot.lane.b32.xlu0 %v26697_v53, %s15880_s26  ;;  %v8809_v45 = vcombine.high %v8471_v46, %v8471_v46  ;;  %v26699_v53 = vcombine.low %v26687_v25, %v26698_v58  ;;  %v22002_v47 = vrot.slane %v1044_v20, %v16028_v5  ;;  %v1729_v1 = vrot.slane %v1727_v12, 2 }
 0x2f4   :  { %v7768_v43 = vsel %vm7738_vm12, %v7718_v7, %v6244_v0  ;;  %v22006_v37 = vrot.slane %v4618_v16, %v16028_v5  ;;  %v6016_v59 = vcombine.low %v21722_v62, %v21940_v11  ;;  %v1733_v49 = vrot.slane %v21974_v8, 7 }
 0x2f5   :  { %7273 = vrot.lane.b32.xlu1 %v26699_v53, %s15885_s16  ;;  %v22012_v21 = vrot.slane %v8809_v45, %v16028_v5  ;;  %v7260_v56 = vpop.permute.xlu1 %7259  ;;  %v22017_v20 = vrot.slane %v3622_v28, %v16028_v5  ;;  %v1732_v12 = vrot.slane %v1730_v52, 2  ;;  %v1736_v0 = vrot.slane %v21991_v51, 7  ;;  %v5266_v45 = vpop.permute.xlu0 %5265  ;;  %v26702_v53 = vld [vmem:[#allocation39_spill] sm:$0xff] }
 0x2f6   :  { %v7818_v16 = vsel %vm7788_vm13, %v7768_v43, %v6676_v34  ;;  %v22022_v7 = vrot.slane %v3638_v30, %v16028_v5  ;;  %v22025_v62 = vrot.slane %v6015_v4, %v16028_v5  ;;  %v22029_v11 = vcombine.low %v21759_v10, %v21928_v9 }
 0x2f7   :  { %26700 = vst [vmem:[#allocation51_spill] sm:$0xff] %v22012_v21  ;;  %5279 = vrot.lane.b32.xlu0 %v21533_v41, %s15881_s27  ;;  %v8825_v41 = vcombine.high %v22012_v21, %v22012_v21  ;;  %v7868_v28 = vsel %vm7838_vm14, %v7818_v16, %v6952_v18  ;;  %v26703_v34 = vcombine.low %v21616_v60, %v26702_v53  ;;  %v1735_v21 = vrot.slane %v1733_v49, 2 }
 0x2f8   :  { %26701 = vst [vmem:[#allocation47_spill] sm:$0xff] %v22029_v11  ;;  %v2757_v30 = vcombine.low %v21874_v14, %v21965_v32  ;;  %v2773_v43 = vcombine.low %v21974_v8, %v21991_v51  ;;  %v22045_v11 = vsel %vm16175_vm6, %v1729_v1, %v1730_v52  ;;  %v1738_v18 = vrot.slane %v1736_v0, 2 }
 0x2f9   :  { %7513 = vrot.lane.b32.xlu1 %v26703_v34, %s15884_s2  ;;  %v22048_v16 = vmax.f32 %v21911_v33, %v8825_v41  ;;  %v7918_v9 = vsel %vm7888_vm15, %v7868_v28, %v7260_v56  ;;  %v26704_v34 = vld [vmem:[#allocation29_spill] sm:$0xff]  ;;  %v7500_v4 = vpop.permute.xlu1 %7499  ;;  %v22057_v25 = vsel %vm16175_vm6, %v1732_v12, %v1733_v49  ;;  %v5132_v52 = vcombine.low %v21766_v24, %v21819_v57 }
 0x2fa   :  { %v26706_v14 = vcombine.low %v26704_v34, %v26705_v13  ;;  %v7968_v1 = vsel %vm7938_vm0, %v7918_v9, %v7500_v4  ;;  %v22065_v56 = vrot.slane %v6016_v59, %v16028_v5  ;;  %v22070_v28 = vrot.slane %v8471_v46, %v16028_v5  ;;  %v6246_v34 = vpop.permute.xlu0 %6245  ;;  %v26707_v49 = vld [vmem:[#allocation77_spill] sm:$0xff]  ;;  %v26713_v4 = vld [vmem:[#allocation79_spill] sm:$0xff] }
 0x2fb   :  { %14861 = vmatmul.mubr.msk.f32.gmra.mrb[58].mxu0 %vm25827_vm4, %v7968_v1  ;;  %v22083_v59 = vrot.slane %v2773_v43, %v16028_v5  ;;  %v22087_v46 = vsel %vm16175_vm6, %v1735_v21, %v1736_v0  ;;  %v26712_v13 = vrot.slane %v22002_v47, 7  ;;  %v7619_v41 = vsel %vm7588_vm9, %v26713_v4, %v21952_v26  ;;  %v8292_v4 = vpop.f32.mrb[32].mxu0 }
 0x2fc   :  { %6259 = vrot.lane.b32.xlu0 %v26706_v14, %s15872_s12  ;;  %v22078_v14 = vrot.slane %v2757_v30, %v16028_v5  ;;  %14863 = vmatprep.mubr.msk.f32.mxu0 %vm15888_vm8, %v25931_v42  ;;  %v3639_v30 = vcombine.low %v22045_v11, %v22057_v25  ;;  %v26714_v43 = vcombine.low %v21259_v44, %v21474_v40 }
 0x2fd   :  { %6691 = vrot.lane.b32.xlu1 %v26707_v49, %s15879_s3  ;;  %26711 = vst [vmem:[#allocation48_spill] sm:$0xff] %v22083_v59  ;;  %v22093_v1 = vsel %vm16175_vm6, %v1738_v18, %v26712_v13  ;;  %v6678_v21 = vpop.permute.xlu1 %6677  ;;  %v22107_v49 = vrot.slane %v5132_v52, %v16028_v5  ;;  %v4619_v18 = vcombine.low %v21965_v32, %v21974_v8  ;;  %v165_v13 = vld [vmem:[%s25399_s0 + $0x1b0] sm:$0xff] }
 0x2fe   :  { %26710 = vst [vmem:[#allocation85_spill] sm:$0xff] %v22078_v14  ;;  %v7669_v26 = vsel %vm25834_vm10, %v7619_v41, %v4798_v6  ;;  %v4635_v52 = vcombine.low %v21991_v51, %v22002_v47  ;;  %v22124_v8 = vpop.permute.xlu0 %3819  ;;  %v8293_v0 = vadd.f32 %v21801_v31, %v8292_v4  ;;  %v26716_v6 = vcombine.low %v21756_v35, %v21759_v10  ;;  %v14823_v41 = vpop.f32.mrb[33].mxu0 }
 0x2ff   :  { %26715 = vst [vmem:[#allocation25_spill] sm:$0xff] %v22107_v49  ;;  %v7719_v32 = vsel %vm25826_vm11, %v7669_v26, %v5266_v45  ;;  %v3655_v40 = vcombine.low %v22087_v46, %v22093_v1  ;;  %v22136_v44 = vrot.slane %v3639_v30, %v16028_v5  ;;  %v1060_v45 = vcombine.high %v165_v13, %v165_v13 }
 0x300   :  { %3833 = vrot.lane.b32.xlu0 %v26714_v43, %s15883_s13  ;;  %v22139_v26 = vrot.slane %v165_v13, %v16028_v5  ;;  %v8472_v4 = vmax.f32 %v8293_v0, 0.0  ;;  %v26717_v10 = vcombine.low %v21279_v23, %v21421_v27  ;;  %v22148_v43 = vrot.slane %v4619_v18, %v16028_v5  ;;  %v8297_v29 = vpop.f32.mrb[34].mxu0 }
 0x301   :  { %6967 = vrot.lane.b32.xlu1 %v26716_v6, %s15882_s11  ;;  %v6954_v6 = vpop.permute.xlu1 %6953  ;;  %v6032_v30 = vcombine.low %v21944_v50, %v21948_v55  ;;  %v14377_v51 = vrot.slane %v22048_v16, 9  ;;  %v7769_v13 = vsel %vm7738_vm12, %v7719_v32, %v6246_v34  ;;  %v22155_v0 = vrot.slane %v4635_v52, %v16028_v5 }
 0x302   :  { %v6033_v23 = vcombine.low %v21961_v36, %v22045_v11  ;;  %v8826_v27 = vcombine.high %v8472_v4, %v8472_v4  ;;  %v22160_v41 = vpop.permute.xlu0 %4799  ;;  %v26719_v18 = vcombine.low %v21784_v22, %v21787_v48  ;;  %v22167_v50 = vrot.slane %v3655_v40, %v16028_v5 }
 0x303   :  { %26718 = vst [vmem:[#allocation34_spill] sm:$0xff] %v22155_v0  ;;  %v14293_v55 = vcombine.high %v21766_v24, %v21819_v57  ;;  %v22174_v36 = vrot.slane %v1060_v45, %v16028_v5  ;;  %v22178_v11 = vcombine.high %v22139_v26, %v22139_v26  ;;  %v22182_v52 = vcombine.high %v22002_v47, %v22002_v47 }
 0x304   :  { %4813 = vrot.lane.b32.xlu0 %v26717_v10, %s15880_s26  ;;  %v8833_v10 = vrot.slane %v8472_v4, %v16028_v5  ;;  %26720 = vst [vmem:[#allocation20_spill] sm:$0xff] %v22167_v50  ;;  %v8840_v40 = vrot.slane %v8826_v27, %v16028_v5  ;;  %v26721_v24 = vcombine.high %v21911_v33, %v21911_v33  ;;  %v26723_v33 = vrot.slane %v22002_v47, 7 }
 0x305   :  { %7275 = vrot.lane.b32.xlu1 %v26719_v18, %s15885_s16  ;;  %v26722_v45 = vcombine.low %v21616_v60, %v21790_v38  ;;  %v7262_v4 = vpop.permute.xlu1 %7261  ;;  %v22193_v18 = vrot.slane %v6032_v30, %v16028_v5  ;;  %v7819_v34 = vsel %vm7788_vm13, %v7769_v13, %v6678_v21  ;;  %v22197_v48 = vrot.slane %v6033_v23, %v16028_v5 }
 0x306   :  { %v8841_v32 = vcombine.high %v8833_v10, %v8833_v10  ;;  %v9612_v57 = vmax.f32 %v26721_v24, %v8833_v10  ;;  %v2774_v27 = vcombine.low %v22002_v47, %v22139_v26  ;;  %v1741_v10 = vrot.slane %v26723_v33, 2  ;;  %v5268_v9 = vpop.permute.xlu0 %5267 }
 0x307   :  { %v8842_v24 = vcombine.high %v8840_v40, %v8840_v40  ;;  %v26724_v38 = vcombine.high %v21914_v19, %v21914_v19  ;;  %v7869_v30 = vsel %vm7838_vm14, %v7819_v34, %v6954_v6  ;;  %v22212_v21 = vcombine.high %v22174_v36, %v22174_v36 }
 0x308   :  { %5281 = vrot.lane.b32.xlu0 %v26722_v45, %s15881_s27  ;;  %v9613_v12 = vmax.f32 %v21914_v19, %v8841_v32  ;;  %v1742_v13 = vrot.slane %v22182_v52, 7  ;;  %v1746_v23 = vrot.slane %v22178_v11, 7  ;;  %v1749_v32 = vrot.slane %v22174_v36, 7 }
 0x309   :  { %v9614_v45 = vmax.f32 %v26724_v38, %v8840_v40  ;;  %7515 = vrot.lane.b32.xlu1 %v21905_v15, %s15884_s2  ;;  %v9615_v33 = vmax.f32 %v22070_v28, %v8842_v24  ;;  %v7919_v19 = vsel %vm7888_vm15, %v7869_v30, %v7262_v4  ;;  %v26725_v6 = vcombine.low %v21871_v3, %v21879_v39  ;;  %v7502_v34 = vpop.permute.xlu1 %7501 }
 0x30a   :  { %v2790_v40 = vcombine.low %v22178_v11, %v22174_v36  ;;  %v14261_v38 = vrot.slane %v22139_v26, 9  ;;  %v22227_v49 = vmax.f32 %v22048_v16, %v14377_v51  ;;  %v14378_v61 = vrot.slane %v9612_v57, 9  ;;  %v6248_v24 = vpop.permute.xlu0 %6247 }
 0x30b   :  { %v7969_v53 = vsel %vm7938_vm0, %v7919_v19, %v7502_v34  ;;  %v22232_v4 = vcombine.low %v22148_v43, %v22155_v0  ;;  %v26727_v39 = vcombine.low %v21882_v54, %v21756_v35  ;;  %v22244_v51 = vrot.slane %v14293_v55, %v16028_v5 }
 0x30c   :  { %6261 = vrot.lane.b32.xlu0 %v26725_v6, %s15872_s12  ;;  %26726 = vst [vmem:[#allocation71_spill] sm:$0xff] %v22227_v49  ;;  %14864 = vmatmul.mubr.msk.f32.gmra.mrb[60].mxu0 %vm25827_vm4, %v7969_v53  ;;  %v1748_v19 = vrot.slane %v1746_v23, 2  ;;  %v1751_v54 = vrot.slane %v1749_v32, 2  ;;  %v26729_v53 = vld [vmem:[#allocation38_spill] sm:$0xff]  ;;  %v22256_v16 = vrot.slane %v2774_v27, %v16028_v5  ;;  %v22259_v55 = vrot.slane %v2790_v40, %v16028_v5  ;;  %v26732_v6 = vld [vmem:[#allocation56_spill] sm:$0xff]  ;;  %v26733_v49 = vld [vmem:[#allocation57_spill] sm:$0xff] }
 0x30d   :  { %6693 = vrot.lane.b32.xlu1 %v26727_v39, %s15879_s3  ;;  %26728 = vst [vmem:[#allocation29_spill] sm:$0xff] %v22244_v51  ;;  %14866 = vmatprep.mubr.msk.f32.mxu0 %vm15888_vm8, %v25931_v42  ;;  %v26730_v34 = vcombine.low %v21507_v63, %v26729_v53  ;;  %v6680_v39 = vpop.permute.xlu1 %6679  ;;  %v1743_v3 = vsel %vm16175_vm6, %v1741_v10, %v1742_v13  ;;  %v14379_v53 = vrot.slane %v9613_v12, 9  ;;  %v166_v40 = vld [vmem:[%s25399_s0 + $0x1b8] sm:$0xff]  ;;  %v14381_v0 = vrot.slane %v9615_v33, 9 }
 0x30e   :  { %26731 = vst [vmem:[#allocation67_spill] sm:$0xff] %v22256_v16  ;;  %v22265_v30 = vsel %vm16175_vm6, %v14261_v38, %v1746_v23  ;;  %v26734_v35 = vcombine.low %v26732_v6, %v26733_v49  ;;  %v10102_v27 = vmax.f32 %v9612_v57, %v14378_v61  ;;  %v3822_v13 = vpop.permute.xlu0 %3821  ;;  %v8298_v23 = vadd.f32 %v21801_v31, %v8297_v29  ;;  %v26735_v38 = vld [vmem:[#allocation30_spill] sm:$0xff] }
 0x30f   :  { %v26736_v49 = vld [vmem:[#allocation58_spill] sm:$0xff]  ;;  %v22287_v57 = vsel %vm16175_vm6, %v1748_v19, %v1749_v32  ;;  %v14280_v19 = vcombine.high %v22002_v47, %v22139_v26  ;;  %v10103_v61 = vmax.f32 %v9613_v12, %v14379_v53  ;;  %v10105_v51 = vmax.f32 %v9615_v33, %v14381_v0 }
 0x310   :  { %3835 = vrot.lane.b32.xlu0 %v26730_v34, %s15883_s13  ;;  %v7620_v63 = vsel %vm7588_vm9, %v26734_v35, %v22124_v8  ;;  %v14380_v34 = vrot.slane %v9614_v45, 9  ;;  %v26737_v6 = vcombine.low %v26735_v38, %v26736_v49  ;;  %v14826_v35 = vpop.f32.mrb[35].mxu0  ;;  %v22296_v38 = vmax.f32 %v8298_v23, 0.0 }
 0x311   :  { %v7670_v10 = vsel %vm25834_vm10, %v7620_v63, %v22160_v41  ;;  %v26738_v41 = vrot.slane %v22212_v21, 7  ;;  %v3656_v63 = vcombine.low %v1743_v3, %v22265_v30  ;;  %v22310_v23 = vrot.slane %v166_v40, %v16028_v5 }
 0x312   :  { %6969 = vrot.lane.b32.xlu1 %v26737_v6, %s15882_s11  ;;  %v7720_v8 = vsel %vm25826_vm11, %v7670_v10, %v5268_v9  ;;  %v26739_v6 = vld [vmem:[#allocation84_spill] sm:$0xff]  ;;  %v6956_v9 = vpop.permute.xlu1 %6955  ;;  %v1077_v10 = vcombine.high %v166_v40, %v166_v40  ;;  %v6049_v33 = vcombine.low %v22057_v25, %v22087_v46  ;;  %v26744_v40 = vcombine.high %v22070_v28, %v22070_v28 }
 0x313   :  { %v22293_v29 = vsel %vm16175_vm6, %v1751_v54, %v26738_v41  ;;  %v26740_v35 = vcombine.low %v26739_v6, %v21616_v60  ;;  %v10104_v54 = vmax.f32 %v9614_v45, %v14380_v34  ;;  %v26741_v41 = vld [vmem:[#allocation76_spill] sm:$0xff]  ;;  %v8850_v60 = vrot.slane %v22296_v38, %v16028_v5  ;;  %v22314_v6 = vpop.permute.xlu0 %4801 }
 0x314   :  { %v22307_v49 = vrot.slane %v10102_v27, %v26741_v41  ;;  %v3672_v12 = vcombine.low %v22287_v57, %v22293_v29  ;;  %v4652_v45 = vcombine.low %v22174_v36, %v22212_v21  ;;  %v7770_v53 = vsel %vm7738_vm12, %v7720_v8, %v6248_v24 }
 0x315   :  { %4815 = vrot.lane.b32.xlu0 %v26740_v35, %s15880_s26  ;;  %v26743_v35 = vcombine.low %v22017_v20, %v22022_v7  ;;  %v22326_v0 = vrot.slane %v3656_v63, %v16028_v5  ;;  %v6050_v34 = vcombine.low %v22093_v1, %v1743_v3  ;;  %v8858_v27 = vcombine.high %v8850_v60, %v8850_v60  ;;  %v26748_v1 = vld [vmem:[#allocation51_spill] sm:$0xff] }
 0x316   :  { %26742 = vst [vmem:[#allocation79_spill] sm:$0xff] %v22307_v49  ;;  %v7264_v32 = vpop.permute.xlu1 %7263  ;;  %v22337_v36 = vrot.slane %v14280_v19, %v16028_v5  ;;  %v22340_v24 = vrot.slane %v1077_v10, %v16028_v5  ;;  %v22343_v8 = vrot.slane %v10103_v61, %v26741_v41  ;;  %v22346_v25 = vrot.slane %v10104_v54, %v26741_v41  ;;  %v26751_v10 = vld [vmem:[#allocation43_spill] sm:$0xff] }
 0x317   :  { %7277 = vrot.lane.b32.xlu1 %v26743_v35, %s15885_s16  ;;  %v9616_v35 = vmax.f32 %v26744_v40, %v8850_v60  ;;  %v7820_v46 = vsel %vm7788_vm13, %v7770_v53, %v6680_v39  ;;  %v22351_v28 = vcombine.high %v22310_v23, %v22310_v23  ;;  %v9617_v3 = vmax.f32 %v26748_v1, %v8858_v27  ;;  %v5270_v63 = vpop.permute.xlu0 %5269  ;;  %v26755_v1 = vld [vmem:[#allocation47_spill] sm:$0xff] }
 0x318   :  { %26745 = vst [vmem:[#allocation38_spill] sm:$0xff] %v22343_v8  ;;  %26746 = vst [vmem:[#allocation56_spill] sm:$0xff] %v22346_v25  ;;  %v26749_v61 = vcombine.low %v21999_v17, %v22006_v37  ;;  %v22362_v19 = vrot.slane %v3672_v12, %v16028_v5  ;;  %v22365_v39 = vrot.slane %v4652_v45, %v16028_v5 }
 0x319   :  { %5283 = vrot.lane.b32.xlu0 %v21905_v15, %s15881_s27  ;;  %v22354_v15 = vrot.slane %v10105_v51, %v26741_v41  ;;  %v7621_v54 = vsel %vm7588_vm9, %v26751_v10, %v3822_v13  ;;  %v7870_v51 = vsel %vm7838_vm14, %v7820_v46, %v6956_v9  ;;  %v22371_v60 = vrot.slane %v6049_v33, %v16028_v5  ;;  %v8302_v10 = vpop.f32.mrb[36].mxu0 }
 0x31a   :  { %26750 = vst [vmem:[#allocation30_spill] sm:$0xff] %v22362_v19  ;;  %v22374_v53 = vrot.slane %v6050_v34, %v16028_v5  ;;  %v14382_v27 = vrot.slane %v9616_v35, 9  ;;  %v7920_v40 = vsel %vm7888_vm15, %v7870_v51, %v7264_v32  ;;  %v26754_v12 = vcombine.low %v22025_v62, %v22065_v56  ;;  %v7504_v45 = vpop.permute.xlu1 %7503 }
 0x31b   :  { %26747 = vst [vmem:[#allocation57_spill] sm:$0xff] %v22354_v15  ;;  %7517 = vrot.lane.b32.xlu1 %v26749_v61, %s15884_s2  ;;  %26752 = vst [vmem:[#allocation84_spill] sm:$0xff] %v22371_v60  ;;  %v6556_v13 = vcombine.low %v22002_v47, %v22182_v52  ;;  %v1184_v9 = vcombine.high %v22340_v24, %v22340_v24  ;;  %v8843_v33 = vcombine.high %v22296_v38, %v22296_v38  ;;  %v6250_v56 = vpop.permute.xlu0 %6249 }
 0x31c   :  { %26753 = vst [vmem:[#allocation76_spill] sm:$0xff] %v22374_v53  ;;  %v7970_v34 = vsel %vm7938_vm0, %v7920_v40, %v7504_v45  ;;  %v2791_v32 = vcombine.low %v22212_v21, %v22310_v23  ;;  %v2807_v46 = vcombine.low %v22351_v28, %v22340_v24  ;;  %v14383_v62 = vrot.slane %v9617_v3, 9 }
 0x31d   :  { %6263 = vrot.lane.b32.xlu0 %v26754_v12, %s15872_s12  ;;  %14867 = vmatmul.mubr.msk.f32.gmra.mrb[62].mxu0 %vm25827_vm4, %v7970_v34  ;;  %v4653_v47 = vcombine.low %v22310_v23, %v22351_v28  ;;  %v4669_v52 = vcombine.low %v22340_v24, %v1184_v9  ;;  %v1755_v38 = vrot.slane %v22310_v23, 7  ;;  %v10938_v61 = vsel %vm10458_vm5, %v22354_v15, %v22346_v25  ;;  %v14829_v25 = vpop.f32.mrb[37].mxu0 }
 0x31e   :  { %14869 = vmatprep.mubr.msk.f32.mxu0 %vm15888_vm8, %v25931_v42  ;;  %v1758_v51 = vrot.slane %v22351_v28, 7  ;;  %v1761_v40 = vrot.slane %v22340_v24, 7  ;;  %v10106_v12 = vmax.f32 %v9616_v35, %v14382_v27  ;;  %v26756_v45 = vcombine.low %v26698_v58, %v21784_v22  ;;  %v6682_v23 = vpop.permute.xlu1 %6681  ;;  %v26762_v25 = vld [vmem:[#allocation39_spill] sm:$0xff] }
 0x31f   :  { %6695 = vrot.lane.b32.xlu1 %v26755_v1, %s15879_s3  ;;  %v22417_v49 = vrot.slane %v6556_v13, %v16028_v5  ;;  %v22420_v28 = vrot.slane %v8843_v33, %v16028_v5  ;;  %v22423_v35 = vrot.slane %v2791_v32, %v16028_v5  ;;  %v22426_v22 = vrot.slane %v2807_v46, %v16028_v5  ;;  %v3824_v34 = vpop.permute.xlu0 %3823 }
 0x320   :  { %v26758_v58 = vrot.slane %v22212_v21, 7  ;;  %v26759_v13 = vcombine.low %v22078_v14, %v22083_v59  ;;  %v22435_v33 = vrot.slane %v4653_v47, %v16028_v5  ;;  %v22438_v32 = vrot.slane %v4669_v52, %v16028_v5 }
 0x321   :  { %3837 = vrot.lane.b32.xlu0 %v26756_v45, %s15883_s13  ;;  %26757 = vst [vmem:[#allocation51_spill] sm:$0xff] %v22426_v22  ;;  %v10107_v45 = vmax.f32 %v9617_v3, %v14383_v62  ;;  %v1757_v15 = vrot.slane %v1755_v38, 2  ;;  %v8303_v46 = vadd.f32 %v21801_v31, %v8302_v10  ;;  %v1764_v8 = vrot.slane %v1184_v9, 7 }
 0x322   :  { %v1754_v27 = vrot.slane %v26758_v58, 2  ;;  %26760 = vst [vmem:[#allocation43_spill] sm:$0xff] %v22438_v32  ;;  %v1760_v21 = vrot.slane %v1758_v51, 2  ;;  %v1763_v58 = vrot.slane %v1761_v40, 2  ;;  %v22442_v3 = vrot.slane %v10106_v12, %v26741_v41  ;;  %v6958_v1 = vpop.permute.xlu1 %6957  ;;  %v167_v12 = vld [vmem:[%s25399_s0 + $0x1c0] sm:$0xff] }
 0x323   :  { %6971 = vrot.lane.b32.xlu1 %v26759_v13, %s15882_s11  ;;  %v7671_v62 = vsel %vm25834_vm10, %v7621_v54, %v22314_v6  ;;  %v26763_v13 = vld [vmem:[#allocation46_spill] sm:$0xff]  ;;  %v4804_v9 = vpop.permute.xlu0 %4803  ;;  %v26768_v52 = vcombine.low %v22136_v44, %v22167_v50  ;;  %v8474_v54 = vmax.f32 %v8303_v46, 0.0 }
 0x324   :  { %26761 = vst [vmem:[#allocation87_spill] sm:$0xff] %v22442_v3  ;;  %v26764_v47 = vcombine.low %v26762_v25, %v26763_v13  ;;  %v7721_v6 = vsel %vm25826_vm11, %v7671_v62, %v5270_v63  ;;  %v1756_v25 = vsel %vm16175_vm6, %v1754_v27, %v1755_v38  ;;  %v22465_v13 = vrot.slane %v10107_v45, %v26741_v41 }
 0x325   :  { %v22476_v62 = vsel %vm16175_vm6, %v1757_v15, %v1758_v51  ;;  %v22480_v38 = vsel %vm16175_vm6, %v1760_v21, %v1761_v40  ;;  %v1093_v27 = vcombine.high %v167_v12, %v167_v12  ;;  %v22488_v45 = vsel %vm1188_vm1, %v22442_v3, %v10938_v61  ;;  %v8307_v3 = vpop.f32.mrb[38].mxu0 }
 0x326   :  { %4817 = vrot.lane.b32.xlu0 %v26764_v47, %s15880_s26  ;;  %26767 = vst [vmem:[#allocation39_spill] sm:$0xff] %v22465_v13  ;;  %v7771_v47 = vsel %vm7738_vm12, %v7721_v6, %v6250_v56  ;;  %v22484_v56 = vsel %vm16175_vm6, %v1763_v58, %v1764_v8  ;;  %26769 = vst [vmem:[#allocation46_spill] sm:$0xff] %v22488_v45  ;;  %v7266_v15 = vpop.permute.xlu1 %7265  ;;  %v6066_v40 = vcombine.low %v22265_v30, %v22287_v57  ;;  %v26786_v45 = vld [vmem:[#allocation59_spill] sm:$0xff] }
 0x327   :  { %7279 = vrot.lane.b32.xlu1 %v26768_v52, %s15885_s16  ;;  %v26770_v52 = vld [vmem:[#allocation25_spill] sm:$0xff]  ;;  %v6067_v8 = vcombine.low %v22293_v29, %v1756_v25  ;;  %v7821_v46 = vsel %vm7788_vm13, %v7771_v47, %v6682_v23  ;;  %v3673_v21 = vcombine.low %v1756_v25, %v22476_v62  ;;  %v22502_v61 = vrot.slane %v167_v12, %v16028_v5  ;;  %v22511_v60 = vpop.permute.xlu0 %5271 }
 0x328   :  { %v26771_v6 = vcombine.low %v26770_v52, %v22006_v37  ;;  %v22505_v58 = vrot.slane %v1093_v27, %v16028_v5  ;;  %v26772_v52 = vld [vmem:[#allocation40_spill] sm:$0xff]  ;;  %v3689_v30 = vcombine.low %v22480_v38, %v22484_v56  ;;  %v5142_v29 = vcombine.low %v22139_v26, %v22178_v11 }
 0x329   :  { %v22524_v23 = vld [vmem:[%s25399_s0 + $0x1c8] sm:$0xff]  ;;  %v7871_v12 = vsel %vm7838_vm14, %v7821_v46, %v6958_v1  ;;  %v22529_v25 = vcombine.high %v22502_v61, %v22502_v61  ;;  %v26775_v11 = vcombine.low %v22193_v18, %v22197_v48  ;;  %v22544_v1 = vrot.slane %v6066_v40, %v16028_v5 }
 0x32a   :  { %5285 = vrot.lane.b32.xlu0 %v26771_v6, %s15881_s27  ;;  %v26773_v6 = vld [vmem:[#allocation37_spill] sm:$0xff]  ;;  %v22533_v47 = vcombine.high %v22505_v58, %v22505_v58  ;;  %v7921_v26 = vsel %vm7888_vm15, %v7871_v12, %v7266_v15  ;;  %v7506_v27 = vpop.permute.xlu1 %7505  ;;  %v22547_v46 = vrot.slane %v6067_v8, %v16028_v5  ;;  %v22562_v40 = vrot.slane %v3673_v21, %v16028_v5 }
 0x32b   :  { %v26774_v63 = vcombine.low %v26772_v52, %v26773_v6  ;;  %7519 = vrot.lane.b32.xlu1 %v22232_v4, %s15884_s2  ;;  %v7971_v52 = vsel %vm7938_vm0, %v7921_v26, %v7506_v27  ;;  %v1768_v15 = vrot.slane %v22529_v25, 7  ;;  %v1771_v6 = vrot.slane %v22505_v58, 7  ;;  %v6252_v12 = vpop.permute.xlu0 %6251  ;;  %v26776_v48 = vld [vmem:[#allocation29_spill] sm:$0xff] }
 0x32c   :  { %v26777_v18 = vcombine.low %v26776_v48, %v22078_v14  ;;  %14870 = vmatmul.mubr.msk.f32.gmra.mrb[64].mxu0 %vm25827_vm4, %v7971_v52  ;;  %26778 = vst [vmem:[#allocation25_spill] sm:$0xff] %v22562_v40  ;;  %v22565_v8 = vrot.slane %v3689_v30, %v16028_v5  ;;  %v22568_v26 = vrot.slane %v5142_v29, %v16028_v5  ;;  %v26780_v52 = vld [vmem:[#allocation42_spill] sm:$0xff]  ;;  %v14262_v13 = vrot.slane %v22502_v61, 9 }
 0x32d   :  { %v7622_v51 = vsel %vm7588_vm9, %v26774_v63, %v3824_v34  ;;  %v8860_v34 = vcombine.high %v8474_v54, %v8474_v54  ;;  %v22536_v63 = vrot.slane %v8474_v54, %v16028_v5  ;;  %v22552_v54 = vrot.slane %v22524_v23, %v16028_v5  ;;  %14872 = vmatprep.mubr.msk.f32.mxu0 %vm15888_vm8, %v25931_v42 }
 0x32e   :  { %6265 = vrot.lane.b32.xlu0 %v26775_v11, %s15872_s12  ;;  %v1774_v11 = vrot.slane %v22533_v47, 7  ;;  %v7672_v57 = vsel %vm25834_vm10, %v7622_v51, %v4804_v9  ;;  %v22579_v21 = vcombine.low %v22259_v55, %v22423_v35  ;;  %v6684_v48 = vpop.permute.xlu1 %6683  ;;  %v1770_v14 = vrot.slane %v1768_v15, 2 }
 0x32f   :  { %6697 = vrot.lane.b32.xlu1 %v26777_v18, %s15879_s3  ;;  %v22572_v27 = vrot.slane %v8860_v34, %v16028_v5  ;;  %v26781_v34 = vcombine.low %v26780_v52, %v22017_v20  ;;  %v1773_v30 = vrot.slane %v1771_v6, 2  ;;  %v22595_v53 = vpop.permute.xlu0 %3825  ;;  %v8308_v20 = vadd.f32 %v21801_v31, %v8307_v3  ;;  %v26785_v18 = vld [vmem:[#allocation34_spill] sm:$0xff] }
 0x330   :  { %26779 = vst [vmem:[#allocation40_spill] sm:$0xff] %v22579_v21  ;;  %v1776_v50 = vrot.slane %v1774_v11, 2  ;;  %v26784_v52 = vcombine.low %v22256_v16, %v22259_v55  ;;  %v5151_v51 = vcombine.low %v22340_v24, %v22502_v61  ;;  %v2808_v3 = vcombine.low %v22502_v61, %v22529_v25 }
 0x331   :  { %v26787_v9 = vcombine.low %v26786_v45, %v21999_v17  ;;  %v2824_v10 = vcombine.low %v22505_v58, %v22533_v47  ;;  %v4670_v29 = vcombine.low %v22529_v25, %v22505_v58  ;;  %v6083_v21 = vcombine.low %v22476_v62, %v22480_v38 }
 0x332   :  { %3839 = vrot.lane.b32.xlu0 %v26781_v34, %s15883_s13  ;;  %v14832_v34 = vpop.f32.mrb[39].mxu0  ;;  %v6960_v16 = vpop.permute.xlu1 %6959  ;;  %v1769_v55 = vsel %vm16175_vm6, %v14262_v13, %v1768_v15  ;;  %v22634_v17 = vsel %vm16175_vm6, %v1773_v30, %v1774_v11  ;;  %v26788_v45 = vrot.slane %v22552_v54, 7  ;;  %v7722_v62 = vsel %vm25826_vm11, %v7672_v57, %v22511_v60 }
 0x333   :  { %6973 = vrot.lane.b32.xlu1 %v26784_v52, %s15882_s11  ;;  %v1110_v52 = vcombine.high %v22524_v23, %v22524_v23  ;;  %v8475_v34 = vmax.f32 %v8308_v20, 0.0  ;;  %v22630_v23 = vsel %vm16175_vm6, %v1770_v14, %v1771_v6  ;;  %v4806_v58 = vpop.permute.xlu0 %4805  ;;  %v26789_v14 = vcombine.low %v22326_v0, %v22362_v19 }
 0x334   :  { %v22652_v25 = vrot.slane %v5151_v51, %v16028_v5  ;;  %v7772_v15 = vsel %vm7738_vm12, %v7722_v62, %v6252_v12  ;;  %v4686_v60 = vcombine.low %v22533_v47, %v22552_v54  ;;  %v6084_v57 = vcombine.low %v22484_v56, %v1769_v55 }
 0x335   :  { %v8877_v38 = vcombine.high %v8475_v34, %v8475_v34  ;;  %v22645_v13 = vrot.slane %v8475_v34, %v16028_v5  ;;  %v3690_v51 = vcombine.low %v1769_v55, %v22630_v23  ;;  %v7822_v20 = vsel %vm7788_vm13, %v7772_v15, %v6684_v48  ;;  %v22705_v15 = vld [vmem:[%s25399_s0 + $0x1d0] sm:$0xff] }
 0x336   :  { %4819 = vrot.lane.b32.xlu0 %v26787_v9, %s15880_s26  ;;  %v22640_v9 = vsel %vm16175_vm6, %v1776_v50, %v26788_v45  ;;  %v22656_v50 = vrot.slane %v2808_v3, %v16028_v5  ;;  %v7268_v30 = vpop.permute.xlu1 %7267  ;;  %v22671_v47 = vrot.slane %v2824_v10, %v16028_v5  ;;  %v22674_v56 = vrot.slane %v4670_v29, %v16028_v5 }
 0x337   :  { %7281 = vrot.lane.b32.xlu1 %v26789_v14, %s15885_s16  ;;  %v8891_v6 = vrot.slane %v8877_v38, %v16028_v5  ;;  %v8892_v11 = vcombine.high %v22645_v13, %v22645_v13  ;;  %v3706_v12 = vcombine.low %v22634_v17, %v22640_v9  ;;  %v1125_v3 = vcombine.high %v22552_v54, %v22552_v54  ;;  %v5274_v62 = vpop.permute.xlu0 %5273 }
 0x338   :  { %26790 = vst [vmem:[#allocation37_spill] sm:$0xff] %v22656_v50  ;;  %26791 = vst [vmem:[#allocation29_spill] sm:$0xff] %v22674_v56  ;;  %v26792_v55 = vcombine.high %v22420_v28, %v22420_v28  ;;  %v26793_v10 = vcombine.low %v22337_v36, %v22365_v39  ;;  %v14294_v29 = vcombine.high %v22340_v24, %v22502_v61  ;;  %v26797_v61 = vld [vmem:[#allocation76_spill] sm:$0xff] }
 0x339   :  { %v8893_v34 = vcombine.high %v8891_v6, %v8891_v6  ;;  %v7872_v48 = vsel %vm7838_vm14, %v7822_v20, %v6960_v16  ;;  %v22694_v38 = vrot.slane %v4686_v60, %v16028_v5  ;;  %v22697_v14 = vrot.slane %v6083_v21, %v16028_v5  ;;  %v26796_v16 = vld [vmem:[#allocation84_spill] sm:$0xff] }
 0x33a   :  { %5287 = vrot.lane.b32.xlu0 %v22232_v4, %s15881_s27  ;;  %v22679_v4 = vmax.f32 %v22420_v28, %v8892_v11  ;;  %v22684_v45 = vmax.f32 %v26792_v55, %v8891_v6  ;;  %v22700_v28 = vrot.slane %v6084_v57, %v16028_v5  ;;  %v7922_v24 = vsel %vm7888_vm15, %v7872_v48, %v7268_v30  ;;  %v7508_v21 = vpop.permute.xlu1 %7507 }
 0x33b   :  { %7521 = vrot.lane.b32.xlu1 %v26793_v10, %s15884_s2  ;;  %26794 = vst [vmem:[#allocation42_spill] sm:$0xff] %v22697_v14  ;;  %v22708_v6 = vmax.f32 %v22536_v63, %v8893_v34  ;;  %v26798_v60 = vcombine.low %v26796_v16, %v26797_v61  ;;  %v22716_v11 = vrot.slane %v3690_v51, %v16028_v5  ;;  %v1780_v34 = vrot.slane %v1125_v3, 7  ;;  %v26799_v10 = vld [vmem:[#allocation44_spill] sm:$0xff] }
 0x33c   :  { %26795 = vst [vmem:[#allocation34_spill] sm:$0xff] %v22700_v28  ;;  %v22719_v57 = vrot.slane %v3706_v12, %v16028_v5  ;;  %v7972_v20 = vsel %vm7938_vm0, %v7922_v24, %v7508_v21  ;;  %v22723_v55 = vrot.slane %v1110_v52, %v16028_v5  ;;  %v7623_v48 = vsel %vm7588_vm9, %v26799_v10, %v22595_v53  ;;  %v6254_v16 = vpop.permute.xlu0 %6253 }
 0x33d   :  { %v26800_v51 = vcombine.low %v22423_v35, %v22426_v22  ;;  %14873 = vmatmul.mubr.msk.f32.gmra.mrb[66].mxu0 %vm25827_vm4, %v7972_v20  ;;  %v22736_v12 = vrot.slane %v14294_v29, %v16028_v5  ;;  %v22740_v52 = vrot.slane %v22705_v15, %v16028_v5  ;;  %v7673_v24 = vsel %vm25834_vm10, %v7623_v48, %v4806_v58 }
 0x33e   :  { %6267 = vrot.lane.b32.xlu0 %v26798_v60, %s15872_s12  ;;  %14875 = vmatprep.mubr.msk.f32.mxu0 %vm15888_vm8, %v25931_v42  ;;  %v22749_v35 = vcombine.low %v22674_v56, %v22694_v38  ;;  %v26802_v61 = vcombine.low %v22083_v59, %v22417_v49  ;;  %v6686_v60 = vpop.permute.xlu1 %6685  ;;  %v26803_v21 = vrot.slane %v22552_v54, 7  ;;  %v4687_v10 = vcombine.low %v1125_v3, %v22723_v55 }
 0x33f   :  { %6975 = vrot.lane.b32.xlu1 %v26800_v51, %s15882_s11  ;;  %26801 = vst [vmem:[#allocation59_spill] sm:$0xff] %v22736_v12  ;;  %v2825_v48 = vcombine.low %v22552_v54, %v1125_v3  ;;  %v8312_v51 = vpop.f32.mrb[40].mxu0  ;;  %v1782_v30 = vrot.slane %v1780_v34, 2  ;;  %v1783_v53 = vrot.slane %v22723_v55, 7  ;;  %v22768_v49 = vcombine.high %v22723_v55, %v22723_v55 }
 0x340   :  { %v1779_v20 = vrot.slane %v26803_v21, 2  ;;  %v8313_v58 = vadd.f32 %v21801_v31, %v8312_v51  ;;  %v26805_v21 = vcombine.low %v22435_v33, %v22438_v32  ;;  %v14835_v54 = vpop.f32.mrb[41].mxu0  ;;  %v22783_v59 = vcombine.high %v22740_v52, %v22740_v52 }
 0x341   :  { %26804 = vst [vmem:[#allocation84_spill] sm:$0xff] %v22768_v49  ;;  %v14384_v56 = vrot.slane %v22679_v4, 9  ;;  %v14385_v31 = vrot.slane %v22684_v45, 9  ;;  %v7723_v51 = vsel %vm25826_vm11, %v7673_v24, %v5274_v62  ;;  %v26806_v3 = vcombine.low %v22562_v40, %v22565_v8 }
 0x342   :  { %6699 = vrot.lane.b32.xlu0 %v26802_v61, %s15879_s3  ;;  %v22770_v61 = vpop.permute.xlu0 %3827  ;;  %v8476_v54 = vmax.f32 %v8313_v58, 0.0  ;;  %v6962_v29 = vpop.permute.xlu1 %6961  ;;  %v1781_v32 = vsel %vm16175_vm6, %v1779_v20, %v1780_v34  ;;  %v22797_v19 = vrot.slane %v4687_v10, %v16028_v5  ;;  %v22800_v12 = vrot.slane %v2825_v48, %v16028_v5 }
 0x343   :  { %7523 = vrot.lane.b32.xlu1 %v26805_v21, %s15884_s2  ;;  %v2841_v21 = vcombine.low %v22723_v55, %v22740_v52  ;;  %v14386_v62 = vrot.slane %v22708_v6, 9  ;;  %v22805_v24 = vsel %vm16175_vm6, %v1782_v30, %v1783_v53  ;;  %v1785_v58 = vrot.slane %v1783_v53, 2 }
 0x344   :  { %v1786_v40 = vrot.slane %v22768_v49, 7  ;;  %v8901_v22 = vrot.slane %v8476_v54, %v16028_v5  ;;  %v26807_v34 = vcombine.low %v22006_v37, %v22148_v43  ;;  %v14263_v20 = vrot.slane %v22740_v52, 9 }
 0x345   :  { %v1790_v10 = vrot.slane %v22783_v59, 7  ;;  %v10108_v48 = vmax.f32 %v22679_v4, %v14384_v56  ;;  %v10109_v30 = vmax.f32 %v22684_v45, %v14385_v31  ;;  %v7773_v53 = vsel %vm7738_vm12, %v7723_v51, %v6254_v16  ;;  %v170_v45 = vld [vmem:[%s25399_s0 + $0x1d8] sm:$0xff] }
 0x346   :  { %7283 = vrot.lane.b32.xlu0 %v26806_v3, %s15885_s16  ;;  %v8894_v3 = vcombine.high %v8476_v54, %v8476_v54  ;;  %v4808_v28 = vpop.permute.xlu0 %4807  ;;  %v1126_v49 = vcombine.high %v22705_v15, %v22705_v15  ;;  %v8909_v14 = vcombine.high %v8901_v22, %v8901_v22  ;;  %v26808_v37 = vcombine.high %v22536_v63, %v22536_v63  ;;  %v7270_v56 = vpop.permute.xlu1 %7269 }
 0x347   :  { %4821 = vrot.lane.b32.xlu1 %v26807_v34, %s15880_s26  ;;  %v26809_v34 = vcombine.low %v22022_v7, %v22136_v44  ;;  %v3707_v4 = vcombine.low %v1781_v32, %v22805_v24  ;;  %v7823_v15 = vsel %vm7788_vm13, %v7773_v53, %v6686_v60  ;;  %v22835_v16 = vsel %vm16175_vm6, %v1785_v58, %v1786_v40  ;;  %v26826_v53 = vld [vmem:[#allocation82_spill] sm:$0xff] }
 0x348   :  { %v8908_v54 = vrot.slane %v8894_v3, %v16028_v5  ;;  %v9621_v43 = vmax.f32 %v26808_v37, %v8901_v22  ;;  %v6100_v22 = vcombine.low %v22630_v23, %v22634_v17  ;;  %v6101_v63 = vcombine.low %v22640_v9, %v1781_v32 }
 0x349   :  { %v9622_v44 = vmax.f32 %v22572_v27, %v8909_v14  ;;  %v26810_v31 = vcombine.high %v22572_v27, %v22572_v27  ;;  %v26811_v60 = vcombine.low %v22544_v1, %v22547_v46  ;;  %v22852_v40 = vsel %vm16175_vm6, %v14263_v20, %v1790_v10  ;;  %v26816_v20 = vld [vmem:[#allocation40_spill] sm:$0xff] }
 0x34a   :  { %3841 = vrot.lane.b32.xlu0 %v26809_v34, %s15883_s13  ;;  %v8910_v7 = vcombine.high %v8908_v54, %v8908_v54  ;;  %v5276_v3 = vpop.permute.xlu0 %5275  ;;  %v7873_v32 = vsel %vm7838_vm14, %v7823_v15, %v6962_v29  ;;  %v22856_v23 = vrot.slane %v2841_v21, %v16028_v5  ;;  %v22859_v27 = vrot.slane %v1126_v49, %v16028_v5  ;;  %v7510_v29 = vpop.permute.xlu1 %7509  ;;  %v26820_v15 = vld [vmem:[#allocation31_spill] sm:$0xff] }
 0x34b   :  { %v9623_v51 = vmax.f32 %v26810_v31, %v8908_v54  ;;  %6269 = vrot.lane.b32.xlu1 %v26811_v60, %s15872_s12  ;;  %v22862_v17 = vrot.slane %v170_v45, %v16028_v5  ;;  %v10110_v1 = vmax.f32 %v22708_v6, %v14386_v62  ;;  %v7923_v9 = vsel %vm7888_vm15, %v7873_v32, %v7270_v56  ;;  %v26827_v60 = vld [vmem:[#allocation28_spill] sm:$0xff] }
 0x34c   :  { %26812 = vst [vmem:[#allocation76_spill] sm:$0xff] %v22856_v23  ;;  %v22866_v46 = vmax.f32 %v22645_v13, %v8910_v7  ;;  %v26814_v14 = vcombine.low %v22568_v26, %v22365_v39  ;;  %v22874_v21 = vrot.slane %v3707_v4, %v16028_v5  ;;  %v7973_v49 = vsel %vm7938_vm0, %v7923_v9, %v7510_v29 }
 0x34d   :  { %v3723_v58 = vcombine.low %v22835_v16, %v22852_v40  ;;  %v22880_v6 = vrot.slane %v6100_v22, %v16028_v5  ;;  %v22883_v13 = vrot.slane %v6101_v63, %v16028_v5  ;;  %v22886_v62 = vrot.slane %v10108_v48, %v26741_v41  ;;  %14876 = vmatmul.mubr.msk.f32.gmra.mrb[68].mxu0 %vm25827_vm4, %v7973_v49  ;;  %v26822_v63 = vld [vmem:[#allocation20_spill] sm:$0xff] }
 0x34e   :  { %26813 = vst [vmem:[#allocation44_spill] sm:$0xff] %v22866_v46  ;;  %5289 = vrot.lane.b32.xlu0 %v26814_v14, %s15881_s27  ;;  %v6256_v26 = vpop.permute.xlu0 %6255  ;;  %v1143_v54 = vcombine.high %v170_v45, %v170_v45  ;;  %v22894_v37 = vrot.slane %v10109_v30, %v26741_v41  ;;  %v14387_v34 = vrot.slane %v9621_v43, 9  ;;  %14878 = vmatprep.mubr.msk.f32.mxu0 %vm15888_vm8, %v25931_v42  ;;  %v26819_v45 = vld [vmem:[#allocation61_spill] sm:$0xff]  ;;  %v6688_v31 = vpop.permute.xlu1 %6687  ;;  %v14389_v49 = vrot.slane %v9623_v51, 9 }
 0x34f   :  { %26815 = vst [vmem:[#allocation88_spill] sm:$0xff] %v22886_v62  ;;  %6701 = vrot.lane.b32.xlu1 %v26816_v20, %s15879_s3  ;;  %v22900_v48 = vcombine.high %v22859_v27, %v22859_v27  ;;  %v22904_v56 = vcombine.high %v22862_v17, %v22862_v17  ;;  %v22907_v4 = vrot.slane %v10110_v1, %v26741_v41  ;;  %v14388_v1 = vrot.slane %v9622_v44, 9  ;;  %v8317_v14 = vpop.f32.mrb[42].mxu0 }
 0x350   :  { %26817 = vst [vmem:[#allocation89_spill] sm:$0xff] %v22894_v37  ;;  %v26821_v30 = vcombine.low %v26819_v45, %v26820_v15  ;;  %v26823_v7 = vcombine.low %v26822_v63, %v22326_v0  ;;  %v22924_v29 = vrot.slane %v3723_v58, %v16028_v5  ;;  %v22929_v15 = vld [vmem:[#allocation5] ss:$0 sm:$0xff]  ;;  %v26824_v63 = vcombine.low %v22656_v50, %v22671_v47 }
 0x351   :  { %26818 = vst [vmem:[#allocation90_spill] sm:$0xff] %v22907_v4  ;;  %v22937_v58 = vrot.slane %v1143_v54, %v16028_v5  ;;  %v1796_v54 = vrot.slane %v22900_v48, 7 }
 0x352   :  { %v7624_v22 = vsel %vm7588_vm9, %v26821_v30, %v22770_v61  ;;  %3843 = vrot.lane.b32.xlu0 %v26823_v7, %s15883_s13  ;;  %v3830_v45 = vpop.permute.xlu0 %3829  ;;  %v8318_v30 = vadd.f32 %v22929_v15, %v8317_v14  ;;  %v4704_v7 = vcombine.low %v22859_v27, %v22900_v48  ;;  %v26825_v14 = vcombine.low %v26785_v18, %v22337_v36  ;;  %v6964_v61 = vpop.permute.xlu1 %6963 }
 0x353   :  { %v7674_v9 = vsel %vm25834_vm10, %v7624_v22, %v4808_v28  ;;  %6977 = vrot.lane.b32.xlu1 %v26824_v63, %s15882_s11  ;;  %v14838_v28 = vpop.f32.mrb[43].mxu0  ;;  %v10111_v22 = vmax.f32 %v9621_v43, %v14387_v34  ;;  %v1792_v63 = vrot.slane %v1790_v10, 2  ;;  %v1799_v43 = vrot.slane %v22862_v17, 7 }
 0x354   :  { %v7724_v0 = vsel %vm25826_vm11, %v7674_v9, %v5276_v3  ;;  %v4720_v3 = vcombine.low %v22862_v17, %v22904_v56  ;;  %v1793_v9 = vrot.slane %v22859_v27, 7  ;;  %v1802_v34 = vrot.slane %v22904_v56, 7 }
 0x355   :  { %v10112_v28 = vmax.f32 %v9622_v44, %v14388_v1  ;;  %v10113_v36 = vmax.f32 %v9623_v51, %v14389_v49  ;;  %v8477_v18 = vmax.f32 %v8318_v30, 0.0  ;;  %v26828_v10 = vcombine.low %v22716_v11, %v22719_v57 }
 0x356   :  { %4823 = vrot.lane.b32.xlu0 %v26825_v14, %s15880_s26  ;;  %v1795_v20 = vrot.slane %v1793_v9, 2  ;;  %v4810_v14 = vpop.permute.xlu0 %4809  ;;  %v1798_v46 = vrot.slane %v1796_v54, 2  ;;  %v1801_v62 = vrot.slane %v1799_v43, 2  ;;  %v22962_v37 = vrot.slane %v10111_v22, %v26741_v41  ;;  %v7272_v30 = vpop.permute.xlu1 %7271 }
 0x357   :  { %7285 = vrot.lane.b32.xlu1 %v26828_v10, %s15885_s16  ;;  %v14281_v44 = vcombine.high %v22723_v55, %v22740_v52  ;;  %v1804_v1 = vrot.slane %v1802_v34, 2  ;;  %v7774_v51 = vsel %vm7738_vm12, %v7724_v0, %v6256_v26  ;;  %v26830_v49 = vcombine.low %v22435_v33, %v22652_v25  ;;  %v26843_v26 = vld [vmem:[#allocation51_spill] sm:$0xff] }
 0x358   :  { %26829 = vst [vmem:[#allocation61_spill] sm:$0xff] %v22962_v37  ;;  %v22973_v10 = vrot.slane %v4704_v7, %v16028_v5  ;;  %v22976_v22 = vrot.slane %v4720_v3, %v16028_v5  ;;  %v22980_v32 = vsel %vm16175_vm6, %v1792_v63, %v1793_v9  ;;  %v22983_v50 = vrot.slane %v10112_v28, %v26741_v41 }
 0x359   :  { %v1797_v25 = vsel %vm16175_vm6, %v1795_v20, %v1796_v54  ;;  %v22991_v0 = vsel %vm16175_vm6, %v1798_v46, %v1799_v43  ;;  %v7824_v7 = vsel %vm7788_vm13, %v7774_v51, %v6688_v31  ;;  %v8911_v3 = vcombine.high %v8477_v18, %v8477_v18  ;;  %v26837_v51 = vld [vmem:[#allocation34_spill] sm:$0xff] }
 0x35a   :  { %5291 = vrot.lane.b32.xlu0 %v26830_v49, %s15881_s27  ;;  %26831 = vst [vmem:[#allocation31_spill] sm:$0xff] %v22973_v10  ;;  %26832 = vst [vmem:[#allocation20_spill] sm:$0xff] %v22976_v22  ;;  %v5278_v49 = vpop.permute.xlu0 %5277  ;;  %v22998_v9 = vsel %vm16175_vm6, %v1801_v62, %v1802_v34  ;;  %v26834_v63 = vrot.slane %v22937_v58, 7  ;;  %v23007_v46 = vrot.slane %v10113_v36, %v26741_v41  ;;  %v26836_v34 = vld [vmem:[#allocation42_spill] sm:$0xff] }
 0x35b   :  { %26833 = vst [vmem:[#allocation82_spill] sm:$0xff] %v22983_v50  ;;  %7525 = vrot.lane.b32.xlu1 %v22749_v35, %s15884_s2  ;;  %v7874_v31 = vsel %vm7838_vm14, %v7824_v7, %v6964_v61  ;;  %v23011_v54 = vrot.slane %v14281_v44, %v16028_v5  ;;  %v3724_v43 = vcombine.low %v22980_v32, %v1797_v25 }
 0x35c   :  { %v23004_v20 = vsel %vm16175_vm6, %v1804_v1, %v26834_v63  ;;  %26835 = vst [vmem:[#allocation28_spill] sm:$0xff] %v23007_v46  ;;  %v23015_v28 = vrot.slane %v8477_v18, %v16028_v5  ;;  %v7924_v62 = vsel %vm7888_vm15, %v7874_v31, %v7272_v30  ;;  %v26838_v1 = vcombine.low %v26836_v34, %v26837_v51  ;;  %v7512_v63 = vpop.permute.xlu1 %7511  ;;  %v171_v31 = vld [vmem:[%s25399_s0 + $0x1e0] sm:$0xff] }
 0x35d   :  { %v23025_v61 = vsel %vm10458_vm5, %v22962_v37, %v22907_v4  ;;  %v6134_v36 = vcombine.low %v1797_v25, %v22991_v0  ;;  %v7974_v44 = vsel %vm7938_vm0, %v7924_v62, %v7512_v63  ;;  %v6135_v18 = vcombine.low %v22998_v9, %v23004_v20  ;;  %v26840_v34 = vld [vmem:[#allocation64_spill] sm:$0xff]  ;;  %v26841_v51 = vld [vmem:[#allocation35_spill] sm:$0xff] }
 0x35e   :  { %6271 = vrot.lane.b32.xlu0 %v26838_v1, %s15872_s12  ;;  %26839 = vst [vmem:[#allocation42_spill] sm:$0xff] %v23025_v61  ;;  %v2842_v30 = vcombine.low %v22783_v59, %v22859_v27  ;;  %v2858_v7 = vcombine.low %v22900_v48, %v22862_v17  ;;  %v26842_v1 = vcombine.low %v26840_v34, %v26841_v51  ;;  %v6258_v63 = vpop.permute.xlu0 %6257  ;;  %v26844_v46 = vld [vmem:[#allocation59_spill] sm:$0xff]  ;;  %v26848_v34 = vld [vmem:[#allocation30_spill] sm:$0xff]  ;;  %v26849_v51 = vld [vmem:[#allocation25_spill] sm:$0xff] }
 0x35f   :  { %v23043_v62 = vrot.slane %v8911_v3, %v16028_v5  ;;  %v26845_v27 = vcombine.low %v26843_v26, %v26844_v46  ;;  %14879 = vmatmul.mubr.msk.f32.gmra.mrb[70].mxu0 %vm25827_vm4, %v7974_v44  ;;  %v23052_v17 = vcombine.low %v22973_v10, %v22976_v22  ;;  %v23061_v3 = vcombine.low %v22671_v47, %v22800_v12 }
 0x360   :  { %v7625_v25 = vsel %vm7588_vm9, %v26842_v1, %v3830_v45  ;;  %14881 = vmatprep.mubr.msk.f32.mxu0 %vm15888_vm8, %v25931_v42  ;;  %v23064_v46 = vrot.slane %v3724_v43, %v16028_v5  ;;  %v6690_v1 = vpop.permute.xlu1 %6689  ;;  %v1847_v47 = vcombine.high %v171_v31, %v171_v31  ;;  %v8322_v45 = vpop.f32.mrb[44].mxu0  ;;  %v23077_v43 = vrot.slane %v6134_v36, %v16028_v5 }
 0x361   :  { %6703 = vrot.lane.b32.xlu1 %v26845_v27, %s15879_s3  ;;  %26846 = vst [vmem:[#allocation34_spill] sm:$0xff] %v23052_v17  ;;  %v7675_v48 = vsel %vm25834_vm10, %v7625_v25, %v4810_v14  ;;  %26847 = vst [vmem:[#allocation64_spill] sm:$0xff] %v23061_v3  ;;  %v26850_v14 = vcombine.low %v26848_v34, %v26849_v51  ;;  %v2859_v25 = vcombine.low %v22904_v56, %v22937_v58  ;;  %v172_v56 = vld [vmem:[%s25399_s0 + $0x1e8] sm:$0xff] }
 0x362   :  { %v5161_v27 = vcombine.low %v22740_v52, %v22783_v59  ;;  %v23080_v26 = vrot.slane %v6135_v18, %v16028_v5  ;;  %v23083_v44 = vrot.slane %v2842_v30, %v16028_v5  ;;  %v23086_v34 = vrot.slane %v2858_v7, %v16028_v5  ;;  %v23093_v52 = vpop.permute.xlu0 %3831  ;;  %v14841_v30 = vpop.f32.mrb[45].mxu0  ;;  %v26853_v51 = vld [vmem:[#allocation29_spill] sm:$0xff] }
 0x363   :  { %3845 = vrot.lane.b32.xlu0 %v26850_v14, %s15883_s13  ;;  %v8323_v36 = vadd.f32 %v22929_v15, %v8322_v45  ;;  %v26852_v18 = vcombine.low %v22365_v39, %v22435_v33  ;;  %v3740_v7 = vcombine.low %v22991_v0, %v22998_v9  ;;  %v26854_v14 = vld [vmem:[#allocation43_spill] sm:$0xff]  ;;  %v7725_v50 = vsel %vm25826_vm11, %v7675_v48, %v5278_v49 }
 0x364   :  { %26851 = vst [vmem:[#allocation35_spill] sm:$0xff] %v23083_v44  ;;  %v23108_v61 = vrot.slane %v171_v31, %v16028_v5  ;;  %v23111_v45 = vrot.slane %v1847_v47, %v16028_v5  ;;  %v26855_v33 = vcombine.low %v22719_v57, %v22874_v21  ;;  %v6966_v0 = vpop.permute.xlu1 %6965  ;;  %v23118_v9 = vrot.slane %v2859_v25, %v16028_v5 }
 0x365   :  { %4825 = vrot.lane.b32.xlu1 %v26852_v18, %s15880_s26  ;;  %v8478_v39 = vmax.f32 %v8323_v36, 0.0  ;;  %v23121_v49 = vrot.slane %v5161_v27, %v16028_v5  ;;  %v23124_v48 = vrot.slane %v172_v56, %v16028_v5  ;;  %v7775_v31 = vsel %vm7738_vm12, %v7725_v50, %v6258_v63 }
 0x366   :  { %26856 = vst [vmem:[#allocation59_spill] sm:$0xff] %v23118_v9  ;;  %v26858_v57 = vrot.slane %v22937_v58, 7  ;;  %v4812_v30 = vpop.permute.xlu0 %4811  ;;  %v26859_v27 = vcombine.low %v22694_v38, %v22797_v19  ;;  %v1864_v63 = vcombine.high %v172_v56, %v172_v56  ;;  %v23144_v36 = vrot.slane %v3740_v7, %v16028_v5 }
 0x367   :  { %3849 = vrot.lane.b32.xlu0 %v26855_v33, %s15883_s13  ;;  %26857 = vst [vmem:[#allocation30_spill] sm:$0xff] %v23121_v49  ;;  %v8928_v25 = vcombine.high %v8478_v39, %v8478_v39  ;;  %v6117_v33 = vcombine.low %v22805_v24, %v22835_v16  ;;  %v6118_v59 = vcombine.low %v22852_v40, %v22980_v32  ;;  %v26864_v22 = vrot.slane %v23111_v45, 7 }
 0x368   :  { %v23133_v18 = vrot.slane %v26858_v57, 2  ;;  %v23148_v57 = vcombine.high %v23111_v45, %v23111_v45  ;;  %v23154_v38 = vcombine.high %v23108_v61, %v23108_v61  ;;  %v26861_v24 = vcombine.low %v22800_v12, %v22856_v23  ;;  %v7274_v16 = vpop.permute.xlu1 %7273 }
 0x369   :  { %4829 = vrot.lane.b32.xlu1 %v26859_v27, %s15880_s26  ;;  %v23157_v27 = vrot.slane %v8928_v25, %v16028_v5  ;;  %v23165_v56 = vcombine.low %v23086_v34, %v23118_v9  ;;  %v23171_v32 = vcombine.high %v23124_v48, %v23124_v48  ;;  %v7825_v7 = vsel %vm7788_vm13, %v7775_v31, %v6690_v1 }
 0x36a   :  { %v1912_v50 = vrot.slane %v23148_v57, 7  ;;  %v1915_v12 = vrot.slane %v23124_v48, 7  ;;  %v5280_v37 = vpop.permute.xlu0 %5279  ;;  %v26863_v40 = vcombine.low %v22874_v21, %v22924_v29  ;;  %v23184_v47 = vrot.slane %v1864_v63, %v16028_v5 }
 0x36b   :  { %26860 = vst [vmem:[#allocation25_spill] sm:$0xff] %v23157_v27  ;;  %6979 = vrot.lane.b32.xlu0 %v26861_v24, %s15882_s11  ;;  %26862 = vst [vmem:[#allocation29_spill] sm:$0xff] %v23165_v56  ;;  %v8944_v24 = vcombine.high %v23157_v27, %v23157_v27  ;;  %v23187_v1 = vrot.slane %v6117_v33, %v16028_v5  ;;  %v1918_v31 = vrot.slane %v23171_v32, 7  ;;  %v1911_v9 = vrot.slane %v26864_v22, 2  ;;  %v26867_v22 = vld [vmem:[#allocation52_spill] sm:$0xff] }
 0x36c   :  { %v7875_v25 = vsel %vm7838_vm14, %v7825_v7, %v6966_v0  ;;  %v23192_v23 = vrot.slane %v6118_v59, %v16028_v5  ;;  %v5171_v4 = vcombine.low %v22937_v58, %v23108_v61  ;;  %v5172_v21 = vcombine.low %v23154_v38, %v23111_v45  ;;  %v7514_v33 = vpop.permute.xlu1 %7513 }
 0x36d   :  { %7287 = vrot.lane.b32.xlu1 %v26863_v40, %s15885_s16  ;;  %v9625_v40 = vmax.f32 %v23015_v28, %v8944_v24  ;;  %v7925_v63 = vsel %vm7888_vm15, %v7875_v25, %v7274_v16  ;;  %v6584_v0 = vcombine.low %v23111_v45, %v23148_v57  ;;  %v6600_v59 = vcombine.low %v23124_v48, %v23171_v32 }
 0x36e   :  { %v7975_v7 = vsel %vm7938_vm0, %v7925_v63, %v7514_v33  ;;  %v1914_v27 = vrot.slane %v1912_v50, 2  ;;  %v1917_v10 = vrot.slane %v1915_v12, 2  ;;  %v6260_v24 = vpop.permute.xlu0 %6259  ;;  %v26865_v16 = vcombine.low %v22880_v6, %v22883_v13 }
 0x36f   :  { %5293 = vrot.lane.b32.xlu0 %v22749_v35, %s15881_s27  ;;  %14882 = vmatmul.mubr.msk.f32.gmra.mrb[72].mxu0 %vm25827_vm4, %v7975_v7  ;;  %v1920_v25 = vrot.slane %v1918_v31, 2  ;;  %v23219_v63 = vcombine.high %v22937_v58, %v22937_v58  ;;  %v7626_v33 = vsel %vm7588_vm9, %v26867_v22, %v23093_v52  ;;  %v23225_v56 = vrot.slane %v8478_v39, %v16028_v5  ;;  %v8327_v35 = vpop.f32.mrb[46].mxu0 }
 0x370   :  { %14884 = vmatprep.mubr.msk.f32.mxu0 %vm15888_vm8, %v25931_v42  ;;  %v23230_v6 = vrot.slane %v5171_v4, %v16028_v5  ;;  %v23233_v13 = vrot.slane %v5172_v21, %v16028_v5  ;;  %v6692_v7 = vpop.permute.xlu1 %6691  ;;  %v23241_v52 = vrot.slane %v6600_v59, %v16028_v5  ;;  %v1906_v22 = vrot.slane %v23154_v38, 7 }
 0x371   :  { %6273 = vrot.lane.b32.xlu1 %v26865_v16, %s15872_s12  ;;  %26866 = vst [vmem:[#allocation43_spill] sm:$0xff] %v23219_v63  ;;  %v23238_v16 = vrot.slane %v6584_v0, %v16028_v5  ;;  %v7676_v4 = vsel %vm25834_vm10, %v7626_v33, %v4812_v30  ;;  %v23249_v21 = vsel %vm16175_vm6, %v1911_v9, %v1912_v50  ;;  %v14844_v33 = vpop.f32.mrb[47].mxu0  ;;  %v26870_v9 = vrot.slane %v23184_v47, 7 }
 0x372   :  { %26868 = vst [vmem:[#allocation52_spill] sm:$0xff] %v23233_v13  ;;  %v23253_v49 = vsel %vm16175_vm6, %v1914_v27, %v1915_v12  ;;  %v23257_v0 = vsel %vm16175_vm6, %v1917_v10, %v1918_v31  ;;  %v3834_v59 = vpop.permute.xlu0 %3833  ;;  %v8328_v39 = vadd.f32 %v22929_v15, %v8327_v35  ;;  %v26869_v30 = vcombine.low %v22565_v8, %v22716_v11  ;;  %v26872_v8 = vld [vmem:[#allocation84_spill] sm:$0xff] }
 0x373   :  { %5297 = vrot.lane.b32.xlu0 %v23052_v17, %s15881_s27  ;;  %v23268_v50 = vsel %vm16175_vm6, %v1920_v25, %v26870_v9  ;;  %v1808_v27 = vrot.slane %v23219_v63, 7  ;;  %v14265_v10 = vrot.slane %v23108_v61, 9  ;;  %v14391_v31 = vrot.slane %v9625_v40, 9 }
 0x374   :  { %26871 = vst [vmem:[#allocation91_spill] sm:$0xff] %v23268_v50  ;;  %v6574_v11 = vcombine.low %v22723_v55, %v26872_v8  ;;  %v8479_v33 = vmax.f32 %v8328_v39, 0.0  ;;  %v26873_v25 = vcombine.low %v22797_v19, %v23011_v54  ;;  %v6968_v9 = vpop.permute.xlu1 %6967  ;;  %v1908_v12 = vrot.slane %v1906_v22, 2  ;;  %v26875_v39 = vld [vmem:[#allocation60_spill] sm:$0xff] }
 0x375   :  { %3847 = vrot.lane.b32.xlu1 %v26869_v30, %s15883_s13  ;;  %v7726_v30 = vsel %vm25826_vm11, %v7676_v4, %v5280_v37  ;;  %v7150_v35 = vcombine.low %v23249_v21, %v23253_v49  ;;  %v7151_v55 = vcombine.low %v23257_v0, %v23268_v50  ;;  %v23302_v17 = vmax.f32 %v9625_v40, %v14391_v31 }
 0x376   :  { %v7776_v63 = vsel %vm7738_vm12, %v7726_v30, %v6260_v24  ;;  %v8945_v8 = vcombine.high %v8479_v33, %v8479_v33  ;;  %v8952_v13 = vrot.slane %v8479_v33, %v16028_v5  ;;  %v1809_v24 = vsel %vm16175_vm6, %v23133_v18, %v1808_v27 }
 0x377   :  { %7527 = vrot.lane.b32.xlu0 %v26873_v25, %s15884_s2  ;;  %v4814_v25 = vpop.permute.xlu0 %4813  ;;  %v23300_v30 = vsel %vm16175_vm6, %v14265_v10, %v1906_v22  ;;  %v23305_v50 = vrot.slane %v6574_v11, %v16028_v5  ;;  %v3741_v4 = vcombine.low %v23004_v20, %v1809_v24  ;;  %v14295_v33 = vcombine.high %v22937_v58, %v23108_v61 }
 0x378   :  { %v8960_v37 = vcombine.high %v8952_v13, %v8952_v13  ;;  %v26876_v18 = vcombine.high %v23015_v28, %v23015_v28  ;;  %v26877_v40 = vcombine.low %v23077_v43, %v23080_v26  ;;  %v7276_v22 = vpop.permute.xlu1 %7275  ;;  %v26878_v10 = vrot.slane %v23111_v45, 7 }
 0x379   :  { %6705 = vrot.lane.b32.xlu1 %v23061_v3, %s15879_s3  ;;  %v8959_v3 = vrot.slane %v8945_v8, %v16028_v5  ;;  %v7826_v31 = vsel %vm7788_vm13, %v7776_v63, %v6692_v7  ;;  %v23328_v11 = vrot.slane %v7150_v35, %v16028_v5  ;;  %v23331_v28 = vrot.slane %v7151_v55, %v16028_v5  ;;  %v173_v35 = vld [vmem:[%s25399_s0 + $0x1f0] sm:$0xff] }
 0x37a   :  { %v23314_v27 = vmax.f32 %v26876_v18, %v8952_v13  ;;  %v23324_v20 = vsel %vm16175_vm6, %v1908_v12, %v26878_v10  ;;  %v6151_v13 = vcombine.low %v1809_v24, %v23300_v30  ;;  %v23335_v26 = vmax.f32 %v23043_v62, %v8960_v37 }
 0x37b   :  { %6277 = vrot.lane.b32.xlu0 %v26877_v40, %s15872_s12  ;;  %v8961_v8 = vcombine.high %v8959_v3, %v8959_v3  ;;  %v26879_v43 = vcombine.high %v23043_v62, %v23043_v62  ;;  %v5282_v12 = vpop.permute.xlu0 %5281  ;;  %v26880_v63 = vcombine.low %v26854_v14, %v26853_v51  ;;  %v5188_v7 = vcombine.low %v23148_v57, %v23124_v48 }
 0x37c   :  { %v7876_v55 = vsel %vm7838_vm14, %v7826_v31, %v6968_v9  ;;  %v5189_v37 = vcombine.low %v23171_v32, %v23184_v47  ;;  %v26881_v48 = vcombine.low %v22924_v29, %v23064_v46  ;;  %v7516_v57 = vpop.permute.xlu1 %7515  ;;  %v23367_v9 = vrot.slane %v14295_v33, %v16028_v5 }
 0x37d   :  { %v23340_v45 = vmax.f32 %v26879_v43, %v8959_v3  ;;  %4827 = vrot.lane.b32.xlu1 %v26880_v63, %s15880_s26  ;;  %v6152_v3 = vcombine.low %v23324_v20, %v23249_v21  ;;  %v23359_v51 = vmax.f32 %v23225_v56, %v8961_v8  ;;  %v7926_v14 = vsel %vm7888_vm15, %v7876_v55, %v7276_v22 }
 0x37e   :  { %v23370_v24 = vrot.slane %v3741_v4, %v16028_v5  ;;  %v26882_v21 = vcombine.low %v26827_v60, %v26826_v53  ;;  %v7976_v40 = vsel %vm7938_vm0, %v7926_v14, %v7516_v57  ;;  %v1963_v22 = vcombine.high %v173_v35, %v173_v35 }
 0x37f   :  { %3851 = vrot.lane.b32.xlu0 %v26881_v48, %s15883_s13  ;;  %v6262_v29 = vpop.permute.xlu0 %6261  ;;  %v26883_v33 = vcombine.low %v23083_v44, %v23086_v34  ;;  %14885 = vmatmul.mubr.msk.f32.gmra.mrb[74].mxu0 %vm25827_vm4, %v7976_v40  ;;  %v23387_v10 = vrot.slane %v6151_v13, %v16028_v5  ;;  %v5196_v53 = vrot.slane %v5188_v7, %v16028_v5  ;;  %v26884_v13 = vld [vmem:[#allocation29_spill] sm:$0xff]  ;;  %v26885_v48 = vld [vmem:[#allocation30_spill] sm:$0xff] }
 0x380   :  { %v7627_v18 = vsel %vm7588_vm9, %v26882_v21, %v3834_v59  ;;  %14887 = vmatprep.mubr.msk.f32.mxu0 %vm15888_vm8, %v25931_v42  ;;  %v23393_v60 = vrot.slane %v6152_v3, %v16028_v5  ;;  %v5203_v59 = vrot.slane %v5189_v37, %v16028_v5  ;;  %v23397_v34 = vrot.slane %v173_v35, %v16028_v5  ;;  %v6694_v43 = vpop.permute.xlu1 %6693  ;;  %v8332_v3 = vpop.f32.mrb[48].mxu0 }
 0x381   :  { %6981 = vrot.lane.b32.xlu1 %v26883_v33, %s15882_s11  ;;  %v23400_v31 = vrot.slane %v1963_v22, %v16028_v5  ;;  %v7677_v8 = vsel %vm25834_vm10, %v7627_v18, %v4814_v25  ;;  %v7141_v63 = vcombine.low %v23300_v30, %v23324_v20  ;;  %v14392_v35 = vrot.slane %v23314_v27, 9  ;;  %v14847_v21 = vpop.f32.mrb[49].mxu0 }
 0x382   :  { %v6849_v37 = vcombine.low %v23108_v61, %v23154_v38  ;;  %v1978_v25 = vcombine.high %v23397_v34, %v23397_v34  ;;  %v23418_v14 = vcombine.high %v23184_v47, %v23184_v47  ;;  %v8333_v20 = vadd.f32 %v22929_v15, %v8332_v3 }
 0x383   :  { %6709 = vrot.lane.b32.xlu0 %v26884_v13, %s15879_s3  ;;  %v3836_v30 = vpop.permute.xlu0 %3835  ;;  %v26886_v57 = vcombine.low %v22797_v19, %v26885_v48  ;;  %v26887_v18 = vrot.slane %v23184_v47, 7  ;;  %v23429_v61 = vcombine.high %v23400_v31, %v23400_v31  ;;  %v14267_v38 = vrot.slane %v23397_v34, 9  ;;  %v26888_v48 = vld [vmem:[#allocation31_spill] sm:$0xff] }
 0x384   :  { %v7727_v22 = vsel %vm25826_vm11, %v7677_v8, %v5282_v12  ;;  %v23435_v3 = vcombine.low %v5196_v53, %v5203_v59  ;;  %v2022_v32 = vrot.slane %v1978_v25, 7  ;;  %v8480_v19 = vmax.f32 %v8333_v20, 0.0  ;;  %v6970_v21 = vpop.permute.xlu1 %6969 }
 0x385   :  { %5295 = vrot.lane.b32.xlu1 %v26886_v57, %s15881_s27  ;;  %v1923_v40 = vrot.slane %v26887_v18, 2  ;;  %v26889_v57 = vcombine.low %v23011_v54, %v26888_v48  ;;  %v1924_v18 = vrot.slane %v23418_v14, 7  ;;  %v2025_v55 = vrot.slane %v23400_v31, 7 }
 0x386   :  { %v23445_v12 = vrot.slane %v6849_v37, %v16028_v5  ;;  %v6859_v53 = vcombine.low %v23184_v47, %v23397_v34  ;;  %v2023_v59 = vsel %vm16175_vm6, %v14267_v38, %v2022_v32  ;;  %v2024_v8 = vrot.slane %v2022_v32, 2 }
 0x387   :  { %4831 = vrot.lane.b32.xlu0 %v26889_v57, %s15880_s26  ;;  %v8969_v54 = vrot.slane %v8480_v19, %v16028_v5  ;;  %v4816_v20 = vpop.permute.xlu0 %4815  ;;  %v26890_v48 = vcombine.low %v23064_v46, %v23144_v36  ;;  %v6860_v57 = vcombine.low %v1978_v25, %v23400_v31  ;;  %v1925_v37 = vsel %vm16175_vm6, %v1923_v40, %v1924_v18  ;;  %v26895_v18 = vld [vmem:[#allocation25_spill] sm:$0xff] }
 0x388   :  { %v2027_v33 = vrot.slane %v2025_v55, 2  ;;  %v23460_v62 = vmax.f32 %v23314_v27, %v14392_v35  ;;  %v7777_v38 = vsel %vm7738_vm12, %v7727_v22, %v6262_v29  ;;  %v8962_v32 = vcombine.high %v8480_v19, %v8480_v19 }
 0x389   :  { %7289 = vrot.lane.b32.xlu1 %v26890_v48, %s15885_s16  ;;  %v2026_v4 = vsel %vm16175_vm6, %v2024_v8, %v2025_v55  ;;  %v8977_v7 = vcombine.high %v8969_v54, %v8969_v54  ;;  %v26891_v46 = vcombine.high %v23225_v56, %v23225_v56  ;;  %v26893_v25 = vcombine.low %v23238_v16, %v23241_v52  ;;  %v7278_v40 = vpop.permute.xlu1 %7277 }
 0x38a   :  { %v26894_v27 = vrot.slane %v23429_v61, 7  ;;  %v7167_v35 = vcombine.low %v1925_v37, %v2023_v59  ;;  %v7827_v55 = vsel %vm7788_vm13, %v7777_v38, %v6694_v43  ;;  %v23480_v22 = vrot.slane %v7141_v63, %v16028_v5  ;;  %v26898_v63 = vld [vmem:[#allocation43_spill] sm:$0xff] }
 0x38b   :  { %v23468_v48 = vmax.f32 %v26891_v46, %v8969_v54  ;;  %6985 = vrot.lane.b32.xlu0 %v26893_v25, %s15882_s11  ;;  %v23483_v56 = vrot.slane %v6859_v53, %v16028_v5  ;;  %v23486_v8 = vmax.f32 %v26895_v18, %v8977_v7  ;;  %v7877_v54 = vsel %vm7838_vm14, %v7827_v55, %v6970_v21  ;;  %v5284_v46 = vpop.permute.xlu0 %5283  ;;  %v26899_v53 = vld [vmem:[#allocation77_spill] sm:$0xff]  ;;  %v26900_v38 = vld [vmem:[#allocation59_spill] sm:$0xff] }
 0x38c   :  { %v2029_v29 = vsel %vm16175_vm6, %v2027_v33, %v26894_v27  ;;  %v26897_v33 = vcombine.low %v23187_v1, %v23192_v23  ;;  %v23494_v43 = vrot.slane %v6860_v57, %v16028_v5  ;;  %v4721_v59 = vcombine.low %v22937_v58, %v26898_v63  ;;  %v26901_v23 = vld [vmem:[#allocation52_spill] sm:$0xff] }
 0x38d   :  { %26892 = vst [vmem:[#allocation84_spill] sm:$0xff] %v23468_v48  ;;  %v7168_v19 = vcombine.low %v2026_v4, %v2029_v29  ;;  %26896 = vst [vmem:[#allocation60_spill] sm:$0xff] %v23486_v8  ;;  %v7628_v4 = vsel %vm7588_vm9, %v26899_v53, %v3836_v30  ;;  %v23501_v7 = vrot.slane %v8962_v32, %v16028_v5  ;;  %v7518_v57 = vpop.permute.xlu1 %7517  ;;  %v26903_v32 = vld [vmem:[#allocation91_spill] sm:$0xff] }
 0x38e   :  { %6275 = vrot.lane.b32.xlu1 %v26897_v33, %s15872_s12  ;;  %v7927_v21 = vsel %vm7888_vm15, %v7877_v54, %v7278_v40  ;;  %v6857_v25 = vcombine.low %v26900_v38, %v23445_v12  ;;  %v26902_v1 = vcombine.low %v23230_v6, %v26901_v23  ;;  %v23511_v27 = vrot.slane %v7167_v35, %v16028_v5  ;;  %v174_v29 = vld [vmem:[%s25399_s0 + $0x1f8] sm:$0xff]  ;;  %v26922_v38 = vld [vmem:[#allocation53_spill] sm:$0xff]  ;;  %s15889_s0 = smov 64  }
 0x38f   :  { %v23514_v58 = vrot.slane %v7168_v19, %v16028_v5  ;;  %v6168_v30 = vcombine.low %v23253_v49, %v23257_v0  ;;  %v6169_v40 = vcombine.low %v26903_v32, %v1925_v37  ;;  %v7678_v55 = vsel %vm25834_vm10, %v7628_v4, %v4816_v20  ;;  %v6264_v54 = vpop.permute.xlu0 %6263  ;;  %v26904_v49 = vld [vmem:[#allocation34_spill] sm:$0xff] }
 0x390   :  { %5299 = vrot.lane.b32.xlu0 %v26902_v1, %s15881_s27  ;;  %v7977_v6 = vsel %vm7938_vm0, %v7927_v21, %v7518_v57  ;;  %v7149_v35 = vcombine.low %v23370_v24, %v23480_v22  ;;  %v14297_v19 = vcombine.high %v23184_v47, %v23397_v34  ;;  %v6875_v0 = vcombine.low %v23483_v56, %v23494_v43  ;;  %v8337_v57 = vpop.f32.mrb[50].mxu0  ;;  %v26924_v22 = vld [vmem:[#allocation21_spill] sm:$0xff]  ;;  %v26929_v56 = vld [vmem:[#allocation23_spill] sm:$0xff] }
 0x391   :  { %14888 = vmatmul.mubr.msk.f32.gmra.mrb[76].mxu0 %vm25827_vm4, %v7977_v6  ;;  %v23535_v20 = vrot.slane %v4721_v59, %v16028_v5  ;;  %v7408_v37 = vcombine.low %v23400_v31, %v23429_v61  ;;  %v7728_v33 = vsel %vm25826_vm11, %v7678_v55, %v5284_v46  ;;  %v1980_v63 = vcombine.high %v174_v29, %v174_v29  ;;  %v6696_v59 = vpop.permute.xlu1 %6695  ;;  %v14850_v6 = vpop.f32.mrb[51].mxu0  ;;  %v26910_v31 = vld [vmem:[#allocation45_spill] sm:$0xff] }
 0x392   :  { %7529 = vrot.lane.b32.xlu1 %v26904_v49, %s15884_s2  ;;  %14890 = vmatprep.mubr.msk.f32.mxu0 %vm15888_vm8, %v25931_v42  ;;  %v1987_v53 = vrot.slane %v174_v29, %v16028_v5  ;;  %v26905_v4 = vcombine.low %v23328_v11, %v23331_v28  ;;  %v23552_v21 = vrot.slane %v6168_v30, %v16028_v5  ;;  %vm10464_vm11 = vcmask 1045509  }
 0x393   :  { %v23555_v46 = vrot.slane %v6169_v40, %v16028_v5  ;;  %v6601_v1 = vcombine.low %v23184_v47, %v23418_v14  ;;  %v23560_v32 = vrot.slane %v14297_v19, %v16028_v5  ;;  %v23563_v11 = vrot.slane %v7408_v37, %v16028_v5  ;;  %v3838_v55 = vpop.permute.xlu0 %3837  ;;  %v26907_v47 = vld [vmem:[#allocation20_spill] sm:$0xff]  ;;  %v26921_v37 = vld [vmem:[#allocation55_spill] sm:$0xff] }
 0x394   :  { %7293 = vrot.lane.b32.xlu0 %v26905_v4, %s15885_s16  ;;  %v1994_v28 = vrot.slane %v1980_v63, %v16028_v5  ;;  %v1995_v29 = vcombine.high %v1987_v53, %v1987_v53  ;;  %v8338_v30 = vadd.f32 %v22929_v15, %v8337_v57  ;;  %v26906_v40 = vcombine.low %v23305_v50, %v23083_v44 }
 0x395   :  { %v6876_v19 = vcombine.low %v23429_v61, %v1987_v53  ;;  %v2031_v49 = vrot.slane %v1987_v53, 7  ;;  %v23577_v4 = vrot.slane %v6601_v1, %v16028_v5  ;;  %v26908_v57 = vrot.slane %v23429_v61, 7  ;;  %v6972_v34 = vpop.permute.xlu1 %6971 }
 0x396   :  { %6707 = vrot.lane.b32.xlu1 %v26906_v40, %s15879_s3  ;;  %v6877_v63 = vcombine.low %v1995_v29, %v1994_v28  ;;  %v7778_v50 = vsel %vm7738_vm12, %v7728_v33, %v6264_v54  ;;  %v8481_v40 = vmax.f32 %v8338_v30, 0.0  ;;  %v26909_v6 = vcombine.low %v23387_v10, %v23393_v60 }
 0x397   :  { %v2030_v18 = vrot.slane %v26908_v57, 2  ;;  %v1997_v14 = vcombine.high %v1994_v28, %v1994_v28  ;;  %v7828_v1 = vsel %vm7788_vm13, %v7778_v50, %v6696_v59  ;;  %v26911_v61 = vcombine.low %v26875_v39, %v26910_v31 }
 0x398   :  { %6279 = vrot.lane.b32.xlu0 %v26909_v6, %s15872_s12  ;;  %v7424_v33 = vcombine.low %v1987_v53, %v1995_v29  ;;  %v4818_v30 = vpop.permute.xlu0 %4817  ;;  %v26912_v10 = vcombine.low %v23367_v9, %v23238_v16  ;;  %v23600_v60 = vrot.slane %v6876_v19, %v16028_v5  ;;  %v23603_v59 = vrot.slane %v6877_v63, %v16028_v5 }
 0x399   :  { %v7629_v57 = vsel %vm7588_vm9, %v26911_v61, %v3838_v55  ;;  %v7425_v50 = vcombine.low %v1994_v28, %v1997_v14  ;;  %v2033_v39 = vrot.slane %v2031_v49, 2  ;;  %v8979_v31 = vcombine.high %v8481_v40, %v8481_v40  ;;  %v7280_v9 = vpop.permute.xlu1 %7279  ;;  %v26918_v55 = vld [vmem:[#allocation80_spill] sm:$0xff] }
 0x39a   :  { %6711 = vrot.lane.b32.xlu1 %v26912_v10, %s15879_s3  ;;  %v2032_v53 = vsel %vm16175_vm6, %v2030_v18, %v2031_v49  ;;  %v2034_v6 = vrot.slane %v1995_v29, 7  ;;  %v23610_v61 = vrot.slane %v8481_v40, %v16028_v5  ;;  %v7878_v16 = vsel %vm7838_vm14, %v7828_v1, %v6972_v34  ;;  %v26914_v1 = vld [vmem:[#allocation49_spill] sm:$0xff]  ;;  %v8342_v2 = vpop.f32.mrb[52].mxu0 }
 0x39b   :  { %v2040_v19 = vrot.slane %v1997_v14, 7  ;;  %v2037_v63 = vrot.slane %v1994_v28, 7  ;;  %v7679_v10 = vsel %vm25834_vm10, %v7629_v57, %v4818_v30  ;;  %v23617_v54 = vrot.slane %v7424_v33, %v16028_v5  ;;  %v26915_v57 = vld [vmem:[#allocation50_spill] sm:$0xff] }
 0x39c   :  { %7533 = vrot.lane.b32.xlu0 %v23435_v3, %s15884_s2  ;;  %v2035_v18 = vsel %vm16175_vm6, %v2033_v39, %v2034_v6  ;;  %v2036_v29 = vrot.slane %v2034_v6, 2  ;;  %v5286_v49 = vpop.permute.xlu0 %5285  ;;  %v26913_v34 = vcombine.low %v23144_v36, %v23370_v24  ;;  %v23628_v28 = vrot.slane %v7425_v50, %v16028_v5  ;;  %v26944_v24 = vld [vmem:[#allocation36_spill] sm:$0xff] }
 0x39d   :  { %v2039_v14 = vrot.slane %v2037_v63, 2  ;;  %v26916_v33 = vrot.slane %v26915_v57, %v26741_v41  ;;  %v23636_v39 = vrot.slane %v8979_v31, %v16028_v5  ;;  %v7928_v6 = vsel %vm7888_vm15, %v7878_v16, %v7280_v9  ;;  %v7520_v57 = vpop.permute.xlu1 %7519  ;;  %v26920_v9 = vld [vmem:[#allocation32_spill] sm:$0xff] }
 0x39e   :  { %3853 = vrot.lane.b32.xlu1 %v26913_v34, %s15883_s13  ;;  %v2038_v36 = vsel %vm16175_vm6, %v2036_v29, %v2037_v63  ;;  %v26917_v34 = vld [vmem:[#allocation33_spill] sm:$0xff]  ;;  %v7184_v31 = vcombine.low %v2032_v53, %v2035_v18  ;;  %v7978_v40 = vsel %vm7938_vm0, %v7928_v6, %v7520_v57  ;;  %v26923_v18 = vld [vmem:[#allocation70_spill] sm:$0xff]  ;;  %v26926_v57 = vld [vmem:[#allocation72_spill] sm:$0xff]  ;;  %v8343_v6 = vadd.f32 %v22929_v15, %v8342_v2 }
 0x39f   :  { %v10679_v30 = vsel %vm1190_vm2, %v26916_v33, %v26914_v1  ;;  %v11038_v50 = vsel %vm10458_vm5, %v26918_v55, %v26917_v34  ;;  %v2041_v1 = vsel %vm16175_vm6, %v2039_v14, %v2040_v19  ;;  %v26919_v33 = vld [vmem:[#allocation26_spill] sm:$0xff]  ;;  %14891 = vmatmul.mubr.msk.f32.gmra.mrb[78].mxu0 %vm25827_vm4, %v7978_v40  ;;  %vm25844_vm6 = vcmask 1047559   ;;  %v26933_v29 = vld [vmem:[#allocation81_spill] sm:$0xff] }
 0x3a0   :  { %6983 = vrot.lane.b32.xlu0 %v6857_v25, %s15882_s11  ;;  %v10680_v16 = vsel %vm10464_vm11, %v26919_v33, %v10679_v30  ;;  %v11039_v63 = vsel %vm1188_vm1, %v26920_v9, %v11038_v50  ;;  %v6266_v53 = vpop.permute.xlu0 %6265  ;;  %v7185_v19 = vcombine.low %v2038_v36, %v2041_v1  ;;  %v10924_v30 = vsel %vm10458_vm5, %v26921_v37, %v26919_v33  ;;  %v26927_v1 = vld [vmem:[#allocation75_spill] sm:$0xff] }
 0x3a1   :  { %v10681_v12 = vsel %vm25845_vm3, %v26921_v37, %v10680_v16  ;;  %v11040_v25 = vsel %vm10461_vm7, %v26922_v38, %v11039_v63  ;;  %14893 = vmatprep.mubr.msk.f32.mxu0 %vm15888_vm8, %v25931_v42  ;;  %vm26925_vm4 = vcmask 48128   ;;  %v6698_v36 = vpop.permute.xlu1 %6697  ;;  %v23686_v50 = vrot.slane %v7184_v31, %v16028_v5  ;;  %v26928_v63 = vld [vmem:[#allocation54_spill] sm:$0xff] }
 0x3a2   :  { %7291 = vrot.lane.b32.xlu1 %v7149_v35, %s15885_s16  ;;  %v11041_v14 = vsel %vm1190_vm2, %v26923_v18, %v11040_v25  ;;  %v7729_v40 = vsel %vm26925_vm4, %v7679_v10, %v5286_v49  ;;  %v10566_v16 = vsel %vm10464_vm11, %v26927_v1, %v26926_v57  ;;  %v10925_v25 = vsel %vm1188_vm1, %v26928_v63, %v10924_v30  ;;  %v26945_v1 = vld [vmem:[#allocation47_spill] sm:$0xff] }
 0x3a3   :  { %v11042_v35 = vsel %vm10464_vm11, %v26924_v22, %v11041_v14  ;;  %v7779_v14 = vsel %vm7738_vm12, %v7729_v40, %v6266_v53  ;;  %v23696_v10 = vsel %vm25844_vm6, %v26928_v63, %v10681_v12  ;;  %v26931_v30 = vcombine.low %v23511_v27, %v23514_v58  ;;  %v14853_v53 = vpop.f32.mrb[53].mxu0  ;;  %v26932_v12 = vld [vmem:[#allocation24_spill] sm:$0xff]  ;;  %v26934_v58 = vld [vmem:[#allocation65_spill] sm:$0xff]  ;;  %v26940_v22 = vld [vmem:[#allocation74_spill] sm:$0xff] }
 0x3a4   :  { %6987 = vrot.lane.b32.xlu0 %v6875_v0, %s15882_s11  ;;  %v11043_v43 = vsel %vm25845_vm3, %v26929_v56, %v11042_v35  ;;  %v26930_v0 = vld [vmem:[#allocation27_spill] sm:$0xff]  ;;  %v3840_v31 = vpop.permute.xlu0 %3839  ;;  %v23708_v40 = vrot.slane %v7185_v19, %v16028_v5  ;;  %v10570_v35 = vsel %vm1188_vm1, %v26918_v55, %v26933_v29  ;;  %v8482_v53 = vmax.f32 %v8343_v6, 0.0 }
 0x3a5   :  { %v10926_v49 = vsel %vm10461_vm7, %v26930_v0, %v10925_v25  ;;  %v10567_v25 = vsel %vm25845_vm3, %v26919_v33, %v10566_v16  ;;  %v10571_v27 = vsel %vm10461_vm7, %v26920_v9, %v10570_v35  ;;  %v6974_v29 = vpop.permute.xlu1 %6973  ;;  %vm26952_vm4 = vcmask 146432  }
 0x3a6   :  { %7295 = vrot.lane.b32.xlu1 %v26931_v30, %s15885_s16  ;;  %v10927_v57 = vsel %vm1190_vm2, %v26932_v12, %v10926_v49  ;;  %v26935_v30 = vld [vmem:[#allocation22_spill] sm:$0xff]  ;;  %v26936_v49 = vcombine.low %v26907_v47, %v23535_v20  ;;  %v26938_v47 = vld [vmem:[#allocation85_spill] sm:$0xff]  ;;  %v8996_v0 = vcombine.high %v8482_v53, %v8482_v53 }
 0x3a7   :  { %v10928_v2 = vsel %vm10464_vm11, %v26920_v9, %v10927_v57  ;;  %v10932_v19 = vsel %vm1188_vm1, %v26935_v30, %v26934_v58  ;;  %v23730_v16 = vsel %vm25844_vm6, %v26935_v30, %v11043_v43  ;;  %v26937_v57 = vld [vmem:[#allocation73_spill] sm:$0xff]  ;;  %v23738_v58 = vsel %vm25844_vm6, %v26921_v37, %v10567_v25 }
 0x3a8   :  { %4833 = vrot.lane.b32.xlu0 %v26936_v49, %s15880_s26  ;;  %v10929_v12 = vsel %vm25845_vm3, %v26922_v38, %v10928_v2  ;;  %v10933_v35 = vsel %vm10461_vm7, %v26937_v57, %v10932_v19  ;;  %v26939_v49 = vld [vmem:[#allocation58_spill] sm:$0xff]  ;;  %v23749_v2 = vrot.slane %v8482_v53, %v16028_v5  ;;  %v4820_v8 = vpop.permute.xlu0 %4819  ;;  %v10572_v19 = vsel %vm1190_vm2, %v26922_v38, %v10571_v27 }
 0x3a9   :  { %v23742_v6 = vsel %vm25844_vm6, %v26923_v18, %v10929_v12  ;;  %v10934_v43 = vsel %vm1190_vm2, %v26940_v22, %v10933_v35  ;;  %v7829_v12 = vsel %vm7788_vm13, %v7779_v14, %v6698_v36  ;;  %v26941_v53 = vld [vmem:[#allocation66_spill] sm:$0xff]  ;;  %v9010_v33 = vrot.slane %v8996_v0, %v16028_v5  ;;  %v7282_v36 = vpop.permute.xlu1 %7281  ;;  %v26943_v14 = vld [vmem:[#allocation41_spill] sm:$0xff] }
 0x3aa   :  { %5301 = vrot.lane.b32.xlu1 %v23435_v3, %s15881_s27  ;;  %v10935_v13 = vsel %vm10464_vm11, %v26941_v53, %v10934_v43  ;;  %v9011_v3 = vcombine.high %v23749_v2, %v23749_v2  ;;  %v26942_v27 = vcombine.low %v23535_v20, %v26901_v23  ;;  %v10792_v35 = vsel %vm10461_vm7, %v26921_v37, %v26944_v24 }
 0x3ab   :  { %v10936_v25 = vsel %vm25845_vm3, %v26943_v14, %v10935_v13  ;;  %v7630_v43 = vsel %vm7588_vm9, %v26945_v1, %v3840_v31  ;;  %v7879_v0 = vsel %vm7838_vm14, %v7829_v12, %v6974_v29  ;;  %v10573_v44 = vsel %vm10464_vm11, %v26923_v18, %v10572_v19  ;;  %v26948_v31 = vld [vmem:[#allocation69_spill] sm:$0xff]  ;;  %v26949_v12 = vld [vmem:[#allocation38_spill] sm:$0xff] }
 0x3ac   :  { %7531 = vrot.lane.b32.xlu0 %v26942_v27, %s15884_s2  ;;  %v11109_v23 = vsel %vm10458_vm5, %v26920_v9, %v26918_v55  ;;  %v9012_v20 = vcombine.high %v9010_v33, %v9010_v33  ;;  %v9632_v27 = vmax.f32 %v23501_v7, %v9011_v3  ;;  %v26946_v13 = vcombine.high %v23501_v7, %v23501_v7  ;;  %v5288_v24 = vpop.permute.xlu0 %5287 }
 0x3ad   :  { %v26947_v1 = vcombine.low %v23552_v21, %v23555_v46  ;;  %v10574_v29 = vsel %vm25845_vm3, %v26948_v31, %v10573_v44  ;;  %v7929_v19 = vsel %vm7888_vm15, %v7879_v0, %v7282_v36  ;;  %v23797_v37 = vsel %vm25844_vm6, %v26949_v12, %v10936_v25  ;;  %v7522_v46 = vpop.permute.xlu1 %7521 }
 0x3ae   :  { %v9633_v48 = vmax.f32 %v26946_v13, %v9010_v33  ;;  %v10793_v3 = vsel %vm1190_vm2, %v26928_v63, %v10792_v35  ;;  %v11110_v7 = vsel %vm1188_vm1, %v26922_v38, %v11109_v23  ;;  %v9634_v33 = vmax.f32 %v23610_v61, %v9012_v20 }
 0x3af   :  { %6281 = vrot.lane.b32.xlu1 %v26947_v1, %s15872_s12  ;;  %v14398_v13 = vrot.slane %v9632_v27, 9  ;;  %v26950_v44 = vcombine.low %v23560_v32, %v23563_v11  ;;  %v10794_v25 = vsel %vm10464_vm11, %v26917_v34, %v10793_v3  ;;  %v7680_v36 = vsel %vm25834_vm10, %v7630_v43, %v4820_v8  ;;  %s15890_s12 = smov 32  }
 0x3b0   :  { %v14399_v21 = vrot.slane %v9633_v48, 9  ;;  %v7979_v35 = vsel %vm7938_vm0, %v7929_v19, %v7522_v46  ;;  %v23814_v0 = vsel %vm25844_vm6, %v26929_v56, %v10574_v29  ;;  %v10795_v23 = vsel %vm25845_vm3, %v26918_v55, %v10794_v25  ;;  %v6268_v32 = vpop.permute.xlu0 %6267  ;;  %v26954_v29 = vld [vmem:[#allocation71_spill] sm:$0xff]  ;;  %v26957_v46 = vld [vmem:[#allocation57_spill] sm:$0xff] }
 0x3b1   :  { %7535 = vrot.lane.b32.xlu0 %v26950_v44, %s15884_s2  ;;  %v14400_v20 = vrot.slane %v9634_v33, 9  ;;  %v10122_v1 = vmax.f32 %v9632_v27, %v14398_v13  ;;  %v26951_v11 = vcombine.low %v23600_v60, %v23603_v59  ;;  %14894 = vmatmul.mubr.msk.f32.gmra.mrb[80].mxu0 %vm26952_vm4, %v7979_v35  ;;  %v11111_v8 = vsel %vm10461_vm7, %v26923_v18, %v11110_v7  ;;  %v6976_v7 = vpop.permute.xlu1 %6975 }
 0x3b2   :  { %v10123_v63 = vmax.f32 %v9633_v48, %v14399_v21  ;;  %vm26953_vm10 = vcmask 48128   ;;  %14896 = vmatprep.mubr.msk.f32.mxu0 %vm15888_vm8, %v25931_v42  ;;  %v15545_v27 = vpack.i.bf16 %v23814_v0, %v23797_v37  ;;  %v11112_v48 = vsel %vm1190_vm2, %v26948_v31, %v11111_v8  ;;  %v8347_v21 = vpop.f32.mrb[54].mxu0 }
 0x3b3   :  { %6989 = vrot.lane.b32.xlu1 %v26951_v11, %s15882_s11  ;;  %v7730_v43 = vsel %vm26953_vm10, %v7680_v36, %v5288_v24  ;;  %v23834_v60 = vrot.slane %v26954_v29, %v26741_v41  ;;  %v10124_v59 = vmax.f32 %v9634_v33, %v14400_v20  ;;  %v10361_v19 = vrot.slane %v10122_v1, %v26741_v41  ;;  %v26958_v36 = vld [vmem:[#allocation87_spill] sm:$0xff]  ;;  %v14856_v1 = vpop.f32.mrb[55].mxu0  ;;  %vm26968_vm10 = vmmov %vm26952_vm4 }
 0x3b4   :  { %v10365_v3 = vrot.slane %v10123_v63, %v26741_v41  ;;  %v26955_v24 = vcombine.low %v23241_v52, %v23577_v4  ;;  %v11113_v37 = vsel %vm10464_vm11, %v26929_v56, %v11112_v48  ;;  %v7780_v13 = vsel %vm7738_vm12, %v7730_v43, %v6268_v32  ;;  %v26956_v63 = vld [vmem:[#allocation62_spill] sm:$0xff]  ;;  %v6700_v0 = vpop.permute.xlu0 %6699 }
 0x3b5   :  { %v10796_v44 = vsel %vm25844_vm6, %v26920_v9, %v10795_v23  ;;  %v23850_v33 = vsel %vm10458_vm5, %v26940_v22, %v26937_v57  ;;  %v10799_v52 = vsel %vm10461_vm7, %v26929_v56, %v26956_v63  ;;  %v23856_v4 = vrot.slane %v10124_v59, %v26741_v41  ;;  %v7524_v29 = vpop.permute.xlu1 %7523  ;;  %v26961_v59 = vld [vmem:[#allocation78_spill] sm:$0xff] }
 0x3b6   :  { %6713 = vrot.lane.b32.xlu0 %v26955_v24, %s15879_s3  ;;  %v10483_v25 = vsel %vm10458_vm5, %v10361_v19, %v26957_v46  ;;  %v10583_v35 = vsel %vm10458_vm5, %v10365_v3, %v26958_v36  ;;  %v8348_v23 = vadd.f32 %v22929_v15, %v8347_v21  ;;  %v26959_v20 = vcombine.low %v23617_v54, %v23628_v28  ;;  %s15891_s3 = smov 96  }
 0x3b7   :  { %v10484_v32 = vsel %vm1188_vm1, %v10365_v3, %v10483_v25  ;;  %v7830_v11 = vsel %vm7788_vm13, %v7780_v13, %v6700_v0  ;;  %v11114_v8 = vsel %vm25845_vm3, %v26935_v30, %v11113_v37  ;;  %v11116_v43 = vsel %vm10458_vm5, %v26941_v53, %v26940_v22  ;;  %v26962_v13 = vld [vmem:[#allocation79_spill] sm:$0xff] }
 0x3b8   :  { %7537 = vrot.lane.b32.xlu1 %v26959_v20, %s15884_s2  ;;  %v8483_v48 = vmax.f32 %v8348_v23, 0.0  ;;  %v23876_v15 = vsel %vm10461_vm7, %v23856_v4, %v10484_v32  ;;  %v23880_v54 = vsel %vm1188_vm1, %v23856_v4, %v10583_v35  ;;  %v26960_v28 = vcombine.low %v23686_v50, %v23708_v40  ;;  %v7284_v25 = vpop.permute.xlu0 %7283  ;;  %v26964_v23 = vld [vmem:[#allocation56_spill] sm:$0xff] }
 0x3b9   :  { %v10684_v19 = vsel %vm1188_vm1, %v26920_v9, %v26961_v59  ;;  %v11115_v3 = vsel %vm25844_vm6, %v26937_v57, %v11114_v8  ;;  %v10800_v24 = vsel %vm1190_vm2, %v26935_v30, %v10799_v52  ;;  %v11045_v37 = vsel %vm1188_vm1, %v23834_v60, %v23850_v33 }
 0x3ba   :  { %7297 = vrot.lane.b32.xlu0 %v26960_v28, %s15885_s16  ;;  %v11117_v21 = vsel %vm1188_vm1, %v26962_v13, %v11116_v43  ;;  %v9013_v50 = vcombine.high %v8483_v48, %v8483_v48  ;;  %v9020_v40 = vrot.slane %v8483_v48, %v16028_v5  ;;  %v7880_v63 = vsel %vm7838_vm14, %v7830_v11, %v6976_v7  ;;  %v4822_v48 = vpop.permute.xlu1 %4821  ;;  %s15893_s16 = smov [#allocation13]  }
 0x3bb   :  { %v26963_v35 = vpack.i.bf16 %v23696_v10, %v23730_v16  ;;  %v11118_v52 = vsel %vm10461_vm7, %v26949_v12, %v11117_v21  ;;  %v7930_v0 = vsel %vm7888_vm15, %v7880_v63, %v7284_v25  ;;  %v10685_v1 = vsel %vm10461_vm7, %v26922_v38, %v10684_v19  ;;  %s14224_s1 = sshll.u32 %s15893_s16, 4  ;;  %s14225_s1 = int_to_ptr.vmem [resolvable:$true] %s14224_s1 }
 0x3bc   :  { %v11119_v20 = vsel %vm1190_vm2, %v26964_v23, %v11118_v52  ;;  %v11046_v7 = vsel %vm10461_vm7, %v26962_v13, %v11045_v37  ;;  %v9027_v32 = vrot.slane %v9013_v50, %v16028_v5  ;;  %v9028_v11 = vcombine.high %v9020_v40, %v9020_v40  ;;  %p15841_p7 = scmp.lt.s32.totalorder %s14225_s1, %s14225_s1 }
 0x3bd   :  { %15536 = vrot.lane.b32.xlu1 %v26963_v35, %s15889_s0  ;;  %v26965_v10 = vcombine.high %v23610_v61, %v23610_v61  ;;  %v26966_v8 = vpack.i.bf16 %v23738_v58, %v23742_v6  ;;  %v7980_v43 = vsel %vm7938_vm0, %v7930_v0, %v7524_v29  ;;  %v26967_v28 = vrot.slane %v23335_v26, 9  ;;  %v26972_v0 = vld [vmem:[#allocation89_spill] sm:$0xff] }
 0x3be   :  { %14897 = vmatmul.mubr.msk.f32.gmra.mrb[82].mxu0 %vm26968_vm10, %v7980_v43  ;;  %v15540_v19 = vpack.i.bf16 %v10796_v44, %v11115_v3  ;;  %v10801_v61 = vsel %vm10464_vm11, %v26937_v57, %v10800_v24  ;;  %v11047_v37 = vsel %vm1190_vm2, %v26949_v12, %v11046_v7  ;;  %v9029_v21 = vcombine.high %v9027_v32, %v9027_v32  ;;  %v6270_v25 = vpop.permute.xlu1 %6269  ;;  %v26974_v43 = vld [vmem:[#allocation83_spill] sm:$0xff] }
 0x3bf   :  { %v9635_v16 = vmax.f32 %v26965_v10, %v9020_v40  ;;  %15531 = vrot.lane.b32.xlu0 %v26966_v8, %s15890_s12  ;;  %v10117_v59 = vmax.f32 %v23335_v26, %v26967_v28  ;;  %v23931_v58 = vmax.f32 %v23636_v39, %v9028_v11  ;;  %v26969_v6 = vcombine.high %v23636_v39, %v23636_v39  ;;  %v3842_v26 = vpop.permute.xlu0 %3841  ;;  %v26975_v28 = vld [vmem:[#allocation88_spill] sm:$0xff] }
 0x3c0   :  { %14899 = vmatprep.mubr.msk.f32.mxu0 %vm15888_vm8, %v25931_v42  ;;  %v26970_v44 = vcombine.low %v26939_v49, %v26938_v47  ;;  %v11120_v24 = vsel %vm10464_vm11, %v26957_v46, %v11119_v20  ;;  %v10686_v39 = vsel %vm1190_vm2, %v26923_v18, %v10685_v1  ;;  %v11048_v40 = vsel %vm10464_vm11, %v26964_v23, %v11047_v37 }
 0x3c1   :  { %v23936_v29 = vmax.f32 %v26969_v6, %v9027_v32  ;;  %v14401_v50 = vrot.slane %v9635_v16, 9  ;;  %15546 = vrot.lane.b32.xlu1 %v15545_v27, %s15890_s12  ;;  %v23952_v63 = vmax.f32 %v23749_v2, %v9029_v21  ;;  %v11121_v47 = vsel %vm25845_vm3, %v26958_v36, %v11120_v24  ;;  %v24000_v24 = vpop.f32.mrb[56].mxu0 }
 0x3c2   :  { %v7631_v3 = vsel %vm7588_vm9, %v26970_v44, %v3842_v26  ;;  %v10687_v49 = vsel %vm10464_vm11, %v26948_v31, %v10686_v39  ;;  %vm26971_vm4 = vcmask 31744   ;;  %v10802_v52 = vsel %vm25845_vm3, %v26940_v22, %v10801_v61  ;;  %v26977_v61 = vld [vmem:[#allocation39_spill] sm:$0xff] }
 0x3c3   :  { %v10125_v27 = vmax.f32 %v9635_v16, %v14401_v50  ;;  %15541 = vrot.lane.b32.xlu0 %v15540_v19, %s15891_s3  ;;  %v7681_v35 = vsel %vm26971_vm4, %v7631_v3, %v4822_v48  ;;  %v11122_v2 = vsel %vm25844_vm6, %v26972_v0, %v11121_v47  ;;  %v10691_v20 = vsel %vm1188_vm1, %v26941_v53, %v23850_v33  ;;  %v5290_v11 = vpop.permute.xlu0 %5289  ;;  %v6702_v50 = vpop.permute.xlu1 %6701  ;;  %v26981_v47 = vld [vmem:[#allocation82_spill] sm:$0xff] }
 0x3c4   :  { %v26973_v1 = vrot.slane %v23340_v45, 9  ;;  %v10803_v10 = vsel %vm25844_vm6, %v23834_v60, %v10802_v52  ;;  %v11049_v16 = vsel %vm25845_vm3, %v26957_v46, %v11048_v40  ;;  %v10688_v48 = vsel %vm25845_vm3, %v26974_v43, %v10687_v49  ;;  %v14859_v52 = vpop.f32.mrb[57].mxu0 }
 0x3c5   :  { %v10373_v32 = vrot.slane %v10125_v27, %v26741_v41  ;;  %v15555_v8 = vpack.i.bf16 %v10803_v10, %v11122_v2  ;;  %v11050_v33 = vsel %vm25844_vm6, %v26975_v28, %v11049_v16  ;;  %v10692_v19 = vsel %vm10461_vm7, %v26943_v14, %v10691_v20 }
 0x3c6   :  { %v10118_v7 = vmax.f32 %v23340_v45, %v26973_v1  ;;  %v10697_v37 = vsel %vm10458_vm5, %v23856_v4, %v26977_v61  ;;  %vm26978_vm10 = vcmask 48128   ;;  %v10689_v6 = vsel %vm25844_vm6, %v26935_v30, %v10688_v48  ;;  %v26979_v4 = vld [vmem:[#allocation90_spill] sm:$0xff]  ;;  %v26982_v1 = vld [vmem:[#allocation61_spill] sm:$0xff] }
 0x3c7   :  { %v23983_v45 = vsel %vm1190_vm2, %v10373_v32, %v23876_v15  ;;  %v7731_v21 = vsel %vm26978_vm10, %v7681_v35, %v5290_v11  ;;  %v14395_v26 = vrot.slane %v23359_v51, 9  ;;  %v23994_v44 = vsel %vm10461_vm7, %v10373_v32, %v23880_v54  ;;  %15556 = vrot.lane.b32.xlu1 %v15555_v8, %s15891_s3  ;;  %v26980_v54 = vld [vmem:[#allocation42_spill] sm:$0xff]  ;;  %v24013_v35 = vpop.permute.xlu0 %3843  ;;  %v6978_v16 = vpop.permute.xlu1 %6977 }
 0x3c8   :  { %26976 = vst [vmem:[#allocation30_spill] sm:$0xff] %v23983_v45  ;;  %v23997_v3 = vsel %vm1188_vm1, %v10373_v32, %v10697_v37  ;;  %v15550_v15 = vpack.i.bf16 %v10689_v6, %v11050_v33  ;;  %v11051_v39 = vsel %vm10458_vm5, %v26979_v4, %v26972_v0  ;;  %v11005_v40 = vrot.slane %v23460_v62, %v26741_v41  ;;  %v26983_v8 = vld [vmem:[#allocation46_spill] sm:$0xff]  ;;  %v10177_v45 = vld [vmem:[#allocation7 + $0x30] sm:$0xff] }
 0x3c9   :  { %v24008_v27 = vrot.slane %v10117_v59, %v26741_v41  ;;  %v11124_v49 = vsel %vm1188_vm1, %v26981_v47, %v26980_v54  ;;  %v7781_v2 = vsel %vm7738_vm12, %v7731_v21, %v6270_v25  ;;  %v10693_v20 = vsel %vm1190_vm2, %v26949_v12, %v10692_v19  ;;  %v26984_v19 = vld [vmem:[#allocation28_spill] sm:$0xff] }
 0x3ca   :  { %15551 = vrot.lane.b32.xlu0 %v15550_v15, %s15889_s0  ;;  %v11052_v62 = vsel %vm1188_vm1, %v26982_v1, %v11051_v39  ;;  %v10576_v59 = vsel %vm10458_vm5, %v26937_v57, %v26935_v30  ;;  %v24025_v32 = vrot.slane %v10118_v7, %v26741_v41  ;;  %v10694_v11 = vsel %vm10464_vm11, %v26964_v23, %v10693_v20 }
 0x3cb   :  { %v11053_v10 = vsel %vm10461_vm7, %v26981_v47, %v11052_v62  ;;  %v10577_v25 = vsel %vm1188_vm1, %v26940_v22, %v10576_v59  ;;  %v10940_v48 = vsel %vm10461_vm7, %v26977_v61, %v26983_v8  ;;  %v10119_v33 = vmax.f32 %v23359_v51, %v14395_v26  ;;  %v24049_v52 = vpop.permute.xlu0 %4823  ;;  %v7286_v59 = vpop.permute.xlu1 %7285  ;;  %v10195_v61 = vld [vmem:[#allocation7 + $0xc0] sm:$0xff] }
 0x3cc   :  { %v11125_v7 = vsel %vm10461_vm7, %v26984_v19, %v11124_v49  ;;  %v26985_v37 = vrot.slane %v23302_v17, %v26741_v41  ;;  %v7831_v6 = vsel %vm7788_vm13, %v7781_v2, %v6702_v50  ;;  %v10578_v39 = vsel %vm10461_vm7, %v26941_v53, %v10577_v25 }
 0x3cd   :  { %v10941_v54 = vsel %vm1190_vm2, %v26979_v4, %v10940_v48  ;;  %v10695_v51 = vsel %vm25845_vm3, %v26957_v46, %v10694_v11  ;;  %v10579_v26 = vsel %vm1190_vm2, %v26962_v13, %v10578_v39  ;;  %v11126_v49 = vsel %vm1190_vm2, %v11005_v40, %v11125_v7 }
 0x3ce   :  { %v11054_v21 = vsel %vm1190_vm2, %v26985_v37, %v11053_v10  ;;  %v10942_v50 = vsel %vm10464_vm11, %v26982_v1, %v10941_v54  ;;  %v10696_v2 = vsel %vm25844_vm6, %v26958_v36, %v10695_v51  ;;  %v10580_v62 = vsel %vm10464_vm11, %v26949_v12, %v10579_v26  ;;  %v10188_v54 = vld [vmem:[#allocation7 + $0x88] sm:$0xff]  ;;  %v10171_v51 = vld [vmem:[#allocation7] sm:$0xff] }
 0x3cf   :  { %v11055_v15 = vsel %vm10464_vm11, %v11005_v40, %v11054_v21  ;;  %v10581_v10 = vsel %vm25845_vm3, %v26964_v23, %v10580_v62  ;;  %v10943_v25 = vsel %vm25845_vm3, %v26981_v47, %v10942_v50  ;;  %v7881_v8 = vsel %vm7838_vm14, %v7831_v6, %v6978_v16  ;;  %v24078_v37 = vpop.permute.xlu0 %5291  ;;  %v10187_v21 = vld [vmem:[#allocation7 + $0x80] sm:$0xff]  ;;  %v10189_v62 = vld [vmem:[#allocation7 + $0x90] sm:$0xff]  ;;  %v10196_v36 = vld [vmem:[#allocation7 + $0xc8] sm:$0xff] }
 0x3d0   :  { %v11056_v17 = vsel %vm25845_vm3, %v24008_v27, %v11055_v15  ;;  %v10582_v40 = vsel %vm25844_vm6, %v26957_v46, %v10581_v10  ;;  %v10944_v48 = vsel %vm25844_vm6, %v26984_v19, %v10943_v25  ;;  %v10804_v7 = vsel %vm10458_vm5, %v26949_v12, %v26962_v13  ;;  %v26987_v10 = vld [vmem:[#allocation67_spill] sm:$0xff] }
 0x3d1   :  { %v11057_v20 = vsel %vm25844_vm6, %v24025_v32, %v11056_v17  ;;  %v15560_v15 = vpack.i.bf16 %v10582_v40, %v10944_v48  ;;  %v10805_v39 = vsel %vm1188_vm1, %v26964_v23, %v10804_v7  ;;  %v24084_v16 = vrot.slane %v10119_v33, %v26741_v41  ;;  %v10172_v17 = vld [vmem:[#allocation7 + $0x8] sm:$0xff] }
 0x3d2   :  { %v15565_v11 = vpack.i.bf16 %v10696_v2, %v11057_v20  ;;  %v11127_v6 = vsel %vm10464_vm11, %v24008_v27, %v11126_v49  ;;  %v10806_v26 = vsel %vm10461_vm7, %v26957_v46, %v10805_v39  ;;  %v7931_v2 = vsel %vm7888_vm15, %v7881_v8, %v7286_v59  ;;  %v7526_v20 = vpop.permute.xlu1 %7525  ;;  %v26988_v33 = vld [vmem:[#allocation48_spill] sm:$0xff] }
 0x3d3   :  { %26986 = vst [vmem:[#allocation31_spill] sm:$0xff] %v24084_v16  ;;  %v11128_v50 = vsel %vm25845_vm3, %v24025_v32, %v11127_v6  ;;  %v2789_v25 = vcombine.low %v26988_v33, %v26987_v10  ;;  %15561 = vrot.lane.b32.xlu0 %v15560_v15, %s15890_s12  ;;  %v10807_v49 = vsel %vm1190_vm2, %v26975_v28, %v10806_v26  ;;  %v24103_v59 = vpop.permute.xlu0 %6271  ;;  %vm26989_vm4 = vcmask 146432   ;;  %v10173_v6 = vld [vmem:[#allocation7 + $0x10] sm:$0xff]  ;;  %v10174_v10 = vld [vmem:[#allocation7 + $0x18] sm:$0xff]  ;;  %v10191_v26 = vld [vmem:[#allocation7 + $0xa0] sm:$0xff] }
 0x3d4   :  { %15566 = vrot.lane.b32.xlu1 %v15565_v11, %s15889_s0  ;;  %v10190_v11 = vld [vmem:[#allocation7 + $0x98] sm:$0xff]  ;;  %v7981_v40 = vsel %vm7938_vm0, %v7931_v2, %v7526_v20  ;;  %v10808_v48 = vsel %vm10464_vm11, %v26972_v0, %v10807_v49  ;;  %v11129_v7 = vsel %vm25844_vm6, %v24084_v16, %v11128_v50  ;;  %v14952_v8 = vpack.c.bf16 %v10188_v54, %v10187_v21  ;;  %v10192_v2 = vld [vmem:[#allocation7 + $0xa8] sm:$0xff] }
 0x3d5   :  { %14900 = vmatmul.mubr.msk.f32.gmra.mrb[84].mxu0 %vm26989_vm4, %v7981_v40  ;;  %v14954_v39 = vpack.c.bf16 %v10172_v17, %v10171_v51  ;;  %v10809_v15 = vsel %vm25845_vm3, %v26979_v4, %v10808_v48  ;;  %v14956_v28 = vpack.c.bf16 %v10190_v11, %v10189_v62  ;;  %v14402_v21 = vrot.slane %v23931_v58, 9  ;;  %v8357_v51 = vpop.f32.mrb[58].mxu0  ;;  %v24117_v49 = vld [vmem:[#allocation5] ss:$0 sm:$0xff] }
 0x3d6   :  { %14902 = vmatprep.mubr.msk.f32.mxu0 %vm15888_vm8, %v25931_v42  ;;  %v10810_v50 = vsel %vm25844_vm6, %v26982_v1, %v10809_v15  ;;  %v24112_v20 = vpop.permute.xlu1 %6703  ;;  %14953 = vmatprep.subr.bf16.mxu0 %v14952_v8  ;;  %v14958_v17 = vpack.c.bf16 %v10174_v10, %v10173_v6  ;;  %v7632_v33 = vsel %vm7588_vm9, %v2789_v25, %v24013_v35  ;;  %v14862_v48 = vpop.f32.mrb[59].mxu0  ;;  %v10175_v15 = vld [vmem:[#allocation7 + $0x20] sm:$0xff]  ;;  %v10193_v6 = vld [vmem:[#allocation7 + $0xb0] sm:$0xff]  ;;  %v10194_v35 = vld [vmem:[#allocation7 + $0xb8] sm:$0xff]  ;;  %vm26991_vm10 = vcmask 31744  }
 0x3d7   :  { %v15570_v54 = vpack.i.bf16 %v10810_v50, %v11129_v7  ;;  %14955 = vmatpush3.bf16.msra.mxu0 %v14954_v39  ;;  %v8353_v62 = vadd.f32 %v24117_v49, %v24000_v24  ;;  %v24121_v11 = vpop.permute.xlu0 %3845  ;;  %v8358_v40 = vadd.f32 %v24117_v49, %v8357_v51  ;;  %v14960_v8 = vpack.c.bf16 %v10192_v2, %v10191_v26  ;;  %v10176_v7 = vld [vmem:[#allocation7 + $0x28] sm:$0xff]  ;;  %v10178_v0 = vld [vmem:[#allocation7 + $0x38] sm:$0xff] }
 0x3d8   :  { %14957 = vmatprep.subr.bf16.mxu0 %v14956_v28  ;;  %v14403_v39 = vrot.slane %v23936_v29, 9  ;;  %v26990_v24 = vld [vmem:[#allocation44_spill] sm:$0xff]  ;;  %v7682_v51 = vsel %vm26991_vm10, %v7632_v33, %v24049_v52  ;;  %v14962_v28 = vpack.c.bf16 %v10176_v7, %v10175_v15  ;;  %v10126_v26 = vmax.f32 %v23931_v58, %v14402_v21 }
 0x3d9   :  { %15571 = vrot.lane.b32.xlu0 %v15570_v54, %s15891_s3  ;;  %v24126_v25 = vmax.f32 %v8358_v40, 0.0  ;;  %v14390_v50 = vrot.slane %v26990_v24, 9  ;;  %v24134_v2 = vmax.f32 %v8353_v62, 0.0  ;;  %v14964_v40 = vpack.c.bf16 %v10194_v35, %v10193_v6  ;;  %v26993_v62 = vld [vmem:[#allocation84_spill] sm:$0xff]  ;;  %v10179_v6 = vld [vmem:[#allocation7 + $0x40] sm:$0xff] }
 0x3da   :  { %v24128_v10 = vpop.permute.xlu1 %4825  ;;  %v10127_v4 = vmax.f32 %v23936_v29, %v14403_v39  ;;  %vm26992_vm4 = vcmask 48128   ;;  %v14966_v29 = vpack.c.bf16 %v10178_v0, %v10177_v45  ;;  %v24156_v15 = vrot.slane %v10126_v26, %v26741_v41  ;;  %v10180_v35 = vld [vmem:[#allocation7 + $0x48] sm:$0xff]  ;;  %v10197_v45 = vld [vmem:[#allocation7 + $0xd0] sm:$0xff] }
 0x3db   :  { %14959 = vmatpush3.bf16.msra.mxu0 %v14958_v17  ;;  %v9047_v54 = vcombine.high %v24126_v25, %v24126_v25  ;;  %v24138_v48 = vpop.permute.xlu0 %3849  ;;  %v7732_v52 = vsel %vm26992_vm4, %v7682_v51, %v24078_v37  ;;  %v24151_v17 = vsel %vm10458_vm5, %v26943_v14, %v26941_v53  ;;  %v10114_v33 = vmax.f32 %v26990_v24, %v14390_v50  ;;  %v10198_v50 = vld [vmem:[#allocation7 + $0xd8] sm:$0xff] }
 0x3dc   :  { %14961 = vmatprep.subr.bf16.mxu0 %v14960_v8  ;;  %v14396_v8 = vrot.slane %v26993_v62, 9  ;;  %26994 = vst [vmem:[#allocation25_spill] sm:$0xff] %v24156_v15  ;;  %v24160_v37 = vrot.slane %v24134_v2, %v16028_v5  ;;  %v14968_v14 = vpack.c.bf16 %v10196_v36, %v10195_v61  ;;  %v24165_v24 = vrot.slane %v10127_v4, %v26741_v41  ;;  %v10181_v61 = vld [vmem:[#allocation7 + $0x50] sm:$0xff] }
 0x3dd   :  { %v24144_v58 = vrot.slane %v9047_v54, %v16028_v5  ;;  %v7782_v0 = vsel %vm7738_vm12, %v7732_v52, %v24103_v59  ;;  %v24173_v26 = vrot.slane %v10114_v33, %v26741_v41  ;;  %v14970_v36 = vpack.c.bf16 %v10180_v35, %v10179_v6 }
 0x3de   :  { %v24146_v21 = vpop.permute.xlu1 %4829  ;;  %v10120_v54 = vmax.f32 %v26993_v62, %v14396_v8  ;;  %v7832_v4 = vsel %vm7788_vm13, %v7782_v0, %v24112_v20  ;;  %v14972_v59 = vpack.c.bf16 %v10198_v50, %v10197_v45  ;;  %v10586_v52 = vsel %vm1190_vm2, %v24156_v15, %v23994_v44  ;;  %v10200_v62 = vld [vmem:[#allocation7 + $0xe8] sm:$0xff] }
 0x3df   :  { %14963 = vmatpush3.bf16.msra.mxu0 %v14962_v28  ;;  %v9063_v7 = vcombine.high %v24144_v58, %v24144_v58  ;;  %v6980_v39 = vpop.permute.xlu0 %6979  ;;  %v9030_v33 = vcombine.high %v24134_v2, %v24134_v2  ;;  %v24187_v8 = vsel %vm10464_vm11, %v24165_v24, %v10586_v52  ;;  %v11197_v20 = vsel %vm10458_vm5, %v26981_v47, %v26982_v1  ;;  %v8362_v35 = vpop.f32.mrb[60].mxu0  ;;  %v10202_v1 = vld [vmem:[#allocation7 + $0xf8] sm:$0xff] }
 0x3e0   :  { %14965 = vmatprep.subr.bf16.mxu0 %v14964_v40  ;;  %v10182_v40 = vld [vmem:[#allocation7 + $0x58] sm:$0xff]  ;;  %v11198_v6 = vsel %vm1188_vm1, %v26984_v19, %v11197_v20  ;;  %v10871_v44 = vsel %vm10458_vm5, %v26948_v31, %v26923_v18  ;;  %v7882_v2 = vsel %vm7838_vm14, %v7832_v4, %v6980_v39  ;;  %v24201_v0 = vrot.slane %v10120_v54, %v26741_v41  ;;  %v14865_v52 = vpop.f32.mrb[61].mxu0  ;;  %v10183_v19 = vld [vmem:[#allocation7 + $0x60] sm:$0xff]  ;;  %v10184_v39 = vld [vmem:[#allocation7 + $0x68] sm:$0xff] }
 0x3e1   :  { %v24170_v51 = vmax.f32 %v24160_v37, %v9063_v7  ;;  %v10199_v7 = vld [vmem:[#allocation7 + $0xe0] sm:$0xff]  ;;  %v11199_v45 = vsel %vm10461_vm7, %v24173_v26, %v11198_v6  ;;  %v10872_v50 = vsel %vm1188_vm1, %v26929_v56, %v10871_v44  ;;  %v9044_v4 = vrot.slane %v9030_v33, %v16028_v5  ;;  %v10201_v6 = vld [vmem:[#allocation7 + $0xf0] sm:$0xff] }
 0x3e2   :  { %v7288_v28 = vpop.permute.xlu1 %7287  ;;  %26995 = vst [vmem:[#allocation43_spill] sm:$0xff] %v24201_v0  ;;  %v14976_v20 = vpack.c.bf16 %v10200_v62, %v10199_v7  ;;  %v10873_v54 = vsel %vm10461_vm7, %v26935_v30, %v10872_v50  ;;  %v9045_v33 = vcombine.high %v24160_v37, %v24160_v37  ;;  %v14978_v50 = vpack.c.bf16 %v10184_v39, %v10183_v19 }
 0x3e3   :  { %14967 = vmatpush3.bf16.msra.mxu0 %v14966_v29  ;;  %v24178_v46 = vpop.permute.xlu0 %5293  ;;  %v9046_v19 = vcombine.high %v9044_v4, %v9044_v4  ;;  %vm26996_vm10 = vcmask 146432   ;;  %vm26999_vm4 = vcmask 31744  }
 0x3e4   :  { %14969 = vmatprep.subr.bf16.mxu0 %v14968_v14  ;;  %v14974_v14 = vpack.c.bf16 %v10182_v40, %v10181_v61  ;;  %v8363_v40 = vadd.f32 %v24117_v49, %v8362_v35  ;;  %v10874_v35 = vsel %vm1190_vm2, %v26937_v57, %v10873_v54  ;;  %v10185_v54 = vld [vmem:[#allocation7 + $0x70] sm:$0xff] }
 0x3e6   :  { %v24192_v29 = vpop.permute.xlu1 %6273  ;;  %v8486_v7 = vmax.f32 %v8363_v40, 0.0 }
 0x3e7   :  { %14971 = vmatpush3.bf16.msra.mxu0 %v14970_v36  ;;  %v24207_v61 = vpop.permute.xlu0 %5297  ;;  %v11200_v36 = vsel %vm1190_vm2, %v24008_v27, %v11199_v45  ;;  %v10875_v45 = vsel %vm10464_vm11, %v26940_v22, %v10874_v35 }
 0x3e8   :  { %14973 = vmatprep.subr.bf16.mxu0 %v14972_v59  ;;  %v11201_v44 = vsel %vm10464_vm11, %v24025_v32, %v11200_v36  ;;  %v7932_v59 = vsel %vm7888_vm15, %v7882_v2, %v7288_v28  ;;  %v10876_v28 = vsel %vm25845_vm3, %v26941_v53, %v10875_v45  ;;  %v9064_v2 = vcombine.high %v8486_v7, %v8486_v7 }
 0x3e9   :  { %v11202_v27 = vsel %vm25845_vm3, %v24084_v16, %v11201_v44  ;;  %v9071_v40 = vrot.slane %v8486_v7, %v16028_v5  ;;  %v14980_v36 = vpack.c.bf16 %v10202_v1, %v10201_v6  ;;  %v10186_v44 = vld [vmem:[#allocation7 + $0x78] sm:$0xff]  ;;  %v24237_v37 = vsel %vm25844_vm6, %v26962_v13, %v10876_v28 }
 0x3ea   :  { %v24220_v62 = vpop.permute.xlu1 %3847  ;;  %v24230_v32 = vsel %vm25844_vm6, %v24201_v0, %v11202_v27  ;;  %v9078_v39 = vrot.slane %v9064_v2, %v16028_v5  ;;  %v10476_v1 = vsel %vm10458_vm5, %v26935_v30, %v26929_v56  ;;  %v9054_v6 = vrot.slane %v24126_v25, %v16028_v5  ;;  %v26997_v56 = vld [vmem:[#allocation40_spill] sm:$0xff] }
 0x3eb   :  { %14975 = vmatpush3.bf16.msra.mxu0 %v14974_v14  ;;  %v7528_v52 = vpop.permute.xlu0 %7527  ;;  %v9079_v35 = vcombine.high %v9071_v40, %v9071_v40  ;;  %v9640_v27 = vmax.f32 %v9045_v33, %v9071_v40  ;;  %v10477_v7 = vsel %vm1188_vm1, %v26937_v57, %v10476_v1 }
 0x3ec   :  { %14977 = vmatprep.subr.bf16.mxu0 %v14976_v20  ;;  %v7982_v14 = vsel %vm7938_vm0, %v7932_v59, %v7528_v52  ;;  %v14404_v20 = vrot.slane %v23952_v63, 9  ;;  %v14982_v59 = vpack.c.bf16 %v10186_v44, %v10185_v54  ;;  %v9080_v45 = vcombine.high %v9078_v39, %v9078_v39 }
 0x3ed   :  { %14903 = vmatmul.mubr.msk.f32.gmra.mrb[86].mxu0 %vm26996_vm10, %v7982_v14  ;;  %v9641_v33 = vmax.f32 %v9044_v4, %v9079_v35  ;;  %v9642_v28 = vmax.f32 %v9046_v19, %v9078_v39  ;;  %v14406_v2 = vrot.slane %v9640_v27, 9  ;;  %v7633_v52 = vsel %vm7588_vm9, %v26997_v56, %v24121_v11 }
 0x3ee   :  { %v6706_v53 = vpop.permute.xlu1 %6705  ;;  %14905 = vmatprep.mubr.msk.f32.mxu0 %vm15888_vm8, %v25931_v42  ;;  %v9643_v25 = vmax.f32 %v9054_v6, %v9080_v45  ;;  %v10128_v4 = vmax.f32 %v23952_v63, %v14404_v20  ;;  %v7683_v19 = vsel %vm26999_vm4, %v7633_v52, %v24128_v10  ;;  %vm27000_vm10 = vcmask 48128  }
 0x3ef   :  { %14979 = vmatpush3.bf16.msra.mxu0 %v14978_v50  ;;  %v24252_v40 = vpop.permute.xlu0 %6277  ;;  %v14407_v14 = vrot.slane %v9641_v33, 9  ;;  %v10130_v0 = vmax.f32 %v9640_v27, %v14406_v2  ;;  %v10478_v50 = vsel %vm10461_vm7, %v26940_v22, %v10477_v7  ;;  %v14408_v35 = vrot.slane %v9642_v28, 9 }
 0x3f0   :  { %14981 = vmatprep.subr.bf16.mxu0 %v14980_v36  ;;  %v10479_v11 = vsel %vm1190_vm2, %v23834_v60, %v10478_v50  ;;  %v8367_v1 = vpop.f32.mrb[62].mxu0  ;;  %v10659_v20 = vrot.slane %v10128_v4, %v26741_v41  ;;  %v10699_v60 = vsel %vm10461_vm7, %v24156_v15, %v23997_v3  ;;  %v14409_v45 = vrot.slane %v9643_v25, 9  ;;  %v27001_v50 = vld [vmem:[#allocation64_spill] sm:$0xff] }
 0x3f1   :  { %v10131_v54 = vmax.f32 %v9641_v33, %v14407_v14  ;;  %v24263_v44 = vrot.slane %v10130_v0, %v26741_v41  ;;  %v24273_v39 = vsel %vm10464_vm11, %v26962_v13, %v10479_v11  ;;  %v7733_v13 = vsel %vm27000_vm10, %v7683_v19, %v24178_v46  ;;  %v14868_v7 = vpop.f32.mrb[63].mxu0  ;;  %v27022_v15 = vld [vmem:[#allocation68_spill] sm:$0xff] }
 0x3f2   :  { %v24257_v16 = vpop.permute.xlu1 %4827  ;;  %v10132_v2 = vmax.f32 %v9642_v28, %v14408_v35  ;;  %v7783_v46 = vsel %vm7738_vm12, %v7733_v13, %v24192_v29  ;;  %v10700_v52 = vsel %vm1190_vm2, %v24165_v24, %v10699_v60  ;;  %v9062_v14 = vcombine.high %v9054_v6, %v9054_v6 }
 0x3f3   :  { %14983 = vmatpush3.bf16.msra.mxu0 %v14982_v59  ;;  %26998 = vst [vmem:[#allocation77_spill] sm:$0xff] %v24263_v44  ;;  %v24265_v36 = vpop.permute.xlu0 %3851  ;;  %v24276_v27 = vrot.slane %v10131_v54, %v26741_v41  ;;  %v10588_v0 = vsel %vm25845_vm3, %v24263_v44, %v24187_v8  ;;  %v8368_v59 = vadd.f32 %v24117_v49, %v8367_v1 }
 0x3f4   :  { %v7635_v4 = vsel %vm7588_vm9, %v27001_v50, %v24138_v48  ;;  %v10133_v28 = vmax.f32 %v9643_v25, %v14409_v45  ;;  %v24312_v29 = vrot.slane %v10132_v2, %v26741_v41  ;;  %v7833_v24 = vsel %vm7788_vm13, %v7783_v46, %v6706_v53 }
 0x3f5   :  { %v24290_v33 = vsel %vm25844_vm6, %v24276_v27, %v10588_v0  ;;  %v10945_v8 = vsel %vm10458_vm5, %v24276_v27, %v24173_v26  ;;  %v24295_v56 = vmax.f32 %v8368_v59, 0.0  ;;  %v10701_v26 = vsel %vm10464_vm11, %v10659_v20, %v10700_v52 }
 0x3f6   :  { %v6982_v63 = vpop.permute.xlu1 %6981  ;;  %v24309_v19 = vsel %vm25845_vm3, %v24276_v27, %v10701_v26  ;;  %v7685_v48 = vsel %vm26999_vm4, %v7635_v4, %v24146_v21  ;;  %v24319_v25 = vrot.slane %v10133_v28, %v26741_v41  ;;  %v10946_v2 = vsel %vm1188_vm1, %v24312_v29, %v10945_v8  ;;  %v27003_v26 = vld [vmem:[#allocation37_spill] sm:$0xff]  ;;  %v27004_v28 = vld [vmem:[#allocation51_spill] sm:$0xff] }
 0x3f7   :  { %v6710_v10 = vpop.permute.xlu0 %6709  ;;  %v9088_v54 = vrot.slane %v24295_v56, %v16028_v5  ;;  %27002 = vst [vmem:[#allocation59_spill] sm:$0xff] %v24309_v19  ;;  %v7883_v13 = vsel %vm7838_vm14, %v7833_v24, %v6982_v63  ;;  %v7735_v59 = vsel %vm27000_vm10, %v7685_v48, %v24207_v61  ;;  %v2823_v24 = vcombine.low %v27004_v28, %v27003_v26 }
 0x3f8   :  { %v10947_v63 = vsel %vm10461_vm7, %v24319_v25, %v10946_v2  ;;  %vm27005_vm4 = vcmask 146432   ;;  %v10204_v2 = vld [vmem:[#allocation7 + $0x108] sm:$0xff]  ;;  %vm27008_vm10 = vcmask 31744   ;;  %vm27010_vm6 = vcmask 146432  }
 0x3f9   :  { %v9096_v6 = vcombine.high %v9088_v54, %v9088_v54  ;;  %v9644_v35 = vmax.f32 %v9062_v14, %v9088_v54  ;;  %v7785_v14 = vsel %vm7738_vm12, %v7735_v59, %v24252_v40  ;;  %v27007_v59 = vld [vmem:[#allocation76_spill] sm:$0xff]  ;;  %vm27011_vm3 = vmmov %vm27008_vm10 }
 0x3fa   :  { %v5296_v3 = vpop.permute.xlu1 %5295 }
 0x3fb   :  { %v4832_v11 = vpop.permute.xlu0 %4831  ;;  %v9645_v0 = vmax.f32 %v24144_v58, %v9096_v6  ;;  %v14410_v60 = vrot.slane %v9644_v35, 9  ;;  %v7835_v6 = vsel %vm7788_vm13, %v7785_v14, %v6710_v10 }
 0x3fd   :  { %v14411_v7 = vrot.slane %v9645_v0, 9  ;;  %v10134_v53 = vmax.f32 %v9644_v35, %v14410_v60  ;;  %v7634_v60 = vsel %vm7588_vm9, %v2823_v24, %v24220_v62  ;;  %v14405_v62 = vrot.slane %v24170_v51, 9 }
 0x3fe   :  { %v7290_v1 = vpop.permute.xlu1 %7289  ;;  %v7684_v14 = vsel %vm27008_vm10, %v7634_v60, %v24257_v16 }
 0x3ff   :  { %v6986_v20 = vpop.permute.xlu0 %6985  ;;  %v10135_v46 = vmax.f32 %v9645_v0, %v14411_v7  ;;  %v24327_v21 = vrot.slane %v10134_v53, %v26741_v41  ;;  %v7933_v58 = vsel %vm7888_vm15, %v7883_v13, %v7290_v1  ;;  %v8372_v54 = vpop.f32.mrb[64].mxu0  ;;  %v27006_v13 = vld [vmem:[#allocation35_spill] sm:$0xff] }
 0x400   :  { %v14871_v40 = vpop.f32.mrb[65].mxu0  ;;  %v7885_v0 = vsel %vm7838_vm14, %v7835_v6, %v6986_v20  ;;  %v2857_v10 = vcombine.low %v27007_v59, %v27006_v13  ;;  %v10203_v53 = vld [vmem:[#allocation7 + $0x100] sm:$0xff] }
 0x401   :  { %v24335_v61 = vrot.slane %v10135_v46, %v26741_v41  ;;  %v10948_v8 = vsel %vm1190_vm2, %v24327_v21, %v10947_v63  ;;  %v14985_v63 = vpack.c.bf16 %v10204_v2, %v10203_v53  ;;  %v10129_v40 = vmax.f32 %v24170_v51, %v14405_v62 }
 0x402   :  { %v6276_v45 = vpop.permute.xlu1 %6275 }
 0x403   :  { %v5300_v52 = vpop.permute.xlu0 %5299  ;;  %v24346_v1 = vsel %vm10464_vm11, %v24335_v61, %v10948_v8  ;;  %v10205_v8 = vld [vmem:[#allocation7 + $0x110] sm:$0xff]  ;;  %v24377_v51 = vrot.slane %v10129_v40, %v26741_v41 }
 0x405   :  { %27014 = vst [vmem:[#allocation52_spill] sm:$0xff] %v24377_v51 }
 0x406   :  { %v7530_v50 = vpop.permute.xlu1 %7529 }
 0x407   :  { %v7983_v4 = vsel %vm7938_vm0, %v7933_v58, %v7530_v50  ;;  %v7294_v35 = vpop.permute.xlu0 %7293  ;;  %v7636_v50 = vsel %vm7588_vm9, %v2857_v10, %v24265_v36 }
 0x408   :  { %14906 = vmatmul.mubr.msk.f32.gmra.mrb[88].mxu0 %vm27005_vm4, %v7983_v4  ;;  %v7935_v46 = vsel %vm7888_vm15, %v7885_v0, %v7294_v35  ;;  %v10206_v4 = vld [vmem:[#allocation7 + $0x118] sm:$0xff]  ;;  %vm27009_vm4 = vcmask 48128   ;;  %v7686_v6 = vsel %vm27011_vm3, %v7636_v50, %v4832_v11  ;;  %v27012_v35 = vmov 0.0|0.0   ;;  %v27015_v50 = vld [vmem:[#allocation75_spill] sm:$0xff] }
 0x409   :  { %14908 = vmatprep.mubr.msk.f32.mxu0 %vm15888_vm8, %v25931_v42  ;;  %v7734_v28 = vsel %vm27009_vm4, %v7684_v14, %v5296_v3  ;;  %v14988_v16 = vpack.c.bf16 %v10206_v4, %v10205_v8  ;;  %v9081_v3 = vcombine.high %v24295_v56, %v24295_v56  ;;  %vm27013_vm10 = vmmov %vm27009_vm4  ;;  %v8373_v11 = vadd.f32 %v24117_v49, %v8372_v54 }
 0x40a   :  { %v6708_v48 = vpop.permute.xlu1 %6707  ;;  %v7784_v0 = vsel %vm7738_vm12, %v7734_v28, %v6276_v45  ;;  %v7736_v60 = vsel %vm27013_vm10, %v7686_v6, %v5300_v52  ;;  %v27018_v28 = vld [vmem:[#allocation54_spill] sm:$0xff]  ;;  %vm27027_vm10 = vcmask 1046534  }
 0x40b   :  { %v6280_v7 = vpop.permute.xlu0 %6279  ;;  %v7834_v10 = vsel %vm7788_vm13, %v7784_v0, %v6708_v48  ;;  %v9095_v56 = vrot.slane %v9081_v3, %v16028_v5 }
 0x40c   :  { %v7786_v45 = vsel %vm7738_vm12, %v7736_v60, %v6280_v7  ;;  %v27017_v7 = vld [vmem:[#allocation55_spill] sm:$0xff] }
 0x40d   :  { %v10469_v6 = vsel %vm10458_vm5, %v27018_v28, %v27017_v7  ;;  %v9097_v40 = vcombine.high %v9095_v56, %v9095_v56 }
 0x40e   :  { %v6712_v58 = vpop.permute.xlu1 %6711 }
 0x40f   :  { %v7534_v20 = vpop.permute.xlu0 %7533  ;;  %v7836_v8 = vsel %vm7788_vm13, %v7786_v45, %v6712_v58  ;;  %v11183_v58 = vsel %vm10458_vm5, %v26922_v38, %v26920_v9 }
 0x410   :  { %v7985_v26 = vsel %vm7938_vm0, %v7935_v46, %v7534_v20  ;;  %v8377_v59 = vpop.f32.mrb[66].mxu0  ;;  %v27016_v20 = vld [vmem:[#allocation26_spill] sm:$0xff] }
 0x411   :  { %14912 = vmatmul.mubr.msk.f32.vlgmr.msra.gmra.mrb[0].mxu1 %vm27010_vm6, %v7985_v26  ;;  %v8378_v2 = vadd.f32 %v24117_v49, %v8377_v59  ;;  %v14874_v46 = vpop.f32.mrb[67].mxu0  ;;  %v10864_v48 = vsel %vm10458_vm5, %v27016_v20, %v27015_v50  ;;  %v27020_v59 = vld [vmem:[#allocation60_spill] sm:$0xff] }
 0x412   :  { %v3854_v24 = vpop.permute.xlu1 %3853  ;;  %14914 = vmatprep.mubr.msk.f32.mxu1 %vm15888_vm8, %v25931_v42  ;;  %14986 = vmatpush3.bf16.msra.mxu1 %v14985_v63  ;;  %v24381_v63 = vmax.f32 %v8373_v11, 0.0 }
 0x413   :  { %v6984_v36 = vpop.permute.xlu0 %6983  ;;  %14987 = vmatprep.subr.bf16.mxu1 %v27012_v35  ;;  %v8489_v14 = vmax.f32 %v8378_v2, 0.0 }
 0x414   :  { %v7884_v54 = vsel %vm7838_vm14, %v7834_v10, %v6984_v36  ;;  %v27019_v36 = vld [vmem:[#allocation29_spill] sm:$0xff]  ;;  %v14397_v10 = vrot.slane %v27020_v59, 9 }
 0x415   :  { %v9115_v4 = vcombine.high %v8489_v14, %v8489_v14  ;;  %v24389_v62 = vrot.slane %v8489_v14, %v16028_v5  ;;  %v7637_v35 = vsel %vm7588_vm9, %v27019_v36, %v3854_v24  ;;  %v24411_v24 = vrot.slane %v24381_v63, %v16028_v5  ;;  %vm27023_vm9 = vmmov %vm27010_vm6 }
 0x416   :  { %v7292_v13 = vpop.permute.xlu1 %7291  ;;  %14989 = vmatpush3.bf16.msra.mxu1 %v14988_v16  ;;  %v10811_v16 = vsel %vm10458_vm5, %v24377_v51, %v26981_v47  ;;  %v27021_v51 = vld [vmem:[#allocation63_spill] sm:$0xff]  ;;  %vm27024_vm6 = vmmov %vm27009_vm4 }
 0x417   :  { %v6988_v53 = vpop.permute.xlu0 %6987  ;;  %v7934_v0 = vsel %vm7888_vm15, %v7884_v54, %v7292_v13  ;;  %v9129_v3 = vrot.slane %v9115_v4, %v16028_v5  ;;  %v9130_v60 = vcombine.high %v24389_v62, %v24389_v62  ;;  %v10812_v2 = vsel %vm1188_vm1, %v24263_v44, %v10811_v16  ;;  %vm27026_vm4 = vmmov %vm27023_vm9 }
 0x418   :  { %v7886_v46 = vsel %vm7838_vm14, %v7836_v8, %v6988_v53  ;;  %v10463_v19 = vsel %vm1190_vm2, %v27022_v15, %v27021_v51  ;;  %v11184_v16 = vsel %vm1188_vm1, %v26923_v18, %v11183_v58  ;;  %v10865_v44 = vsel %vm1188_vm1, %v27017_v7, %v10864_v48  ;;  %v27025_v58 = vld [vmem:[#allocation86_spill] sm:$0xff] }
 0x419   :  { %v9131_v45 = vcombine.high %v9129_v3, %v9129_v3  ;;  %v9646_v14 = vmax.f32 %v9095_v56, %v9130_v60  ;;  %v24414_v13 = vmax.f32 %v9097_v40, %v9129_v3  ;;  %v10470_v15 = vsel %vm1188_vm1, %v26917_v34, %v10469_v6 }
 0x41a   :  { %v7296_v52 = vpop.permute.xlu1 %7295  ;;  %v10465_v40 = vsel %vm10464_vm11, %v27025_v58, %v10463_v19  ;;  %v11185_v48 = vsel %vm10461_vm7, %v26948_v31, %v11184_v16  ;;  %v11191_v3 = vsel %vm1188_vm1, %v26949_v12, %v24151_v17  ;;  %v10866_v34 = vsel %vm10461_vm7, %v27018_v28, %v10865_v44 }
 0x41b   :  { %v4834_v26 = vpop.permute.xlu0 %4833  ;;  %v9648_v53 = vmax.f32 %v24411_v24, %v9131_v45  ;;  %v14412_v56 = vrot.slane %v9646_v14, 9  ;;  %v7936_v8 = vsel %vm7888_vm15, %v7886_v46, %v7296_v52  ;;  %v10490_v52 = vsel %vm10458_vm5, %v24312_v29, %v24276_v27  ;;  %v27028_v45 = vld [vmem:[#allocation27_spill] sm:$0xff] }
 0x41c   :  { %v7687_v54 = vsel %vm27011_vm3, %v7637_v35, %v4834_v26  ;;  %v10813_v35 = vsel %vm10461_vm7, %v24276_v27, %v10812_v2  ;;  %v24446_v6 = vmax.f32 %v27020_v59, %v14397_v10  ;;  %v9098_v19 = vcombine.high %v24381_v63, %v24381_v63  ;;  %vm27030_vm3 = vmmov %vm27027_vm10 }
 0x41d   :  { %v10136_v7 = vmax.f32 %v9646_v14, %v14412_v56  ;;  %v10814_v60 = vsel %vm1190_vm2, %v24312_v29, %v10813_v35  ;;  %v10466_v44 = vsel %vm27027_vm10, %v27015_v50, %v10465_v40  ;;  %v11186_v28 = vsel %vm1190_vm2, %v26974_v43, %v11185_v48  ;;  %v27031_v48 = vld [vmem:[#allocation57_spill] sm:$0xff] }
 0x41e   :  { %v5302_v11 = vpop.permute.xlu1 %5301  ;;  %v10491_v63 = vsel %vm1188_vm1, %v24319_v25, %v10490_v52  ;;  %v11187_v10 = vsel %vm10464_vm11, %v26935_v30, %v11186_v28  ;;  %v11192_v46 = vsel %vm10461_vm7, %v26964_v23, %v11191_v3  ;;  %v10867_v14 = vsel %vm1190_vm2, %v27028_v45, %v10866_v34  ;;  %v27036_v45 = vld [vmem:[#allocation39_spill] sm:$0xff] }
 0x41f   :  { %v7532_v4 = vpop.permute.xlu0 %7531  ;;  %v7737_v51 = vsel %vm27024_vm6, %v7687_v54, %v5302_v11  ;;  %v24454_v11 = vrot.slane %v10136_v7, %v26741_v41  ;;  %v10815_v30 = vsel %vm10464_vm11, %v24319_v25, %v10814_v60  ;;  %v9112_v16 = vrot.slane %v9098_v19, %v16028_v5 }
 0x420   :  { %v7984_v36 = vsel %vm7938_vm0, %v7934_v0, %v7532_v4  ;;  %v8382_v59 = vpop.f32.mrb[68].mxu0  ;;  %v14414_v56 = vrot.slane %v9648_v53, 9  ;;  %v11188_v40 = vsel %vm27030_vm3, %v26937_v57, %v11187_v10  ;;  %v11193_v7 = vsel %vm1190_vm2, %v27031_v48, %v11192_v46 }
 0x421   :  { %14909 = vmatmul.mubr.msk.f32.gmra.mrb[90].mxu0 %vm27023_vm9, %v7984_v36  ;;  %v24474_v50 = vsel %vm10461_vm7, %v24454_v11, %v10491_v63  ;;  %v8383_v54 = vadd.f32 %v24117_v49, %v8382_v59  ;;  %v14877_v4 = vpop.f32.mrb[69].mxu0  ;;  %v10868_v36 = vsel %vm10464_vm11, %v26918_v55, %v10867_v14  ;;  %vm27032_vm9 = vcmask 1047559  }
 0x422   :  { %v6282_v26 = vpop.permute.xlu1 %6281  ;;  %v10468_v52 = vsel %vm27032_vm9, %v27016_v20, %v10466_v44  ;;  %vm11226_vm6 = vcmask 261120   ;;  %v9113_v19 = vcombine.high %v24411_v24, %v24411_v24  ;;  %v10138_v28 = vmax.f32 %v9648_v53, %v14414_v56 }
 0x423   :  { %v7536_v0 = vpop.permute.xlu0 %7535  ;;  %v7787_v2 = vsel %vm7738_vm12, %v7737_v51, %v6282_v26  ;;  %vm27029_vm12 = vmmov %vm27027_vm10  ;;  %v8490_v35 = vmax.f32 %v8383_v54, 0.0 }
 0x424   :  { %v7986_v31 = vsel %vm7938_vm0, %v7936_v8, %v7536_v0  ;;  %v24485_v26 = vsel %vm27029_vm12, %v24454_v11, %v10815_v30  ;;  %v27033_v0 = vld [vmem:[#allocation87_spill] sm:$0xff]  ;;  %vm27037_vm10 = vmmov %vm27030_vm3 }
 0x425   :  { %14915 = vmatmul.mubr.msk.f32.gmra.mrb[2].mxu1 %vm27026_vm4, %v7986_v31  ;;  %v11194_v3 = vsel %vm10464_vm11, %v27033_v0, %v11193_v7  ;;  %v9132_v31 = vcombine.high %v8490_v35, %v8490_v35  ;;  %v9139_v60 = vrot.slane %v8490_v35, %v16028_v5  ;;  %vm27038_vm12 = vmmov %vm27032_vm9 }
 0x426   :  { %v6990_v17 = vpop.permute.xlu1 %6989  ;;  %14917 = vmatprep.mubr.msk.f32.mxu1 %vm15888_vm8, %v25931_v42  ;;  %v11195_v14 = vsel %vm27037_vm10, %v27036_v45, %v11194_v3  ;;  %v11178_v45 = vrot.slane %v24446_v6, %v26741_v41 }
 0x427   :  { %v9146_v63 = vrot.slane %v9132_v31, %v16028_v5  ;;  %v9147_v59 = vcombine.high %v9139_v60, %v9139_v60  ;;  %v9649_v10 = vmax.f32 %v9113_v19, %v9139_v60 }
 0x428   :  { %v6714_v43 = vpop.permute.xlu0 %6713 }
 0x429   :  { %v7837_v8 = vsel %vm7788_vm13, %v7787_v2, %v6714_v43  ;;  %vm27034_vm13 = vmmov %vm27030_vm3  ;;  %v10471_v2 = vsel %vm10461_vm7, %v26918_v55, %v10470_v15  ;;  %vm11234_vm3 = vcmask 523264   ;;  %v9650_v15 = vmax.f32 %v9112_v16, %v9147_v59 }
 0x42a   :  { %v7538_v51 = vpop.permute.xlu1 %7537  ;;  %v7887_v58 = vsel %vm7838_vm14, %v7837_v8, %v6990_v17  ;;  %v10869_v34 = vsel %vm27034_vm13, %v26920_v9, %v10868_v36  ;;  %v9114_v17 = vcombine.high %v9112_v16, %v9112_v16  ;;  %vm27035_vm14 = vmmov %vm27032_vm9  ;;  %v10472_v53 = vsel %vm1190_vm2, %v26920_v9, %v10471_v2 }
 0x42b   :  { %v11189_v44 = vsel %vm27035_vm14, %v26940_v22, %v11188_v40  ;;  %v10870_v55 = vsel %vm27038_vm12, %v26922_v38, %v10869_v34  ;;  %v9148_v22 = vcombine.high %v9146_v63, %v9146_v63  ;;  %v14415_v54 = vrot.slane %v9649_v10, 9 }
 0x42c   :  { %v7298_v57 = vpop.permute.xlu0 %7297  ;;  %v9651_v43 = vmax.f32 %v9114_v17, %v9146_v63  ;;  %v24518_v36 = vrot.slane %v10138_v28, %v26741_v41 }
 0x42d   :  { %v7937_v20 = vsel %vm7888_vm15, %v7887_v58, %v7298_v57  ;;  %v9652_v35 = vmax.f32 %v24389_v62, %v9148_v22  ;;  %v10139_v58 = vmax.f32 %v9649_v10, %v14415_v54  ;;  %vm11242_vm15 = vcmask 785408   ;;  %v27039_v62 = vld [vmem:[#allocation90_spill] sm:$0xff]  ;;  %v27044_v54 = vld [vmem:[#allocation21_spill] sm:$0xff] }
 0x42e   :  { %v7987_v24 = vsel %vm7938_vm0, %v7937_v20, %v7538_v51  ;;  %v14416_v51 = vrot.slane %v9650_v15, 9  ;;  %v14417_v9 = vrot.slane %v9651_v43, 9  ;;  %vm27040_vm0 = vmmov %vm27032_vm9  ;;  %v10704_v20 = vsel %vm10458_vm5, %v24327_v21, %v24319_v25 }
 0x42f   :  { %v15537_v46 = vpop.permute.xlu1 %15536  ;;  %14918 = vmatmul.mubr.msk.f32.gmra.mrb[4].mxu1 %vm27026_vm4, %v7987_v24  ;;  %v14418_v34 = vrot.slane %v9652_v35, 9  ;;  %v24525_v19 = vrot.slane %v10139_v58, %v26741_v41  ;;  %v11196_v60 = vsel %vm27040_vm0, %v27039_v62, %v11195_v14  ;;  %vm27041_vm9 = vmmov %vm27037_vm10  ;;  %v10705_v6 = vsel %vm1188_vm1, %v24335_v61, %v10704_v20 }
 0x430   :  { %14928 = vmatprep.mubr.msk.f32.mxu1 %vm15888_vm8, %v25931_v42  ;;  %v15539_v30 = vunpack.i.h.bf16 %v15537_v46  ;;  %v15538_v40 = vunpack.i.l.bf16 %v15537_v46  ;;  %v10140_v57 = vmax.f32 %v9650_v15, %v14416_v51  ;;  %v10950_v28 = vsel %vm27041_vm9, %v24518_v36, %v24346_v1  ;;  %vm27042_vm13 = vmmov %vm27040_vm0 }
 0x431   :  { %v15532_v4 = vpop.permute.xlu0 %15531  ;;  %v10951_v59 = vsel %vm27042_vm13, %v24525_v19, %v10950_v28  ;;  %v10141_v10 = vmax.f32 %v9651_v43, %v14417_v9  ;;  %v10142_v14 = vmax.f32 %v9652_v35, %v14418_v34  ;;  %vm27043_vm14 = vmmov %vm27041_vm9 }
 0x432   :  { %v15534_v56 = vunpack.i.h.bf16 %v15532_v4  ;;  %v15533_v8 = vunpack.i.l.bf16 %v15532_v4  ;;  %v8387_v24 = vpop.f32.mrb[70].mxu0  ;;  %v15575_v1 = vpack.i.bf16 %v24290_v33, %v10951_v59  ;;  %vm27045_vm4 = vmmov %vm27040_vm0 }
 0x433   :  { %14929 = vmatmul.mubr.msk.f32.vlgmr.msra.gmra.mrb[6].mxu1 %vm11226_vm6, %v11189_v44  ;;  %v15547_v7 = vpop.permute.xlu1 %15546  ;;  %v24576_v9 = vrot.slane %v10142_v14, %v26741_v41  ;;  %vm27046_vm10 = vmmov %vm27041_vm9  ;;  %v27049_v14 = vld [vmem:[#allocation61_spill] sm:$0xff] }
 0x434   :  { %v11227_v16 = vsel %vm11226_vm6, %v10468_v52, %v15534_v56  ;;  %v11250_v3 = vsel %vm11226_vm6, %v10870_v55, %v15533_v8  ;;  %14931 = vmatprep.mubr.msk.f32.mxu1 %vm15888_vm8, %v25931_v42  ;;  %v10473_v52 = vsel %vm10464_vm11, %v26922_v38, %v10472_v53  ;;  %v14880_v55 = vpop.f32.mrb[71].mxu0  ;;  %v24552_v53 = vrot.slane %v10140_v57, %v26741_v41  ;;  %vm27048_vm12 = vmmov %vm27040_vm0 }
 0x435   :  { %v15542_v31 = vpop.permute.xlu0 %15541  ;;  %v11257_v44 = vsel %vm11234_vm3, %v11250_v3, %v15538_v40  ;;  %v11235_v63 = vsel %vm11234_vm3, %v11227_v16, %v15539_v30  ;;  %v15549_v22 = vunpack.i.h.bf16 %v15547_v7  ;;  %v15548_v15 = vunpack.i.l.bf16 %v15547_v7  ;;  %15576 = vrot.lane.b32.xlu1 %v15575_v1, %s15890_s12  ;;  %vm27050_vm0 = vmmov %vm27041_vm9 }
 0x436   :  { %v15544_v2 = vunpack.i.h.bf16 %v15542_v31  ;;  %v15543_v17 = vunpack.i.l.bf16 %v15542_v31  ;;  %v10474_v33 = vsel %vm27043_vm14, %v26923_v18, %v10473_v52  ;;  %v10878_v30 = vsel %vm10458_vm5, %v26964_v23, %v26949_v12  ;;  %vm27051_vm9 = vmmov %vm27050_vm0 }
 0x437   :  { %14932 = vmatmul.mubr.msk.f32.gmra.mrb[8].mxu1 %vm11226_vm6, %v11196_v60  ;;  %v10475_v4 = vsel %vm27045_vm4, %v27044_v54, %v10474_v33  ;;  %v11204_v56 = vsel %vm10458_vm5, %v24518_v36, %v11178_v45  ;;  %v24567_v8 = vrot.slane %v10141_v10, %v26741_v41  ;;  %v10706_v16 = vsel %vm10461_vm7, %v24518_v36, %v10705_v6  ;;  %vm27052_vm13 = vmmov %vm27045_vm4 }
 0x438   :  { %v11264_v38 = vsel %vm11242_vm15, %v11257_v44, %v15543_v17  ;;  %v11243_v46 = vsel %vm11242_vm15, %v11235_v63, %v15544_v2  ;;  %14934 = vmatprep.mubr.msk.f32.mxu1 %vm15888_vm8, %v25931_v42  ;;  %v11205_v18 = vsel %vm1188_vm1, %v24525_v19, %v11204_v56  ;;  %v11251_v7 = vsel %vm11226_vm6, %v24237_v37, %v15548_v15  ;;  %v27047_v63 = vld [vmem:[#allocation89_spill] sm:$0xff]  ;;  %vm27053_vm14 = vmmov %vm27045_vm4 }
 0x439   :  { %11355 = vmatprep.mubr.f32.mxu0 %v11264_v38  ;;  %v15557_v43 = vpop.permute.xlu1 %15556  ;;  %v11228_v3 = vsel %vm11226_vm6, %v10475_v4, %v15549_v22  ;;  %v10707_v34 = vsel %vm1190_vm2, %v24525_v19, %v10706_v16  ;;  %v10879_v37 = vsel %vm1188_vm1, %v27031_v48, %v10878_v30  ;;  %v10481_v55 = vsel %vm27051_vm9, %v26949_v12, %v24273_v39  ;;  %vm27059_vm9 = vmmov %vm27050_vm0 }
 0x43a   :  { %11356 = vmatmul.mubr.f32.vlgmr.msra.gmra.mrb[92].mxu0 %v11243_v46  ;;  %v15559_v35 = vunpack.i.h.bf16 %v15557_v43  ;;  %v15558_v51 = vunpack.i.l.bf16 %v15557_v43  ;;  %v10708_v28 = vsel %vm10464_vm11, %v24552_v53, %v10707_v34  ;;  %v10880_v20 = vsel %vm10461_vm7, %v27033_v0, %v10879_v37  ;;  %v27054_v37 = vld [vmem:[#allocation31_spill] sm:$0xff] }
 0x43b   :  { %14935 = vmatmul.mubr.msk.f32.gmra.mrb[10].mxu1 %vm11226_vm6, %v24230_v32  ;;  %v11206_v32 = vsel %vm10461_vm7, %v24552_v53, %v11205_v18  ;;  %v10709_v44 = vsel %vm27046_vm10, %v24567_v8, %v10708_v28  ;;  %v10881_v59 = vsel %vm1190_vm2, %v27047_v63, %v10880_v20  ;;  %v8388_v15 = vadd.f32 %v24117_v49, %v8387_v24  ;;  %v27055_v63 = vld [vmem:[#allocation43_spill] sm:$0xff]  ;;  %vm27057_vm10 = vmmov %vm27050_vm0 }
 0x43c   :  { %v15552_v58 = vpop.permute.xlu0 %15551  ;;  %14937 = vmatprep.mubr.msk.f32.mxu1 %vm15888_vm8, %v25931_v42  ;;  %v11207_v2 = vsel %vm1190_vm2, %v24567_v8, %v11206_v32  ;;  %v24609_v48 = vsel %vm27048_vm12, %v24576_v9, %v10709_v44  ;;  %v10882_v38 = vsel %vm10464_vm11, %v27039_v62, %v10881_v59  ;;  %v10482_v4 = vsel %vm27053_vm14, %v26964_v23, %v10481_v55  ;;  %vm27058_vm12 = vmmov %vm27045_vm4 }
 0x43d   :  { %v15554_v61 = vunpack.i.h.bf16 %v15552_v58  ;;  %v15553_v40 = vunpack.i.l.bf16 %v15552_v58  ;;  %v24597_v17 = vsel %vm10464_vm11, %v24576_v9, %v11207_v2  ;;  %v10883_v0 = vsel %vm27050_vm0, %v27049_v14, %v10882_v38  ;;  %vm27061_vm14 = vmmov %vm27045_vm4 }
 0x43e   :  { %v10884_v62 = vsel %vm27052_vm13, %v26981_v47, %v10883_v0  ;;  %v8491_v39 = vmax.f32 %v8388_v15, 0.0  ;;  %v11058_v28 = vsel %vm10458_vm5, %v24454_v11, %v27054_v37  ;;  %vm27060_vm13 = vmmov %vm27045_vm4 }
 0x43f   :  { %v11258_v31 = vsel %vm11234_vm3, %v11251_v7, %v15553_v40  ;;  %v11236_v60 = vsel %vm11234_vm3, %v11228_v3, %v15554_v61  ;;  %v14413_v40 = vrot.slane %v24414_v13, 9 }
 0x440   :  { %v11265_v52 = vsel %vm11242_vm15, %v11258_v31, %v15558_v51  ;;  %v11244_v57 = vsel %vm11242_vm15, %v11236_v60, %v15559_v35  ;;  %v9156_v7 = vrot.slane %v8491_v39, %v16028_v5  ;;  %v9149_v60 = vcombine.high %v8491_v39, %v8491_v39 }
 0x441   :  { %11360 = vmatprep.mubr.f32.mxu0 %v11265_v52  ;;  %v10137_v32 = vmax.f32 %v24414_v13, %v14413_v40 }
 0x442   :  { %11361 = vmatmul.mubr.f32.gmra.mrb[94].mxu0 %v11244_v57  ;;  %v8392_v22 = vpop.f32.mrb[72].mxu0  ;;  %v9163_v44 = vrot.slane %v9149_v60, %v16028_v5  ;;  %v9164_v38 = vcombine.high %v9156_v7, %v9156_v7 }
 0x443   :  { %v8393_v43 = vadd.f32 %v24117_v49, %v8392_v22  ;;  %v14883_v33 = vpop.f32.mrb[73].mxu0  ;;  %v24639_v31 = vrot.slane %v10137_v32, %v26741_v41 }
 0x444   :  { %v9165_v11 = vcombine.high %v9163_v44, %v9163_v44 }
 0x445   :  { %v15562_v10 = vpop.permute.xlu0 %15561  ;;  %v8492_v35 = vmax.f32 %v8393_v43, 0.0  ;;  %v11130_v13 = vsel %vm10458_vm5, %v24639_v31, %v27055_v63 }
 0x446   :  { %v15567_v46 = vpop.permute.xlu1 %15566  ;;  %v15564_v1 = vunpack.i.h.bf16 %v15562_v10  ;;  %v15563_v45 = vunpack.i.l.bf16 %v15562_v10  ;;  %v11059_v10 = vsel %vm1188_vm1, %v24639_v31, %v11058_v28 }
 0x447   :  { %v15569_v6 = vunpack.i.h.bf16 %v15567_v46  ;;  %v15568_v54 = vunpack.i.l.bf16 %v15567_v46  ;;  %v9166_v58 = vcombine.high %v8492_v35, %v8492_v35  ;;  %v9173_v43 = vrot.slane %v8492_v35, %v16028_v5 }
 0x448   :  { %v11252_v30 = vsel %vm11226_vm6, %v10884_v62, %v15563_v45  ;;  %v11229_v56 = vsel %vm11226_vm6, %v10482_v4, %v15564_v1  ;;  %v11131_v45 = vsel %vm1188_vm1, %v24518_v36, %v11130_v13  ;;  %v11060_v33 = vsel %vm10461_vm7, %v24518_v36, %v11059_v10 }
 0x449   :  { %v11259_v18 = vsel %vm11234_vm3, %v11252_v30, %v15568_v54  ;;  %v11237_v61 = vsel %vm11234_vm3, %v11229_v56, %v15569_v6  ;;  %v24632_v16 = vrot.slane %v9166_v58, %v16028_v5  ;;  %v11132_v15 = vsel %vm10461_vm7, %v24525_v19, %v11131_v45 }
 0x44a   :  { %v11061_v56 = vsel %vm1190_vm2, %v24525_v19, %v11060_v33  ;;  %v11133_v35 = vsel %vm1190_vm2, %v24552_v53, %v11132_v15 }
 0x44b   :  { %v15572_v12 = vpop.permute.xlu0 %15571  ;;  %v9182_v3 = vcombine.high %v24632_v16, %v24632_v16  ;;  %v11062_v40 = vsel %vm10464_vm11, %v24552_v53, %v11061_v56  ;;  %v11134_v60 = vsel %vm10464_vm11, %v24567_v8, %v11133_v35 }
 0x44c   :  { %v15574_v51 = vunpack.i.h.bf16 %v15572_v12  ;;  %v15573_v24 = vunpack.i.l.bf16 %v15572_v12 }
 0x44d   :  { %v9653_v34 = vmax.f32 %v9156_v7, %v9182_v3 }
 0x44e   :  { %v11266_v47 = vsel %vm11242_vm15, %v11259_v18, %v15573_v24  ;;  %v11245_v23 = vsel %vm11242_vm15, %v11237_v61, %v15574_v51 }
 0x44f   :  { %11365 = vmatprep.mubr.f32.mxu0 %v11266_v47  ;;  %v14419_v20 = vrot.slane %v9653_v34, 9  ;;  %v27056_v47 = vld [vmem:[#allocation59_spill] sm:$0xff] }
 0x450   :  { %11366 = vmatmul.mubr.f32.gmra.mrb[96].mxu0 %v11245_v23  ;;  %v10703_v23 = vsel %vm27045_vm4, %v24312_v29, %v27056_v47 }
 0x451   :  { %v10143_v14 = vmax.f32 %v9653_v34, %v14419_v20 }
 0x452   :  { %v8397_v52 = vpop.f32.mrb[74].mxu0 }
 0x453   :  { %v8398_v57 = vadd.f32 %v24117_v49, %v8397_v52  ;;  %v14886_v2 = vpop.f32.mrb[75].mxu0  ;;  %v24661_v30 = vrot.slane %v10143_v14, %v26741_v41 }
 0x455   :  { %v8493_v59 = vmax.f32 %v8398_v57, 0.0  ;;  %v11063_v7 = vsel %vm27057_vm10, %v24661_v30, %v11062_v40  ;;  %vm27062_vm10 = vmmov %vm27050_vm0 }
 0x457   :  { %v9183_v46 = vcombine.high %v8493_v59, %v8493_v59  ;;  %v9190_v1 = vrot.slane %v8493_v59, %v16028_v5 }
 0x459   :  { %v9197_v0 = vrot.slane %v9183_v46, %v16028_v5  ;;  %v9198_v55 = vcombine.high %v9190_v1, %v9190_v1  ;;  %v9654_v22 = vmax.f32 %v9164_v38, %v9190_v1  ;;  %v9181_v38 = vcombine.high %v9173_v43, %v9173_v43 }
 0x45b   :  { %v9199_v6 = vcombine.high %v9197_v0, %v9197_v0  ;;  %v9655_v54 = vmax.f32 %v9163_v44, %v9198_v55  ;;  %v9656_v62 = vmax.f32 %v9165_v11, %v9197_v0  ;;  %v14420_v4 = vrot.slane %v9654_v22, 9 }
 0x45c   :  { %v10817_v44 = vsel %vm27060_vm13, %v24639_v31, %v24485_v26  ;;  %v10590_v26 = vsel %vm10458_vm5, %v24319_v25, %v24312_v29  ;;  %vm27066_vm13 = vmmov %vm27062_vm10 }
 0x45d   :  { %v9657_v12 = vmax.f32 %v9173_v43, %v9199_v6  ;;  %v14421_v39 = vrot.slane %v9655_v54, 9  ;;  %v14422_v51 = vrot.slane %v9656_v62, 9  ;;  %v10144_v24 = vmax.f32 %v9654_v22, %v14420_v4 }
 0x45e   :  { %v10591_v1 = vsel %vm1188_vm1, %v24327_v21, %v10590_v26 }
 0x45f   :  { %v10145_v58 = vmax.f32 %v9655_v54, %v14421_v39  ;;  %v10146_v18 = vmax.f32 %v9656_v62, %v14422_v51  ;;  %v24668_v61 = vrot.slane %v10144_v24, %v26741_v41  ;;  %v14423_v13 = vrot.slane %v9657_v12, 9 }
 0x460   :  { %v10592_v55 = vsel %vm10461_vm7, %v24639_v31, %v10591_v1 }
 0x461   :  { %v24678_v3 = vrot.slane %v10145_v58, %v26741_v41  ;;  %v24681_v32 = vrot.slane %v10146_v18, %v26741_v41  ;;  %v11064_v34 = vsel %vm27058_vm12, %v24668_v61, %v11063_v7  ;;  %v11135_v2 = vsel %vm27050_vm0, %v24668_v61, %v11134_v60  ;;  %vm27063_vm12 = vmmov %vm27050_vm0  ;;  %v24747_v7 = vld [vmem:[#allocation5] ss:$0 sm:$0xff] }
 0x462   :  { %v15580_v57 = vpack.i.bf16 %v10703_v23, %v11064_v34  ;;  %v10147_v45 = vmax.f32 %v9657_v12, %v14423_v13  ;;  %v10593_v6 = vsel %vm1190_vm2, %v24518_v36, %v10592_v55  ;;  %vm27064_vm0 = vmmov %vm27045_vm4 }
 0x463   :  { %v11209_v20 = vsel %vm27059_vm9, %v24678_v3, %v24597_v17  ;;  %v11136_v63 = vsel %vm27061_vm14, %v24678_v3, %v11135_v2  ;;  %v10952_v17 = vsel %vm10458_vm5, %v24567_v8, %v24552_v53  ;;  %vm27065_vm9 = vmmov %vm27064_vm0 }
 0x464   :  { %v8402_v52 = vpop.f32.mrb[76].mxu0  ;;  %15581 = vrot.lane.b32.xlu0 %v15580_v57, %s15889_s0  ;;  %v11210_v59 = vsel %vm27045_vm4, %v24681_v32, %v11209_v20  ;;  %v15585_v10 = vpack.i.bf16 %v10817_v44, %v11136_v63  ;;  %v10953_v0 = vsel %vm1188_vm1, %v24576_v9, %v10952_v17  ;;  %v24722_v33 = vrot.slane %v10147_v45, %v26741_v41  ;;  %vm27067_vm14 = vmmov %vm27062_vm10 }
 0x465   :  { %v8403_v37 = vadd.f32 %v24117_v49, %v8402_v52  ;;  %v14889_v28 = vpop.f32.mrb[77].mxu0  ;;  %14938 = vmatmul.mubr.msk.f32.gmra.mrb[12].mxu1 %vm11226_vm6, %v11210_v59  ;;  %v10954_v22 = vsel %vm10461_vm7, %v24678_v3, %v10953_v0  ;;  %v10594_v9 = vsel %vm10464_vm11, %v24525_v19, %v10593_v6  ;;  %v10711_v0 = vsel %vm10458_vm5, %v24681_v32, %v24678_v3  ;;  %vm27068_vm4 = vmmov %vm27064_vm0 }
 0x466   :  { %15586 = vrot.lane.b32.xlu1 %v15585_v10, %s15891_s3  ;;  %14940 = vmatprep.mubr.msk.f32.mxu1 %vm15888_vm8, %v25931_v42  ;;  %v10955_v4 = vsel %vm1190_vm2, %v24681_v32, %v10954_v22 }
 0x467   :  { %v8494_v49 = vmax.f32 %v8403_v37, 0.0  ;;  %v10956_v39 = vsel %vm10464_vm11, %v24722_v33, %v10955_v4 }
 0x469   :  { %v9207_v46 = vrot.slane %v8494_v49, %v16028_v5  ;;  %v9200_v23 = vcombine.high %v8494_v49, %v8494_v49 }
 0x46b   :  { %v9215_v14 = vcombine.high %v9207_v46, %v9207_v46  ;;  %v9658_v11 = vmax.f32 %v9181_v38, %v9207_v46  ;;  %v9214_v2 = vrot.slane %v9200_v23, %v16028_v5 }
 0x46d   :  { %v9659_v15 = vmax.f32 %v24632_v16, %v9215_v14  ;;  %v14424_v43 = vrot.slane %v9658_v11, 9  ;;  %v10595_v16 = vsel %vm27062_vm10, %v24552_v53, %v10594_v9  ;;  %v9216_v63 = vcombine.high %v9214_v2, %v9214_v2 }
 0x46e   :  { %v10596_v18 = vsel %vm27064_vm0, %v24567_v8, %v10595_v16 }
 0x46f   :  { %v14425_v54 = vrot.slane %v9659_v15, 9  ;;  %v10148_v62 = vmax.f32 %v9658_v11, %v14424_v43  ;;  %v10818_v11 = vsel %vm10458_vm5, %v24525_v19, %v24518_v36 }
 0x470   :  { %v10819_v9 = vsel %vm1188_vm1, %v24552_v53, %v10818_v11 }
 0x471   :  { %v10149_v56 = vmax.f32 %v9659_v15, %v14425_v54  ;;  %v24731_v12 = vrot.slane %v10148_v62, %v26741_v41 }
 0x472   :  { %v8407_v35 = vpop.f32.mrb[78].mxu0 }
 0x473   :  { %v24738_v51 = vrot.slane %v10149_v56, %v26741_v41  ;;  %v10957_v24 = vsel %vm27063_vm12, %v24731_v12, %v10956_v39  ;;  %v14892_v58 = vpop.f32.mrb[79].mxu0  ;;  %v8408_v34 = vadd.f32 %v24747_v7, %v8407_v35  ;;  %v10820_v56 = vsel %vm10461_vm7, %v24661_v30, %v10819_v9  ;;  %vm27069_vm12 = vmmov %vm27062_vm10 }
 0x474   :  { %v10712_v39 = vsel %vm1188_vm1, %v24722_v33, %v10711_v0 }
 0x475   :  { %v10958_v40 = vsel %vm27065_vm9, %v24738_v51, %v10957_v24  ;;  %v8495_v28 = vmax.f32 %v8408_v34, 0.0  ;;  %vm27070_vm9 = vmmov %vm27064_vm0 }
 0x476   :  { %v15590_v47 = vpack.i.bf16 %v10596_v18, %v10958_v40 }
 0x477   :  { %v9217_v10 = vcombine.high %v8495_v28, %v8495_v28  ;;  %v9224_v49 = vrot.slane %v8495_v28, %v16028_v5 }
 0x478   :  { %15591 = vrot.lane.b32.xlu0 %v15590_v47, %s15890_s12  ;;  %v11137_v47 = vsel %vm10458_vm5, %v24722_v33, %v24681_v32 }
 0x479   :  { %v9231_v15 = vrot.slane %v9217_v10, %v16028_v5  ;;  %v9232_v16 = vcombine.high %v9224_v49, %v9224_v49 }
 0x47b   :  { %v9233_v58 = vcombine.high %v9231_v15, %v9231_v15 }
 0x484   :  { %v8412_v60 = vpop.f32.mrb[80].mxu0 }
 0x485   :  { %v8413_v52 = vadd.f32 %v24747_v7, %v8412_v60  ;;  %v14895_v57 = vpop.f32.mrb[81].mxu0 }
 0x486   :  { %v11211_v57 = vsel %vm10458_vm5, %v24731_v12, %v24722_v33 }
 0x487   :  { %v8496_v37 = vmax.f32 %v8413_v52, 0.0 }
 0x489   :  { %v9234_v20 = vcombine.high %v8496_v37, %v8496_v37  ;;  %v9241_v44 = vrot.slane %v8496_v37, %v16028_v5  ;;  %v11138_v37 = vsel %vm1188_vm1, %v24731_v12, %v11137_v47 }
 0x48b   :  { %v9248_v13 = vrot.slane %v9234_v20, %v16028_v5  ;;  %v9249_v59 = vcombine.high %v9241_v44, %v9241_v44 }
 0x48d   :  { %v9250_v17 = vcombine.high %v9248_v13, %v9248_v13  ;;  %v9660_v26 = vmax.f32 %v9214_v2, %v9249_v59  ;;  %v9661_v38 = vmax.f32 %v9216_v63, %v9248_v13  ;;  %v10821_v2 = vsel %vm1190_vm2, %v24668_v61, %v10820_v56 }
 0x48f   :  { %v9662_v46 = vmax.f32 %v9224_v49, %v9250_v17  ;;  %v14426_v1 = vrot.slane %v9660_v26, 9  ;;  %v14427_v45 = vrot.slane %v9661_v38, 9 }
 0x491   :  { %v8417_v14 = vpop.f32.mrb[82].mxu0  ;;  %v14428_v43 = vrot.slane %v9662_v46, 9  ;;  %v10150_v6 = vmax.f32 %v9660_v26, %v14426_v1  ;;  %v10151_v54 = vmax.f32 %v9661_v38, %v14427_v45  ;;  %v11212_v1 = vsel %vm1188_vm1, %v24738_v51, %v11211_v57 }
 0x492   :  { %v8418_v55 = vadd.f32 %v24747_v7, %v8417_v14  ;;  %v14898_v22 = vpop.f32.mrb[83].mxu0  ;;  %v10822_v45 = vsel %vm10464_vm11, %v24678_v3, %v10821_v2 }
 0x493   :  { %v24766_v4 = vrot.slane %v10150_v6, %v26741_v41  ;;  %v10152_v18 = vmax.f32 %v9662_v46, %v14428_v43  ;;  %v24774_v40 = vrot.slane %v10151_v54, %v26741_v41  ;;  %v10823_v56 = vsel %vm27067_vm14, %v24681_v32, %v10822_v45  ;;  %v27073_v45 = vld [vmem:[#allocation77_spill] sm:$0xff]  ;;  %vm27074_vm14 = vmmov %vm27062_vm10 }
 0x494   :  { %v8497_v62 = vmax.f32 %v8418_v55, 0.0 }
 0x495   :  { %v11065_v23 = vsel %vm10461_vm7, %v24766_v4, %v10712_v39  ;;  %v24790_v59 = vrot.slane %v10152_v18, %v26741_v41  ;;  %v11139_v49 = vsel %vm10461_vm7, %v24774_v40, %v11138_v37 }
 0x496   :  { %v9251_v24 = vcombine.high %v8497_v62, %v8497_v62  ;;  %v9258_v35 = vrot.slane %v8497_v62, %v16028_v5  ;;  %v11066_v10 = vsel %vm1190_vm2, %v24774_v40, %v11065_v23 }
 0x497   :  { %v11067_v22 = vsel %vm10464_vm11, %v24790_v59, %v11066_v10 }
 0x498   :  { %v9265_v34 = vrot.slane %v9251_v24, %v16028_v5  ;;  %v9266_v60 = vcombine.high %v9258_v35, %v9258_v35  ;;  %v9663_v52 = vmax.f32 %v9232_v16, %v9258_v35  ;;  %v10713_v24 = vsel %vm10461_vm7, %v24731_v12, %v10712_v39 }
 0x499   :  { %v24845_v57 = vsel %vm1190_vm2, %v24738_v51, %v10713_v24  ;;  %v27076_v24 = vld [vmem:[#allocation25_spill] sm:$0xff] }
 0x49a   :  { %v9267_v28 = vcombine.high %v9265_v34, %v9265_v34  ;;  %v9664_v20 = vmax.f32 %v9231_v15, %v9266_v60  ;;  %v9665_v63 = vmax.f32 %v9233_v58, %v9265_v34  ;;  %v14429_v13 = vrot.slane %v9663_v52, 9 }
 0x49b   :  { %v11140_v15 = vsel %vm1190_vm2, %v24790_v59, %v11139_v49  ;;  %v10824_v60 = vsel %vm27070_vm9, %v24722_v33, %v10823_v56 }
 0x49c   :  { %v9666_v17 = vmax.f32 %v9241_v44, %v9267_v28  ;;  %v14430_v26 = vrot.slane %v9664_v20, 9  ;;  %v14431_v38 = vrot.slane %v9665_v63, 9  ;;  %v10153_v46 = vmax.f32 %v9663_v52, %v14429_v13 }
 0x49d   :  { %v11213_v44 = vsel %vm10461_vm7, %v24790_v59, %v11212_v1  ;;  %v27072_v1 = vld [vmem:[#allocation28_spill] sm:$0xff] }
 0x49e   :  { %v14432_v14 = vrot.slane %v9666_v17, 9  ;;  %v10154_v11 = vmax.f32 %v9664_v20, %v14430_v26  ;;  %v10155_v0 = vmax.f32 %v9665_v63, %v14431_v38  ;;  %v24801_v55 = vrot.slane %v10153_v46, %v26741_v41 }
 0x4a0   :  { %v24810_v43 = vrot.slane %v10154_v11, %v26741_v41  ;;  %v24813_v6 = vrot.slane %v10155_v0, %v26741_v41  ;;  %v11068_v54 = vsel %vm27066_vm13, %v24801_v55, %v11067_v22  ;;  %v10156_v62 = vmax.f32 %v9666_v17, %v14432_v14  ;;  %vm27071_vm13 = vmmov %vm27064_vm0 }
 0x4a1   :  { %v11214_v9 = vsel %vm1190_vm2, %v24801_v55, %v11213_v44  ;;  %v11141_v16 = vsel %vm10464_vm11, %v24801_v55, %v11140_v15  ;;  %v10885_v14 = vsel %vm10458_vm5, %v27073_v45, %v27072_v1  ;;  %v10959_v1 = vsel %vm10458_vm5, %v24801_v55, %v24790_v59 }
 0x4a2   :  { %v11069_v35 = vsel %vm27068_vm4, %v24810_v43, %v11068_v54  ;;  %v24828_v58 = vrot.slane %v10156_v62, %v26741_v41  ;;  %v11215_v18 = vsel %vm10464_vm11, %v24810_v43, %v11214_v9  ;;  %v11142_v34 = vsel %vm27069_vm12, %v24810_v43, %v11141_v16  ;;  %v27075_v16 = vld [vmem:[#allocation30_spill] sm:$0xff]  ;;  %vm27078_vm4 = vmmov %vm27062_vm10 }
 0x4a3   :  { %v15595_v47 = vpack.i.bf16 %v24609_v48, %v11069_v35  ;;  %v11216_v23 = vsel %vm27062_vm10, %v24813_v6, %v11215_v18  ;;  %v11143_v52 = vsel %vm27071_vm13, %v24813_v6, %v11142_v34  ;;  %v10886_v11 = vsel %vm1188_vm1, %v24276_v27, %v10885_v14  ;;  %v27077_v35 = vld [vmem:[#allocation52_spill] sm:$0xff]  ;;  %vm27079_vm10 = vmmov %vm27064_vm0 }
 0x4a4   :  { %v11217_v39 = vsel %vm27064_vm0, %v24828_v58, %v11216_v23  ;;  %v15600_v48 = vpack.i.bf16 %v10824_v60, %v11143_v52  ;;  %v10887_v0 = vsel %vm10461_vm7, %v24312_v29, %v10886_v11  ;;  %v10487_v27 = vsel %vm10464_vm11, %v27076_v24, %v27075_v16  ;;  %vm27080_vm12 = vmmov %vm27064_vm0 }
 0x4a5   :  { %15596 = vrot.lane.b32.xlu1 %v15595_v47, %s15889_s0  ;;  %14941 = vmatmul.mubr.msk.f32.gmra.mrb[14].mxu1 %vm11226_vm6, %v11217_v39  ;;  %v10888_v44 = vsel %vm1190_vm2, %v24319_v25, %v10887_v0  ;;  %v10488_v29 = vsel %vm27078_vm4, %v27077_v35, %v10487_v27  ;;  %v10597_v23 = vsel %vm10458_vm5, %v24678_v3, %v24668_v61  ;;  %vm27081_vm0 = vmmov %vm27078_vm4 }
 0x4a6   :  { %14943 = vmatprep.mubr.msk.f32.mxu1 %vm15888_vm8, %v25931_v42  ;;  %15601 = vrot.lane.b32.xlu0 %v15600_v48, %s15891_s3  ;;  %v10889_v15 = vsel %vm10464_vm11, %v24327_v21, %v10888_v44  ;;  %v10489_v21 = vsel %vm27080_vm12, %v27073_v45, %v10488_v29  ;;  %v10825_v34 = vsel %vm10458_vm5, %v24774_v40, %v24766_v4  ;;  %vm27082_vm9 = vmmov %vm27081_vm0 }
 0x4a7   :  { %v15577_v22 = vpop.permute.xlu1 %15576  ;;  %v10890_v54 = vsel %vm27074_vm14, %v24639_v31, %v10889_v15  ;;  %v10826_v15 = vsel %vm1188_vm1, %v24790_v59, %v10825_v34  ;;  %v10960_v24 = vsel %vm1188_vm1, %v24810_v43, %v10959_v1  ;;  %vm27083_vm13 = vmmov %vm27081_vm0 }
 0x4a8   :  { %v8422_v2 = vpop.f32.mrb[84].mxu0  ;;  %v15579_v62 = vunpack.i.h.bf16 %v15577_v22  ;;  %v15578_v9 = vunpack.i.l.bf16 %v15577_v22  ;;  %v10891_v25 = vsel %vm27079_vm10, %v24518_v36, %v10890_v54  ;;  %v10827_v35 = vsel %vm10461_vm7, %v24801_v55, %v10826_v15  ;;  %vm27084_vm14 = vmmov %vm27079_vm10 }
 0x4a9   :  { %v14901_v37 = vpop.f32.mrb[85].mxu0  ;;  %v8423_v28 = vadd.f32 %v24747_v7, %v8422_v2  ;;  %vm27085_vm4 = vmmov %vm27079_vm10 }
 0x4aa   :  { %vm27086_vm10 = vmmov %vm27085_vm4 }
 0x4ab   :  { %v8498_v51 = vmax.f32 %v8423_v28, 0.0  ;;  %vm27087_vm12 = vmmov %vm27081_vm0 }
 0x4ad   :  { %v9275_v17 = vrot.slane %v8498_v51, %v16028_v5  ;;  %v9268_v56 = vcombine.high %v8498_v51, %v8498_v51 }
 0x4af   :  { %v9282_v2 = vrot.slane %v9268_v56, %v16028_v5  ;;  %v9283_v45 = vcombine.high %v9275_v17, %v9275_v17 }
 0x4c0   :  { %v8427_v20 = vpop.f32.mrb[86].mxu0 }
 0x4c1   :  { %v8428_v63 = vadd.f32 %v24747_v7, %v8427_v20  ;;  %v14904_v13 = vpop.f32.mrb[87].mxu0  ;;  %v11253_v20 = vsel %vm11226_vm6, %v10891_v25, %v15578_v9  ;;  %v9284_v9 = vcombine.high %v9282_v2, %v9282_v2 }
 0x4c3   :  { %v8499_v10 = vmax.f32 %v8428_v63, 0.0  ;;  %v11230_v63 = vsel %vm11226_vm6, %v10489_v21, %v15579_v62  ;;  %v10598_v62 = vsel %vm1188_vm1, %v24681_v32, %v10597_v23 }
 0x4c4   :  { %v10599_v23 = vsel %vm10461_vm7, %v24722_v33, %v10598_v62 }
 0x4c5   :  { %v9285_v49 = vcombine.high %v8499_v10, %v8499_v10  ;;  %v24908_v27 = vrot.slane %v8499_v10, %v16028_v5 }
 0x4c7   :  { %v24856_v26 = vrot.slane %v9285_v49, %v16028_v5 }
 0x4c9   :  { %v9301_v38 = vcombine.high %v24856_v26, %v24856_v26 }
 0x4cb   :  { %v9667_v46 = vmax.f32 %v9275_v17, %v9301_v38 }
 0x4cd   :  { %v14433_v37 = vrot.slane %v9667_v46, 9 }
 0x4cf   :  { %v10157_v54 = vmax.f32 %v9667_v46, %v14433_v37  ;;  %v10828_v37 = vsel %vm1190_vm2, %v24810_v43, %v10827_v35 }
 0x4d1   :  { %v10773_v25 = vrot.slane %v10157_v54, %v26741_v41 }
 0x4d6   :  { %v15582_v47 = vpop.permute.xlu0 %15581 }
 0x4d7   :  { %v15584_v60 = vunpack.i.h.bf16 %v15582_v47  ;;  %v15583_v52 = vunpack.i.l.bf16 %v15582_v47 }
 0x4d8   :  { %v15587_v28 = vpop.permute.xlu1 %15586 }
 0x4d9   :  { %v15589_v51 = vunpack.i.h.bf16 %v15587_v28  ;;  %v15588_v49 = vunpack.i.l.bf16 %v15587_v28  ;;  %v11260_v38 = vsel %vm11234_vm3, %v11253_v20, %v15583_v52  ;;  %v11238_v14 = vsel %vm11234_vm3, %v11230_v63, %v15584_v60 }
 0x4db   :  { %v8432_v18 = vpop.f32.mrb[88].mxu0  ;;  %v11267_v22 = vsel %vm11242_vm15, %v11260_v38, %v15588_v49  ;;  %v11246_v44 = vsel %vm11242_vm15, %v11238_v14, %v15589_v51  ;;  %v10829_v49 = vsel %vm10464_vm11, %v10773_v25, %v10828_v37 }
 0x4dc   :  { %v8433_v39 = vadd.f32 %v24747_v7, %v8432_v18  ;;  %v14907_v48 = vpop.f32.mrb[89].mxu0  ;;  %11370 = vmatprep.mubr.f32.mxu0 %v11267_v22 }
 0x4dd   :  { %11371 = vmatmul.mubr.f32.gmra.mrb[98].mxu0 %v11246_v44  ;;  %v10961_v48 = vsel %vm10461_vm7, %v24813_v6, %v10960_v24 }
 0x4de   :  { %v8500_v13 = vmax.f32 %v8433_v39, 0.0 }
 0x4e0   :  { %v9302_v11 = vcombine.high %v8500_v13, %v8500_v13  ;;  %v9309_v0 = vrot.slane %v8500_v13, %v16028_v5 }
 0x4e2   :  { %v9316_v17 = vrot.slane %v9302_v11, %v16028_v5  ;;  %v9317_v56 = vcombine.high %v9309_v0, %v9309_v0  ;;  %v9668_v16 = vmax.f32 %v9283_v45, %v9309_v0  ;;  %v10962_v11 = vsel %vm1190_vm2, %v24828_v58, %v10961_v48 }
 0x4e4   :  { %v9318_v46 = vcombine.high %v9316_v17, %v9316_v17  ;;  %v9669_v29 = vmax.f32 %v9282_v2, %v9317_v56  ;;  %v9670_v18 = vmax.f32 %v9284_v9, %v9316_v17  ;;  %v14434_v47 = vrot.slane %v9668_v16, 9  ;;  %v8442_v21 = vpop.f32.mrb[0].mxu1 }
 0x4e5   :  { %v14913_v10 = vpop.f32.mrb[1].mxu1  ;;  %v10600_v2 = vsel %vm1190_vm2, %v24731_v12, %v10599_v23 }
 0x4e6   :  { %v9671_v34 = vmax.f32 %v24908_v27, %v9318_v46  ;;  %v14435_v39 = vrot.slane %v9669_v29, 9  ;;  %v14436_v60 = vrot.slane %v9670_v18, 9  ;;  %v10158_v52 = vmax.f32 %v9668_v16, %v14434_v47 }
 0x4e7   :  { %v10601_v51 = vsel %vm10464_vm11, %v24774_v40, %v10600_v2  ;;  %v15892_v10 = vmov 1966171168  }
 0x4e8   :  { %v14437_v28 = vrot.slane %v9671_v34, 9  ;;  %v10159_v20 = vmax.f32 %v9669_v29, %v14435_v39  ;;  %v10160_v63 = vmax.f32 %v9670_v18, %v14436_v60  ;;  %v24923_v13 = vrot.slane %v10158_v52, %v26741_v41 }
 0x4e9   :  { %v10602_v9 = vsel %vm27082_vm9, %v24790_v59, %v10601_v51  ;;  %v8443_v52 = vadd.f32 %v24747_v7, %v8442_v21  ;;  %v11503_v48 = vunpack.c.l.s4 %v15892_v10  ;;  %v25016_v10 = vsel %vm10458_vm5, %v24813_v6, %v24810_v43 }
 0x4ea   :  { %v10161_v38 = vmax.f32 %v9671_v34, %v14437_v28  ;;  %v24929_v1 = vrot.slane %v10159_v20, %v26741_v41  ;;  %v24932_v45 = vrot.slane %v10160_v63, %v26741_v41  ;;  %v11070_v14 = vsel %vm10458_vm5, %v24923_v13, %v10773_v25 }
 0x4eb   :  { %v10830_v0 = vsel %vm27081_vm0, %v24923_v13, %v10829_v49  ;;  %v10603_v56 = vsel %vm27084_vm14, %v24801_v55, %v10602_v9  ;;  %v10715_v28 = vsel %vm10464_vm11, %v24790_v59, %v24845_v57  ;;  %v9300_v20 = vcombine.high %v24908_v27, %v24908_v27  ;;  %vm27089_vm0 = vmmov %vm27085_vm4 }
 0x4ec   :  { %v24941_v22 = vrot.slane %v10161_v38, %v26741_v41  ;;  %v11071_v44 = vsel %vm1188_vm1, %v24929_v1, %v11070_v14  ;;  %v11144_v15 = vsel %vm10458_vm5, %v24929_v1, %v24923_v13  ;;  %v10963_v54 = vsel %vm10464_vm11, %v24929_v1, %v10962_v11  ;;  %vm27091_vm14 = vmmov %vm27082_vm9 }
 0x4ed   :  { %v11145_v62 = vsel %vm1188_vm1, %v24932_v45, %v11144_v15  ;;  %v10964_v17 = vsel %vm27083_vm13, %v24932_v45, %v10963_v54  ;;  %v11072_v24 = vsel %vm10461_vm7, %v24932_v45, %v11071_v44  ;;  %v24968_v29 = vsel %vm27086_vm10, %v24929_v1, %v10830_v0  ;;  %vm27090_vm13 = vmmov %vm27082_vm9 }
 0x4ee   :  { %v10965_v16 = vsel %vm27085_vm4, %v24941_v22, %v10964_v17  ;;  %v24964_v46 = vsel %vm1190_vm2, %v24941_v22, %v11072_v24  ;;  %v11146_v18 = vsel %vm10461_vm7, %v24941_v22, %v11145_v62  ;;  %v11218_v47 = vsel %vm10458_vm5, %v24932_v45, %v24929_v1  ;;  %vm27092_vm4 = vmmov %vm27089_vm0 }
 0x4ef   :  { %v15605_v35 = vpack.i.bf16 %v10603_v56, %v10965_v16  ;;  %v24978_v25 = vsel %vm10458_vm5, %v24941_v22, %v24932_v45  ;;  %v11219_v23 = vsel %vm1188_vm1, %v24941_v22, %v11218_v47  ;;  %v8502_v14 = vmax.f32 %v8443_v52, 0.0  ;;  %v27088_v16 = vld [vmem:[#allocation19_spill] sm:$0xff]  ;;  %vm27093_vm10 = vmmov %vm27089_vm0 }
 0x4f0   :  { %v11504_v11 = vunpack.c.0.s8 %v11503_v48  ;;  %v10716_v21 = vsel %vm27087_vm12, %v24801_v55, %v10715_v28  ;;  %v10493_v48 = vsel %vm1190_vm2, %v24639_v31, %v24474_v50  ;;  %vm27094_vm12 = vmmov %vm27082_vm9 }
 0x4f1   :  { %15606 = vrot.lane.b32.xlu1 %v15605_v35, %s15890_s12  ;;  %v9336_v17 = vcombine.high %v8502_v14, %v8502_v14  ;;  %v25004_v35 = vsel %vm27089_vm0, %v24810_v43, %v10716_v21 }
 0x4f2   :  { %v25000_v24 = vsub.s32 %v11504_v11, %v27088_v16 }
 0x4f4   :  { %v8437_v34 = vpop.f32.mrb[90].mxu0 }
 0x4f5   :  { %v8438_v39 = vadd.f32 %v24747_v7, %v8437_v34  ;;  %v14910_v60 = vpop.f32.mrb[91].mxu0 }
 0x4f6   :  { %v9343_v60 = vrot.slane %v8502_v14, %v16028_v5 }
 0x4f7   :  { %v8501_v2 = vmax.f32 %v8438_v39, 0.0 }
 0x4f8   :  { %v8447_v37 = vpop.f32.mrb[2].mxu1 }
 0x4f9   :  { %v9319_v63 = vcombine.high %v8501_v2, %v8501_v2  ;;  %v9326_v51 = vrot.slane %v8501_v2, %v16028_v5  ;;  %v8448_v49 = vadd.f32 %v24747_v7, %v8447_v37  ;;  %v14916_v38 = vpop.f32.mrb[3].mxu1 }
 0x4fb   :  { %v9333_v0 = vrot.slane %v9319_v63, %v16028_v5  ;;  %v9334_v44 = vcombine.high %v9326_v51, %v9326_v51  ;;  %v9672_v15 = vmax.f32 %v9300_v20, %v9326_v51  ;;  %v8503_v54 = vmax.f32 %v8448_v49, 0.0 }
 0x4fc   :  { %v9350_v51 = vrot.slane %v9336_v17, %v16028_v5  ;;  %v9351_v17 = vcombine.high %v9343_v60, %v9343_v60 }
 0x4fd   :  { %v9335_v57 = vcombine.high %v9333_v0, %v9333_v0  ;;  %v9673_v62 = vmax.f32 %v24856_v26, %v9334_v44  ;;  %v14438_v27 = vrot.slane %v9672_v15, 9  ;;  %v9353_v9 = vcombine.high %v8503_v54, %v8503_v54 }
 0x4fe   :  { %v24997_v56 = vrot.slane %v8503_v54, %v16028_v5  ;;  %v10892_v26 = vsel %vm10458_vm5, %v24552_v53, %v24525_v19 }
 0x4ff   :  { %v14439_v47 = vrot.slane %v9673_v62, 9  ;;  %v10162_v34 = vmax.f32 %v9672_v15, %v14438_v27  ;;  %v9367_v39 = vrot.slane %v9353_v9, %v16028_v5  ;;  %v10893_v11 = vsel %vm1188_vm1, %v24567_v8, %v10892_v26 }
 0x500   :  { %v9368_v52 = vcombine.high %v24997_v56, %v24997_v56  ;;  %v9352_v26 = vcombine.high %v9350_v51, %v9350_v51 }
 0x501   :  { %v10163_v2 = vmax.f32 %v9673_v62, %v14439_v47  ;;  %v25022_v37 = vrot.slane %v10162_v34, %v26741_v41  ;;  %v9369_v28 = vcombine.high %v9367_v39, %v9367_v39  ;;  %v9675_v20 = vmax.f32 %v9335_v57, %v9367_v39 }
 0x502   :  { %v8452_v63 = vpop.f32.mrb[4].mxu1  ;;  %v9674_v49 = vmax.f32 %v9333_v0, %v9368_v52  ;;  %v10894_v0 = vsel %vm10461_vm7, %v24668_v61, %v10893_v11 }
 0x503   :  { %v8453_v38 = vadd.f32 %v24747_v7, %v8452_v63  ;;  %v14919_v14 = vpop.f32.mrb[5].mxu1  ;;  %v10923_v21 = vrot.slane %v10163_v2, %v26741_v41  ;;  %v9676_v44 = vmax.f32 %v9343_v60, %v9369_v28  ;;  %v14441_v50 = vrot.slane %v9675_v20, 9 }
 0x504   :  { %v11147_v31 = vsel %vm1190_vm2, %v25022_v37, %v11146_v18  ;;  %v14440_v15 = vrot.slane %v9674_v49, 9  ;;  %v11220_v57 = vsel %vm10461_vm7, %v25022_v37, %v11219_v23  ;;  %v25045_v2 = vsel %vm10458_vm5, %v24828_v58, %v24813_v6 }
 0x505   :  { %v8504_v54 = vmax.f32 %v8453_v38, 0.0  ;;  %v14442_v7 = vrot.slane %v9676_v44, 9  ;;  %v10165_v62 = vmax.f32 %v9675_v20, %v14441_v50  ;;  %v25037_v8 = vsel %vm10458_vm5, %v10923_v21, %v25022_v37 }
 0x506   :  { %v11456_v27 = vpop.f32.mrb[6].mxu1  ;;  %v11221_v9 = vsel %vm1190_vm2, %v10923_v21, %v11220_v57  ;;  %v10164_v47 = vmax.f32 %v9674_v49, %v14440_v15  ;;  %v10895_v11 = vsel %vm1190_vm2, %v24678_v3, %v10894_v0  ;;  %v10494_v21 = vsel %vm10464_vm11, %v24518_v36, %v10493_v48  ;;  %v25063_v0 = vpop.permute.xlu0 %15591 }
 0x507   :  { %v9370_v18 = vcombine.high %v8504_v54, %v8504_v54  ;;  %v9377_v34 = vrot.slane %v8504_v54, %v16028_v5  ;;  %v14930_v39 = vpop.f32.mrb[7].mxu1  ;;  %v10166_v23 = vmax.f32 %v9676_v44, %v14442_v7  ;;  %v11025_v52 = vrot.slane %v10165_v62, %v26741_v41 }
 0x508   :  { %v11021_v28 = vrot.slane %v10164_v47, %v26741_v41  ;;  %v25066_v47 = vld [vmem:[#allocation8] ss:$0 sm:$0xff] }
 0x509   :  { %v9384_v20 = vrot.slane %v9370_v18, %v16028_v5  ;;  %v9385_v63 = vcombine.high %v9377_v34, %v9377_v34  ;;  %v9677_v60 = vmax.f32 %v9351_v17, %v9377_v34  ;;  %v11029_v38 = vrot.slane %v10166_v23, %v26741_v41 }
 0x50a   :  { %v25049_v49 = vpop.f32.mrb[8].mxu1  ;;  %v11148_v14 = vsel %vm10464_vm11, %v11025_v52, %v11147_v31  ;;  %v11074_v57 = vsel %vm10464_vm11, %v11021_v28, %v24964_v46  ;;  %v10495_v31 = vsel %vm27090_vm13, %v24525_v19, %v10494_v21  ;;  %v10899_v19 = vsel %vm10458_vm5, %v24790_v59, %v24774_v40  ;;  %vm27096_vm13 = vmmov %vm27089_vm0 }
 0x50b   :  { %v9386_v58 = vcombine.high %v9384_v20, %v9384_v20  ;;  %v9678_v44 = vmax.f32 %v9350_v51, %v9385_v63  ;;  %v9679_v50 = vmax.f32 %v9352_v26, %v9384_v20  ;;  %v14443_v15 = vrot.slane %v9677_v60, 9  ;;  %v14933_v54 = vpop.f32.mrb[9].mxu1 }
 0x50c   :  { %v11149_v7 = vsel %vm27082_vm9, %v11029_v38, %v11148_v14  ;;  %v11222_v62 = vsel %vm10464_vm11, %v11029_v38, %v11221_v9  ;;  %v11075_v46 = vsel %vm27091_vm14, %v11025_v52, %v11074_v57  ;;  %v10896_v9 = vsel %vm10464_vm11, %v24681_v32, %v10895_v11  ;;  %vm27097_vm14 = vmmov %vm27082_vm9 }
 0x50d   :  { %v14560_v5 = vpop.f32.mrb[92].mxu0  ;;  %v9680_v36 = vmax.f32 %v24997_v56, %v9386_v58  ;;  %v14444_v48 = vrot.slane %v9678_v44, 9  ;;  %v14445_v51 = vrot.slane %v9679_v50, 9  ;;  %v10167_v17 = vmax.f32 %v9677_v60, %v14443_v15 }
 0x50e   :  { %v14561_v18 = vpop.f32.mrb[93].mxu0  ;;  %v25068_v39 = vpop.f32.mrb[10].mxu1  ;;  %v15594_v63 = vunpack.i.h.bf16 %v25063_v0  ;;  %v11076_v14 = vsel %vm27092_vm4, %v11029_v38, %v11075_v46  ;;  %v10900_v52 = vsel %vm1188_vm1, %v24801_v55, %v10899_v19  ;;  %vm27098_vm4 = vmmov %vm27089_vm0 }
 0x50f   :  { %v14562_v34 = vadd.f32 %v14561_v18, %v14560_v5  ;;  %v14446_v26 = vrot.slane %v9680_v36, 9  ;;  %v10168_v56 = vmax.f32 %v9678_v44, %v14444_v48  ;;  %v10169_v23 = vmax.f32 %v9679_v50, %v14445_v51  ;;  %v14936_v20 = vpop.f32.mrb[11].mxu1 }
 0x510   :  { %v11033_v28 = vrot.slane %v10167_v17, %v26741_v41  ;;  %v15610_v21 = vpack.i.bf16 %v25004_v35, %v11076_v14  ;;  %v10901_v35 = vsel %vm10461_vm7, %v24810_v43, %v10900_v52  ;;  %v15620_v18 = vpack.i.bf16 %v25016_v10, %v25037_v8 }
 0x511   :  { %v11358_v60 = vadd.f32 %v14562_v34, %v25066_v47  ;;  %v11108_v11 = vrot.slane %v10169_v23, %v26741_v41  ;;  %v11037_v44 = vrot.slane %v10168_v56, %v26741_v41  ;;  %v10170_v5 = vmax.f32 %v9680_v36, %v14446_v26 }
 0x512   :  { %v11150_v58 = vsel %vm27093_vm10, %v11033_v28, %v11149_v7  ;;  %v11223_v54 = vsel %vm27094_vm12, %v11033_v28, %v11222_v62  ;;  %15611 = vrot.lane.b32.xlu0 %v15610_v21, %s15889_s0  ;;  %v15593_v36 = vunpack.i.l.bf16 %v25063_v0  ;;  %v10902_v34 = vsel %vm1190_vm2, %v24813_v6, %v10901_v35  ;;  %vm27099_vm10 = vmmov %vm27082_vm9 }
 0x513   :  { %v11457_v50 = vadd.f32 %v11456_v27, %v11358_v60  ;;  %v15615_v15 = vpack.i.bf16 %v24968_v29, %v11150_v58  ;;  %v11224_v38 = vsel %vm27089_vm0, %v11037_v44, %v11223_v54  ;;  %v11151_v57 = vsel %vm10458_vm5, %v11108_v11, %v11037_v44 }
 0x514   :  { %v11077_v48 = vsel %vm10458_vm5, %v11037_v44, %v11033_v28  ;;  %14944 = vmatmul.mubr.msk.f32.gmra.mrb[16].mxu1 %vm11226_vm6, %v11224_v38  ;;  %v15630_v29 = vpack.i.bf16 %v24978_v25, %v11151_v57  ;;  %v11182_v62 = vrot.slane %v10170_v5, %v26741_v41  ;;  %v25109_v25 = vsel %vm10458_vm5, %v25022_v37, %v24941_v22 }
 0x515   :  { %v11489_v7 = vmax.f32 %v11457_v50, 0.0  ;;  %v14563_v51 = vpop.f32.mrb[94].mxu0  ;;  %15616 = vrot.lane.b32.xlu1 %v15615_v15, %s15891_s3  ;;  %v15625_v27 = vpack.i.bf16 %v25045_v2, %v11077_v48  ;;  %14946 = vmatprep.mubr.msk.f32.mxu1 %vm15888_vm8, %v25931_v42  ;;  %v10897_v10 = vsel %vm27082_vm9, %v24722_v33, %v10896_v9  ;;  %vm27095_vm8 = vmmov %vm27089_vm0  ;;  %v10903_v6 = vsel %vm10464_vm11, %v24923_v13, %v10902_v34 }
 0x516   :  { %v14564_v17 = vpop.f32.mrb[95].mxu0  ;;  %v11225_v0 = vsel %vm10458_vm5, %v11182_v62, %v11108_v11  ;;  %15621 = vrot.lane.b32.xlu0 %v15620_v18, %s15890_s12  ;;  %v10496_v8 = vsel %vm27095_vm8, %v24552_v53, %v10495_v31  ;;  %v10898_v23 = vsel %vm27096_vm13, %v24731_v12, %v10897_v10  ;;  %v10904_v13 = vsel %vm27097_vm14, %v24929_v1, %v10903_v6 }
 0x517   :  { %v11501_v2 = vcombine.high %v11489_v7, %v11489_v7  ;;  %v11508_v46 = vrot.slane %v11489_v7, %v25000_v24  ;;  %v14565_v19 = vadd.f32 %v14564_v17, %v14563_v51  ;;  %v15597_v56 = vpop.permute.xlu1 %15596  ;;  %v11254_v53 = vsel %vm11226_vm6, %v10898_v23, %v15593_v36 }
 0x518   :  { %v15599_v28 = vunpack.i.h.bf16 %v15597_v56  ;;  %v15598_v20 = vunpack.i.l.bf16 %v15597_v56  ;;  %14947 = vmatmul.mubr.msk.f32.gmra.mrb[18].mxu1 %vm11226_vm6, %v11225_v0  ;;  %v15602_v14 = vpop.permute.xlu0 %15601  ;;  %v11231_v52 = vsel %vm11226_vm6, %v10496_v8, %v15594_v63 }
 0x519   :  { %v11515_v22 = vrot.slane %v11501_v2, %v25000_v24  ;;  %v11516_v37 = vcombine.high %v11508_v46, %v11508_v46  ;;  %v11363_v26 = vadd.f32 %v14565_v19, %v25066_v47  ;;  %15626 = vrot.lane.b32.xlu1 %v15625_v27, %s15889_s0  ;;  %v11524_v9 = vrot.slane %v11508_v46, %v25000_v24 }
 0x51a   :  { %12041 = vmatprep.mubr.f32.mxu1 %v25931_v42  ;;  %15631 = vrot.lane.b32.xlu0 %v15630_v29, %s15891_s3  ;;  %v15604_v11 = vunpack.i.h.bf16 %v15602_v14  ;;  %v15603_v21 = vunpack.i.l.bf16 %v15602_v14  ;;  %v11261_v58 = vsel %vm11234_vm3, %v11254_v53, %v15598_v20  ;;  %v11239_v15 = vsel %vm11234_vm3, %v11231_v52, %v15599_v28 }
 0x51b   :  { %v11517_v31 = vcombine.high %v11515_v22, %v11515_v22  ;;  %v11531_v60 = vrot.slane %v11515_v22, %v25000_v24  ;;  %v11462_v12 = vadd.f32 %v25049_v49, %v11363_v26  ;;  %v11538_v1 = vrot.slane %v11516_v37, %v25000_v24 }
 0x51c   :  { %v11268_v63 = vsel %vm11242_vm15, %v11261_v58, %v15603_v21  ;;  %v11247_v5 = vsel %vm11242_vm15, %v11239_v15, %v15604_v11  ;;  %v25143_v49 = vsel %vm27098_vm4, %v24932_v45, %v10904_v13  ;;  %v11546_v51 = vcombine.high %v11524_v9, %v11524_v9 }
 0x51d   :  { %v11545_v44 = vrot.slane %v11517_v31, %v25000_v24  ;;  %v11547_v50 = vcombine.high %v11531_v60, %v11531_v60  ;;  %v11490_v54 = vmax.f32 %v11462_v12, 0.0  ;;  %11375 = vmatprep.mubr.f32.mxu0 %v11268_v63  ;;  %v11548_v27 = vcombine.high %v11538_v1, %v11538_v1 }
 0x51e   :  { %11376 = vmatmul.mubr.f32.gmra.mrb[100].mxu0 %v11247_v5  ;;  %v10497_v5 = vsel %vm10458_vm5, %v24668_v61, %v24661_v30 }
 0x51f   :  { %v11549_v38 = vcombine.high %v11545_v44, %v11545_v44  ;;  %v11773_v57 = vmax.f32 %v11524_v9, %v11545_v44  ;;  %v11774_v48 = vmax.f32 %v11538_v1, %v11547_v50  ;;  %v11550_v35 = vcombine.high %v11490_v54, %v11490_v54  ;;  %v11879_v1 = vld [vmem:[#allocation10 + $0x288] sm:$0xff]  ;;  %v11889_v44 = vld [vmem:[#allocation10 + $0x2d8] sm:$0xff]  ;;  %v11878_v50 = vld [vmem:[#allocation10 + $0x280] sm:$0xff] }
 0x520   :  { %v11557_v7 = vrot.slane %v11490_v54, %v25000_v24  ;;  %v14990_v15 = vpack.c.bf16 %v11889_v44, %v11879_v1  ;;  %v11888_v54 = vld [vmem:[#allocation10 + $0x2d0] sm:$0xff]  ;;  %v11939_v1 = vld [vmem:[#allocation10 + $0x468] sm:$0xff] }
 0x521   :  { %v25146_v29 = vmax.f32 %v11773_v57, %v11774_v48  ;;  %v11564_v62 = vrot.slane %v11550_v35, %v25000_v24  ;;  %v25150_v17 = vmax.f32 %v11546_v51, %v11549_v38  ;;  %v14992_v63 = vpack.c.bf16 %v11888_v54, %v11878_v50  ;;  %v11949_v54 = vld [vmem:[#allocation10 + $0x4b8] sm:$0xff] }
 0x522   :  { %v11573_v36 = vrot.slane %v11557_v7, %v25000_v24  ;;  %v11565_v10 = vcombine.high %v11557_v7, %v11557_v7  ;;  %14991 = vmatprep.subr.bf16.mxu1 %v14990_v15  ;;  %v10498_v57 = vsel %vm1188_vm1, %v24678_v3, %v10497_v5  ;;  %vm27100_vm1 = vmmov %vm27089_vm0  ;;  %v10504_v15 = vsel %vm10458_vm5, %v24810_v43, %v24801_v55  ;;  %v11881_v43 = vld [vmem:[#allocation10 + $0x298] sm:$0xff] }
 0x523   :  { %v11566_v45 = vcombine.high %v11564_v62, %v11564_v62  ;;  %v14566_v18 = vpop.f32.mrb[96].mxu0  ;;  %v11580_v31 = vrot.slane %v11564_v62, %v25000_v24  ;;  %14993 = vmatpush1.bf16.msra.mxu1 %v14992_v63  ;;  %v10499_v35 = vsel %vm10461_vm7, %v24681_v32, %v10498_v57 }
 0x524   :  { %v25152_v34 = vmax.f32 %v11548_v27, %v11573_v36  ;;  %v14567_v2 = vpop.f32.mrb[97].mxu0  ;;  %v11595_v8 = vcombine.high %v11573_v36, %v11573_v36  ;;  %v11587_v56 = vrot.slane %v11565_v10, %v25000_v24  ;;  %v10500_v7 = vsel %vm1190_vm2, %v24722_v33, %v10499_v35 }
 0x525   :  { %v11594_v46 = vrot.slane %v11566_v45, %v25000_v24  ;;  %v14568_v19 = vadd.f32 %v14567_v2, %v14566_v18  ;;  %v10501_v27 = vsel %vm10464_vm11, %v24766_v4, %v10500_v7 }
 0x526   :  { %v11790_v0 = vmax.f32 %v25150_v17, %v25152_v34  ;;  %v11596_v20 = vcombine.high %v11587_v56, %v11587_v56  ;;  %v10502_v30 = vsel %vm27099_vm10, %v24774_v40, %v10501_v27  ;;  %v11909_v40 = vld [vmem:[#allocation10 + $0x378] sm:$0xff]  ;;  %v11938_v27 = vld [vmem:[#allocation10 + $0x460] sm:$0xff] }
 0x527   :  { %v11597_v6 = vcombine.high %v11594_v46, %v11594_v46  ;;  %v11368_v22 = vadd.f32 %v14568_v19, %v25066_v47  ;;  %v10503_v2 = vsel %vm27100_vm1, %v24790_v59, %v10502_v30  ;;  %v11891_v30 = vld [vmem:[#allocation10 + $0x2e8] sm:$0xff] }
 0x529   :  { %v25158_v37 = vmax.f32 %v11595_v8, %v11597_v6  ;;  %v11467_v26 = vadd.f32 %v25068_v39, %v11368_v22  ;;  %v11899_v8 = vld [vmem:[#allocation10 + $0x328] sm:$0xff]  ;;  %v11898_v6 = vld [vmem:[#allocation10 + $0x320] sm:$0xff] }
 0x52a   :  { %v14994_v59 = vpack.c.bf16 %v11909_v40, %v11899_v8 }
 0x52b   :  { %v11491_v23 = vmax.f32 %v11467_v26, 0.0 }
 0x52c   :  { %14995 = vmatprep.subr.bf16.mxu1 %v14994_v59 }
 0x52d   :  { %v11604_v28 = vrot.slane %v11491_v23, %v25000_v24  ;;  %v11908_v23 = vld [vmem:[#allocation10 + $0x370] sm:$0xff] }
 0x52f   :  { %v11605_v53 = vcombine.high %v11604_v28, %v11604_v28  ;;  %v11612_v13 = vrot.slane %v11604_v28, %v25000_v24  ;;  %v11919_v28 = vld [vmem:[#allocation10 + $0x3c8] sm:$0xff] }
 0x531   :  { %v11619_v9 = vrot.slane %v11605_v53, %v25000_v24  ;;  %v11620_v60 = vcombine.high %v11612_v13, %v11612_v13  ;;  %v25166_v14 = vmax.f32 %v11596_v20, %v11612_v13  ;;  %v11929_v20 = vld [vmem:[#allocation10 + $0x418] sm:$0xff] }
 0x533   :  { %v25168_v52 = vmax.f32 %v11580_v31, %v11619_v9  ;;  %v25170_v12 = vmax.f32 %v11594_v46, %v11620_v60  ;;  %v11791_v39 = vmax.f32 %v25158_v37, %v25166_v14  ;;  %v14996_v31 = vpack.c.bf16 %v11908_v23, %v11898_v6  ;;  %v11918_v60 = vld [vmem:[#allocation10 + $0x3c0] sm:$0xff] }
 0x534   :  { %v14998_v9 = vpack.c.bf16 %v11929_v20, %v11919_v28 }
 0x535   :  { %v11792_v11 = vmax.f32 %v25168_v52, %v25170_v12  ;;  %14997 = vmatpush1.bf16.msra.mxu1 %v14996_v31  ;;  %v11864_v52 = vld [vmem:[#allocation10 + $0x218] sm:$0xff]  ;;  %v11874_v12 = vld [vmem:[#allocation10 + $0x268] sm:$0xff] }
 0x536   :  { %14999 = vmatprep.subr.bf16.mxu1 %v14998_v9 }
 0x538   :  { %v25176_v21 = vpop.f32.mrb[12].mxu1 }
 0x539   :  { %v14939_v58 = vpop.f32.mrb[13].mxu1 }
 0x53a   :  { %v11928_v58 = vld [vmem:[#allocation10 + $0x410] sm:$0xff] }
 0x53b   :  { %v15000_v57 = vpack.c.bf16 %v11928_v58, %v11918_v60 }
 0x53d   :  { %15001 = vmatpush1.bf16.msra.mxu1 %v15000_v57 }
 0x563   :  { %v15607_v51 = vpop.permute.xlu1 %15606 }
 0x564   :  { %v15609_v62 = vunpack.i.h.bf16 %v15607_v51  ;;  %v15608_v36 = vunpack.i.l.bf16 %v15607_v51  ;;  %v15002_v51 = vpack.c.bf16 %v11949_v54, %v11939_v1 }
 0x566   :  { %v11255_v33 = vsel %vm11226_vm6, %v25143_v49, %v15608_v36  ;;  %v11232_v19 = vsel %vm11226_vm6, %v10503_v2, %v15609_v62  ;;  %v11948_v62 = vld [vmem:[#allocation10 + $0x4b0] sm:$0xff]  ;;  %15003 = vmatprep.subr.bf16.mxu1 %v15002_v51 }
 0x578   :  { %v25181_v38 = vpop.f32.mrb[14].mxu1 }
 0x579   :  { %v14942_v48 = vpop.f32.mrb[15].mxu1 }
 0x584   :  { %v15612_v61 = vpop.permute.xlu0 %15611 }
 0x585   :  { %v15614_v45 = vunpack.i.h.bf16 %v15612_v61  ;;  %v15613_v18 = vunpack.i.l.bf16 %v15612_v61 }
 0x587   :  { %v15617_v3 = vpop.permute.xlu1 %15616  ;;  %v11262_v4 = vsel %vm11234_vm3, %v11255_v33, %v15613_v18  ;;  %v11240_v10 = vsel %vm11234_vm3, %v11232_v19, %v15614_v45  ;;  %v15004_v45 = vpack.c.bf16 %v11948_v62, %v11938_v27  ;;  %v15006_v18 = vpack.c.bf16 %v11891_v30, %v11881_v43  ;;  %v11880_v62 = vld [vmem:[#allocation10 + $0x290] sm:$0xff]  ;;  %v11911_v43 = vld [vmem:[#allocation10 + $0x388] sm:$0xff] }
 0x588   :  { %v15619_v32 = vunpack.i.h.bf16 %v15617_v3  ;;  %v15618_v46 = vunpack.i.l.bf16 %v15617_v3  ;;  %v15622_v22 = vpop.permute.xlu0 %15621 }
 0x589   :  { %v15624_v53 = vunpack.i.h.bf16 %v15622_v22  ;;  %v15623_v49 = vunpack.i.l.bf16 %v15622_v22  ;;  %15005 = vmatpush1.bf16.msra.mxu1 %v15004_v45 }
 0x58a   :  { %v11269_v26 = vsel %vm11242_vm15, %v11262_v4, %v15618_v46  ;;  %v11248_v56 = vsel %vm11242_vm15, %v11240_v10, %v15619_v32  ;;  %15007 = vmatprep.subr.bf16.mxu1 %v15006_v18  ;;  %v11900_v18 = vld [vmem:[#allocation10 + $0x330] sm:$0xff] }
 0x58b   :  { %v15627_v13 = vpop.permute.xlu1 %15626  ;;  %11380 = vmatprep.mubr.f32.mxu0 %v11269_v26  ;;  %v11256_v63 = vsel %vm11226_vm6, %v25109_v25, %v15623_v49  ;;  %v11233_v5 = vsel %vm11226_vm6, %v10504_v15, %v15624_v53 }
 0x58c   :  { %v15629_v44 = vunpack.i.h.bf16 %v15627_v13  ;;  %v15628_v50 = vunpack.i.l.bf16 %v15627_v13  ;;  %11381 = vmatmul.mubr.f32.gmra.mrb[102].mxu0 %v11248_v56  ;;  %v15632_v48 = vpop.permute.xlu0 %15631 }
 0x58d   :  { %v15634_v36 = vunpack.i.h.bf16 %v15632_v48  ;;  %v15633_v55 = vunpack.i.l.bf16 %v15632_v48 }
 0x58e   :  { %v11263_v35 = vsel %vm11234_vm3, %v11256_v63, %v15628_v50  ;;  %v11241_v7 = vsel %vm11234_vm3, %v11233_v5, %v15629_v44 }
 0x58f   :  { %v11270_v61 = vsel %vm11242_vm15, %v11263_v35, %v15633_v55  ;;  %v11249_v25 = vsel %vm11242_vm15, %v11241_v7, %v15634_v36  ;;  %v11890_v36 = vld [vmem:[#allocation10 + $0x2e0] sm:$0xff]  ;;  %v11901_v55 = vld [vmem:[#allocation10 + $0x338] sm:$0xff] }
 0x590   :  { %11385 = vmatprep.mubr.f32.mxu0 %v11270_v61  ;;  %v15008_v61 = vpack.c.bf16 %v11890_v36, %v11880_v62  ;;  %v15010_v45 = vpack.c.bf16 %v11911_v43, %v11901_v55  ;;  %v11884_v36 = vld [vmem:[#allocation10 + $0x2b0] sm:$0xff]  ;;  %v11894_v55 = vld [vmem:[#allocation10 + $0x300] sm:$0xff]  ;;  %v11905_v43 = vld [vmem:[#allocation10 + $0x358] sm:$0xff] }
 0x591   :  { %11386 = vmatmul.mubr.f32.gmra.mrb[104].mxu0 %v11249_v25 }
 0x5b0   :  { %v14569_v3 = vpop.f32.mrb[98].mxu0 }
 0x5b1   :  { %v14570_v2 = vpop.f32.mrb[99].mxu0 }
 0x5b2   :  { %v14571_v32 = vadd.f32 %v14570_v2, %v14569_v3  ;;  %v11910_v3 = vld [vmem:[#allocation10 + $0x380] sm:$0xff]  ;;  %v11921_v2 = vld [vmem:[#allocation10 + $0x3d8] sm:$0xff] }
 0x5b3   :  { %v15012_v17 = vpack.c.bf16 %v11910_v3, %v11900_v18  ;;  %v11904_v18 = vld [vmem:[#allocation10 + $0x350] sm:$0xff]  ;;  %v11914_v3 = vld [vmem:[#allocation10 + $0x3a0] sm:$0xff] }
 0x5b4   :  { %v11373_v46 = vadd.f32 %v14571_v32, %v25066_v47  ;;  %v11931_v32 = vld [vmem:[#allocation10 + $0x428] sm:$0xff] }
 0x5b5   :  { %v15014_v34 = vpack.c.bf16 %v11931_v32, %v11921_v2  ;;  %v11925_v2 = vld [vmem:[#allocation10 + $0x3f8] sm:$0xff]  ;;  %v11935_v32 = vld [vmem:[#allocation10 + $0x448] sm:$0xff] }
 0x5b6   :  { %v11472_v33 = vadd.f32 %v25176_v21, %v11373_v46  ;;  %v11930_v46 = vld [vmem:[#allocation10 + $0x420] sm:$0xff] }
 0x5b8   :  { %v11492_v19 = vmax.f32 %v11472_v33, 0.0  ;;  %v11941_v33 = vld [vmem:[#allocation10 + $0x478] sm:$0xff] }
 0x5ba   :  { %v11621_v4 = vcombine.high %v11492_v19, %v11492_v19  ;;  %v11628_v10 = vrot.slane %v11492_v19, %v25000_v24  ;;  %v11951_v19 = vld [vmem:[#allocation10 + $0x4c8] sm:$0xff] }
 0x5bc   :  { %v11635_v8 = vrot.slane %v11621_v4, %v25000_v24  ;;  %v11636_v40 = vcombine.high %v11628_v10, %v11628_v10  ;;  %v11644_v22 = vrot.slane %v11628_v10, %v25000_v24  ;;  %v15018_v10 = vpack.c.bf16 %v11951_v19, %v11941_v33  ;;  %v11945_v33 = vld [vmem:[#allocation10 + $0x498] sm:$0xff]  ;;  %v11955_v19 = vld [vmem:[#allocation10 + $0x4e8] sm:$0xff] }
 0x5be   :  { %v11637_v6 = vcombine.high %v11635_v8, %v11635_v8  ;;  %v11651_v26 = vrot.slane %v11635_v8, %v25000_v24  ;;  %v11658_v56 = vrot.slane %v11636_v40, %v25000_v24  ;;  %v11666_v28 = vcombine.high %v11644_v22, %v11644_v22  ;;  %v11940_v8 = vld [vmem:[#allocation10 + $0x470] sm:$0xff]  ;;  %v11950_v40 = vld [vmem:[#allocation10 + $0x4c0] sm:$0xff]  ;;  %v11893_v22 = vld [vmem:[#allocation10 + $0x2f8] sm:$0xff] }
 0x5c0   :  { %v11665_v59 = vrot.slane %v11637_v6, %v25000_v24  ;;  %v11667_v23 = vcombine.high %v11651_v26, %v11651_v26  ;;  %v11668_v57 = vcombine.high %v11658_v56, %v11658_v56  ;;  %v11883_v6 = vld [vmem:[#allocation10 + $0x2a8] sm:$0xff] }
 0x5c2   :  { %v11669_v20 = vcombine.high %v11665_v59, %v11665_v59  ;;  %v11781_v21 = vmax.f32 %v11658_v56, %v11667_v23  ;;  %v15022_v56 = vpack.c.bf16 %v11893_v22, %v11883_v6  ;;  %v11882_v59 = vld [vmem:[#allocation10 + $0x2a0] sm:$0xff]  ;;  %v11892_v23 = vld [vmem:[#allocation10 + $0x2f0] sm:$0xff]  ;;  %v11887_v6 = vld [vmem:[#allocation10 + $0x2c8] sm:$0xff] }
 0x5c3   :  { %v11897_v22 = vld [vmem:[#allocation10 + $0x318] sm:$0xff] }
 0x5c4   :  { %v11782_v53 = vmax.f32 %v11666_v28, %v11669_v20  ;;  %v11903_v28 = vld [vmem:[#allocation10 + $0x348] sm:$0xff]  ;;  %v11913_v20 = vld [vmem:[#allocation10 + $0x398] sm:$0xff] }
 0x5c6   :  { %v11793_v49 = vmax.f32 %v11781_v21, %v11782_v53  ;;  %v15024_v21 = vpack.c.bf16 %v11892_v23, %v11882_v59  ;;  %v15026_v53 = vpack.c.bf16 %v11913_v20, %v11903_v28  ;;  %v11886_v59 = vld [vmem:[#allocation10 + $0x2c0] sm:$0xff]  ;;  %v11896_v23 = vld [vmem:[#allocation10 + $0x310] sm:$0xff]  ;;  %v11907_v28 = vld [vmem:[#allocation10 + $0x368] sm:$0xff] }
 0x5c7   :  { %v11917_v20 = vld [vmem:[#allocation10 + $0x3b8] sm:$0xff] }
 0x5c8   :  { %v25221_v13 = vcombine.low %v25146_v29, %v11793_v49  ;;  %v11902_v49 = vld [vmem:[#allocation10 + $0x340] sm:$0xff] }
 0x5e7   :  { %v25223_v31 = vpop.f32.mrb[16].mxu1 }
 0x5e8   :  { %v14945_v9 = vpop.f32.mrb[17].mxu1 }
 0x5e9   :  { %v11912_v9 = vld [vmem:[#allocation10 + $0x390] sm:$0xff] }
 0x5eb   :  { %v11486_v60 = vpop.f32.mrb[18].mxu1 }
 0x5ec   :  { %v14948_v58 = vpop.f32.mrb[19].mxu1  ;;  %v11923_v60 = vld [vmem:[#allocation10 + $0x3e8] sm:$0xff] }
 0x5ed   :  { %v11933_v58 = vld [vmem:[#allocation10 + $0x438] sm:$0xff] }
 0x5f1   :  { %v14572_v1 = vpop.f32.mrb[100].mxu0 }
 0x5f2   :  { %v14573_v44 = vpop.f32.mrb[101].mxu0 }
 0x5f3   :  { %v14574_v50 = vadd.f32 %v14573_v44, %v14572_v1  ;;  %v15028_v1 = vpack.c.bf16 %v11912_v9, %v11902_v49  ;;  %v15030_v44 = vpack.c.bf16 %v11933_v58, %v11923_v60  ;;  %v11906_v49 = vld [vmem:[#allocation10 + $0x360] sm:$0xff]  ;;  %v11916_v9 = vld [vmem:[#allocation10 + $0x3b0] sm:$0xff]  ;;  %v11927_v60 = vld [vmem:[#allocation10 + $0x408] sm:$0xff] }
 0x5f4   :  { %v11937_v58 = vld [vmem:[#allocation10 + $0x458] sm:$0xff] }
 0x5f5   :  { %v11378_v15 = vadd.f32 %v14574_v50, %v25066_v47  ;;  %v11922_v50 = vld [vmem:[#allocation10 + $0x3e0] sm:$0xff] }
 0x5f7   :  { %v11477_v54 = vadd.f32 %v25181_v38, %v11378_v15  ;;  %v11932_v15 = vld [vmem:[#allocation10 + $0x430] sm:$0xff] }
 0x5f9   :  { %v25227_v63 = vmax.f32 %v11477_v54, 0.0  ;;  %v11943_v54 = vld [vmem:[#allocation10 + $0x488] sm:$0xff] }
 0x5fb   :  { %v11677_v5 = vrot.slane %v25227_v63, %v25000_v24 }
 0x5fd   :  { %v11685_v29 = vcombine.high %v11677_v5, %v11677_v5  ;;  %v11693_v48 = vrot.slane %v11677_v5, %v25000_v24  ;;  %v11953_v5 = vld [vmem:[#allocation10 + $0x4d8] sm:$0xff] }
 0x5ff   :  { %v25233_v35 = vrot.slane %v11685_v29, %v25000_v24  ;;  %v11783_v7 = vmax.f32 %v11668_v57, %v11693_v48  ;;  %v15032_v57 = vpack.c.bf16 %v11932_v15, %v11922_v50  ;;  %v15034_v29 = vpack.c.bf16 %v11953_v5, %v11943_v54  ;;  %v11942_v48 = vld [vmem:[#allocation10 + $0x480] sm:$0xff]  ;;  %v11936_v15 = vld [vmem:[#allocation10 + $0x450] sm:$0xff]  ;;  %v11947_v54 = vld [vmem:[#allocation10 + $0x4a8] sm:$0xff] }
 0x600   :  { %v11926_v50 = vld [vmem:[#allocation10 + $0x400] sm:$0xff]  ;;  %v11957_v5 = vld [vmem:[#allocation10 + $0x4f8] sm:$0xff] }
 0x601   :  { %v11784_v51 = vmax.f32 %v11651_v26, %v25233_v35  ;;  %v15020_v26 = vpack.c.bf16 %v11950_v40, %v11940_v8  ;;  %v11944_v8 = vld [vmem:[#allocation10 + $0x490] sm:$0xff]  ;;  %v11954_v40 = vld [vmem:[#allocation10 + $0x4e0] sm:$0xff] }
 0x603   :  { %v11794_v27 = vmax.f32 %v11783_v7, %v11784_v51  ;;  %v11952_v7 = vld [vmem:[#allocation10 + $0x4d0] sm:$0xff]  ;;  %v11885_v51 = vld [vmem:[#allocation10 + $0x2b8] sm:$0xff] }
 0x605   :  { %v11960_v38 = vcombine.low %v11790_v0, %v11794_v27  ;;  %v11920_v0 = vld [vmem:[#allocation10 + $0x3d0] sm:$0xff]  ;;  %v11895_v27 = vld [vmem:[#allocation10 + $0x308] sm:$0xff] }
 0x606   :  { %v15016_v4 = vpack.c.bf16 %v11930_v46, %v11920_v0  ;;  %v15038_v62 = vpack.c.bf16 %v11895_v27, %v11885_v51  ;;  %v11924_v0 = vld [vmem:[#allocation10 + $0x3f0] sm:$0xff]  ;;  %v11934_v46 = vld [vmem:[#allocation10 + $0x440] sm:$0xff]  ;;  %v11798_v51 = vld [vmem:[#allocation10 + $0x8] sm:$0xff] }
 0x607   :  { %v11967_v30 = vrot.slane %v11960_v38, %v25000_v24  ;;  %v15036_v38 = vpack.c.bf16 %v11952_v7, %v11942_v48  ;;  %v11946_v48 = vld [vmem:[#allocation10 + $0x4a0] sm:$0xff]  ;;  %v11956_v7 = vld [vmem:[#allocation10 + $0x4f0] sm:$0xff]  ;;  %v11808_v27 = vld [vmem:[#allocation10 + $0x58] sm:$0xff] }
 0x609   :  { %v25241_v25 = vrot.slane %v11967_v30, %v25000_v24  ;;  %v11915_v30 = vld [vmem:[#allocation10 + $0x3a8] sm:$0xff] }
 0x60b   :  { %14455 = vmatmul.mubr.msk.f32.vlgmr.msra.gmra.mrb[20].mxu1 %vm11234_vm3, %v25241_v25 }
 0x60c   :  { %15009 = vmatpush1.bf16.msra.mxu1 %v15008_v61  ;;  %12112 = vmatprep.mubr.f32.mxu1 %v25931_v42  ;;  %v15040_v61 = vpack.c.bf16 %v11894_v55, %v11884_v36  ;;  %v11797_v36 = vld [vmem:[#allocation10] sm:$0xff]  ;;  %v11807_v55 = vld [vmem:[#allocation10 + $0x50] sm:$0xff] }
 0x60d   :  { %15011 = vmatprep.subr.bf16.mxu1 %v15010_v45  ;;  %v15042_v45 = vpack.c.bf16 %v11915_v30, %v11905_v43  ;;  %v11818_v43 = vld [vmem:[#allocation10 + $0xa8] sm:$0xff]  ;;  %v11828_v30 = vld [vmem:[#allocation10 + $0xf8] sm:$0xff] }
 0x610   :  { %15013 = vmatpush1.bf16.msra.mxu1 %v15012_v17  ;;  %v15044_v17 = vpack.c.bf16 %v11914_v3, %v11904_v18  ;;  %v11817_v18 = vld [vmem:[#allocation10 + $0xa0] sm:$0xff]  ;;  %v11827_v3 = vld [vmem:[#allocation10 + $0xf0] sm:$0xff] }
 0x611   :  { %15015 = vmatprep.subr.bf16.mxu1 %v15014_v34  ;;  %v15046_v34 = vpack.c.bf16 %v11935_v32, %v11925_v2  ;;  %v11838_v2 = vld [vmem:[#allocation10 + $0x148] sm:$0xff]  ;;  %v11848_v32 = vld [vmem:[#allocation10 + $0x198] sm:$0xff] }
 0x614   :  { %15017 = vmatpush1.bf16.msra.mxu1 %v15016_v4  ;;  %v15048_v4 = vpack.c.bf16 %v11934_v46, %v11924_v0  ;;  %v11837_v0 = vld [vmem:[#allocation10 + $0x140] sm:$0xff]  ;;  %v11847_v46 = vld [vmem:[#allocation10 + $0x190] sm:$0xff] }
 0x615   :  { %15019 = vmatprep.subr.bf16.mxu1 %v15018_v10  ;;  %v15050_v10 = vpack.c.bf16 %v11955_v19, %v11945_v33  ;;  %v11858_v33 = vld [vmem:[#allocation10 + $0x1e8] sm:$0xff]  ;;  %v11868_v19 = vld [vmem:[#allocation10 + $0x238] sm:$0xff] }
 0x618   :  { %15021 = vmatpush1.bf16.msra.mxu1 %v15020_v26  ;;  %v15052_v26 = vpack.c.bf16 %v11954_v40, %v11944_v8  ;;  %v11857_v8 = vld [vmem:[#allocation10 + $0x1e0] sm:$0xff]  ;;  %v11867_v40 = vld [vmem:[#allocation10 + $0x230] sm:$0xff] }
 0x619   :  { %15023 = vmatprep.subr.bf16.mxu1 %v15022_v56  ;;  %v15054_v56 = vpack.c.bf16 %v11897_v22, %v11887_v6  ;;  %v11800_v6 = vld [vmem:[#allocation10 + $0x18] sm:$0xff]  ;;  %v11810_v22 = vld [vmem:[#allocation10 + $0x68] sm:$0xff] }
 0x61b   :  { %14456 = vmatmul.mubr.msk.f32.vlgmr.msra.gmra.mrb[22].mxu1 %vm11234_vm3, %v25241_v25 }
 0x61c   :  { %15025 = vmatpush1.bf16.msra.mxu1 %v15024_v21  ;;  %12183 = vmatprep.mubr.f32.mxu1 %v25931_v42  ;;  %v15056_v21 = vpack.c.bf16 %v11896_v23, %v11886_v59  ;;  %v11799_v59 = vld [vmem:[#allocation10 + $0x10] sm:$0xff]  ;;  %v11809_v23 = vld [vmem:[#allocation10 + $0x60] sm:$0xff] }
 0x61d   :  { %15027 = vmatprep.subr.bf16.mxu1 %v15026_v53  ;;  %v15058_v53 = vpack.c.bf16 %v11917_v20, %v11907_v28  ;;  %v11820_v28 = vld [vmem:[#allocation10 + $0xb8] sm:$0xff]  ;;  %v11830_v20 = vld [vmem:[#allocation10 + $0x108] sm:$0xff] }
 0x620   :  { %15029 = vmatpush1.bf16.msra.mxu1 %v15028_v1  ;;  %v15060_v1 = vpack.c.bf16 %v11916_v9, %v11906_v49  ;;  %v15090_v49 = vpack.c.bf16 %v11830_v20, %v11820_v28  ;;  %v11819_v9 = vld [vmem:[#allocation10 + $0xb0] sm:$0xff] }
 0x621   :  { %15031 = vmatprep.subr.bf16.mxu1 %v15030_v44  ;;  %v15062_v44 = vpack.c.bf16 %v11937_v58, %v11927_v60  ;;  %v11829_v60 = vld [vmem:[#allocation10 + $0x100] sm:$0xff]  ;;  %v11840_v58 = vld [vmem:[#allocation10 + $0x158] sm:$0xff] }
 0x624   :  { %15033 = vmatpush1.bf16.msra.mxu1 %v15032_v57  ;;  %v15064_v57 = vpack.c.bf16 %v11936_v15, %v11926_v50  ;;  %v11839_v15 = vld [vmem:[#allocation10 + $0x150] sm:$0xff] }
 0x625   :  { %15035 = vmatprep.subr.bf16.mxu1 %v15034_v29  ;;  %v15066_v29 = vpack.c.bf16 %v11957_v5, %v11947_v54  ;;  %v11849_v54 = vld [vmem:[#allocation10 + $0x1a0] sm:$0xff] }
 0x628   :  { %15037 = vmatpush1.bf16.msra.mxu1 %v15036_v38  ;;  %v15068_v38 = vpack.c.bf16 %v11956_v7, %v11946_v48  ;;  %v11670_v48 = vcombine.high %v25227_v63, %v25227_v63 }
 0x629   :  { %15039 = vmatprep.subr.bf16.mxu1 %v15038_v62  ;;  %v15070_v62 = vpack.c.bf16 %v11808_v27, %v11798_v51  ;;  %v15096_v51 = vpack.c.bf16 %v11849_v54, %v11839_v15 }
 0x62b   :  { %14457 = vmatmul.mubr.msk.f32.vlgmr.msra.gmra.mrb[24].mxu1 %vm11234_vm3, %v25241_v25 }
 0x62c   :  { %15041 = vmatpush1.bf16.msra.mxu1 %v15040_v61  ;;  %12254 = vmatprep.mubr.f32.mxu1 %v25931_v42  ;;  %v15072_v61 = vpack.c.bf16 %v11807_v55, %v11797_v36  ;;  %v11869_v36 = vld [vmem:[#allocation10 + $0x240] sm:$0xff]  ;;  %v11802_v55 = vld [vmem:[#allocation10 + $0x28] sm:$0xff] }
 0x62d   :  { %15043 = vmatprep.subr.bf16.mxu1 %v15042_v45  ;;  %v15074_v45 = vpack.c.bf16 %v11828_v30, %v11818_v43  ;;  %v11812_v43 = vld [vmem:[#allocation10 + $0x78] sm:$0xff]  ;;  %v11684_v30 = vrot.slane %v11670_v48, %v25000_v24  ;;  %v11871_v48 = vld [vmem:[#allocation10 + $0x250] sm:$0xff] }
 0x630   :  { %15045 = vmatpush1.bf16.msra.mxu1 %v15044_v17  ;;  %v15076_v17 = vpack.c.bf16 %v11827_v3, %v11817_v18  ;;  %v11801_v3 = vld [vmem:[#allocation10 + $0x20] sm:$0xff] }
 0x631   :  { %15047 = vmatprep.subr.bf16.mxu1 %v15046_v34  ;;  %v15078_v34 = vpack.c.bf16 %v11848_v32, %v11838_v2  ;;  %v15102_v32 = vpack.c.bf16 %v11812_v43, %v11802_v55  ;;  %v11824_v55 = vld [vmem:[#allocation10 + $0xd8] sm:$0xff]  ;;  %v11834_v43 = vld [vmem:[#allocation10 + $0x128] sm:$0xff] }
 0x632   :  { %v15122_v14 = vpack.c.bf16 %v11834_v43, %v11824_v55  ;;  %v12747_v43 = vld [vmem:[#allocation10 + $0x640] sm:$0xff] }
 0x634   :  { %15049 = vmatpush1.bf16.msra.mxu1 %v15048_v4  ;;  %v15080_v4 = vpack.c.bf16 %v11847_v46, %v11837_v0  ;;  %v11686_v0 = vcombine.high %v11684_v30, %v11684_v30 }
 0x635   :  { %15051 = vmatprep.subr.bf16.mxu1 %v15050_v10  ;;  %v15082_v10 = vpack.c.bf16 %v11868_v19, %v11858_v33 }
 0x638   :  { %15053 = vmatpush1.bf16.msra.mxu1 %v15052_v26  ;;  %v12341_v26 = vrot.slane %v25221_v13, %v25000_v24  ;;  %v15092_v13 = vpack.c.bf16 %v11829_v60, %v11819_v9  ;;  %v11841_v60 = vld [vmem:[#allocation10 + $0x160] sm:$0xff] }
 0x639   :  { %15055 = vmatprep.subr.bf16.mxu1 %v15054_v56  ;;  %v15086_v56 = vpack.c.bf16 %v11810_v22, %v11800_v6  ;;  %v11831_v6 = vld [vmem:[#allocation10 + $0x110] sm:$0xff]  ;;  %v11842_v22 = vld [vmem:[#allocation10 + $0x168] sm:$0xff] }
 0x63b   :  { %14458 = vmatmul.mubr.msk.f32.vlgmr.msra.gmra.mrb[26].mxu1 %vm11234_vm3, %v25241_v25 }
 0x63c   :  { %15057 = vmatpush1.bf16.msra.mxu1 %v15056_v21  ;;  %12325 = vmatprep.mubr.f32.mxu1 %v25931_v42  ;;  %v15088_v21 = vpack.c.bf16 %v11809_v23, %v11799_v59 }
 0x63d   :  { %15059 = vmatprep.subr.bf16.mxu1 %v15058_v53  ;;  %v25261_v53 = vrot.slane %v12341_v26, %v25000_v24  ;;  %v11714_v26 = vrot.slane %v11686_v0, %v25000_v24  ;;  %v11806_v0 = vld [vmem:[#allocation10 + $0x48] sm:$0xff] }
 0x640   :  { %15061 = vmatpush1.bf16.msra.mxu1 %v15060_v1  ;;  %v11850_v1 = vld [vmem:[#allocation10 + $0x1a8] sm:$0xff] }
 0x641   :  { %15063 = vmatprep.subr.bf16.mxu1 %v15062_v44  ;;  %v15094_v50 = vpack.c.bf16 %v11850_v1, %v11840_v58  ;;  %v11851_v58 = vld [vmem:[#allocation10 + $0x1b0] sm:$0xff]  ;;  %v11862_v1 = vld [vmem:[#allocation10 + $0x208] sm:$0xff] }
 0x642   :  { %v15112_v15 = vpack.c.bf16 %v11851_v58, %v11841_v60  ;;  %v11865_v60 = vld [vmem:[#allocation10 + $0x220] sm:$0xff]  ;;  %v11875_v58 = vld [vmem:[#allocation10 + $0x270] sm:$0xff] }
 0x644   :  { %15065 = vmatpush1.bf16.msra.mxu1 %v15064_v57  ;;  %v11860_v57 = vld [vmem:[#allocation10 + $0x1f8] sm:$0xff] }
 0x645   :  { %15067 = vmatprep.subr.bf16.mxu1 %v15066_v29  ;;  %v11870_v29 = vld [vmem:[#allocation10 + $0x248] sm:$0xff] }
 0x648   :  { %15069 = vmatpush1.bf16.msra.mxu1 %v15068_v38  ;;  %v15098_v38 = vpack.c.bf16 %v11870_v29, %v11860_v57  ;;  %v11861_v29 = vld [vmem:[#allocation10 + $0x200] sm:$0xff] }
 0x649   :  { %15071 = vmatprep.subr.bf16.mxu1 %v15070_v62  ;;  %v11859_v62 = vld [vmem:[#allocation10 + $0x1f0] sm:$0xff] }
 0x64a   :  { %v15100_v18 = vpack.c.bf16 %v11869_v36, %v11859_v62  ;;  %v11803_v62 = vld [vmem:[#allocation10 + $0x30] sm:$0xff]  ;;  %v11813_v36 = vld [vmem:[#allocation10 + $0x80] sm:$0xff] }
 0x64b   :  { %14459 = vmatmul.mubr.msk.f32.vlgmr.msra.gmra.mrb[28].mxu1 %vm11234_vm3, %v25241_v25  ;;  %v15084_v25 = vpack.c.bf16 %v11867_v40, %v11857_v8 }
 0x64c   :  { %15073 = vmatpush1.bf16.msra.mxu1 %v15072_v61  ;;  %12415 = vmatprep.mubr.f32.mxu1 %v25931_v42 }
 0x64d   :  { %15075 = vmatprep.subr.bf16.mxu1 %v15074_v45 }
 0x650   :  { %15077 = vmatpush1.bf16.msra.mxu1 %v15076_v17  ;;  %v11811_v17 = vld [vmem:[#allocation10 + $0x70] sm:$0xff] }
 0x651   :  { %15079 = vmatprep.subr.bf16.mxu1 %v15078_v34  ;;  %v11832_v34 = vld [vmem:[#allocation10 + $0x118] sm:$0xff]  ;;  %v15104_v33 = vpack.c.bf16 %v11811_v17, %v11801_v3  ;;  %v15130_v17 = vpack.c.bf16 %v11874_v12, %v11864_v52  ;;  %v12709_v12 = vld [vmem:[#allocation10 + $0x510] sm:$0xff] }
 0x654   :  { %15081 = vmatpush1.bf16.msra.mxu1 %v15080_v4  ;;  %v11821_v4 = vld [vmem:[#allocation10 + $0xc0] sm:$0xff] }
 0x655   :  { %15083 = vmatprep.subr.bf16.mxu1 %v15082_v10  ;;  %v11716_v10 = vcombine.high %v25233_v35, %v25233_v35  ;;  %v15108_v28 = vpack.c.bf16 %v11831_v6, %v11821_v4  ;;  %v11805_v4 = vld [vmem:[#allocation10 + $0x40] sm:$0xff] }
 0x658   :  { %15085 = vmatpush1.bf16.msra.mxu1 %v15084_v25  ;;  %v11852_v25 = vld [vmem:[#allocation10 + $0x1b8] sm:$0xff] }
 0x659   :  { %15087 = vmatprep.subr.bf16.mxu1 %v15086_v56  ;;  %v15110_v20 = vpack.c.bf16 %v11852_v25, %v11842_v22  ;;  %v11825_v22 = vld [vmem:[#allocation10 + $0xe0] sm:$0xff]  ;;  %v11835_v25 = vld [vmem:[#allocation10 + $0x130] sm:$0xff] }
 0x65b   :  { %14460 = vmatmul.mubr.msk.f32.vlgmr.msra.gmra.mrb[20].mxu1 %vm11234_vm3, %v25261_v53 }
 0x65c   :  { %15089 = vmatpush1.bf16.msra.mxu1 %v15088_v21  ;;  %12486 = vmatprep.mubr.f32.mxu1 %v25931_v42 }
 0x65d   :  { %15091 = vmatprep.subr.bf16.mxu1 %v15090_v49 }
 0x65f   :  { %v14575_v44 = vpop.f32.mrb[102].mxu0 }
 0x660   :  { %v14576_v5 = vpop.f32.mrb[103].mxu0  ;;  %15093 = vmatpush1.bf16.msra.mxu1 %v15092_v13  ;;  %v11872_v13 = vld [vmem:[#allocation10 + $0x258] sm:$0xff] }
 0x661   :  { %v14577_v7 = vadd.f32 %v14576_v5, %v14575_v44  ;;  %15095 = vmatprep.subr.bf16.mxu1 %v15094_v50  ;;  %v15114_v57 = vpack.c.bf16 %v11872_v13, %v11862_v1  ;;  %v12708_v1 = vld [vmem:[#allocation10 + $0x508] sm:$0xff]  ;;  %v12718_v13 = vld [vmem:[#allocation10 + $0x558] sm:$0xff] }
 0x663   :  { %v11383_v27 = vadd.f32 %v14577_v7, %v25066_v47  ;;  %v11822_v47 = vld [vmem:[#allocation10 + $0xc8] sm:$0xff]  ;;  %v11804_v7 = vld [vmem:[#allocation10 + $0x38] sm:$0xff] }
 0x664   :  { %v14578_v45 = vpop.f32.mrb[104].mxu0  ;;  %15097 = vmatpush1.bf16.msra.mxu1 %v15096_v51  ;;  %v15106_v19 = vpack.c.bf16 %v11832_v34, %v11822_v47  ;;  %v11814_v51 = vld [vmem:[#allocation10 + $0x88] sm:$0xff]  ;;  %v11863_v47 = vld [vmem:[#allocation10 + $0x210] sm:$0xff]  ;;  %v11873_v34 = vld [vmem:[#allocation10 + $0x260] sm:$0xff] }
 0x665   :  { %v11482_v61 = vadd.f32 %v25223_v31, %v11383_v27  ;;  %v14579_v2 = vpop.f32.mrb[105].mxu0  ;;  %15099 = vmatprep.subr.bf16.mxu1 %v15098_v38  ;;  %v11700_v31 = vrot.slane %v11684_v30, %v25000_v24  ;;  %v15116_v27 = vpack.c.bf16 %v11871_v48, %v11861_v29  ;;  %v15118_v38 = vpack.c.bf16 %v11814_v51, %v11804_v7  ;;  %v11844_v45 = vld [vmem:[#allocation10 + $0x178] sm:$0xff]  ;;  %v12727_v51 = vld [vmem:[#allocation10 + $0x5a0] sm:$0xff] }
 0x666   :  { %v15120_v30 = vpack.c.bf16 %v11813_v36, %v11803_v62  ;;  %v11843_v2 = vld [vmem:[#allocation10 + $0x170] sm:$0xff]  ;;  %v12738_v29 = vld [vmem:[#allocation10 + $0x5f8] sm:$0xff] }
 0x667   :  { %v11494_v63 = vmax.f32 %v11482_v61, 0.0  ;;  %v11715_v35 = vcombine.high %v11700_v31, %v11700_v31  ;;  %v11833_v61 = vld [vmem:[#allocation10 + $0x120] sm:$0xff]  ;;  %v12758_v62 = vld [vmem:[#allocation10 + $0x698] sm:$0xff] }
 0x668   :  { %15101 = vmatpush1.bf16.msra.mxu1 %v15100_v18  ;;  %v11854_v18 = vld [vmem:[#allocation10 + $0x1c8] sm:$0xff] }
 0x669   :  { %v11723_v46 = vrot.slane %v11494_v63, %v25000_v24  ;;  %15103 = vmatprep.subr.bf16.mxu1 %v15102_v32  ;;  %v15126_v63 = vpack.c.bf16 %v11854_v18, %v11844_v45  ;;  %v11853_v32 = vld [vmem:[#allocation10 + $0x1c0] sm:$0xff] }
 0x66a   :  { %v12767_v18 = vld [vmem:[#allocation10 + $0x6e0] sm:$0xff] }
 0x66b   :  { %v11724_v8 = vcombine.high %v11723_v46, %v11723_v46  ;;  %v11731_v40 = vrot.slane %v11723_v46, %v25000_v24  ;;  %14461 = vmatmul.mubr.msk.f32.vlgmr.msra.gmra.mrb[22].mxu1 %vm11234_vm3, %v25261_v53  ;;  %v11816_v46 = vld [vmem:[#allocation10 + $0x98] sm:$0xff] }
 0x66c   :  { %15105 = vmatpush1.bf16.msra.mxu1 %v15104_v33  ;;  %12557 = vmatprep.mubr.f32.mxu1 %v25931_v42  ;;  %v15132_v33 = vpack.c.bf16 %v11873_v34, %v11863_v47  ;;  %v12740_v47 = vld [vmem:[#allocation10 + $0x608] sm:$0xff] }
 0x66d   :  { %v11738_v56 = vrot.slane %v11724_v8, %v25000_v24  ;;  %v11739_v59 = vcombine.high %v11731_v40, %v11731_v40  ;;  %v11785_v23 = vmax.f32 %v11716_v10, %v11731_v40  ;;  %15107 = vmatprep.subr.bf16.mxu1 %v15106_v19  ;;  %v15134_v19 = vpack.c.bf16 %v11816_v46, %v11806_v0  ;;  %v11826_v10 = vld [vmem:[#allocation10 + $0xe8] sm:$0xff]  ;;  %v11836_v8 = vld [vmem:[#allocation10 + $0x138] sm:$0xff] }
 0x66e   :  { %v15138_v6 = vpack.c.bf16 %v11836_v8, %v11826_v10  ;;  %v12749_v8 = vld [vmem:[#allocation10 + $0x650] sm:$0xff] }
 0x66f   :  { %v11740_v21 = vcombine.high %v11738_v56, %v11738_v56  ;;  %v11786_v49 = vmax.f32 %v11700_v31, %v11738_v56  ;;  %v11787_v9 = vmax.f32 %v11714_v26, %v11739_v59  ;;  %v11815_v31 = vld [vmem:[#allocation10 + $0x90] sm:$0xff]  ;;  %v11846_v26 = vld [vmem:[#allocation10 + $0x188] sm:$0xff]  ;;  %v11856_v56 = vld [vmem:[#allocation10 + $0x1d8] sm:$0xff]  ;;  %v15140_v59 = vpack.c.bf16 %v11835_v25, %v11825_v22 }
 0x670   :  { %15109 = vmatpush1.bf16.msra.mxu1 %v15108_v28  ;;  %v15136_v40 = vpack.c.bf16 %v11815_v31, %v11805_v4  ;;  %v11845_v28 = vld [vmem:[#allocation10 + $0x180] sm:$0xff]  ;;  %v12750_v4 = vld [vmem:[#allocation10 + $0x658] sm:$0xff]  ;;  %v12760_v31 = vld [vmem:[#allocation10 + $0x6a8] sm:$0xff] }
 0x671   :  { %v11788_v44 = vmax.f32 %v11715_v35, %v11740_v21  ;;  %v11795_v50 = vmax.f32 %v11785_v23, %v11786_v49  ;;  %15111 = vmatprep.subr.bf16.mxu1 %v15110_v20  ;;  %v15142_v23 = vpack.c.bf16 %v11856_v56, %v11846_v26  ;;  %v11855_v20 = vld [vmem:[#allocation10 + $0x1d0] sm:$0xff]  ;;  %v11866_v35 = vld [vmem:[#allocation10 + $0x228] sm:$0xff]  ;;  %v11876_v21 = vld [vmem:[#allocation10 + $0x278] sm:$0xff]  ;;  %v15174_v10 = vpack.c.bf16 %v12760_v31, %v12750_v4 }
 0x672   :  { %v15144_v49 = vpack.c.bf16 %v11855_v20, %v11845_v28  ;;  %v12780_v22 = vld [vmem:[#allocation10 + $0x748] sm:$0xff]  ;;  %v12769_v56 = vld [vmem:[#allocation10 + $0x6f0] sm:$0xff]  ;;  %v12722_v28 = vld [vmem:[#allocation10 + $0x578] sm:$0xff] }
 0x673   :  { %v11796_v54 = vmax.f32 %v11787_v9, %v11788_v44  ;;  %v25284_v5 = vcombine.low %v11791_v39, %v11795_v50  ;;  %v11823_v39 = vld [vmem:[#allocation10 + $0xd0] sm:$0xff]  ;;  %v15146_v9 = vpack.c.bf16 %v11876_v21, %v11866_v35  ;;  %v15148_v44 = vpack.c.bf16 %v11875_v58, %v11865_v60  ;;  %v12711_v21 = vld [vmem:[#allocation10 + $0x520] sm:$0xff]  ;;  %v12742_v60 = vld [vmem:[#allocation10 + $0x618] sm:$0xff] }
 0x674   :  { %15113 = vmatpush1.bf16.msra.mxu1 %v15112_v15  ;;  %v15124_v3 = vpack.c.bf16 %v11833_v61, %v11823_v39  ;;  %v15150_v50 = vpack.c.bf16 %v12718_v13, %v12708_v1  ;;  %v12707_v15 = vld [vmem:[#allocation10 + $0x500] sm:$0xff]  ;;  %v12778_v39 = vld [vmem:[#allocation10 + $0x738] sm:$0xff] }
 0x675   :  { %15115 = vmatprep.subr.bf16.mxu1 %v15114_v57  ;;  %v25289_v37 = vcombine.low %v11792_v11, %v11796_v54  ;;  %v15128_v11 = vpack.c.bf16 %v11853_v32, %v11843_v2  ;;  %v12717_v54 = vld [vmem:[#allocation10 + $0x550] sm:$0xff]  ;;  %v12728_v57 = vld [vmem:[#allocation10 + $0x5a8] sm:$0xff]  ;;  %v12796_v32 = vrot.slane %v25284_v5, %v25000_v24  ;;  %v12731_v13 = vld [vmem:[#allocation10 + $0x5c0] sm:$0xff] }
 0x676   :  { %v15152_v48 = vpack.c.bf16 %v12717_v54, %v12707_v15  ;;  %v15154_v7 = vpack.c.bf16 %v12738_v29, %v12728_v57  ;;  %v12720_v2 = vld [vmem:[#allocation10 + $0x568] sm:$0xff]  ;;  %v12762_v15 = vld [vmem:[#allocation10 + $0x6b8] sm:$0xff]  ;;  %v12751_v54 = vld [vmem:[#allocation10 + $0x660] sm:$0xff] }
 0x677   :  { %v25303_v0 = vrot.slane %v12796_v32, %v25000_v24  ;;  %v12761_v57 = vld [vmem:[#allocation10 + $0x6b0] sm:$0xff]  ;;  %v13716_v29 = vld [vmem:[#allocation11 + $0x80] sm:$0xff] }
 0x678   :  { %15117 = vmatpush1.bf16.msra.mxu1 %v15116_v27  ;;  %v12737_v27 = vld [vmem:[#allocation10 + $0x5f0] sm:$0xff] }
 0x679   :  { %15119 = vmatprep.subr.bf16.mxu1 %v15118_v38  ;;  %v12748_v38 = vld [vmem:[#allocation10 + $0x648] sm:$0xff]  ;;  %v15156_v36 = vpack.c.bf16 %v12737_v27, %v12727_v51 }
 0x67a   :  { %v15158_v55 = vpack.c.bf16 %v12758_v62, %v12748_v38  ;;  %v13701_v38 = vld [vmem:[#allocation11 + $0x8] sm:$0xff]  ;;  %v13718_v62 = vld [vmem:[#allocation11 + $0x90] sm:$0xff] }
 0x67b   :  { %14462 = vmatmul.mubr.msk.f32.vlgmr.msra.gmra.mrb[24].mxu1 %vm11234_vm3, %v25261_v53 }
 0x67c   :  { %15121 = vmatpush1.bf16.msra.mxu1 %v15120_v30  ;;  %12628 = vmatprep.mubr.f32.mxu1 %v25931_v42  ;;  %v12757_v30 = vld [vmem:[#allocation10 + $0x690] sm:$0xff] }
 0x67d   :  { %15123 = vmatprep.subr.bf16.mxu1 %v15122_v14  ;;  %v12768_v14 = vld [vmem:[#allocation10 + $0x6e8] sm:$0xff]  ;;  %v15160_v61 = vpack.c.bf16 %v12757_v30, %v12747_v43 }
 0x67e   :  { %v15162_v45 = vpack.c.bf16 %v12778_v39, %v12768_v14  ;;  %v13702_v14 = vld [vmem:[#allocation11 + $0x10] sm:$0xff]  ;;  %v13703_v39 = vld [vmem:[#allocation11 + $0x18] sm:$0xff] }
 0x680   :  { %15125 = vmatpush1.bf16.msra.mxu1 %v15124_v3  ;;  %v12777_v3 = vld [vmem:[#allocation10 + $0x730] sm:$0xff] }
 0x681   :  { %15127 = vmatprep.subr.bf16.mxu1 %v15126_v63  ;;  %v12710_v63 = vld [vmem:[#allocation10 + $0x518] sm:$0xff] }
 0x682   :  { %v15166_v52 = vpack.c.bf16 %v12720_v2, %v12710_v63  ;;  %v15316_v63 = vpack.c.bf16 %v13703_v39, %v13702_v14  ;;  %v15192_v2 = vpack.c.bf16 %v12761_v57, %v12751_v54  ;;  %v13710_v57 = vld [vmem:[#allocation11 + $0x50] sm:$0xff]  ;;  %v13713_v14 = vld [vmem:[#allocation11 + $0x68] sm:$0xff] }
 0x684   :  { %15129 = vmatpush1.bf16.msra.mxu1 %v15128_v11  ;;  %v12719_v11 = vld [vmem:[#allocation10 + $0x560] sm:$0xff] }
 0x685   :  { %15131 = vmatprep.subr.bf16.mxu1 %v15130_v17  ;;  %v12730_v17 = vld [vmem:[#allocation10 + $0x5b8] sm:$0xff]  ;;  %v15168_v34 = vpack.c.bf16 %v12719_v11, %v12709_v12  ;;  %v13705_v12 = vld [vmem:[#allocation11 + $0x28] sm:$0xff] }
 0x686   :  { %v15170_v46 = vpack.c.bf16 %v12740_v47, %v12730_v17  ;;  %v12781_v17 = vld [vmem:[#allocation10 + $0x750] sm:$0xff] }
 0x687   :  { %v13722_v47 = vld [vmem:[#allocation11 + $0xb0] sm:$0xff] }
 0x688   :  { %15133 = vmatpush1.bf16.msra.mxu1 %v15132_v33  ;;  %v12729_v33 = vld [vmem:[#allocation10 + $0x5b0] sm:$0xff] }
 0x689   :  { %15135 = vmatprep.subr.bf16.mxu1 %v15134_v19  ;;  %v12739_v19 = vld [vmem:[#allocation10 + $0x600] sm:$0xff] }
 0x68a   :  { %v15172_v5 = vpack.c.bf16 %v12739_v19, %v12729_v33  ;;  %v12724_v33 = vld [vmem:[#allocation10 + $0x588] sm:$0xff] }
 0x68b   :  { %14463 = vmatmul.mubr.msk.f32.vlgmr.msra.gmra.mrb[26].mxu1 %vm11234_vm3, %v25261_v53 }
 0x68c   :  { %15137 = vmatpush1.bf16.msra.mxu1 %v15136_v40  ;;  %12699 = vmatprep.mubr.f32.mxu1 %v25931_v42  ;;  %v12759_v40 = vld [vmem:[#allocation10 + $0x6a0] sm:$0xff] }
 0x68d   :  { %15139 = vmatprep.subr.bf16.mxu1 %v15138_v6  ;;  %v12770_v6 = vld [vmem:[#allocation10 + $0x6f8] sm:$0xff]  ;;  %v15176_v25 = vpack.c.bf16 %v12759_v40, %v12749_v8  ;;  %v12713_v40 = vld [vmem:[#allocation10 + $0x530] sm:$0xff] }
 0x68e   :  { %v15178_v26 = vpack.c.bf16 %v12780_v22, %v12770_v6  ;;  %v12723_v6 = vld [vmem:[#allocation10 + $0x580] sm:$0xff]  ;;  %v12734_v22 = vld [vmem:[#allocation10 + $0x5d8] sm:$0xff] }
 0x690   :  { %15141 = vmatpush1.bf16.msra.mxu1 %v15140_v59  ;;  %v12779_v59 = vld [vmem:[#allocation10 + $0x740] sm:$0xff] }
 0x691   :  { %15143 = vmatprep.subr.bf16.mxu1 %v15142_v23  ;;  %v12712_v23 = vld [vmem:[#allocation10 + $0x528] sm:$0xff]  ;;  %v15180_v20 = vpack.c.bf16 %v12779_v59, %v12769_v56 }
 0x692   :  { %v15182_v35 = vpack.c.bf16 %v12722_v28, %v12712_v23  ;;  %v13725_v56 = vld [vmem:[#allocation11 + $0xc8] sm:$0xff]  ;;  %v15200_v23 = vpack.c.bf16 %v12723_v6, %v12713_v40  ;;  %v12733_v28 = vld [vmem:[#allocation10 + $0x5d0] sm:$0xff]  ;;  %v12786_v40 = vld [vmem:[#allocation10 + $0x778] sm:$0xff] }
 0x694   :  { %15145 = vmatpush1.bf16.msra.mxu1 %v15144_v49  ;;  %v12721_v49 = vld [vmem:[#allocation10 + $0x570] sm:$0xff] }
 0x695   :  { %15147 = vmatprep.subr.bf16.mxu1 %v15146_v9  ;;  %v12732_v9 = vld [vmem:[#allocation10 + $0x5c8] sm:$0xff]  ;;  %v15184_v58 = vpack.c.bf16 %v12721_v49, %v12711_v21  ;;  %v12743_v49 = vld [vmem:[#allocation10 + $0x620] sm:$0xff] }
 0x696   :  { %v15186_v1 = vpack.c.bf16 %v12742_v60, %v12732_v9  ;;  %v13726_v60 = vld [vmem:[#allocation11 + $0xd0] sm:$0xff] }
 0x698   :  { %15149 = vmatpush1.bf16.msra.mxu1 %v15148_v44  ;;  %v12741_v44 = vld [vmem:[#allocation10 + $0x610] sm:$0xff] }
 0x699   :  { %15151 = vmatprep.subr.bf16.mxu1 %v15150_v50  ;;  %v12752_v50 = vld [vmem:[#allocation10 + $0x668] sm:$0xff]  ;;  %v15188_v51 = vpack.c.bf16 %v12741_v44, %v12731_v13 }
 0x69a   :  { %v12764_v13 = vld [vmem:[#allocation10 + $0x6c8] sm:$0xff] }
 0x69b   :  { %14464 = vmatmul.mubr.msk.f32.vlgmr.msra.gmra.mrb[28].mxu1 %vm11234_vm3, %v25261_v53  ;;  %v15164_v53 = vpack.c.bf16 %v12777_v3, %v12767_v18  ;;  %v12782_v18 = vld [vmem:[#allocation10 + $0x758] sm:$0xff]  ;;  %v13721_v3 = vld [vmem:[#allocation11 + $0xa8] sm:$0xff] }
 0x69c   :  { %15153 = vmatpush1.bf16.msra.mxu1 %v15152_v48  ;;  %12870 = vmatprep.mubr.f32.mxu1 %v25931_v42  ;;  %v13717_v48 = vld [vmem:[#allocation11 + $0x88] sm:$0xff] }
 0x69d   :  { %15155 = vmatprep.subr.bf16.mxu1 %v15154_v7  ;;  %v13700_v7 = vld [vmem:[#allocation11] sm:$0xff]  ;;  %v15310_v27 = vpack.c.bf16 %v13717_v48, %v13716_v29  ;;  %v13711_v29 = vld [vmem:[#allocation11 + $0x58] sm:$0xff] }
 0x69e   :  { %v15312_v43 = vpack.c.bf16 %v13701_v38, %v13700_v7  ;;  %v12763_v7 = vld [vmem:[#allocation10 + $0x6c0] sm:$0xff]  ;;  %v12774_v38 = vld [vmem:[#allocation10 + $0x718] sm:$0xff] }
 0x69f   :  { %15311 = vmatprep.subr.bf16.mxu0 %v15310_v27  ;;  %v13729_v27 = vld [vmem:[#allocation11 + $0xe8] sm:$0xff] }
 0x6a0   :  { %15157 = vmatpush1.bf16.msra.mxu1 %v15156_v36  ;;  %v13719_v36 = vld [vmem:[#allocation11 + $0x98] sm:$0xff]  ;;  %15313 = vmatpush3.bf16.msra.mxu0 %v15312_v43 }
 0x6a1   :  { %15159 = vmatprep.subr.bf16.mxu1 %v15158_v55  ;;  %v15190_v55 = vpack.c.bf16 %v12762_v15, %v12752_v50  ;;  %v15314_v30 = vpack.c.bf16 %v13719_v36, %v13718_v62  ;;  %v15204_v50 = vpack.c.bf16 %v12743_v49, %v12733_v28  ;;  %v12753_v15 = vld [vmem:[#allocation10 + $0x670] sm:$0xff]  ;;  %v12784_v62 = vld [vmem:[#allocation10 + $0x768] sm:$0xff]  ;;  %v15332_v36 = vpack.c.bf16 %v13711_v29, %v13710_v57  ;;  %v13203_v49 = vld [vmem:[#allocation10 + $0x878] sm:$0xff] }
 0x6a2   :  { %v15210_v39 = vpack.c.bf16 %v12784_v62, %v12774_v38  ;;  %v13222_v57 = vld [vmem:[#allocation10 + $0x910] sm:$0xff]  ;;  %v13233_v29 = vld [vmem:[#allocation10 + $0x968] sm:$0xff]  ;;  %v13175_v62 = vld [vmem:[#allocation10 + $0x798] sm:$0xff] }
 0x6a3   :  { %15315 = vmatprep.subr.bf16.mxu0 %v15314_v30  ;;  %v13712_v30 = vld [vmem:[#allocation11 + $0x60] sm:$0xff]  ;;  %v13242_v38 = vld [vmem:[#allocation10 + $0x9b0] sm:$0xff] }
 0x6a4   :  { %15161 = vmatpush1.bf16.msra.mxu1 %v15160_v61  ;;  %v13720_v61 = vld [vmem:[#allocation11 + $0xa0] sm:$0xff]  ;;  %15317 = vmatpush3.bf16.msra.mxu0 %v15316_v63  ;;  %v15336_v63 = vpack.c.bf16 %v13713_v14, %v13712_v30  ;;  %v13174_v30 = vld [vmem:[#allocation10 + $0x790] sm:$0xff] }
 0x6a5   :  { %15163 = vmatprep.subr.bf16.mxu1 %v15162_v45  ;;  %v12772_v45 = vld [vmem:[#allocation10 + $0x708] sm:$0xff]  ;;  %v15318_v32 = vpack.c.bf16 %v13721_v3, %v13720_v61  ;;  %v12773_v61 = vld [vmem:[#allocation10 + $0x710] sm:$0xff]  ;;  %v12726_v3 = vld [vmem:[#allocation10 + $0x598] sm:$0xff] }
 0x6a6   :  { %v15194_v11 = vpack.c.bf16 %v12782_v18, %v12772_v45  ;;  %v12783_v45 = vld [vmem:[#allocation10 + $0x760] sm:$0xff]  ;;  %v12716_v18 = vld [vmem:[#allocation10 + $0x548] sm:$0xff] }
 0x6a7   :  { %15319 = vmatprep.subr.bf16.mxu0 %v15318_v32  ;;  %v12715_v32 = vld [vmem:[#allocation10 + $0x540] sm:$0xff] }
 0x6a8   :  { %15165 = vmatpush1.bf16.msra.mxu1 %v15164_v53  ;;  %v12771_v53 = vld [vmem:[#allocation10 + $0x700] sm:$0xff] }
 0x6a9   :  { %15167 = vmatprep.subr.bf16.mxu1 %v15166_v52  ;;  %v13704_v52 = vld [vmem:[#allocation11 + $0x20] sm:$0xff]  ;;  %v15196_v4 = vpack.c.bf16 %v12781_v17, %v12771_v53  ;;  %v15214_v53 = vpack.c.bf16 %v12726_v3, %v12716_v18 }
 0x6aa   :  { %v15320_v19 = vpack.c.bf16 %v13705_v12, %v13704_v52  ;;  %v12725_v52 = vld [vmem:[#allocation10 + $0x590] sm:$0xff]  ;;  %v12736_v12 = vld [vmem:[#allocation10 + $0x5e8] sm:$0xff]  ;;  %v13184_v14 = vld [vmem:[#allocation10 + $0x7e0] sm:$0xff] }
 0x6ab   :  { %14465 = vmatmul.mubr.msk.f32.vlgmr.msra.gmra.mrb[20].mxu1 %vm11234_vm3, %v25303_v0  ;;  %v15216_v17 = vpack.c.bf16 %v12725_v52, %v12715_v32  ;;  %v13225_v32 = vld [vmem:[#allocation10 + $0x928] sm:$0xff] }
 0x6ac   :  { %15169 = vmatpush1.bf16.msra.mxu1 %v15168_v34  ;;  %12941 = vmatprep.mubr.f32.mxu1 %v25931_v42  ;;  %v13723_v34 = vld [vmem:[#allocation11 + $0xb8] sm:$0xff] }
 0x6ad   :  { %15171 = vmatprep.subr.bf16.mxu1 %v15170_v46  ;;  %v12714_v46 = vld [vmem:[#allocation10 + $0x538] sm:$0xff]  ;;  %v15322_v31 = vpack.c.bf16 %v13723_v34, %v13722_v47  ;;  %15321 = vmatpush3.bf16.msra.mxu0 %v15320_v19  ;;  %v12735_v34 = vld [vmem:[#allocation10 + $0x5e0] sm:$0xff] }
 0x6ae   :  { %v15198_v8 = vpack.c.bf16 %v12724_v33, %v12714_v46  ;;  %v12745_v46 = vld [vmem:[#allocation10 + $0x630] sm:$0xff]  ;;  %v12756_v33 = vld [vmem:[#allocation10 + $0x688] sm:$0xff]  ;;  %v12766_v19 = vld [vmem:[#allocation10 + $0x6d8] sm:$0xff] }
 0x6af   :  { %15323 = vmatprep.subr.bf16.mxu0 %v15322_v31  ;;  %v15222_v31 = vpack.c.bf16 %v12766_v19, %v12756_v33  ;;  %v13244_v33 = vld [vmem:[#allocation10 + $0x9c0] sm:$0xff]  ;;  %v13177_v19 = vld [vmem:[#allocation10 + $0x7a8] sm:$0xff] }
 0x6b0   :  { %15173 = vmatpush1.bf16.msra.mxu1 %v15172_v5  ;;  %v13706_v5 = vld [vmem:[#allocation11 + $0x30] sm:$0xff] }
 0x6b1   :  { %15175 = vmatprep.subr.bf16.mxu1 %v15174_v10  ;;  %v13707_v10 = vld [vmem:[#allocation11 + $0x38] sm:$0xff] }
 0x6b2   :  { %v15324_v59 = vpack.c.bf16 %v13707_v10, %v13706_v5  ;;  %v12755_v5 = vld [vmem:[#allocation10 + $0x680] sm:$0xff]  ;;  %v12765_v10 = vld [vmem:[#allocation10 + $0x6d0] sm:$0xff] }
 0x6b3   :  { %v15224_v6 = vpack.c.bf16 %v12765_v10, %v12755_v5  ;;  %v13176_v10 = vld [vmem:[#allocation10 + $0x7a0] sm:$0xff] }
 0x6b4   :  { %15177 = vmatpush1.bf16.msra.mxu1 %v15176_v25  ;;  %v12744_v25 = vld [vmem:[#allocation10 + $0x628] sm:$0xff]  ;;  %15325 = vmatpush3.bf16.msra.mxu0 %v15324_v59  ;;  %v13183_v59 = vld [vmem:[#allocation10 + $0x7d8] sm:$0xff] }
 0x6b5   :  { %15179 = vmatprep.subr.bf16.mxu1 %v15178_v26  ;;  %v13724_v26 = vld [vmem:[#allocation11 + $0xc0] sm:$0xff]  ;;  %v15202_v21 = vpack.c.bf16 %v12744_v25, %v12734_v22 }
 0x6b6   :  { %v15326_v9 = vpack.c.bf16 %v13725_v56, %v13724_v26  ;;  %v12775_v25 = vld [vmem:[#allocation10 + $0x720] sm:$0xff]  ;;  %v12785_v26 = vld [vmem:[#allocation10 + $0x770] sm:$0xff]  ;;  %v13173_v56 = vld [vmem:[#allocation10 + $0x788] sm:$0xff] }
 0x6b7   :  { %v15230_v28 = vpack.c.bf16 %v13183_v59, %v13173_v56  ;;  %v13206_v56 = vld [vmem:[#allocation10 + $0x890] sm:$0xff]  ;;  %v13217_v59 = vld [vmem:[#allocation10 + $0x8e8] sm:$0xff] }
 0x6b8   :  { %15181 = vmatpush1.bf16.msra.mxu1 %v15180_v20  ;;  %v13708_v20 = vld [vmem:[#allocation11 + $0x40] sm:$0xff]  ;;  %15327 = vmatprep.subr.bf16.mxu0 %v15326_v9 }
 0x6b9   :  { %15183 = vmatprep.subr.bf16.mxu1 %v15182_v35  ;;  %v13709_v35 = vld [vmem:[#allocation11 + $0x48] sm:$0xff] }
 0x6ba   :  { %v15328_v44 = vpack.c.bf16 %v13709_v35, %v13708_v20  ;;  %v13172_v20 = vld [vmem:[#allocation10 + $0x780] sm:$0xff]  ;;  %v13182_v35 = vld [vmem:[#allocation10 + $0x7d0] sm:$0xff] }
 0x6bb   :  { %14466 = vmatmul.mubr.msk.f32.vlgmr.msra.gmra.mrb[22].mxu1 %vm11234_vm3, %v25303_v0  ;;  %v15232_v9 = vpack.c.bf16 %v13182_v35, %v13172_v20  ;;  %v13216_v35 = vld [vmem:[#allocation10 + $0x8e0] sm:$0xff] }
 0x6bc   :  { %15185 = vmatpush1.bf16.msra.mxu1 %v15184_v58  ;;  %13012 = vmatprep.mubr.f32.mxu1 %v25931_v42  ;;  %v13727_v58 = vld [vmem:[#allocation11 + $0xd8] sm:$0xff] }
 0x6bd   :  { %15187 = vmatprep.subr.bf16.mxu1 %v15186_v1  ;;  %v12754_v1 = vld [vmem:[#allocation10 + $0x678] sm:$0xff]  ;;  %v15330_v54 = vpack.c.bf16 %v13727_v58, %v13726_v60  ;;  %15329 = vmatpush3.bf16.msra.mxu0 %v15328_v44  ;;  %v13192_v58 = vld [vmem:[#allocation10 + $0x820] sm:$0xff] }
 0x6be   :  { %v15206_v48 = vpack.c.bf16 %v12764_v13, %v12754_v1  ;;  %v13202_v1 = vld [vmem:[#allocation10 + $0x870] sm:$0xff]  ;;  %v13213_v13 = vld [vmem:[#allocation10 + $0x8c8] sm:$0xff]  ;;  %v13223_v44 = vld [vmem:[#allocation10 + $0x918] sm:$0xff] }
 0x6bf   :  { %15331 = vmatprep.subr.bf16.mxu0 %v15330_v54  ;;  %v13212_v54 = vld [vmem:[#allocation10 + $0x8c0] sm:$0xff] }
 0x6c0   :  { %15189 = vmatpush1.bf16.msra.mxu1 %v15188_v51  ;;  %v13728_v51 = vld [vmem:[#allocation11 + $0xe0] sm:$0xff] }
 0x6c1   :  { %15191 = vmatprep.subr.bf16.mxu1 %v15190_v55  ;;  %v15208_v55 = vpack.c.bf16 %v12763_v7, %v12753_v15  ;;  %v15334_v43 = vpack.c.bf16 %v13729_v27, %v13728_v51  ;;  %15333 = vmatpush3.bf16.msra.mxu0 %v15332_v36  ;;  %v15238_v15 = vpack.c.bf16 %v13223_v44, %v13213_v13  ;;  %v13232_v27 = vld [vmem:[#allocation10 + $0x960] sm:$0xff]  ;;  %v13185_v36 = vld [vmem:[#allocation10 + $0x7e8] sm:$0xff]  ;;  %v13246_v13 = vld [vmem:[#allocation10 + $0x9d0] sm:$0xff] }
 0x6c2   :  { %v15240_v7 = vpack.c.bf16 %v13222_v57, %v13212_v54  ;;  %v13179_v44 = vld [vmem:[#allocation10 + $0x7b8] sm:$0xff]  ;;  %v13178_v57 = vld [vmem:[#allocation10 + $0x7b0] sm:$0xff] }
 0x6c3   :  { %15335 = vmatprep.subr.bf16.mxu0 %v15334_v43  ;;  %v15246_v43 = vpack.c.bf16 %v13185_v36, %v13175_v62  ;;  %v13208_v62 = vld [vmem:[#allocation10 + $0x8a0] sm:$0xff]  ;;  %v13219_v36 = vld [vmem:[#allocation10 + $0x8f8] sm:$0xff] }
 0x6c4   :  { %15193 = vmatpush1.bf16.msra.mxu1 %v15192_v2  ;;  %v15212_v2 = vpack.c.bf16 %v12783_v45, %v12773_v61  ;;  %v13205_v61 = vld [vmem:[#allocation10 + $0x888] sm:$0xff]  ;;  %v15248_v45 = vpack.c.bf16 %v13184_v14, %v13174_v30  ;;  %v13218_v30 = vld [vmem:[#allocation10 + $0x8f0] sm:$0xff]  ;;  %v13228_v14 = vld [vmem:[#allocation10 + $0x940] sm:$0xff] }
 0x6c5   :  { %15195 = vmatprep.subr.bf16.mxu1 %v15194_v11  ;;  %v12746_v11 = vld [vmem:[#allocation10 + $0x638] sm:$0xff]  ;;  %15337 = vmatpush3.bf16.msra.mxu0 %v15336_v63  ;;  %v13194_v63 = vld [vmem:[#allocation10 + $0x830] sm:$0xff] }
 0x6c6   :  { %v15218_v47 = vpack.c.bf16 %v12746_v11, %v12736_v12  ;;  %v13214_v12 = vld [vmem:[#allocation10 + $0x8d0] sm:$0xff]  ;;  %v13224_v11 = vld [vmem:[#allocation10 + $0x920] sm:$0xff] }
 0x6c8   :  { %15197 = vmatpush1.bf16.msra.mxu1 %v15196_v4  ;;  %v15220_v4 = vpack.c.bf16 %v12745_v46, %v12735_v34  ;;  %v13234_v46 = vld [vmem:[#allocation10 + $0x970] sm:$0xff] }
 0x6c9   :  { %15199 = vmatprep.subr.bf16.mxu1 %v15198_v8  ;;  %v12776_v8 = vld [vmem:[#allocation10 + $0x728] sm:$0xff] }
 0x6ca   :  { %v15226_v22 = vpack.c.bf16 %v12786_v40, %v12776_v8  ;;  %v13186_v8 = vld [vmem:[#allocation10 + $0x7f0] sm:$0xff]  ;;  %v13197_v40 = vld [vmem:[#allocation10 + $0x848] sm:$0xff] }
 0x6cb   :  { %14467 = vmatmul.mubr.msk.f32.vlgmr.msra.gmra.mrb[24].mxu1 %vm11234_vm3, %v25303_v0 }
 0x6cc   :  { %15201 = vmatpush1.bf16.msra.mxu1 %v15200_v23  ;;  %13083 = vmatprep.mubr.f32.mxu1 %v25931_v42  ;;  %v15228_v23 = vpack.c.bf16 %v12785_v26, %v12775_v25  ;;  %v13196_v26 = vld [vmem:[#allocation10 + $0x840] sm:$0xff] }
 0x6cd   :  { %15203 = vmatprep.subr.bf16.mxu1 %v15202_v21  ;;  %v13193_v21 = vld [vmem:[#allocation10 + $0x828] sm:$0xff] }
 0x6ce   :  { %v15234_v60 = vpack.c.bf16 %v13203_v49, %v13193_v21  ;;  %v13226_v21 = vld [vmem:[#allocation10 + $0x930] sm:$0xff]  ;;  %v13237_v49 = vld [vmem:[#allocation10 + $0x988] sm:$0xff] }
 0x6d0   :  { %15205 = vmatpush1.bf16.msra.mxu1 %v15204_v50  ;;  %v15236_v50 = vpack.c.bf16 %v13202_v1, %v13192_v58  ;;  %v13236_v1 = vld [vmem:[#allocation10 + $0x980] sm:$0xff] }
 0x6d1   :  { %15207 = vmatprep.subr.bf16.mxu1 %v15206_v48  ;;  %v13243_v48 = vld [vmem:[#allocation10 + $0x9b8] sm:$0xff] }
 0x6d2   :  { %v15242_v51 = vpack.c.bf16 %v13243_v48, %v13233_v29  ;;  %v13188_v29 = vld [vmem:[#allocation10 + $0x800] sm:$0xff]  ;;  %v13199_v48 = vld [vmem:[#allocation10 + $0x858] sm:$0xff] }
 0x6d4   :  { %15209 = vmatpush1.bf16.msra.mxu1 %v15208_v55  ;;  %v13261_v55 = vrot.slane %v25289_v37, %v25000_v24 }
 0x6d5   :  { %15211 = vmatprep.subr.bf16.mxu1 %v15210_v39  ;;  %v13195_v39 = vld [vmem:[#allocation10 + $0x838] sm:$0xff] }
 0x6d6   :  { %v25323_v18 = vrot.slane %v13261_v55, %v25000_v24  ;;  %v15250_v3 = vpack.c.bf16 %v13205_v61, %v13195_v39  ;;  %v13245_v24 = vld [vmem:[#allocation10 + $0x9c8] sm:$0xff]  ;;  %v13239_v39 = vld [vmem:[#allocation10 + $0x998] sm:$0xff] }
 0x6d7   :  { %v13249_v61 = vld [vmem:[#allocation10 + $0x9e8] sm:$0xff] }
 0x6d8   :  { %15213 = vmatpush1.bf16.msra.mxu1 %v15212_v2  ;;  %v13204_v2 = vld [vmem:[#allocation10 + $0x880] sm:$0xff] }
 0x6d9   :  { %15215 = vmatprep.subr.bf16.mxu1 %v15214_v53  ;;  %v13215_v53 = vld [vmem:[#allocation10 + $0x8d8] sm:$0xff]  ;;  %v15252_v37 = vpack.c.bf16 %v13204_v2, %v13194_v63  ;;  %v13238_v63 = vld [vmem:[#allocation10 + $0x990] sm:$0xff]  ;;  %v13248_v2 = vld [vmem:[#allocation10 + $0x9e0] sm:$0xff] }
 0x6da   :  { %v15254_v52 = vpack.c.bf16 %v13225_v32, %v13215_v53  ;;  %v13181_v53 = vld [vmem:[#allocation10 + $0x7c8] sm:$0xff]  ;;  %v13191_v32 = vld [vmem:[#allocation10 + $0x818] sm:$0xff] }
 0x6db   :  { %14468 = vmatmul.mubr.msk.f32.vlgmr.msra.gmra.mrb[26].mxu1 %vm11234_vm3, %v25303_v0 }
 0x6dc   :  { %15217 = vmatpush1.bf16.msra.mxu1 %v15216_v17  ;;  %13154 = vmatprep.mubr.f32.mxu1 %v25931_v42  ;;  %v13235_v17 = vld [vmem:[#allocation10 + $0x978] sm:$0xff] }
 0x6dd   :  { %15219 = vmatprep.subr.bf16.mxu1 %v15218_v47  ;;  %v15256_v47 = vpack.c.bf16 %v13224_v11, %v13214_v12  ;;  %v15258_v34 = vpack.c.bf16 %v13245_v24, %v13235_v17  ;;  %v13180_v12 = vld [vmem:[#allocation10 + $0x7c0] sm:$0xff]  ;;  %v13190_v11 = vld [vmem:[#allocation10 + $0x810] sm:$0xff]  ;;  %v13201_v17 = vld [vmem:[#allocation10 + $0x868] sm:$0xff] }
 0x6de   :  { %v13211_v24 = vld [vmem:[#allocation10 + $0x8b8] sm:$0xff] }
 0x6e0   :  { %15221 = vmatpush1.bf16.msra.mxu1 %v15220_v4  ;;  %v13187_v4 = vld [vmem:[#allocation10 + $0x7f8] sm:$0xff] }
 0x6e1   :  { %15223 = vmatprep.subr.bf16.mxu1 %v15222_v31  ;;  %v15260_v31 = vpack.c.bf16 %v13244_v33, %v13234_v46  ;;  %v15262_v5 = vpack.c.bf16 %v13187_v4, %v13177_v19  ;;  %v13200_v46 = vld [vmem:[#allocation10 + $0x860] sm:$0xff]  ;;  %v13210_v33 = vld [vmem:[#allocation10 + $0x8b0] sm:$0xff]  ;;  %v13221_v19 = vld [vmem:[#allocation10 + $0x908] sm:$0xff] }
 0x6e2   :  { %v13231_v4 = vld [vmem:[#allocation10 + $0x958] sm:$0xff] }
 0x6e4   :  { %15225 = vmatpush1.bf16.msra.mxu1 %v15224_v6  ;;  %v13207_v6 = vld [vmem:[#allocation10 + $0x898] sm:$0xff] }
 0x6e5   :  { %15227 = vmatprep.subr.bf16.mxu1 %v15226_v22  ;;  %v15264_v22 = vpack.c.bf16 %v13186_v8, %v13176_v10  ;;  %v15266_v25 = vpack.c.bf16 %v13207_v6, %v13197_v40  ;;  %v13220_v10 = vld [vmem:[#allocation10 + $0x900] sm:$0xff]  ;;  %v13230_v8 = vld [vmem:[#allocation10 + $0x950] sm:$0xff]  ;;  %v13241_v40 = vld [vmem:[#allocation10 + $0x9a8] sm:$0xff] }
 0x6e6   :  { %v13251_v6 = vld [vmem:[#allocation10 + $0x9f8] sm:$0xff] }
 0x6e8   :  { %15229 = vmatpush1.bf16.msra.mxu1 %v15228_v23  ;;  %v13227_v23 = vld [vmem:[#allocation10 + $0x938] sm:$0xff] }
 0x6e9   :  { %15231 = vmatprep.subr.bf16.mxu1 %v15230_v28  ;;  %v15268_v28 = vpack.c.bf16 %v13206_v56, %v13196_v26  ;;  %v15270_v20 = vpack.c.bf16 %v13227_v23, %v13217_v59  ;;  %v13240_v26 = vld [vmem:[#allocation10 + $0x9a0] sm:$0xff]  ;;  %v13250_v56 = vld [vmem:[#allocation10 + $0x9f0] sm:$0xff]  ;;  %v13731_v23 = vld [vmem:[#allocation11 + $0xf8] sm:$0xff] }
 0x6ea   :  { %v15308_v59 = vpack.c.bf16 %v13250_v56, %v13240_v26  ;;  %v13745_v26 = vld [vmem:[#allocation11 + $0x168] sm:$0xff]  ;;  %v13762_v56 = vld [vmem:[#allocation11 + $0x1f0] sm:$0xff] }
 0x6eb   :  { %14469 = vmatmul.mubr.msk.f32.vlgmr.msra.gmra.mrb[28].mxu1 %vm11234_vm3, %v25303_v0  ;;  %v15244_v0 = vpack.c.bf16 %v13242_v38, %v13232_v27  ;;  %v13198_v38 = vld [vmem:[#allocation10 + $0x850] sm:$0xff] }
 0x6ec   :  { %15233 = vmatpush1.bf16.msra.mxu1 %v15232_v9  ;;  %13335 = vmatprep.mubr.f32.mxu1 %v25931_v42  ;;  %v13247_v9 = vld [vmem:[#allocation10 + $0x9d8] sm:$0xff]  ;;  %v15284_v55 = vpack.c.bf16 %v13208_v62, %v13198_v38  ;;  %v13734_v38 = vld [vmem:[#allocation11 + $0x110] sm:$0xff] }
 0x6ed   :  { %15235 = vmatprep.subr.bf16.mxu1 %v15234_v60  ;;  %v15272_v60 = vpack.c.bf16 %v13226_v21, %v13216_v35  ;;  %v15274_v58 = vpack.c.bf16 %v13247_v9, %v13237_v49  ;;  %v13715_v35 = vld [vmem:[#allocation11 + $0x78] sm:$0xff]  ;;  %v13748_v49 = vld [vmem:[#allocation11 + $0x180] sm:$0xff]  ;;  %v13749_v9 = vld [vmem:[#allocation11 + $0x188] sm:$0xff] }
 0x6ee   :  { %v13735_v62 = vld [vmem:[#allocation11 + $0x118] sm:$0xff] }
 0x6f0   :  { %15237 = vmatpush1.bf16.msra.mxu1 %v15236_v50  ;;  %v13189_v50 = vld [vmem:[#allocation10 + $0x808] sm:$0xff] }
 0x6f1   :  { %15239 = vmatprep.subr.bf16.mxu1 %v15238_v15  ;;  %v15276_v15 = vpack.c.bf16 %v13246_v13, %v13236_v1  ;;  %v15278_v54 = vpack.c.bf16 %v13189_v50, %v13179_v44  ;;  %v25343_v1 = vld [vmem:[%s25405_s6] sm:$0xff] }
 0x6f2   :  { %v13643_v13 = vrot.slane %v25343_v1, %v26741_v41  ;;  %v13732_v44 = vld [vmem:[#allocation11 + $0x100] sm:$0xff]  ;;  %v13733_v50 = vld [vmem:[#allocation11 + $0x108] sm:$0xff] }
 0x6f4   :  { %15241 = vmatpush1.bf16.msra.mxu1 %v15240_v7  ;;  %v13209_v7 = vld [vmem:[#allocation10 + $0x8a8] sm:$0xff] }
 0x6f5   :  { %15243 = vmatprep.subr.bf16.mxu1 %v15242_v51  ;;  %v15280_v51 = vpack.c.bf16 %v13188_v29, %v13178_v57  ;;  %v15282_v27 = vpack.c.bf16 %v13209_v7, %v13199_v48  ;;  %v13751_v57 = vld [vmem:[#allocation11 + $0x198] sm:$0xff]  ;;  %v15344_v7 = vpack.c.bf16 %v13733_v50, %v13732_v44 }
 0x6f8   :  { %15245 = vmatpush1.bf16.msra.mxu1 %v15244_v0  ;;  %v13229_v0 = vld [vmem:[#allocation10 + $0x948] sm:$0xff] }
 0x6f9   :  { %15247 = vmatprep.subr.bf16.mxu1 %v15246_v43  ;;  %v15286_v43 = vpack.c.bf16 %v13229_v0, %v13219_v36  ;;  %v13752_v36 = vld [vmem:[#allocation11 + $0x1a0] sm:$0xff]  ;;  %v13753_v0 = vld [vmem:[#allocation11 + $0x1a8] sm:$0xff] }
 0x6fb   :  { %14470 = vmatmul.mubr.msk.f32.vlgmr.msra.gmra.mrb[20].mxu1 %vm11234_vm3, %v25323_v18 }
 0x6fc   :  { %15249 = vmatpush1.bf16.msra.mxu1 %v15248_v45  ;;  %13406 = vmatprep.mubr.f32.mxu1 %v25931_v42  ;;  %v15288_v45 = vpack.c.bf16 %v13228_v14, %v13218_v30  ;;  %v13736_v30 = vld [vmem:[#allocation11 + $0x120] sm:$0xff]  ;;  %v13737_v14 = vld [vmem:[#allocation11 + $0x128] sm:$0xff] }
 0x6fd   :  { %15251 = vmatprep.subr.bf16.mxu1 %v15250_v3  ;;  %v15290_v3 = vpack.c.bf16 %v13249_v61, %v13239_v39  ;;  %v13754_v39 = vld [vmem:[#allocation11 + $0x1b0] sm:$0xff]  ;;  %v13755_v61 = vld [vmem:[#allocation11 + $0x1b8] sm:$0xff] }
 0x700   :  { %15253 = vmatpush1.bf16.msra.mxu1 %v15252_v37  ;;  %v15292_v37 = vpack.c.bf16 %v13248_v2, %v13238_v63  ;;  %v15354_v63 = vpack.c.bf16 %v13755_v61, %v13754_v39  ;;  %v13738_v2 = vld [vmem:[#allocation11 + $0x130] sm:$0xff] }
 0x701   :  { %15255 = vmatprep.subr.bf16.mxu1 %v15254_v52  ;;  %v15294_v52 = vpack.c.bf16 %v13191_v32, %v13181_v53  ;;  %v13739_v53 = vld [vmem:[#allocation11 + $0x138] sm:$0xff]  ;;  %v13756_v32 = vld [vmem:[#allocation11 + $0x1c0] sm:$0xff] }
 0x704   :  { %15257 = vmatpush1.bf16.msra.mxu1 %v15256_v47  ;;  %v15296_v47 = vpack.c.bf16 %v13190_v11, %v13180_v12  ;;  %v15356_v12 = vpack.c.bf16 %v13739_v53, %v13738_v2  ;;  %v13787_v2 = vld [vmem:[#allocation11 + $0x2b8] sm:$0xff]  ;;  %v13666_v53 = vsub.s32 6, %v27088_v16 }
 0x705   :  { %15259 = vmatprep.subr.bf16.mxu1 %v15258_v34  ;;  %v15298_v34 = vpack.c.bf16 %v13211_v24, %v13201_v17  ;;  %v13740_v17 = vld [vmem:[#allocation11 + $0x140] sm:$0xff]  ;;  %v13741_v24 = vld [vmem:[#allocation11 + $0x148] sm:$0xff] }
 0x708   :  { %15261 = vmatpush1.bf16.msra.mxu1 %v15260_v31  ;;  %v15300_v31 = vpack.c.bf16 %v13210_v33, %v13200_v46  ;;  %v13759_v46 = vld [vmem:[#allocation11 + $0x1d8] sm:$0xff] }
 0x709   :  { %15263 = vmatprep.subr.bf16.mxu1 %v15262_v5  ;;  %v15302_v5 = vpack.c.bf16 %v13231_v4, %v13221_v19  ;;  %v15360_v4 = vpack.c.bf16 %v13741_v24, %v13740_v17  ;;  %v13788_v17 = vld [vmem:[#allocation11 + $0x2c0] sm:$0xff]  ;;  %v13789_v24 = vld [vmem:[#allocation11 + $0x2c8] sm:$0xff] }
 0x70b   :  { %14471 = vmatmul.mubr.msk.f32.vlgmr.msra.gmra.mrb[22].mxu1 %vm11234_vm3, %v25323_v18 }
 0x70c   :  { %15265 = vmatpush1.bf16.msra.mxu1 %v15264_v22  ;;  %13477 = vmatprep.mubr.f32.mxu1 %v25931_v42  ;;  %v15304_v22 = vpack.c.bf16 %v13230_v8, %v13220_v10  ;;  %v13743_v10 = vld [vmem:[#allocation11 + $0x158] sm:$0xff]  ;;  %v13760_v8 = vld [vmem:[#allocation11 + $0x1e0] sm:$0xff] }
 0x70d   :  { %15267 = vmatprep.subr.bf16.mxu1 %v15266_v25  ;;  %v15306_v25 = vpack.c.bf16 %v13251_v6, %v13241_v40  ;;  %v13761_v40 = vld [vmem:[#allocation11 + $0x1e8] sm:$0xff] }
 0x710   :  { %15269 = vmatpush1.bf16.msra.mxu1 %v15268_v28 }
 0x711   :  { %15271 = vmatprep.subr.bf16.mxu1 %v15270_v20  ;;  %v13714_v20 = vld [vmem:[#allocation11 + $0x70] sm:$0xff] }
 0x712   :  { %v15340_v21 = vpack.c.bf16 %v13715_v35, %v13714_v20  ;;  %v13650_v20 = vsub.s32 2, %v27088_v16 }
 0x714   :  { %15273 = vmatpush1.bf16.msra.mxu1 %v15272_v60  ;;  %v15342_v60 = vpack.c.bf16 %v13749_v9, %v13748_v49  ;;  %v13747_v49 = vld [vmem:[#allocation11 + $0x178] sm:$0xff]  ;;  %v13780_v9 = vld [vmem:[#allocation11 + $0x280] sm:$0xff]  ;;  %v13651_v50 = vrot.slane %v25343_v1, %v13650_v20  ;;  %v13777_v20 = vld [vmem:[#allocation11 + $0x268] sm:$0xff] }
 0x715   :  { %15275 = vmatprep.subr.bf16.mxu1 %v15274_v58  ;;  %v13646_v58 = vsub.s32 1, %v27088_v16 }
 0x718   :  { %15277 = vmatpush1.bf16.msra.mxu1 %v15276_v15 }
 0x719   :  { %15279 = vmatprep.subr.bf16.mxu1 %v15278_v54  ;;  %v13750_v54 = vld [vmem:[#allocation11 + $0x190] sm:$0xff] }
 0x71b   :  { %14472 = vmatmul.mubr.msk.f32.vlgmr.msra.gmra.mrb[24].mxu1 %vm11234_vm3, %v25323_v18 }
 0x71c   :  { %15281 = vmatpush1.bf16.msra.mxu1 %v15280_v51  ;;  %13548 = vmatprep.mubr.f32.mxu1 %v25931_v42 }
 0x71d   :  { %15283 = vmatprep.subr.bf16.mxu1 %v15282_v27  ;;  %v15346_v27 = vpack.c.bf16 %v13751_v57, %v13750_v54  ;;  %v13764_v54 = vld [vmem:[#allocation11 + $0x200] sm:$0xff]  ;;  %v13765_v57 = vld [vmem:[#allocation11 + $0x208] sm:$0xff] }
 0x720   :  { %15285 = vmatpush1.bf16.msra.mxu1 %v15284_v55  ;;  %v15348_v55 = vpack.c.bf16 %v13735_v62, %v13734_v38  ;;  %v15376_v62 = vpack.c.bf16 %v13765_v57, %v13764_v54 }
 0x721   :  { %15287 = vmatprep.subr.bf16.mxu1 %v15286_v43  ;;  %v15350_v43 = vpack.c.bf16 %v13753_v0, %v13752_v36 }
 0x724   :  { %15289 = vmatpush1.bf16.msra.mxu1 %v15288_v45  ;;  %v15352_v45 = vpack.c.bf16 %v13737_v14, %v13736_v30  ;;  %v13784_v30 = vld [vmem:[#allocation11 + $0x2a0] sm:$0xff]  ;;  %v13785_v14 = vld [vmem:[#allocation11 + $0x2a8] sm:$0xff] }
 0x725   :  { %15291 = vmatprep.subr.bf16.mxu1 %v15290_v3  ;;  %v13654_v3 = vsub.s32 3, %v27088_v16  ;;  %v15382_v61 = vpack.c.bf16 %v13785_v14, %v13784_v30  ;;  %v13816_v30 = vld [vmem:[#allocation11 + $0x3a0] sm:$0xff] }
 0x728   :  { %15293 = vmatpush1.bf16.msra.mxu1 %v15292_v37  ;;  %v13757_v37 = vld [vmem:[#allocation11 + $0x1c8] sm:$0xff] }
 0x729   :  { %15295 = vmatprep.subr.bf16.mxu1 %v15294_v52  ;;  %v13655_v52 = vrot.slane %v25343_v1, %v13654_v3  ;;  %v15358_v11 = vpack.c.bf16 %v13757_v37, %v13756_v32  ;;  %v13769_v3 = vld [vmem:[#allocation11 + $0x228] sm:$0xff]  ;;  %v13670_v37 = vsub.s32 7, %v27088_v16 }
 0x72b   :  { %14473 = vmatmul.mubr.msk.f32.vlgmr.msra.gmra.mrb[26].mxu1 %vm11234_vm3, %v25323_v18 }
 0x72c   :  { %15297 = vmatpush1.bf16.msra.mxu1 %v15296_v47  ;;  %13619 = vmatprep.mubr.f32.mxu1 %v25931_v42  ;;  %v13730_v42 = vld [vmem:[#allocation11 + $0xf0] sm:$0xff] }
 0x72d   :  { %15299 = vmatprep.subr.bf16.mxu1 %v15298_v34  ;;  %v15338_v28 = vpack.c.bf16 %v13731_v23, %v13730_v42  ;;  %v13758_v34 = vld [vmem:[#allocation11 + $0x1d0] sm:$0xff]  ;;  %v13658_v42 = vsub.s32 4, %v27088_v16 }
 0x72f   :  { %15339 = vmatprep.subr.bf16.mxu0 %v15338_v28  ;;  %v13662_v28 = vsub.s32 5, %v27088_v16  ;;  %v13799_v16 = vld [vmem:[#allocation11 + $0x318] sm:$0xff] }
 0x730   :  { %15301 = vmatpush1.bf16.msra.mxu1 %v15300_v31  ;;  %15341 = vmatpush3.bf16.msra.mxu0 %v15340_v21  ;;  %v15362_v31 = vpack.c.bf16 %v13759_v46, %v13758_v34  ;;  %v13746_v21 = vld [vmem:[#allocation11 + $0x170] sm:$0xff]  ;;  %v13671_v34 = vrot.slane %v25343_v1, %v13670_v37  ;;  %v13803_v37 = vld [vmem:[#allocation11 + $0x338] sm:$0xff] }
 0x731   :  { %15303 = vmatprep.subr.bf16.mxu1 %v15302_v5  ;;  %15343 = vmatprep.subr.bf16.mxu0 %v15342_v60  ;;  %v13742_v5 = vld [vmem:[#allocation11 + $0x150] sm:$0xff]  ;;  %v13781_v60 = vld [vmem:[#allocation11 + $0x288] sm:$0xff]  ;;  %v15372_v44 = vpack.c.bf16 %v13747_v49, %v13746_v21  ;;  %v13795_v21 = vld [vmem:[#allocation11 + $0x2f8] sm:$0xff] }
 0x732   :  { %v15364_v6 = vpack.c.bf16 %v13743_v10, %v13742_v5  ;;  %v13790_v5 = vld [vmem:[#allocation11 + $0x2d0] sm:$0xff]  ;;  %v13791_v10 = vld [vmem:[#allocation11 + $0x2d8] sm:$0xff] }
 0x734   :  { %15305 = vmatpush1.bf16.msra.mxu1 %v15304_v22  ;;  %v15366_v22 = vpack.c.bf16 %v13761_v40, %v13760_v8 }
 0x735   :  { %15307 = vmatprep.subr.bf16.mxu1 %v15306_v25  ;;  %v13744_v25 = vld [vmem:[#allocation11 + $0x160] sm:$0xff] }
 0x736   :  { %v15368_v23 = vpack.c.bf16 %v13745_v26, %v13744_v25  ;;  %v15394_v25 = vpack.c.bf16 %v13791_v10, %v13790_v5  ;;  %v13774_v26 = vld [vmem:[#allocation11 + $0x250] sm:$0xff]  ;;  %v13825_v5 = vld [vmem:[#allocation11 + $0x3e8] sm:$0xff] }
 0x738   :  { %15309 = vmatpush1.bf16.msra.mxu1 %v15308_v59  ;;  %v13763_v59 = vld [vmem:[#allocation11 + $0x1f8] sm:$0xff] }
 0x739   :  { %v15370_v35 = vpack.c.bf16 %v13763_v59, %v13762_v56  ;;  %v13775_v56 = vld [vmem:[#allocation11 + $0x258] sm:$0xff]  ;;  %v13792_v59 = vld [vmem:[#allocation11 + $0x2e0] sm:$0xff] }
 0x73b   :  { %14474 = vmatmul.mubr.msk.f32.vlgmr.msra.gmra.mrb[28].mxu1 %vm11234_vm3, %v25323_v18  ;;  %v13647_v18 = vrot.slane %v25343_v1, %v13646_v58 }
 0x7ce   :  { %v13337_v15 = vpop.f32.mrb[20].mxu1 }
 0x7cf   :  { %v13339_v29 = vpop.f32.mrb[21].mxu1  ;;  %v13690_v51 = vadd.f32 %v13643_v13, %v13337_v15  ;;  %v13663_v13 = vrot.slane %v25343_v1, %v13662_v28  ;;  %v15374_v15 = vpack.c.bf16 %v13781_v60, %v13780_v9  ;;  %v13776_v28 = vld [vmem:[#allocation11 + $0x260] sm:$0xff]  ;;  %v25369_v9 = vld [vmem:[%s25405_s6 + $0x8] sm:$0x3] }
 0x7d0   :  { %v13691_v48 = vadd.f32 %v13647_v18, %v13339_v29  ;;  %v13659_v18 = vrot.slane %v25343_v1, %v13658_v42  ;;  %v15396_v42 = vpack.c.bf16 %v13775_v56, %v13774_v26  ;;  %v15400_v49 = vpack.c.bf16 %v13777_v20, %v13776_v28  ;;  %v13827_v26 = vld [vmem:[#allocation11 + $0x3f8] sm:$0xff]  ;;  %v13845_v28 = vld [vmem:[#allocation11 + $0x488] sm:$0xff] }
 0x7d2   :  { %13931 = vmatprep.mubr.f32.mxu0 %v13691_v48  ;;  %v13782_v48 = vld [vmem:[#allocation11 + $0x290] sm:$0xff] }
 0x7d3   :  { %13932 = vmatmul.mubr.f32.vlgmr.msra.gmra.mrb[106].mxu0 %v13690_v51 }
 0x7d4   :  { %15345 = vmatpush3.bf16.msra.mxu0 %v15344_v7  ;;  %v13783_v7 = vld [vmem:[#allocation11 + $0x298] sm:$0xff] }
 0x7d5   :  { %15347 = vmatprep.subr.bf16.mxu0 %v15346_v27  ;;  %v15378_v0 = vpack.c.bf16 %v13783_v7, %v13782_v48  ;;  %v13797_v48 = vld [vmem:[#allocation11 + $0x308] sm:$0xff] }
 0x7d8   :  { %15349 = vmatpush3.bf16.msra.mxu0 %v15348_v55  ;;  %v13766_v55 = vld [vmem:[#allocation11 + $0x210] sm:$0xff] }
 0x7d9   :  { %15351 = vmatprep.subr.bf16.mxu0 %v15350_v43  ;;  %v13767_v43 = vld [vmem:[#allocation11 + $0x218] sm:$0xff] }
 0x7da   :  { %v15380_v39 = vpack.c.bf16 %v13767_v43, %v13766_v55  ;;  %v13798_v43 = vld [vmem:[#allocation11 + $0x310] sm:$0xff] }
 0x7db   :  { %v15412_v14 = vpack.c.bf16 %v13799_v16, %v13798_v43  ;;  %v13834_v16 = vld [vmem:[#allocation11 + $0x430] sm:$0xff] }
 0x7dc   :  { %15353 = vmatpush3.bf16.msra.mxu0 %v15352_v45  ;;  %v13768_v45 = vld [vmem:[#allocation11 + $0x220] sm:$0xff] }
 0x7dd   :  { %15355 = vmatprep.subr.bf16.mxu0 %v15354_v63  ;;  %v13786_v63 = vld [vmem:[#allocation11 + $0x2b0] sm:$0xff]  ;;  %v15384_v32 = vpack.c.bf16 %v13769_v3, %v13768_v45  ;;  %v13801_v45 = vld [vmem:[#allocation11 + $0x328] sm:$0xff] }
 0x7de   :  { %v13408_v47 = vpop.f32.mrb[22].mxu1  ;;  %v13818_v3 = vld [vmem:[#allocation11 + $0x3b0] sm:$0xff] }
 0x7df   :  { %v13410_v33 = vpop.f32.mrb[23].mxu1  ;;  %v13692_v36 = vadd.f32 %v13651_v50, %v13408_v47  ;;  %v13667_v47 = vrot.slane %v25343_v1, %v13666_v53  ;;  %v13793_v1 = vld [vmem:[#allocation11 + $0x2e8] sm:$0xff] }
 0x7e0   :  { %v13693_v19 = vadd.f32 %v13655_v52, %v13410_v33  ;;  %15357 = vmatpush3.bf16.msra.mxu0 %v15356_v12  ;;  %v15386_v52 = vpack.c.bf16 %v13787_v2, %v13786_v63  ;;  %v13770_v12 = vld [vmem:[#allocation11 + $0x230] sm:$0xff]  ;;  %v15390_v33 = vpack.c.bf16 %v13789_v24, %v13788_v17  ;;  %v13813_v50 = vld [vmem:[#allocation11 + $0x388] sm:$0xff]  ;;  %v13819_v63 = vld [vmem:[#allocation11 + $0x3b8] sm:$0xff] }
 0x7e1   :  { %15359 = vmatprep.subr.bf16.mxu0 %v15358_v11  ;;  %v13771_v11 = vld [vmem:[#allocation11 + $0x238] sm:$0xff]  ;;  %v15418_v53 = vpack.c.bf16 %v13819_v63, %v13818_v3  ;;  %v13804_v17 = vld [vmem:[#allocation11 + $0x340] sm:$0xff]  ;;  %v13805_v24 = vld [vmem:[#allocation11 + $0x348] sm:$0xff] }
 0x7e2   :  { %14001 = vmatprep.mubr.f32.mxu0 %v13693_v19  ;;  %v15388_v46 = vpack.c.bf16 %v13771_v11, %v13770_v12  ;;  %v13772_v19 = vld [vmem:[#allocation11 + $0x240] sm:$0xff]  ;;  %v13821_v12 = vld [vmem:[#allocation11 + $0x3c8] sm:$0xff]  ;;  %v13855_v3 = vld [vmem:[#allocation11 + $0x4d8] sm:$0xff] }
 0x7e4   :  { %15361 = vmatpush3.bf16.msra.mxu0 %v15360_v4  ;;  %v13773_v4 = vld [vmem:[#allocation11 + $0x248] sm:$0xff] }
 0x7e5   :  { %15363 = vmatprep.subr.bf16.mxu0 %v15362_v31 }
 0x7e8   :  { %15365 = vmatpush3.bf16.msra.mxu0 %v15364_v6 }
 0x7e9   :  { %15367 = vmatprep.subr.bf16.mxu0 %v15366_v22  ;;  %v15392_v22 = vpack.c.bf16 %v13773_v4, %v13772_v19  ;;  %v13806_v19 = vld [vmem:[#allocation11 + $0x350] sm:$0xff]  ;;  %v13807_v4 = vld [vmem:[#allocation11 + $0x358] sm:$0xff] }
 0x7ea   :  { %v15428_v10 = vpack.c.bf16 %v13807_v4, %v13806_v19  ;;  %v13843_v19 = vld [vmem:[#allocation11 + $0x478] sm:$0xff] }
 0x7ec   :  { %15369 = vmatpush3.bf16.msra.mxu0 %v15368_v23  ;;  %v15398_v23 = vpack.c.bf16 %v13793_v1, %v13792_v59  ;;  %v13810_v1 = vld [vmem:[#allocation11 + $0x370] sm:$0xff] }
 0x7ed   :  { %15371 = vmatprep.subr.bf16.mxu0 %v15370_v35  ;;  %v13794_v35 = vld [vmem:[#allocation11 + $0x2f0] sm:$0xff] }
 0x7ee   :  { %v13479_v29 = vpop.f32.mrb[24].mxu1  ;;  %v15402_v60 = vpack.c.bf16 %v13795_v21, %v13794_v35  ;;  %v13828_v21 = vld [vmem:[#allocation11 + $0x400] sm:$0xff] }
 0x7ef   :  { %v25358_v51 = vadd.f32 %v13659_v18, %v13479_v29  ;;  %v13481_v27 = vpop.f32.mrb[25].mxu1  ;;  %v13778_v18 = vld [vmem:[#allocation11 + $0x270] sm:$0xff]  ;;  %v13796_v29 = vld [vmem:[#allocation11 + $0x300] sm:$0xff] }
 0x7f0   :  { %v13695_v38 = vadd.f32 %v13663_v13, %v13481_v27  ;;  %15373 = vmatpush3.bf16.msra.mxu0 %v15372_v44  ;;  %v13779_v13 = vld [vmem:[#allocation11 + $0x278] sm:$0xff]  ;;  %v13812_v44 = vld [vmem:[#allocation11 + $0x380] sm:$0xff]  ;;  %v13814_v27 = vld [vmem:[#allocation11 + $0x390] sm:$0xff] }
 0x7f1   :  { %15375 = vmatprep.subr.bf16.mxu0 %v15374_v15  ;;  %v13679_v15 = vrot.slane %v25369_v9, %v13646_v58  ;;  %v15404_v54 = vpack.c.bf16 %v13779_v13, %v13778_v18  ;;  %v15406_v57 = vpack.c.bf16 %v13813_v50, %v13812_v44  ;;  %v13817_v58 = vld [vmem:[#allocation11 + $0x3a8] sm:$0xff]  ;;  %v13847_v18 = vld [vmem:[#allocation11 + $0x498] sm:$0xff]  ;;  %v13830_v50 = vld [vmem:[#allocation11 + $0x410] sm:$0xff] }
 0x7f3   :  { %14002 = vmatmul.mubr.f32.vlgmr.msra.gmra.mrb[108].mxu0 %v13692_v36 }
 0x7f4   :  { %15377 = vmatpush3.bf16.msra.mxu0 %v15376_v62  ;;  %14071 = vmatprep.mubr.f32.mxu0 %v13695_v38  ;;  %v13815_v38 = vld [vmem:[#allocation11 + $0x398] sm:$0xff] }
 0x7f5   :  { %15379 = vmatprep.subr.bf16.mxu0 %v15378_v0  ;;  %v15408_v0 = vpack.c.bf16 %v13797_v48, %v13796_v29  ;;  %v15410_v55 = vpack.c.bf16 %v13815_v38, %v13814_v27  ;;  %v13832_v27 = vld [vmem:[#allocation11 + $0x420] sm:$0xff]  ;;  %v13833_v38 = vld [vmem:[#allocation11 + $0x428] sm:$0xff] }
 0x7f8   :  { %15381 = vmatpush3.bf16.msra.mxu0 %v15380_v39  ;;  %v15414_v39 = vpack.c.bf16 %v13817_v58, %v13816_v30  ;;  %v13835_v30 = vld [vmem:[#allocation11 + $0x438] sm:$0xff]  ;;  %v13852_v58 = vld [vmem:[#allocation11 + $0x4c0] sm:$0xff] }
 0x7f9   :  { %15383 = vmatprep.subr.bf16.mxu0 %v15382_v61  ;;  %v13800_v61 = vld [vmem:[#allocation11 + $0x320] sm:$0xff] }
 0x7fa   :  { %v15416_v2 = vpack.c.bf16 %v13801_v45, %v13800_v61  ;;  %v13837_v61 = vld [vmem:[#allocation11 + $0x448] sm:$0xff]  ;;  %v13854_v45 = vld [vmem:[#allocation11 + $0x4d0] sm:$0xff] }
 0x7fc   :  { %15385 = vmatpush3.bf16.msra.mxu0 %v15384_v32  ;;  %v13802_v32 = vld [vmem:[#allocation11 + $0x330] sm:$0xff] }
 0x7fd   :  { %15387 = vmatprep.subr.bf16.mxu0 %v15386_v52  ;;  %v13820_v52 = vld [vmem:[#allocation11 + $0x3c0] sm:$0xff]  ;;  %v15420_v11 = vpack.c.bf16 %v13803_v37, %v13802_v32  ;;  %v13839_v32 = vld [vmem:[#allocation11 + $0x458] sm:$0xff] }
 0x7fe   :  { %v13550_v31 = vpop.f32.mrb[26].mxu1  ;;  %v13856_v37 = vld [vmem:[#allocation11 + $0x4e0] sm:$0xff] }
 0x7ff   :  { %v25364_v8 = vadd.f32 %v13667_v47, %v13550_v31  ;;  %v13552_v40 = vpop.f32.mrb[27].mxu1  ;;  %v13822_v47 = vld [vmem:[#allocation11 + $0x3d0] sm:$0xff]  ;;  %v13824_v31 = vld [vmem:[#allocation11 + $0x3e0] sm:$0xff] }
 0x800   :  { %v13697_v6 = vadd.f32 %v13671_v34, %v13552_v40  ;;  %15389 = vmatpush3.bf16.msra.mxu0 %v15388_v46  ;;  %v13823_v34 = vld [vmem:[#allocation11 + $0x3d8] sm:$0xff]  ;;  %v15424_v46 = vpack.c.bf16 %v13805_v24, %v13804_v17  ;;  %v15430_v40 = vpack.c.bf16 %v13825_v5, %v13824_v31  ;;  %v13841_v17 = vld [vmem:[#allocation11 + $0x468] sm:$0xff]  ;;  %v13858_v24 = vld [vmem:[#allocation11 + $0x4f0] sm:$0xff]  ;;  %v13675_v31 = vrot.slane %v25369_v9, %v26741_v41 }
 0x801   :  { %15391 = vmatprep.subr.bf16.mxu0 %v15390_v33  ;;  %v15426_v33 = vpack.c.bf16 %v13823_v34, %v13822_v47  ;;  %v13859_v47 = vld [vmem:[#allocation11 + $0x4f8] sm:$0xff] }
 0x804   :  { %15393 = vmatpush3.bf16.msra.mxu0 %v15392_v22  ;;  %v13809_v22 = vld [vmem:[#allocation11 + $0x368] sm:$0xff] }
 0x805   :  { %15395 = vmatprep.subr.bf16.mxu0 %v15394_v25  ;;  %v13826_v25 = vld [vmem:[#allocation11 + $0x3f0] sm:$0xff] }
 0x806   :  { %v15434_v59 = vpack.c.bf16 %v13827_v26, %v13826_v25 }
 0x808   :  { %15397 = vmatpush3.bf16.msra.mxu0 %v15396_v42  ;;  %v13811_v42 = vld [vmem:[#allocation11 + $0x378] sm:$0xff] }
 0x809   :  { %15399 = vmatprep.subr.bf16.mxu0 %v15398_v23  ;;  %v13844_v23 = vld [vmem:[#allocation11 + $0x480] sm:$0xff]  ;;  %v15436_v20 = vpack.c.bf16 %v13811_v42, %v13810_v1 }
 0x80a   :  { %v15438_v35 = vpack.c.bf16 %v13845_v28, %v13844_v23 }
 0x80c   :  { %15401 = vmatpush3.bf16.msra.mxu0 %v15400_v49  ;;  %v13829_v49 = vld [vmem:[#allocation11 + $0x408] sm:$0xff] }
 0x80d   :  { %15403 = vmatprep.subr.bf16.mxu0 %v15402_v60  ;;  %v13846_v60 = vld [vmem:[#allocation11 + $0x490] sm:$0xff]  ;;  %v15440_v13 = vpack.c.bf16 %v13829_v49, %v13828_v21 }
 0x80e   :  { %v25374_v7 = vpop.f32.mrb[28].mxu1  ;;  %v15442_v44 = vpack.c.bf16 %v13847_v18, %v13846_v60 }
 0x80f   :  { %v13623_v62 = vpop.f32.mrb[29].mxu1  ;;  %v13698_v5 = vadd.f32 %v13675_v31, %v25374_v7 }
 0x810   :  { %v25376_v36 = vadd.f32 %v13679_v15, %v13623_v62  ;;  %15405 = vmatpush3.bf16.msra.mxu0 %v15404_v54  ;;  %v13831_v15 = vld [vmem:[#allocation11 + $0x418] sm:$0xff]  ;;  %v13848_v54 = vld [vmem:[#allocation11 + $0x4a0] sm:$0xff]  ;;  %v13850_v62 = vld [vmem:[#allocation11 + $0x4b0] sm:$0xff] }
 0x811   :  { %15407 = vmatprep.subr.bf16.mxu0 %v15406_v57  ;;  %v13849_v57 = vld [vmem:[#allocation11 + $0x4a8] sm:$0xff]  ;;  %v15444_v29 = vpack.c.bf16 %v13831_v15, %v13830_v50 }
 0x812   :  { %v15446_v48 = vpack.c.bf16 %v13849_v57, %v13848_v54 }
 0x813   :  { %14072 = vmatmul.mubr.f32.vlgmr.msra.gmra.mrb[110].mxu0 %v25358_v51  ;;  %v15422_v51 = vpack.c.bf16 %v13821_v12, %v13820_v52  ;;  %v13857_v52 = vld [vmem:[#allocation11 + $0x4e8] sm:$0xff] }
 0x814   :  { %15409 = vmatpush3.bf16.msra.mxu0 %v15408_v0  ;;  %14141 = vmatprep.mubr.f32.mxu0 %v13697_v6  ;;  %v13808_v6 = vld [vmem:[#allocation11 + $0x360] sm:$0xff]  ;;  %v13851_v0 = vld [vmem:[#allocation11 + $0x4b8] sm:$0xff] }
 0x815   :  { %15411 = vmatprep.subr.bf16.mxu0 %v15410_v55  ;;  %v15432_v56 = vpack.c.bf16 %v13809_v22, %v13808_v6  ;;  %v15448_v55 = vpack.c.bf16 %v13833_v38, %v13832_v27  ;;  %v15450_v43 = vpack.c.bf16 %v13851_v0, %v13850_v62  ;;  %v14475_v22 = vld [vmem:[%s25407_s8] ss:$0 sm:$0xff]  ;;  %s15836_s8 = scalar_lea.vmem %s14225_s1, 32 }
 0x816   :  { %p15837_p6 = scmp.ne.s32.totalorder %s14225_s1, %s15836_s8  ;;  %p15842_p8 = scmp.lt.s32.totalorder %s15836_s8, %s15836_s8 }
 0x818   :  { %15413 = vmatpush3.bf16.msra.mxu0 %v15412_v14  ;;  %v13853_v14 = vld [vmem:[#allocation11 + $0x4c8] sm:$0xff]  ;;  %p15843_p9 = por %p15842_p8, %p15841_p7 }
 0x819   :  { %15415 = vmatprep.subr.bf16.mxu0 %v15414_v39  ;;  %v15454_v39 = vpack.c.bf16 %v13853_v14, %v13852_v58 }
 0x81a   :  { %p15844_p10 = pnand %p15843_p9, %p15837_p6 }
 0x81c   :  { %15417 = vmatpush3.bf16.msra.mxu0 %v15416_v2  ;;  %v15458_v2 = vpack.c.bf16 %v13855_v3, %v13854_v45 }
 0x81d   :  { %15419 = vmatprep.subr.bf16.mxu0 %v15418_v53  ;;  %v13838_v53 = vld [vmem:[#allocation11 + $0x450] sm:$0xff] }
 0x81e   :  { %v15460_v12 = vpack.c.bf16 %v13839_v32, %v13838_v53 }
 0x820   :  { %15421 = vmatpush3.bf16.msra.mxu0 %v15420_v11  ;;  %v15462_v11 = vpack.c.bf16 %v13857_v52, %v13856_v37 }
 0x821   :  { %15423 = vmatprep.subr.bf16.mxu0 %v15422_v51  ;;  %v13840_v51 = vld [vmem:[#allocation11 + $0x460] sm:$0xff] }
 0x822   :  { %v15464_v34 = vpack.c.bf16 %v13841_v17, %v13840_v51 }
 0x824   :  { %15425 = vmatpush3.bf16.msra.mxu0 %v15424_v46  ;;  %v15466_v46 = vpack.c.bf16 %v13859_v47, %v13858_v24 }
 0x825   :  { %15427 = vmatprep.subr.bf16.mxu0 %v15426_v33  ;;  %v13842_v33 = vld [vmem:[#allocation11 + $0x470] sm:$0xff] }
 0x826   :  { %v15468_v4 = vpack.c.bf16 %v13843_v19, %v13842_v33 }
 0x828   :  { %15429 = vmatpush3.bf16.msra.mxu0 %v15428_v10 }
 0x829   :  { %15431 = vmatprep.subr.bf16.mxu0 %v15430_v40 }
 0x82c   :  { %15433 = vmatpush3.bf16.msra.mxu0 %v15432_v56 }
 0x82d   :  { %15435 = vmatprep.subr.bf16.mxu0 %v15434_v59 }
 0x830   :  { %15437 = vmatpush3.bf16.msra.mxu0 %v15436_v20 }
 0x831   :  { %15439 = vmatprep.subr.bf16.mxu0 %v15438_v35 }
 0x833   :  { %14142 = vmatmul.mubr.f32.vlgmr.msra.gmra.mrb[112].mxu0 %v25364_v8  ;;  %v15452_v8 = vpack.c.bf16 %v13835_v30, %v13834_v16 }
 0x834   :  { %15441 = vmatpush3.bf16.msra.mxu0 %v15440_v13  ;;  %14211 = vmatprep.mubr.f32.mxu0 %v25376_v36  ;;  %v13836_v36 = vld [vmem:[#allocation11 + $0x440] sm:$0xff] }
 0x835   :  { %15443 = vmatprep.subr.bf16.mxu0 %v15442_v44  ;;  %v15456_v63 = vpack.c.bf16 %v13837_v61, %v13836_v36 }
 0x838   :  { %15445 = vmatpush3.bf16.msra.mxu0 %v15444_v29 }
 0x839   :  { %15447 = vmatprep.subr.bf16.mxu0 %v15446_v48 }
 0x83c   :  { %15449 = vmatpush3.bf16.msra.mxu0 %v15448_v55 }
 0x83d   :  { %15451 = vmatprep.subr.bf16.mxu0 %v15450_v43 }
 0x840   :  { %15453 = vmatpush3.bf16.msra.mxu0 %v15452_v8 }
 0x841   :  { %15455 = vmatprep.subr.bf16.mxu0 %v15454_v39 }
 0x844   :  { %15457 = vmatpush3.bf16.msra.mxu0 %v15456_v63 }
 0x845   :  { %15459 = vmatprep.subr.bf16.mxu0 %v15458_v2 }
 0x848   :  { %15461 = vmatpush3.bf16.msra.mxu0 %v15460_v12 }
 0x849   :  { %15463 = vmatprep.subr.bf16.mxu0 %v15462_v11 }
 0x84c   :  { %15465 = vmatpush3.bf16.msra.mxu0 %v15464_v34 }
 0x84d   :  { %15467 = vmatprep.subr.bf16.mxu0 %v15466_v46 }
 0x850   :  { %15469 = vmatpush3.bf16.msra.mxu0 %v15468_v4 }
 0x853   :  { %14212 = vmatmul.mubr.f32.vlgmr.msra.gmra.mrb[114].mxu0 %v13698_v5 }
 0x8a6   :  { %v14624_v10 = vpop.f32.mrb[106].mxu0 }
 0x8a7   :  { %v14625_v40 = vpop.f32.mrb[107].mxu0 }
 0x8a8   :  { %v14626_v6 = vadd.f32 %v14625_v40, %v14624_v10 }
 0x8aa   :  { %v13934_v56 = vadd.f32 %v14626_v6, %v14475_v22 }
 0x8c6   :  { %v14659_v25 = vpop.f32.mrb[108].mxu0 }
 0x8c7   :  { %v14660_v26 = vpop.f32.mrb[109].mxu0 }
 0x8c8   :  { %v14661_v59 = vadd.f32 %v14660_v26, %v14659_v25 }
 0x8ca   :  { %v14004_v1 = vadd.f32 %v14661_v59, %v13934_v56 }
 0x8e6   :  { %v14694_v42 = vpop.f32.mrb[110].mxu0 }
 0x8e7   :  { %v14695_v23 = vpop.f32.mrb[111].mxu0 }
 0x8e8   :  { %v14696_v41 = vadd.f32 %v14695_v23, %v14694_v42 }
 0x8ea   :  { %v14074_v9 = vadd.f32 %v14696_v41, %v14004_v1 }
 0x906   :  { %v14729_v28 = vpop.f32.mrb[112].mxu0 }
 0x907   :  { %v14730_v20 = vpop.f32.mrb[113].mxu0 }
 0x908   :  { %v14731_v7 = vadd.f32 %v14730_v20, %v14729_v28 }
 0x90a   :  { %v14144_v35 = vadd.f32 %v14731_v7, %v14074_v9 }
 0x926   :  { %v14764_v21 = vpop.f32.mrb[114].mxu0 }
 0x927   :  { %v14765_v49 = vpop.f32.mrb[115].mxu0 }
 0x928   :  { %v14766_v60 = vadd.f32 %v14765_v49, %v14764_v21 }
 0x92a   :  { %v14214_v18 = vadd.f32 %v14766_v60, %v14144_v35 }
 0x92c   :  { %14217 = vst [vmem:[#allocation13] sm:$0x3] %v14214_v18 }
 0x92d   :  { %15847 = shalt.err (!%p15844_p10)
}
 0x92e   :  { %s15848_s5 = scalar_lea.hbm %s25408_s9, 32 }
 0x92f   :  { %p15849_p11 = scmp.ne.s32.totalorder %s25408_s9, %s15848_s5  ;;  %p15852_p12 = scmp.lt.u32.totalorder %s15848_s5, %s25408_s9 }
 0x931   :  { %p15854_p13 = pnand %p15852_p12, %p15849_p11 }
 0x933   :  { %15857 = shalt.err (!%p15854_p13)
}
 0x934   :  { %14227 = dma.vmem_to_hbm [thread:$0]  %s14225_s1, 32, %s25408_s9, [#allocation4]  }
 0x935   :  { %15866 = dma.done.wait [#allocation4], 32  }
 0x936   :  { %15867 = vsyncadd [#allocation4], 4294967264 }
 0x937   :  { %14231 = vsyncpa [#allocation3], 1 }
 0x938   :  { %14232 = vsyncpa [#allocation6], 1 }
 0x939   :  { %14233 = vsyncpa [#allocation9], 1 }
 0x93a   :  { %14234 = vsyncpa [#allocation12], 1 }
 0x93b   :  { %14235 = vsyncpa [#allocation4], 1 }

</bundles_post_ra>
